<compile_context>
chip_gen: v7x
topology: tpu7x:2x2x1
jax: 0.10.0
libtpu: 0.0.40
codegen_flags: <defaults>
</compile_context>

<pallas_src>
import functools

import jax
import jax.numpy as jnp
from jax import lax
from jax.experimental import pallas as pl
from jax.experimental.pallas import tpu as pltpu


# ----------------------------------------------------------------------------
# Generation-aware VMEM budgets
# ----------------------------------------------------------------------------

def _vmem_capacity_bytes():
    try:
        return int(pltpu.get_tpu_info().vmem_capacity_bytes)
    except Exception:
        # Query unavailable: assume the smallest (v7x-sized, 64 MiB) VMEM.
        return 64 * 1024 * 1024


_VMEM_CAP = _vmem_capacity_bytes()
_VMEM_LIMIT = min(int(_VMEM_CAP * 0.75), 100 * 1024 * 1024)
_TILE_BUDGET = min(int(_VMEM_CAP * 0.30), 40 * 1024 * 1024)
_IM2COL_MAX_COLS = 4608               # largest K*K*Cin packed into one matmul


# ----------------------------------------------------------------------------
# Shared in-kernel conv helper
# ----------------------------------------------------------------------------

def _use_im2col(K, cin):
    return K * K * cin <= _IM2COL_MAX_COLS


def _kernel_weight(w_flat, K, cin, cout):
    """Weight layout handed to the kernel for a K x K conv branch."""
    assert w_flat.shape == (K * K * cin, cout)
    if _use_im2col(K, cin):
        return w_flat                             # (K*K*cin, cout) for one matmul
    return w_flat.reshape(K, K, cin, cout)        # per-tap fallback layout


def _conv_accumulate(win, w_refs, K, tH, W):
    """Same-conv of a spatially padded window against one or more weight refs.

    win:    (tH + K - 1, W + K - 1, cin) values; (tH, W, cin) for K == 1
    w_refs: tuple of weight refs, each (K*K*cin, cout) or (K, K, cin, cout)
    Returns one (tH*W, cout) float32 result per weight ref (taps are shared).
    """
    cin = win.shape[-1]
    if _use_im2col(K, cin):
        # TODO(synk): taps could be gathered straight from the main/halo refs to
        # avoid materializing the assembled window before the im2col concat.
        taps = []
        for dy in range(K):
            for dxk in range(K):
                taps.append(win[dy:dy + tH, dxk:dxk + W, :])
        col = jnp.concatenate(taps, axis=-1).reshape(tH * W, K * K * cin)
        return [jnp.dot(col, w[...], preferred_element_type=jnp.float32)
                for w in w_refs]
    accs = [None] * len(w_refs)
    for dy in range(K):
        for dxk in range(K):
            patch = win[dy:dy + tH, dxk:dxk + W, :].reshape(tH * W, cin)
            for j, w in enumerate(w_refs):
                part = jnp.dot(patch, w[dy, dxk],
                               preferred_element_type=jnp.float32)
                accs[j] = part if accs[j] is None else accs[j] + part
    return accs


# ----------------------------------------------------------------------------
# Row-tile picker (VMEM-budget driven, generation aware)
# ----------------------------------------------------------------------------

def _pick_tile_h(H, W, bytes_fn, requested=None, budget=None):
    """Tile height: a multiple of 4 dividing H (the fused SPADE kernel fetches a
    4-row seg halo block whose start row must be a multiple of 4).  Picks the
    largest candidate fitting the VMEM budget, preferring MXU-friendly tiles
    (tH*W multiple of 256) when that does not shrink the tile by more than 2x."""
    if budget is None:
        budget = _TILE_BUDGET
    if H % 4 != 0:
        raise ValueError(f"H={H} must be a multiple of 4 for fused SPADE tiling")
    cands = [d for d in range(4, H + 1, 4) if H % d == 0]
    if requested is not None:
        capped = [d for d in cands if d <= requested]
        if capped:
            cands = capped
    fitting = [d for d in cands if bytes_fn(d) <= budget] or cands[:1]
    best = max(fitting)
    aligned = [d for d in fitting if (d * W) % 256 == 0 and 2 * d >= best]
    return max(aligned) if aligned else best


def _spade_bytes_fn(W, nc, nh, C):
    def fn(tH):
        rows = tH * W
        prows = (tH + 2) * (W + 2)
        b = 2 * (tH + 4) * (W + 4) * nc * 2               # seg main+halo (dbl buf)
        b += 2 * (9 * nc * nh + 9 * nh * 2 * C) * 2       # weights (dbl buf, bf16)
        b += 2 * rows * C * 2 * 2                         # x block + out block
        b += prows * (9 * nc * 2 + nh * 4 + nh * 2)       # seg im2col + actv f32/bf16
        b += rows * 9 * nh * 2                            # actv im2col (bf16)
        b += rows * 2 * C * 4                             # gamma/beta (f32)
        b += rows * C * 4 * 2                             # x f32 + out f32 temps
        return b
    return fn


def _conv_bytes_fn(W, metas, cout, out_bytes, has_res):
    def fn(tH):
        rows = tH * W
        b = 2 * rows * cout * out_bytes                   # out block (dbl buf)
        b += rows * cout * 4 * 2                          # f32 accumulator + temp
        if has_res:
            b += 2 * rows * cout * 2
        for K, cin in metas:
            b += 2 * rows * cin * 2                       # main block (dbl buf)
            if K == 3:
                b += 2 * 2 * W * cin * 2                  # halo rows
                b += (tH + 2) * (W + 2) * cin * 2 * 2     # assembled window temps
            if _use_im2col(K, cin):
                b += rows * K * K * cin * 2               # im2col buffer
            b += 2 * K * K * cin * cout * 2               # weights (dbl buf)
        return b
    return fn


def _largest_divisor(n, cap):
    for d in range(min(n, cap), 0, -1):
        if n % d == 0:
            return d
    return 1


# ----------------------------------------------------------------------------
# Kernel 1: per-channel batch-norm statistics for the block input x
# ----------------------------------------------------------------------------

def _bn_stats_kernel(x_ref, o_ref, s_acc, q_acc, *, inv_m, eps):
    i = pl.program_id(0)

    @pl.when(i == 0)
    def _init():
        s_acc[...] = jnp.zeros_like(s_acc)
        q_acc[...] = jnp.zeros_like(q_acc)

    x = x_ref[...].astype(jnp.float32)                  # (tM8, 8, C)
    s_acc[...] += jnp.sum(x, axis=0)
    q_acc[...] += jnp.sum(x * x, axis=0)

    @pl.when(i == pl.num_programs(0) - 1)
    def _finalize():
        mean = jnp.sum(s_acc[...], axis=0, keepdims=True) * inv_m
        msq = jnp.sum(q_acc[...], axis=0, keepdims=True) * inv_m
        var = jnp.maximum(msq - mean * mean, 0.0)       # guard catastrophic cancel
        o_ref[...] = jnp.concatenate([mean, lax.rsqrt(var + eps)], axis=0)


def batch_norm_stats(x, *, eps=1e-5):
    """x: (N, H, W, C) -> (2, C) f32 [mean; rsqrt(var + eps)] over N, H, W."""
    # TODO(synk): stats for x are computed from the bf16-cast activations; the
    # dx stats are already taken from the f32 conv accumulator inside conv_0.
    N, H, W, C = x.shape
    M = N * H * W
    assert M % 8 == 0, "N*H*W must be a multiple of 8 for the stats kernel"
    M8 = M // 8
    x3 = x.reshape(M8, 8, C)
    itemsize = jnp.dtype(x.dtype).itemsize
    cap = max(1, min(8192, _TILE_BUDGET // (16 * C * itemsize)))
    tM8 = _largest_divisor(M8, cap)
    return pl.pallas_call(
        functools.partial(_bn_stats_kernel, inv_m=1.0 / M, eps=eps),
        out_shape=jax.ShapeDtypeStruct((2, C), jnp.float32),
        grid=(M8 // tM8,),
        in_specs=[pl.BlockSpec((tM8, 8, C), lambda i: (i, 0, 0))],
        out_specs=pl.BlockSpec((2, C), lambda i: (0, 0)),
        scratch_shapes=[pltpu.VMEM((8, C), jnp.float32),
                        pltpu.VMEM((8, C), jnp.float32)],
        compiler_params=pltpu.CompilerParams(
            dimension_semantics=("arbitrary",),
            vmem_limit_bytes=_VMEM_LIMIT),
    )(x3)


# ----------------------------------------------------------------------------
# Kernel 2: fully fused SPADE module
#   actv = relu(conv3x3(seg));  gamma,beta = conv3x3(actv) (one fused matmul);
#   out  = (x - mean) * rstd * (1 + gamma) + beta
# ----------------------------------------------------------------------------

def _spade_norm_kernel(segm_ref, segh_ref, wsh_ref, bsh_ref, wgb_ref, bgb_ref,
                       x_ref, st_ref, o_ref, *, tH, W):
    h = pl.program_id(1)
    nH = pl.num_programs(1)

    # seg window: rows r0-2 .. r0+tH+1 of the original seg (zero outside),
    # delivered as a tH-row main block plus a 4-row halo block of the padded map.
    segwin = jnp.concatenate([segm_ref[0], segh_ref[0]], axis=0)  # (tH+4, W+4, nc)

    # actv on the (tH+2, W+2) window needed by the gamma/beta 3x3 stencil.
    (a_acc,) = _conv_accumulate(segwin, (wsh_ref,), 3, tH + 2, W + 2)
    nh = a_acc.shape[-1]
    actv = jnp.maximum(a_acc + bsh_ref[...], 0.0).reshape(tH + 2, W + 2, nh)

    # Zero the positions that correspond to the zero padding of actv (row -1 /
    # row H at the first / last row tile, columns -1 and W always).
    ri = lax.broadcasted_iota(jnp.int32, (tH + 2, W + 2), 0)
    ci = lax.broadcasted_iota(jnp.int32, (tH + 2, W + 2), 1)
    interior = (ci >= 1) & (ci <= W)
    interior &= (ri >= 1) | (h > 0)
    interior &= (ri <= tH) | (h < nH - 1)
    mask = interior.astype(jnp.float32)
    actv = (actv * mask[:, :, None]).astype(jnp.bfloat16)

    # One fused matmul for gamma | beta.
    (gb,) = _conv_accumulate(actv, (wgb_ref,), 3, tH, W)          # (tH*W, 2C)
    gb = gb + bgb_ref[...]
    C = o_ref.shape[-1]
    gamma = gb[:, :C]
    beta = gb[:, C:]

    x = x_ref[0].astype(jnp.float32).reshape(tH * W, C)
    mean = st_ref[0:1, :]
    rstd = st_ref[1:2, :]
    out = (x - mean) * rstd * (1.0 + gamma) + beta
    o_ref[0] = out.reshape(tH, W, C).astype(o_ref.dtype)


def spade_normalize(seg2p, sp, x, stats, *, tile_h=None):
    """Fused SPADE module.

    seg2p: (N, H+4, W+4, nc) bf16 seg map zero-padded by 2 pixels
    sp:    dict with w_shared (9*nc, nh), b_shared (nh,),
           w_gb (9*nh, 2C) fused gamma|beta weights, b_gb (2C,)
    x:     (N, H, W, C) bf16 tensor being normalized
    stats: (2, C) f32 [mean; rsqrt(var+eps)]
    """
    N, H, W, C = x.shape
    nc = seg2p.shape[-1]
    nh = sp["w_shared"].shape[-1]
    assert sp["w_gb"].shape == (9 * nh, 2 * C)
    tH = _pick_tile_h(H, W, _spade_bytes_fn(W, nc, nh, C), requested=tile_h)
    nH = H // tH
    Wp = W + 4
    wsh = _kernel_weight(sp["w_shared"], 3, nc, nh)
    wgb = _kernel_weight(sp["w_gb"], 3, nh, 2 * C)
    kernel = functools.partial(_spade_norm_kernel, tH=tH, W=W)
    return pl.pallas_call(
        kernel,
        out_shape=jax.ShapeDtypeStruct((N, H, W, C), jnp.bfloat16),
        grid=(N, nH),
        in_specs=[
            pl.BlockSpec((1, tH, Wp, nc), lambda n, h: (n, h, 0, 0)),
            pl.BlockSpec((1, 4, Wp, nc),
                         lambda n, h, q=tH // 4: (n, (h + 1) * q, 0, 0)),
            pl.BlockSpec(wsh.shape, lambda n, h, nd=wsh.ndim: (0,) * nd),
            pl.BlockSpec((1, nh), lambda n, h: (0, 0)),
            pl.BlockSpec(wgb.shape, lambda n, h, nd=wgb.ndim: (0,) * nd),
            pl.BlockSpec((1, 2 * C), lambda n, h: (0, 0)),
            pl.BlockSpec((1, tH, W, C), lambda n, h: (n, h, 0, 0)),
            pl.BlockSpec((2, C), lambda n, h: (0, 0)),
        ],
        out_specs=pl.BlockSpec((1, tH, W, C), lambda n, h: (n, h, 0, 0)),
        compiler_params=pltpu.CompilerParams(
            dimension_semantics=("parallel", "parallel"),
            vmem_limit_bytes=_VMEM_LIMIT),
    )(seg2p, seg2p, wsh,
      sp["b_shared"].reshape(1, nh).astype(jnp.float32),
      wgb,
      sp["b_gb"].reshape(1, 2 * C).astype(jnp.float32),
      x, stats)


# ----------------------------------------------------------------------------
# Kernel 3: multi-branch same-conv with fused activation / bias / residual,
#           unpadded inputs with in-kernel halo/border handling, optional
#           per-tile BN partial sums for the output.
# ----------------------------------------------------------------------------

def _make_conv_kernel(branch_meta, tH, W, has_bias, has_res, out_act,
                      emit_stats):
    """branch_meta: tuple of (K, input_act).  Ref order per branch:
    [main, (top halo, bottom halo if K==3), weights]; then [bias], [residual];
    outputs: main output, then (optional) stats partial output."""

    def kernel(*refs):
        n_out = 2 if emit_stats else 1
        o_ref = refs[-n_out]
        cout = o_ref.shape[-1]
        h = pl.program_id(1)
        keep_top = (h > 0).astype(jnp.float32)
        keep_bot = (h < pl.num_programs(1) - 1).astype(jnp.float32)

        acc = jnp.zeros((tH * W, cout), jnp.float32)
        i = 0
        for K, act in branch_meta:
            main = refs[i][0]                                   # (tH, W, cin)
            if K == 3:
                top = refs[i + 1][0] * keep_top.astype(main.dtype)
                bot = refs[i + 2][0] * keep_bot.astype(main.dtype)
                w_ref = refs[i + 3]
                i += 4
                cin = main.shape[-1]
                rows = jnp.concatenate([top, main, bot], axis=0)
                zcol = jnp.zeros((tH + 2, 1, cin), main.dtype)
                win = jnp.concatenate([zcol, rows, zcol], axis=1)
            else:
                w_ref = refs[i + 1]
                i += 2
                win = main
            if act == "leaky":
                # leaky_relu(0) == 0, so activating the zero border is identical
                # to activating before padding (as PyTorch does).
                win = jnp.where(win >= 0, win, 0.2 * win)
            (part,) = _conv_accumulate(win, (w_ref,), K, tH, W)
            acc = acc + part
        if has_bias:
            acc = acc + refs[i][...]
            i += 1
        if has_res:
            acc = acc + refs[i][0].reshape(tH * W, cout).astype(jnp.float32)
            i += 1
        if out_act == "relu":
            acc = jnp.maximum(acc, 0.0)
        o_ref[0] = acc.reshape(tH, W, cout).astype(o_ref.dtype)
        if emit_stats:
            s_ref = refs[-1]
            ssum = jnp.sum(acc, axis=0, keepdims=True)
            ssq = jnp.sum(acc * acc, axis=0, keepdims=True)
            pad = jnp.zeros((6, cout), jnp.float32)
            s_ref[...] = jnp.concatenate([ssum, ssq, pad],
                                         axis=0).reshape(1, 1, 8, cout)

    return kernel


def conv2d_fused(branches, *, bias=None, residual=None, out_channels,
                 out_dtype=jnp.float32, out_act="none", emit_stats=False,
                 eps=1e-5, tile_h=None):
    """Multi-branch same-conv with fused input activation / bias / residual add.

    branches: list of (arr, w_flat, K, input_act) with arr of shape
      (N, H, W, Cin) (UNPADDED; the 1-px border is handled in-kernel for K==3).
      All branches share the accumulator, which implements torch.cat(...) along
      channels / the learned 1x1 shortcut.
    Returns (out, stats) where stats is the (2, out_channels) batch-norm stats
    of `out` (from the f32 accumulator) when emit_stats, else None.
    """
    a0 = branches[0][0]
    N, H, W = a0.shape[:3]
    metas = [(K, arr.shape[-1]) for arr, _, K, _ in branches]
    bytes_fn = _conv_bytes_fn(W, metas, out_channels,
                              jnp.dtype(out_dtype).itemsize,
                              residual is not None)
    tH = _pick_tile_h(H, W, bytes_fn, requested=tile_h)
    nH = H // tH

    in_specs, args, branch_meta = [], [], []
    for arr, w_flat, K, act in branches:
        assert K in (1, 3)
        cin = arr.shape[-1]
        assert arr.shape[1] == H and arr.shape[2] == W
        in_specs.append(pl.BlockSpec((1, tH, W, cin), lambda n, h: (n, h, 0, 0)))
        args.append(arr)
        if K == 3:
            in_specs.append(pl.BlockSpec(
                (1, 1, W, cin),
                lambda n, h, t=tH: (n, jnp.maximum(h * t - 1, 0), 0, 0)))
            args.append(arr)
            in_specs.append(pl.BlockSpec(
                (1, 1, W, cin),
                lambda n, h, t=tH, hm=H - 1: (n, jnp.minimum(h * t + t, hm), 0, 0)))
            args.append(arr)
        w_k = _kernel_weight(w_flat, K, cin, out_channels)
        in_specs.append(pl.BlockSpec(w_k.shape,
                                     lambda n, h, nd=w_k.ndim: (0,) * nd))
        args.append(w_k)
        branch_meta.append((K, act))

    if bias is not None:
        in_specs.append(pl.BlockSpec((1, out_channels), lambda n, h: (0, 0)))
        args.append(bias.reshape(1, out_channels).astype(jnp.float32))
    if residual is not None:
        in_specs.append(pl.BlockSpec((1, tH, W, out_channels),
                                     lambda n, h: (n, h, 0, 0)))
        args.append(residual)

    main_shape = jax.ShapeDtypeStruct((N, H, W, out_channels), out_dtype)
    main_spec = pl.BlockSpec((1, tH, W, out_channels), lambda n, h: (n, h, 0, 0))
    if emit_stats:
        out_shape = (main_shape,
                     jax.ShapeDtypeStruct((N, nH, 8, out_channels), jnp.float32))
        out_specs = (main_spec,
                     pl.BlockSpec((1, 1, 8, out_channels),
                                  lambda n, h: (n, h, 0, 0)))
    else:
        out_shape = main_shape
        out_specs = main_spec

    kernel = _make_conv_kernel(tuple(branch_meta), tH, W, bias is not None,
                               residual is not None, out_act, emit_stats)
    res = pl.pallas_call(
        kernel,
        out_shape=out_shape,
        grid=(N, nH),
        in_specs=in_specs,
        out_specs=out_specs,
        compiler_params=pltpu.CompilerParams(
            dimension_semantics=("parallel", "parallel"),
            vmem_limit_bytes=_VMEM_LIMIT),
    )(*args)

    if not emit_stats:
        return res, None
    out, part = res
    M = N * H * W
    s = jnp.sum(part[:, :, 0, :], axis=(0, 1))
    q = jnp.sum(part[:, :, 1, :], axis=(0, 1))
    mean = s / M
    var = jnp.maximum(q / M - mean * mean, 0.0)
    stats = jnp.stack([mean, lax.rsqrt(var + eps)], axis=0)
    return out, stats


# ----------------------------------------------------------------------------
# Parameter construction (deterministic, synthetic)
# ----------------------------------------------------------------------------

def _conv_init(key, cout, cin, k, bias=True):
    kw, kb = jax.random.split(key)
    fan_in = cin * k * k
    bound = fan_in ** -0.5
    w = jax.random.uniform(kw, (cout, cin, k, k), jnp.float32, -bound, bound)
    b = (jax.random.uniform(kb, (cout,), jnp.float32, -bound, bound)
         if bias else jnp.zeros((cout,), jnp.float32))
    return w, b


def spectral_normalize(w_oihw, key, n_iter=5, eps=1e-12):
    # One-time weight preprocessing (JAX glue, not the hot path).
    cout = w_oihw.shape[0]
    wm = w_oihw.reshape(cout, -1)
    u = jax.random.normal(key, (cout,), jnp.float32)
    u = u / (jnp.linalg.norm(u) + eps)
    v = jnp.zeros((wm.shape[1],), jnp.float32)
    for _ in range(n_iter):
        v = wm.T @ u
        v = v / (jnp.linalg.norm(v) + eps)
        u = wm @ v
        u = u / (jnp.linalg.norm(u) + eps)
    sigma = u @ (wm @ v)
    return w_oihw / sigma


def _spade_init(key, norm_nc, label_nc, nhidden=128, ks=3):
    k1, k2, k3 = jax.random.split(key, 3)
    w_sh, b_sh = _conv_init(k1, nhidden, label_nc, ks)
    w_g, b_g = _conv_init(k2, norm_nc, nhidden, ks)
    w_b, b_b = _conv_init(k3, norm_nc, nhidden, ks)
    return dict(w_shared=w_sh, b_shared=b_sh, w_gamma=w_g, b_gamma=b_g,
                w_beta=w_b, b_beta=b_b)


def init_params(key, fin, fout, seg_nc, src_nc, nhidden=128):
    """Raw float32 parameters in PyTorch (OIHW) layout, spectral norm applied."""
    fmiddle = min(fin, fout)
    learned = fin != fout
    ks = jax.random.split(key, 9)
    w0, b0 = _conv_init(ks[0], fmiddle, fin + src_nc, 3)
    w1, b1 = _conv_init(ks[1], fout, fmiddle, 3)
    w0 = spectral_normalize(w0, ks[2])
    w1 = spectral_normalize(w1, ks[3])
    p = dict(fin=fin, w0=w0, b0=b0, w1=w1, b1=b1,
             norm_0=_spade_init(ks[4], fin, seg_nc, nhidden),
             norm_1=_spade_init(ks[5], fmiddle, seg_nc, nhidden))
    if learned:
        w_s, _ = _conv_init(ks[6], fout, fin, 1, bias=False)
        p["w_s"] = spectral_normalize(w_s, ks[7])
        p["norm_s"] = _spade_init(ks[8], fin, seg_nc, nhidden)
    return p


def _flatten_conv(w_oihw):
    cout, cin, kh, kw = w_oihw.shape
    return (jnp.transpose(w_oihw, (2, 3, 1, 0))        # (kh, kw, cin, cout)
            .reshape(kh * kw * cin, cout).astype(jnp.bfloat16))


def prepare_kernel_params(raw):
    """Kernel-ready parameters: bf16 weights flattened to (K*K*Cin, Cout), the
    gamma/beta weights fused into one (9*nh, 2C) matrix, and conv_0's weight
    split at the [normalized_x | in_img] channel boundary."""
    fin = raw["fin"]

    def spade_p(sp):
        w_gb = jnp.concatenate([_flatten_conv(sp["w_gamma"]),
                                _flatten_conv(sp["w_beta"])], axis=1)
        b_gb = jnp.concatenate([sp["b_gamma"], sp["b_beta"]])
        return dict(w_shared=_flatten_conv(sp["w_shared"]),
                    b_shared=sp["b_shared"], w_gb=w_gb, b_gb=b_gb)

    kp = dict(
        w0a=_flatten_conv(raw["w0"][:, :fin]),
        w0b=_flatten_conv(raw["w0"][:, fin:]),
        b0=raw["b0"],
        w1=_flatten_conv(raw["w1"]), b1=raw["b1"],
        norm_0=spade_p(raw["norm_0"]),
        norm_1=spade_p(raw["norm_1"]),
    )
    if "w_s" in raw:
        kp["w_s"] = _flatten_conv(raw["w_s"])
        kp["norm_s"] = spade_p(raw["norm_s"])
    return kp


# ----------------------------------------------------------------------------
# Forward pass
# ----------------------------------------------------------------------------

def _nearest_resize_nchw(x, H, W):
    # F.interpolate(..., mode='nearest'): src = floor(dst * in / out).  Glue.
    _, _, h, w = x.shape
    ri = (jnp.arange(H) * h) // H
    ci = (jnp.arange(W) * w) // W
    return x[:, :, ri[:, None], ci[None, :]]


def spade_resnet_block(kp, seg_, x, *, src_nc, tile_h=None, eps=1e-5):
    """seg_: (N, seg_nc+src_nc, h, w) NCHW; x: (N, fin, H, W) NCHW -> (N, fout, H, W)."""
    N, fin, H, W = x.shape
    seg_r = _nearest_resize_nchw(seg_, H, W)
    layout_only = seg_r.shape[1] - src_nc
    in_img = seg_r[:, layout_only:, :, :]
    seg = seg_r[:, :layout_only, :, :]

    # NCHW -> NHWC, bf16 at kernel boundaries (glue).  Only the tiny seg map is
    # zero-padded (by 2) in the wrapper; all big tensors stay unpadded.
    xb = jnp.transpose(x, (0, 2, 3, 1)).astype(jnp.bfloat16)
    seg2p = jnp.pad(jnp.transpose(seg, (0, 2, 3, 1)).astype(jnp.bfloat16),
                    ((0, 0), (2, 2), (2, 2), (0, 0)))
    in_img_h = jnp.transpose(in_img, (0, 2, 3, 1)).astype(jnp.bfloat16)

    stats_x = batch_norm_stats(xb, eps=eps)          # shared by norm_0 and norm_s

    def spade(sp, target_b, stats):
        return spade_normalize(seg2p, sp, target_b, stats, tile_h=tile_h)

    # conv_0(leaky(cat([SPADE_0(x), in_img])))  -- cat realized as two branches;
    # the BN stats of dx ride on conv_0's f32 accumulator.
    norm0 = spade(kp["norm_0"], xb, stats_x)
    fmid = kp["w0a"].shape[-1]
    dx, stats_dx = conv2d_fused(
        [(norm0, kp["w0a"], 3, "leaky"), (in_img_h, kp["w0b"], 3, "leaky")],
        bias=kp["b0"], out_channels=fmid, out_dtype=jnp.bfloat16,
        emit_stats=True, eps=eps, tile_h=tile_h)

    # conv_1(leaky(SPADE_1(dx))) with the shortcut folded into the same kernel.
    norm1 = spade(kp["norm_1"], dx, stats_dx)

    fout = kp["w1"].shape[-1]
    branches = [(norm1, kp["w1"], 3, "leaky")]
    residual = None
    if "w_s" in kp:                      # learned shortcut: + conv_s(SPADE_s(x))
        norm_s = spade(kp["norm_s"], xb, stats_x)
        branches.append((norm_s, kp["w_s"], 1, "none"))
    else:                                # identity shortcut: + x (bf16)
        residual = xb
    out, _ = conv2d_fused(branches, bias=kp["b1"], residual=residual,
                          out_channels=fout, out_dtype=jnp.float32,
                          tile_h=tile_h)
    return jnp.transpose(out, (0, 3, 1, 2))


# ----------------------------------------------------------------------------
# Pure-JAX float32 reference (validation only)
# ----------------------------------------------------------------------------

def _ref_conv(x, w_oihw, b, pad):
    w_hwio = jnp.transpose(w_oihw, (2, 3, 1, 0)).astype(jnp.float32)
    out = lax.conv_general_dilated(
        x, w_hwio, (1, 1), [(pad, pad), (pad, pad)],
        dimension_numbers=("NHWC", "HWIO", "NHWC"),
        precision=lax.Precision.HIGHEST)
    if b is not None:
        out = out + b.astype(jnp.float32)
    return out


def _ref_spade(x, seg, sp, eps):
    actv = jax.nn.relu(_ref_conv(seg, sp["w_shared"], sp["b_shared"], 1))
    gamma = _ref_conv(actv, sp["w_gamma"], sp["b_gamma"], 1)
    beta = _ref_conv(actv, sp["w_beta"], sp["b_beta"], 1)
    mean = jnp.mean(x, axis=(0, 1, 2), keepdims=True)
    var = jnp.mean((x - mean) ** 2, axis=(0, 1, 2), keepdims=True)
    xhat = (x - mean) * lax.rsqrt(var + eps)
    return xhat * (1.0 + gamma) + beta


def spade_resnet_block_reference(raw, seg_, x, *, src_nc, eps=1e-5):
    N, fin, H, W = x.shape
    seg_r = _nearest_resize_nchw(seg_, H, W)
    layout_only = seg_r.shape[1] - src_nc
    in_img = jnp.transpose(seg_r[:, layout_only:], (0, 2, 3, 1)).astype(jnp.float32)
    seg = jnp.transpose(seg_r[:, :layout_only], (0, 2, 3, 1)).astype(jnp.float32)
    xh = jnp.transpose(x, (0, 2, 3, 1)).astype(jnp.float32)

    def leaky(v):
        return jnp.where(v >= 0, v, 0.2 * v)

    if "w_s" in raw:
        x_s = _ref_conv(_ref_spade(xh, seg, raw["norm_s"], eps), raw["w_s"], None, 0)
    else:
        x_s = xh
    dx = jnp.concatenate([_ref_spade(xh, seg, raw["norm_0"], eps), in_img], axis=-1)
    dx = _ref_conv(leaky(dx), raw["w0"], raw["b0"], 1)
    dx = _ref_conv(leaky(_ref_spade(dx, seg, raw["norm_1"], eps)),
                   raw["w1"], raw["b1"], 1)
    out = x_s + dx
    return jnp.transpose(out, (0, 3, 1, 2))


# ----------------------------------------------------------------------------
# Demo
# ----------------------------------------------------------------------------

if __name__ == "__main__":
    key = jax.random.PRNGKey(0)
    fwd = jax.jit(spade_resnet_block, static_argnames=("src_nc", "tile_h"))

    seg_nc, src_nc = 3, 2
    N, H, W = 2, 16, 16
    hs, ws = 8, 8                        # seg map is upsampled (nearest) to 16x16

    # (4, 8): learned 1x1 shortcut path.  (8, 8): identity-residual path.
    for cfg_i, (fin, fout) in enumerate([(4, 8), (8, 8)]):
        k_p, k_x, k_s = jax.random.split(jax.random.fold_in(key, cfg_i), 3)
        raw = init_params(k_p, fin, fout, seg_nc, src_nc)
        kp = prepare_kernel_params(raw)

        x = jax.random.normal(k_x, (N, fin, H, W), jnp.float32)
        seg_ = jax.random.normal(k_s, (N, seg_nc + src_nc, hs, ws), jnp.float32)

        # tile_h=8 forces a 2-tile row grid so halo fetches and border masking
        # are exercised at both image edges and at an interior tile boundary.
        out = jax.block_until_ready(fwd(kp, seg_, x, src_nc=src_nc, tile_h=8))
        assert out.shape == (N, fout, H, W)
        assert bool(jnp.all(jnp.isfinite(out)))

        ref = spade_resnet_block_reference(raw, seg_, x, src_nc=src_nc)
        err = float(jnp.linalg.norm(out - ref) / (jnp.linalg.norm(ref) + 1e-8))
        assert err < 8e-2, f"config {fin}->{fout}: relative L2 error {err:.4f}"

    print("KERNEL_OK")
</pallas_src>

<mosaic_0001>
module attributes {stable_mosaic.version = 11 : i64} {
  func.func @_bn_stats_kernel(%arg0: i32, %arg1: memref<64x8x4xbf16, #tpu.memory_space<vmem>>, %arg2: memref<2x4xf32, #tpu.memory_space<vmem>>, %arg3: memref<8x4xf32, #tpu.memory_space<vmem>>, %arg4: memref<8x4xf32, #tpu.memory_space<vmem>>) attributes {dimension_semantics = [#tpu.dimension_semantics<arbitrary>], iteration_bounds = array<i64: 1>, scalar_prefetch = 0 : i64, scratch_operands = 2 : i64, tpu.core_type = #tpu.core_type<tc>, window_params = [{transform_indices = @transform_0, window_bounds = array<i64: 64, 8, 4>}, {pipeline_mode = #tpu.pipeline_mode<synchronous>, transform_indices = @transform_1, window_bounds = array<i64: 2, 4>}]} {
    %c0_i32 = arith.constant 0 : i32
    %0 = arith.cmpi eq, %arg0, %c0_i32 : i32
    %1 = arith.extui %0 : i1 to i32
    %c0_i32_0 = arith.constant 0 : i32
    %2 = arith.cmpi ne, %1, %c0_i32_0 : i32
    scf.if %2 {
      %cst_14 = arith.constant 0.000000e+00 : f32
      %17 = vector.broadcast %cst_14 : f32 to vector<8x4xf32>
      %c0_15 = arith.constant 0 : index
      %c0_16 = arith.constant 0 : index
      %18 = vector.load %arg3[%c0_15, %c0_16] : memref<8x4xf32, #tpu.memory_space<vmem>>, vector<8x4xf32>
      tpu.vector_store %arg3[%c0_15, %c0_16], %17 {strides = array<i32>} : memref<8x4xf32, #tpu.memory_space<vmem>>, vector<8x4xf32>,
      %cst_17 = arith.constant 0.000000e+00 : f32
      %19 = vector.broadcast %cst_17 : f32 to vector<8x4xf32>
      %c0_18 = arith.constant 0 : index
      %c0_19 = arith.constant 0 : index
      %20 = vector.load %arg4[%c0_18, %c0_19] : memref<8x4xf32, #tpu.memory_space<vmem>>, vector<8x4xf32>
      tpu.vector_store %arg4[%c0_18, %c0_19], %19 {strides = array<i32>} : memref<8x4xf32, #tpu.memory_space<vmem>>, vector<8x4xf32>,
    } else {
    }
    %c0 = arith.constant 0 : index
    %c0_1 = arith.constant 0 : index
    %c0_2 = arith.constant 0 : index
    %3 = vector.load %arg1[%c0, %c0_1, %c0_2] : memref<64x8x4xbf16, #tpu.memory_space<vmem>>, vector<64x8x4xbf16>
    %4 = arith.extf %3 : vector<64x8x4xbf16> to vector<64x8x4xf32>
    %c0_3 = arith.constant 0 : index
    %c0_4 = arith.constant 0 : index
    %5 = vector.load %arg3[%c0_3, %c0_4] : memref<8x4xf32, #tpu.memory_space<vmem>>, vector<8x4xf32>
    %cst = arith.constant dense<0.000000e+00> : vector<8x4xf32>
    %6 = vector.multi_reduction <add>, %4, %cst [0] : vector<64x8x4xf32> to vector<8x4xf32>
    %7 = arith.addf %5, %6 : vector<8x4xf32>
    %c0_5 = arith.constant 0 : index
    %c0_6 = arith.constant 0 : index
    %8 = vector.load %arg3[%c0_5, %c0_6] : memref<8x4xf32, #tpu.memory_space<vmem>>, vector<8x4xf32>
    tpu.vector_store %arg3[%c0_5, %c0_6], %7 {strides = array<i32>} : memref<8x4xf32, #tpu.memory_space<vmem>>, vector<8x4xf32>,
    %c0_7 = arith.constant 0 : index
    %c0_8 = arith.constant 0 : index
    %9 = vector.load %arg4[%c0_7, %c0_8] : memref<8x4xf32, #tpu.memory_space<vmem>>, vector<8x4xf32>
    %10 = arith.mulf %4, %4 : vector<64x8x4xf32>
    %cst_9 = arith.constant dense<0.000000e+00> : vector<8x4xf32>
    %11 = vector.multi_reduction <add>, %10, %cst_9 [0] : vector<64x8x4xf32> to vector<8x4xf32>
    %12 = arith.addf %9, %11 : vector<8x4xf32>
    %c0_10 = arith.constant 0 : index
    %c0_11 = arith.constant 0 : index
    %13 = vector.load %arg4[%c0_10, %c0_11] : memref<8x4xf32, #tpu.memory_space<vmem>>, vector<8x4xf32>
    tpu.vector_store %arg4[%c0_10, %c0_11], %12 {strides = array<i32>} : memref<8x4xf32, #tpu.memory_space<vmem>>, vector<8x4xf32>,
    %c0_i32_12 = arith.constant 0 : i32
    %14 = arith.cmpi eq, %arg0, %c0_i32_12 : i32
    %15 = arith.extui %14 : i1 to i32
    %c0_i32_13 = arith.constant 0 : i32
    %16 = arith.cmpi ne, %15, %c0_i32_13 : i32
    scf.if %16 {
      %c0_14 = arith.constant 0 : index
      %c0_15 = arith.constant 0 : index
      %17 = vector.load %arg3[%c0_14, %c0_15] : memref<8x4xf32, #tpu.memory_space<vmem>>, vector<8x4xf32>
      %cst_16 = arith.constant dense<0.000000e+00> : vector<4xf32>
      %18 = vector.multi_reduction <add>, %17, %cst_16 [0] : vector<8x4xf32> to vector<4xf32>
      %19 = vector.shape_cast %18 : vector<4xf32> to vector<1x4xf32>
      %cst_17 = arith.constant 0.001953125 : f32
      %20 = vector.broadcast %cst_17 : f32 to vector<1x4xf32>
      %21 = arith.mulf %19, %20 : vector<1x4xf32>
      %c0_18 = arith.constant 0 : index
      %c0_19 = arith.constant 0 : index
      %22 = vector.load %arg4[%c0_18, %c0_19] : memref<8x4xf32, #tpu.memory_space<vmem>>, vector<8x4xf32>
      %cst_20 = arith.constant dense<0.000000e+00> : vector<4xf32>
      %23 = vector.multi_reduction <add>, %22, %cst_20 [0] : vector<8x4xf32> to vector<4xf32>
      %24 = vector.shape_cast %23 : vector<4xf32> to vector<1x4xf32>
      %cst_21 = arith.constant 0.001953125 : f32
      %25 = vector.broadcast %cst_21 : f32 to vector<1x4xf32>
      %26 = arith.mulf %24, %25 : vector<1x4xf32>
      %27 = arith.mulf %21, %21 : vector<1x4xf32>
      %28 = arith.subf %26, %27 : vector<1x4xf32>
      %cst_22 = arith.constant 0.000000e+00 : f32
      %29 = vector.broadcast %cst_22 : f32 to vector<1x4xf32>
      %30 = arith.maximumf %28, %29 : vector<1x4xf32>
      %cst_23 = arith.constant 9.99999974E-6 : f32
      %31 = vector.broadcast %cst_23 : f32 to vector<1x4xf32>
      %32 = arith.addf %30, %31 : vector<1x4xf32>
      %33 = math.rsqrt %32 : vector<1x4xf32>
      %34 = tpu.concatenate %21, %33 in 0 : vector<1x4xf32>, vector<1x4xf32> -> vector<2x4xf32>
      %c0_24 = arith.constant 0 : index
      %c0_25 = arith.constant 0 : index
      %35 = vector.load %arg2[%c0_24, %c0_25] : memref<2x4xf32, #tpu.memory_space<vmem>>, vector<2x4xf32>
      tpu.vector_store %arg2[%c0_24, %c0_25], %34 {strides = array<i32>} : memref<2x4xf32, #tpu.memory_space<vmem>>, vector<2x4xf32>,
    } else {
    }
    return
  }
  func.func @transform_0(%arg0: i32) -> (i32, i32, i32) {
    %c0_i32 = arith.constant 0 : i32
    %c0_i32_0 = arith.constant 0 : i32
    %c0_i32_1 = arith.constant 0 : i32
    return %arg0, %c0_i32, %c0_i32_0 : i32, i32, i32
  }
  func.func @transform_1(%arg0: i32) -> (i32, i32) {
    %c0_i32 = arith.constant 0 : i32
    %c0_i32_0 = arith.constant 0 : i32
    %c0_i32_1 = arith.constant 0 : i32
    return %c0_i32, %c0_i32_0 : i32, i32
  }
}

module attributes {stable_mosaic.version = 11 : i64} {
  func.func @_spade_norm_kernel(%arg0: i32, %arg1: i32, %arg2: memref<1x8x20x3xbf16, #tpu.memory_space<vmem>>, %arg3: memref<1x4x20x3xbf16, #tpu.memory_space<vmem>>, %arg4: memref<27x128xbf16, #tpu.memory_space<vmem>>, %arg5: memref<1x128xf32, #tpu.memory_space<vmem>>, %arg6: memref<1152x8xbf16, #tpu.memory_space<vmem>>, %arg7: memref<1x8xf32, #tpu.memory_space<vmem>>, %arg8: memref<1x8x16x4xbf16, #tpu.memory_space<vmem>>, %arg9: memref<2x4xf32, #tpu.memory_space<vmem>>, %arg10: memref<1x8x16x4xbf16, #tpu.memory_space<vmem>>) attributes {dimension_semantics = [#tpu.dimension_semantics<parallel>, #tpu.dimension_semantics<parallel>], iteration_bounds = array<i64: 2, 2>, scalar_prefetch = 0 : i64, scratch_operands = 0 : i64, tpu.core_type = #tpu.core_type<tc>, window_params = [{transform_indices = @transform_0, window_bounds = array<i64: 1, 8, 20, 3>}, {transform_indices = @transform_1, window_bounds = array<i64: 1, 4, 20, 3>}, {pipeline_mode = #tpu.pipeline_mode<synchronous>, transform_indices = @transform_2, window_bounds = array<i64: 27, 128>}, {pipeline_mode = #tpu.pipeline_mode<synchronous>, transform_indices = @transform_3, window_bounds = array<i64: 1, 128>}, {pipeline_mode = #tpu.pipeline_mode<synchronous>, transform_indices = @transform_4, window_bounds = array<i64: 1152, 8>}, {pipeline_mode = #tpu.pipeline_mode<synchronous>, transform_indices = @transform_5, window_bounds = array<i64: 1, 8>}, {transform_indices = @transform_6, window_bounds = array<i64: 1, 8, 16, 4>}, {pipeline_mode = #tpu.pipeline_mode<synchronous>, transform_indices = @transform_7, window_bounds = array<i64: 2, 4>}, {transform_indices = @transform_8, window_bounds = array<i64: 1, 8, 16, 4>}]} {
    %c0 = arith.constant 0 : index
    %c0_0 = arith.constant 0 : index
    %c0_1 = arith.constant 0 : index
    %c0_2 = arith.constant 0 : index
    %0 = vector.load %arg2[%c0, %c0_0, %c0_1, %c0_2] : memref<1x8x20x3xbf16, #tpu.memory_space<vmem>>, vector<1x8x20x3xbf16>
    %1 = vector.shape_cast %0 : vector<1x8x20x3xbf16> to vector<8x20x3xbf16>
    %c0_3 = arith.constant 0 : index
    %c0_4 = arith.constant 0 : index
    %c0_5 = arith.constant 0 : index
    %c0_6 = arith.constant 0 : index
    %2 = vector.load %arg3[%c0_3, %c0_4, %c0_5, %c0_6] : memref<1x4x20x3xbf16, #tpu.memory_space<vmem>>, vector<1x4x20x3xbf16>
    %3 = vector.shape_cast %2 : vector<1x4x20x3xbf16> to vector<4x20x3xbf16>
    %4 = tpu.concatenate %1, %3 in 0 : vector<8x20x3xbf16>, vector<4x20x3xbf16> -> vector<12x20x3xbf16>
    %5 = vector.extract_strided_slice %4 {offsets = [0, 0, 0], sizes = [10, 18, 3], strides = [1, 1, 1]} : vector<12x20x3xbf16> to vector<10x18x3xbf16>
    %6 = vector.extract_strided_slice %4 {offsets = [0, 1, 0], sizes = [10, 18, 3], strides = [1, 1, 1]} : vector<12x20x3xbf16> to vector<10x18x3xbf16>
    %7 = vector.extract_strided_slice %4 {offsets = [0, 2, 0], sizes = [10, 18, 3], strides = [1, 1, 1]} : vector<12x20x3xbf16> to vector<10x18x3xbf16>
    %8 = vector.extract_strided_slice %4 {offsets = [1, 0, 0], sizes = [10, 18, 3], strides = [1, 1, 1]} : vector<12x20x3xbf16> to vector<10x18x3xbf16>
    %9 = vector.extract_strided_slice %4 {offsets = [1, 1, 0], sizes = [10, 18, 3], strides = [1, 1, 1]} : vector<12x20x3xbf16> to vector<10x18x3xbf16>
    %10 = vector.extract_strided_slice %4 {offsets = [1, 2, 0], sizes = [10, 18, 3], strides = [1, 1, 1]} : vector<12x20x3xbf16> to vector<10x18x3xbf16>
    %11 = vector.extract_strided_slice %4 {offsets = [2, 0, 0], sizes = [10, 18, 3], strides = [1, 1, 1]} : vector<12x20x3xbf16> to vector<10x18x3xbf16>
    %12 = vector.extract_strided_slice %4 {offsets = [2, 1, 0], sizes = [10, 18, 3], strides = [1, 1, 1]} : vector<12x20x3xbf16> to vector<10x18x3xbf16>
    %13 = vector.extract_strided_slice %4 {offsets = [2, 2, 0], sizes = [10, 18, 3], strides = [1, 1, 1]} : vector<12x20x3xbf16> to vector<10x18x3xbf16>
    %14 = tpu.concatenate %5, %6, %7, %8, %9, %10, %11, %12, %13 in 2 : vector<10x18x3xbf16>, vector<10x18x3xbf16>, vector<10x18x3xbf16>, vector<10x18x3xbf16>, vector<10x18x3xbf16>, vector<10x18x3xbf16>, vector<10x18x3xbf16>, vector<10x18x3xbf16>, vector<10x18x3xbf16> -> vector<10x18x27xbf16>
    %15 = vector.shape_cast %14 : vector<10x18x27xbf16> to vector<180x27xbf16>
    %c0_7 = arith.constant 0 : index
    %c0_8 = arith.constant 0 : index
    %16 = vector.load %arg4[%c0_7, %c0_8] : memref<27x128xbf16, #tpu.memory_space<vmem>>, vector<27x128xbf16>
    %cst = arith.constant dense<0.000000e+00> : vector<180x128xf32>
    %17 = tpu.matmul %15, %16, %cst {dimension_numbers = #tpu.dot_dimension_numbers<[1], [0], [0], [1], [0, 0, 1, 1], [], []>} : vector<180x27xbf16>, vector<27x128xbf16>, vector<180x128xf32> -> vector<180x128xf32>
    %c0_9 = arith.constant 0 : index
    %c0_10 = arith.constant 0 : index
    %18 = vector.load %arg5[%c0_9, %c0_10] : memref<1x128xf32, #tpu.memory_space<vmem>>, vector<1x128xf32>
    %19 = vector.broadcast %18 : vector<1x128xf32> to vector<180x128xf32>
    %20 = arith.addf %17, %19 : vector<180x128xf32>
    %cst_11 = arith.constant 0.000000e+00 : f32
    %21 = vector.broadcast %cst_11 : f32 to vector<180x128xf32>
    %22 = arith.maximumf %20, %21 : vector<180x128xf32>
    %23 = vector.shape_cast %22 : vector<180x128xf32> to vector<10x18x128xf32>
    %24 = tpu.iota {dimensions = array<i32: 0>} : vector<10x18xi32>
    %25 = tpu.iota {dimensions = array<i32: 1>} : vector<10x18xi32>
    %c1_i32 = arith.constant 1 : i32
    %26 = vector.broadcast %c1_i32 : i32 to vector<10x18xi32>
    %27 = arith.cmpi sge, %25, %26 : vector<10x18xi32>
    %c16_i32 = arith.constant 16 : i32
    %28 = vector.broadcast %c16_i32 : i32 to vector<10x18xi32>
    %29 = arith.cmpi sle, %25, %28 : vector<10x18xi32>
    %30 = arith.andi %27, %29 : vector<10x18xi1>
    %c1_i32_12 = arith.constant 1 : i32
    %31 = vector.broadcast %c1_i32_12 : i32 to vector<10x18xi32>
    %32 = arith.cmpi sge, %24, %31 : vector<10x18xi32>
    %c0_i32 = arith.constant 0 : i32
    %33 = arith.cmpi sgt, %arg1, %c0_i32 : i32
    %34 = vector.broadcast %33 : i1 to vector<10x18xi1>
    %35 = arith.ori %32, %34 : vector<10x18xi1>
    %36 = arith.andi %30, %35 : vector<10x18xi1>
    %c8_i32 = arith.constant 8 : i32
    %37 = vector.broadcast %c8_i32 : i32 to vector<10x18xi32>
    %38 = arith.cmpi sle, %24, %37 : vector<10x18xi32>
    %c1_i32_13 = arith.constant 1 : i32
    %39 = arith.cmpi slt, %arg1, %c1_i32_13 : i32
    %40 = vector.broadcast %39 : i1 to vector<10x18xi1>
    %41 = arith.ori %38, %40 : vector<10x18xi1>
    %42 = arith.andi %36, %41 : vector<10x18xi1>
    %43 = arith.extui %42 : vector<10x18xi1> to vector<10x18xi32>
    %44 = arith.sitofp %43 : vector<10x18xi32> to vector<10x18xf32>
    %45 = vector.shape_cast %44 : vector<10x18xf32> to vector<10x18x1xf32>
    %46 = vector.broadcast %45 : vector<10x18x1xf32> to vector<10x18x128xf32>
    %47 = arith.mulf %23, %46 : vector<10x18x128xf32>
    %48 = arith.truncf %47 : vector<10x18x128xf32> to vector<10x18x128xbf16>
    %49 = vector.extract_strided_slice %48 {offsets = [0, 0, 0], sizes = [8, 16, 128], strides = [1, 1, 1]} : vector<10x18x128xbf16> to vector<8x16x128xbf16>
    %50 = vector.extract_strided_slice %48 {offsets = [0, 1, 0], sizes = [8, 16, 128], strides = [1, 1, 1]} : vector<10x18x128xbf16> to vector<8x16x128xbf16>
    %51 = vector.extract_strided_slice %48 {offsets = [0, 2, 0], sizes = [8, 16, 128], strides = [1, 1, 1]} : vector<10x18x128xbf16> to vector<8x16x128xbf16>
    %52 = vector.extract_strided_slice %48 {offsets = [1, 0, 0], sizes = [8, 16, 128], strides = [1, 1, 1]} : vector<10x18x128xbf16> to vector<8x16x128xbf16>
    %53 = vector.extract_strided_slice %48 {offsets = [1, 1, 0], sizes = [8, 16, 128], strides = [1, 1, 1]} : vector<10x18x128xbf16> to vector<8x16x128xbf16>
    %54 = vector.extract_strided_slice %48 {offsets = [1, 2, 0], sizes = [8, 16, 128], strides = [1, 1, 1]} : vector<10x18x128xbf16> to vector<8x16x128xbf16>
    %55 = vector.extract_strided_slice %48 {offsets = [2, 0, 0], sizes = [8, 16, 128], strides = [1, 1, 1]} : vector<10x18x128xbf16> to vector<8x16x128xbf16>
    %56 = vector.extract_strided_slice %48 {offsets = [2, 1, 0], sizes = [8, 16, 128], strides = [1, 1, 1]} : vector<10x18x128xbf16> to vector<8x16x128xbf16>
    %57 = vector.extract_strided_slice %48 {offsets = [2, 2, 0], sizes = [8, 16, 128], strides = [1, 1, 1]} : vector<10x18x128xbf16> to vector<8x16x128xbf16>
    %58 = tpu.concatenate %49, %50, %51, %52, %53, %54, %55, %56, %57 in 2 : vector<8x16x128xbf16>, vector<8x16x128xbf16>, vector<8x16x128xbf16>, vector<8x16x128xbf16>, vector<8x16x128xbf16>, vector<8x16x128xbf16>, vector<8x16x128xbf16>, vector<8x16x128xbf16>, vector<8x16x128xbf16> -> vector<8x16x1152xbf16>
    %59 = vector.shape_cast %58 : vector<8x16x1152xbf16> to vector<128x1152xbf16>
    %c0_14 = arith.constant 0 : index
    %c0_15 = arith.constant 0 : index
    %60 = vector.load %arg6[%c0_14, %c0_15] : memref<1152x8xbf16, #tpu.memory_space<vmem>>, vector<1152x8xbf16>
    %cst_16 = arith.constant dense<0.000000e+00> : vector<128x8xf32>
    %61 = tpu.matmul %59, %60, %cst_16 {dimension_numbers = #tpu.dot_dimension_numbers<[1], [0], [0], [1], [0, 0, 1, 1], [], []>} : vector<128x1152xbf16>, vector<1152x8xbf16>, vector<128x8xf32> -> vector<128x8xf32>
    %c0_17 = arith.constant 0 : index
    %c0_18 = arith.constant 0 : index
    %62 = vector.load %arg7[%c0_17, %c0_18] : memref<1x8xf32, #tpu.memory_space<vmem>>, vector<1x8xf32>
    %63 = vector.broadcast %62 : vector<1x8xf32> to vector<128x8xf32>
    %64 = arith.addf %61, %63 : vector<128x8xf32>
    %65 = vector.extract_strided_slice %64 {offsets = [0, 0], sizes = [128, 4], strides = [1, 1]} : vector<128x8xf32> to vector<128x4xf32>
    %66 = vector.extract_strided_slice %64 {offsets = [0, 4], sizes = [128, 4], strides = [1, 1]} : vector<128x8xf32> to vector<128x4xf32>
    %c0_19 = arith.constant 0 : index
    %c0_20 = arith.constant 0 : index
    %c0_21 = arith.constant 0 : index
    %c0_22 = arith.constant 0 : index
    %67 = vector.load %arg8[%c0_19, %c0_20, %c0_21, %c0_22] : memref<1x8x16x4xbf16, #tpu.memory_space<vmem>>, vector<1x8x16x4xbf16>
    %68 = vector.shape_cast %67 : vector<1x8x16x4xbf16> to vector<8x16x4xbf16>
    %69 = arith.extf %68 : vector<8x16x4xbf16> to vector<8x16x4xf32>
    %70 = vector.shape_cast %69 : vector<8x16x4xf32> to vector<128x4xf32>
    %c0_23 = arith.constant 0 : index
    %c0_24 = arith.constant 0 : index
    %71 = vector.load %arg9[%c0_23, %c0_24] : memref<2x4xf32, #tpu.memory_space<vmem>>, vector<1x4xf32>
    %c1 = arith.constant 1 : index
    %c0_25 = arith.constant 0 : index
    %72 = vector.load %arg9[%c1, %c0_25] : memref<2x4xf32, #tpu.memory_space<vmem>>, vector<1x4xf32>
    %73 = vector.broadcast %71 : vector<1x4xf32> to vector<128x4xf32>
    %74 = arith.subf %70, %73 : vector<128x4xf32>
    %75 = vector.broadcast %72 : vector<1x4xf32> to vector<128x4xf32>
    %76 = arith.mulf %74, %75 : vector<128x4xf32>
    %cst_26 = arith.constant 1.000000e+00 : f32
    %77 = vector.broadcast %cst_26 : f32 to vector<128x4xf32>
    %78 = arith.addf %77, %65 : vector<128x4xf32>
    %79 = arith.mulf %76, %78 : vector<128x4xf32>
    %80 = arith.addf %79, %66 : vector<128x4xf32>
    %81 = vector.shape_cast %80 : vector<128x4xf32> to vector<8x16x4xf32>
    %82 = arith.truncf %81 : vector<8x16x4xf32> to vector<8x16x4xbf16>
    %c0_27 = arith.constant 0 : index
    %c0_28 = arith.constant 0 : index
    %c0_29 = arith.constant 0 : index
    %c0_30 = arith.constant 0 : index
    %83 = vector.load %arg10[%c0_27, %c0_28, %c0_29, %c0_30] : memref<1x8x16x4xbf16, #tpu.memory_space<vmem>>, vector<1x8x16x4xbf16>
    %84 = vector.shape_cast %83 : vector<1x8x16x4xbf16> to vector<8x16x4xbf16>
    %85 = vector.shape_cast %82 : vector<8x16x4xbf16> to vector<1x8x16x4xbf16>
    tpu.vector_store %arg10[%c0_27, %c0_28, %c0_29, %c0_30], %85 {strides = array<i32>} : memref<1x8x16x4xbf16, #tpu.memory_space<vmem>>, vector<1x8x16x4xbf16>,
    return
  }
  func.func @transform_0(%arg0: i32, %arg1: i32) -> (i32, i32, i32, i32) {
    %c0_i32 = arith.constant 0 : i32
    %c0_i32_0 = arith.constant 0 : i32
    %c0_i32_1 = arith.constant 0 : i32
    return %arg0, %arg1, %c0_i32, %c0_i32_0 : i32, i32, i32, i32
  }
  func.func @transform_1(%arg0: i32, %arg1: i32) -> (i32, i32, i32, i32) {
    %c1_i32 = arith.constant 1 : i32
    %0 = arith.addi %arg1, %c1_i32 : i32
    %c2_i32 = arith.constant 2 : i32
    %1 = arith.muli %0, %c2_i32 : i32
    %c0_i32 = arith.constant 0 : i32
    %c0_i32_0 = arith.constant 0 : i32
    %c0_i32_1 = arith.constant 0 : i32
    return %arg0, %1, %c0_i32, %c0_i32_0 : i32, i32, i32, i32
  }
  func.func @transform_2(%arg0: i32, %arg1: i32) -> (i32, i32) {
    %c0_i32 = arith.constant 0 : i32
    %c0_i32_0 = arith.constant 0 : i32
    %c0_i32_1 = arith.constant 0 : i32
    return %c0_i32, %c0_i32_0 : i32, i32
  }
  func.func @transform_3(%arg0: i32, %arg1: i32) -> (i32, i32) {
    %c0_i32 = arith.constant 0 : i32
    %c0_i32_0 = arith.constant 0 : i32
    %c0_i32_1 = arith.constant 0 : i32
    return %c0_i32, %c0_i32_0 : i32, i32
  }
  func.func @transform_4(%arg0: i32, %arg1: i32) -> (i32, i32) {
    %c0_i32 = arith.constant 0 : i32
    %c0_i32_0 = arith.constant 0 : i32
    %c0_i32_1 = arith.constant 0 : i32
    return %c0_i32, %c0_i32_0 : i32, i32
  }
  func.func @transform_5(%arg0: i32, %arg1: i32) -> (i32, i32) {
    %c0_i32 = arith.constant 0 : i32
    %c0_i32_0 = arith.constant 0 : i32
    %c0_i32_1 = arith.constant 0 : i32
    return %c0_i32, %c0_i32_0 : i32, i32
  }
  func.func @transform_6(%arg0: i32, %arg1: i32) -> (i32, i32, i32, i32) {
    %c0_i32 = arith.constant 0 : i32
    %c0_i32_0 = arith.constant 0 : i32
    %c0_i32_1 = arith.constant 0 : i32
    return %arg0, %arg1, %c0_i32, %c0_i32_0 : i32, i32, i32, i32
  }
  func.func @transform_7(%arg0: i32, %arg1: i32) -> (i32, i32) {
    %c0_i32 = arith.constant 0 : i32
    %c0_i32_0 = arith.constant 0 : i32
    %c0_i32_1 = arith.constant 0 : i32
    return %c0_i32, %c0_i32_0 : i32, i32
  }
  func.func @transform_8(%arg0: i32, %arg1: i32) -> (i32, i32, i32, i32) {
    %c0_i32 = arith.constant 0 : i32
    %c0_i32_0 = arith.constant 0 : i32
    %c0_i32_1 = arith.constant 0 : i32
    return %arg0, %arg1, %c0_i32, %c0_i32_0 : i32, i32, i32, i32
  }
}

module attributes {stable_mosaic.version = 11 : i64} {
  func.func @kernel(%arg0: i32, %arg1: i32, %arg2: memref<1x8x16x4xbf16, #tpu.memory_space<vmem>>, %arg3: memref<1x1x16x4xbf16, #tpu.memory_space<vmem>>, %arg4: memref<1x1x16x4xbf16, #tpu.memory_space<vmem>>, %arg5: memref<36x4xbf16, #tpu.memory_space<vmem>>, %arg6: memref<1x8x16x2xbf16, #tpu.memory_space<vmem>>, %arg7: memref<1x1x16x2xbf16, #tpu.memory_space<vmem>>, %arg8: memref<1x1x16x2xbf16, #tpu.memory_space<vmem>>, %arg9: memref<18x4xbf16, #tpu.memory_space<vmem>>, %arg10: memref<1x4xf32, #tpu.memory_space<vmem>>, %arg11: memref<1x8x16x4xbf16, #tpu.memory_space<vmem>>, %arg12: memref<1x1x8x4xf32, #tpu.memory_space<vmem>>) attributes {dimension_semantics = [#tpu.dimension_semantics<parallel>, #tpu.dimension_semantics<parallel>], iteration_bounds = array<i64: 2, 2>, scalar_prefetch = 0 : i64, scratch_operands = 0 : i64, tpu.core_type = #tpu.core_type<tc>, window_params = [{transform_indices = @transform_0, window_bounds = array<i64: 1, 8, 16, 4>}, {transform_indices = @transform_1, window_bounds = array<i64: 1, 1, 16, 4>}, {transform_indices = @transform_2, window_bounds = array<i64: 1, 1, 16, 4>}, {pipeline_mode = #tpu.pipeline_mode<synchronous>, transform_indices = @transform_3, window_bounds = array<i64: 36, 4>}, {transform_indices = @transform_4, window_bounds = array<i64: 1, 8, 16, 2>}, {transform_indices = @transform_5, window_bounds = array<i64: 1, 1, 16, 2>}, {transform_indices = @transform_6, window_bounds = array<i64: 1, 1, 16, 2>}, {pipeline_mode = #tpu.pipeline_mode<synchronous>, transform_indices = @transform_7, window_bounds = array<i64: 18, 4>}, {pipeline_mode = #tpu.pipeline_mode<synchronous>, transform_indices = @transform_8, window_bounds = array<i64: 1, 4>}, {transform_indices = @transform_9, window_bounds = array<i64: 1, 8, 16, 4>}, {transform_indices = @transform_10, window_bounds = array<i64: 1, 1, 8, 4>}]} {
    %c0_i32 = arith.constant 0 : i32
    %0 = arith.cmpi sgt, %arg1, %c0_i32 : i32
    %1 = arith.extui %0 : i1 to i32
    %2 = arith.sitofp %1 : i32 to f32
    %c1_i32 = arith.constant 1 : i32
    %3 = arith.cmpi slt, %arg1, %c1_i32 : i32
    %4 = arith.extui %3 : i1 to i32
    %5 = arith.sitofp %4 : i32 to f32
    %cst = arith.constant 0.000000e+00 : f32
    %6 = vector.broadcast %cst : f32 to vector<128x4xf32>
    %c0 = arith.constant 0 : index
    %c0_0 = arith.constant 0 : index
    %c0_1 = arith.constant 0 : index
    %c0_2 = arith.constant 0 : index
    %7 = vector.load %arg2[%c0, %c0_0, %c0_1, %c0_2] : memref<1x8x16x4xbf16, #tpu.memory_space<vmem>>, vector<1x8x16x4xbf16>
    %8 = vector.shape_cast %7 : vector<1x8x16x4xbf16> to vector<8x16x4xbf16>
    %c0_3 = arith.constant 0 : index
    %c0_4 = arith.constant 0 : index
    %c0_5 = arith.constant 0 : index
    %c0_6 = arith.constant 0 : index
    %9 = vector.load %arg3[%c0_3, %c0_4, %c0_5, %c0_6] : memref<1x1x16x4xbf16, #tpu.memory_space<vmem>>, vector<1x1x16x4xbf16>
    %10 = vector.shape_cast %9 : vector<1x1x16x4xbf16> to vector<1x16x4xbf16>
    %11 = arith.truncf %2 : f32 to bf16
    %12 = vector.broadcast %11 : bf16 to vector<1x16x4xbf16>
    %13 = arith.mulf %10, %12 : vector<1x16x4xbf16>
    %c0_7 = arith.constant 0 : index
    %c0_8 = arith.constant 0 : index
    %c0_9 = arith.constant 0 : index
    %c0_10 = arith.constant 0 : index
    %14 = vector.load %arg4[%c0_7, %c0_8, %c0_9, %c0_10] : memref<1x1x16x4xbf16, #tpu.memory_space<vmem>>, vector<1x1x16x4xbf16>
    %15 = vector.shape_cast %14 : vector<1x1x16x4xbf16> to vector<1x16x4xbf16>
    %16 = arith.truncf %5 : f32 to bf16
    %17 = vector.broadcast %16 : bf16 to vector<1x16x4xbf16>
    %18 = arith.mulf %15, %17 : vector<1x16x4xbf16>
    %19 = tpu.concatenate %13, %8, %18 in 0 : vector<1x16x4xbf16>, vector<8x16x4xbf16>, vector<1x16x4xbf16> -> vector<10x16x4xbf16>
    %cst_11 = arith.constant 0.000000e+00 : bf16
    %20 = vector.broadcast %cst_11 : bf16 to vector<10x1x4xbf16>
    %21 = tpu.concatenate %20, %19, %20 in 1 : vector<10x1x4xbf16>, vector<10x16x4xbf16>, vector<10x1x4xbf16> -> vector<10x18x4xbf16>
    %cst_12 = arith.constant 0.000000e+00 : bf16
    %22 = vector.broadcast %cst_12 : bf16 to vector<10x18x4xbf16>
    %23 = arith.cmpf oge, %21, %22 : vector<10x18x4xbf16>
    %cst_13 = arith.constant 2.001950e-01 : bf16
    %24 = vector.broadcast %cst_13 : bf16 to vector<10x18x4xbf16>
    %25 = arith.mulf %24, %21 : vector<10x18x4xbf16>
    %26 = arith.select %23, %21, %25 : vector<10x18x4xi1>, vector<10x18x4xbf16>
    %27 = vector.extract_strided_slice %26 {offsets = [0, 0, 0], sizes = [8, 16, 4], strides = [1, 1, 1]} : vector<10x18x4xbf16> to vector<8x16x4xbf16>
    %28 = vector.extract_strided_slice %26 {offsets = [0, 1, 0], sizes = [8, 16, 4], strides = [1, 1, 1]} : vector<10x18x4xbf16> to vector<8x16x4xbf16>
    %29 = vector.extract_strided_slice %26 {offsets = [0, 2, 0], sizes = [8, 16, 4], strides = [1, 1, 1]} : vector<10x18x4xbf16> to vector<8x16x4xbf16>
    %30 = vector.extract_strided_slice %26 {offsets = [1, 0, 0], sizes = [8, 16, 4], strides = [1, 1, 1]} : vector<10x18x4xbf16> to vector<8x16x4xbf16>
    %31 = vector.extract_strided_slice %26 {offsets = [1, 1, 0], sizes = [8, 16, 4], strides = [1, 1, 1]} : vector<10x18x4xbf16> to vector<8x16x4xbf16>
    %32 = vector.extract_strided_slice %26 {offsets = [1, 2, 0], sizes = [8, 16, 4], strides = [1, 1, 1]} : vector<10x18x4xbf16> to vector<8x16x4xbf16>
    %33 = vector.extract_strided_slice %26 {offsets = [2, 0, 0], sizes = [8, 16, 4], strides = [1, 1, 1]} : vector<10x18x4xbf16> to vector<8x16x4xbf16>
    %34 = vector.extract_strided_slice %26 {offsets = [2, 1, 0], sizes = [8, 16, 4], strides = [1, 1, 1]} : vector<10x18x4xbf16> to vector<8x16x4xbf16>
    %35 = vector.extract_strided_slice %26 {offsets = [2, 2, 0], sizes = [8, 16, 4], strides = [1, 1, 1]} : vector<10x18x4xbf16> to vector<8x16x4xbf16>
    %36 = tpu.concatenate %27, %28, %29, %30, %31, %32, %33, %34, %35 in 2 : vector<8x16x4xbf16>, vector<8x16x4xbf16>, vector<8x16x4xbf16>, vector<8x16x4xbf16>, vector<8x16x4xbf16>, vector<8x16x4xbf16>, vector<8x16x4xbf16>, vector<8x16x4xbf16>, vector<8x16x4xbf16> -> vector<8x16x36xbf16>
    %37 = vector.shape_cast %36 : vector<8x16x36xbf16> to vector<128x36xbf16>
    %c0_14 = arith.constant 0 : index
    %c0_15 = arith.constant 0 : index
    %38 = vector.load %arg5[%c0_14, %c0_15] : memref<36x4xbf16, #tpu.memory_space<vmem>>, vector<36x4xbf16>
    %cst_16 = arith.constant dense<0.000000e+00> : vector<128x4xf32>
    %39 = tpu.matmul %37, %38, %cst_16 {dimension_numbers = #tpu.dot_dimension_numbers<[1], [0], [0], [1], [0, 0, 1, 1], [], []>} : vector<128x36xbf16>, vector<36x4xbf16>, vector<128x4xf32> -> vector<128x4xf32>
    %40 = arith.addf %6, %39 : vector<128x4xf32>
    %c0_17 = arith.constant 0 : index
    %c0_18 = arith.constant 0 : index
    %c0_19 = arith.constant 0 : index
    %c0_20 = arith.constant 0 : index
    %41 = vector.load %arg6[%c0_17, %c0_18, %c0_19, %c0_20] : memref<1x8x16x2xbf16, #tpu.memory_space<vmem>>, vector<1x8x16x2xbf16>
    %42 = vector.shape_cast %41 : vector<1x8x16x2xbf16> to vector<8x16x2xbf16>
    %c0_21 = arith.constant 0 : index
    %c0_22 = arith.constant 0 : index
    %c0_23 = arith.constant 0 : index
    %c0_24 = arith.constant 0 : index
    %43 = vector.load %arg7[%c0_21, %c0_22, %c0_23, %c0_24] : memref<1x1x16x2xbf16, #tpu.memory_space<vmem>>, vector<1x1x16x2xbf16>
    %44 = vector.shape_cast %43 : vector<1x1x16x2xbf16> to vector<1x16x2xbf16>
    %45 = arith.truncf %2 : f32 to bf16
    %46 = vector.broadcast %45 : bf16 to vector<1x16x2xbf16>
    %47 = arith.mulf %44, %46 : vector<1x16x2xbf16>
    %c0_25 = arith.constant 0 : index
    %c0_26 = arith.constant 0 : index
    %c0_27 = arith.constant 0 : index
    %c0_28 = arith.constant 0 : index
    %48 = vector.load %arg8[%c0_25, %c0_26, %c0_27, %c0_28] : memref<1x1x16x2xbf16, #tpu.memory_space<vmem>>, vector<1x1x16x2xbf16>
    %49 = vector.shape_cast %48 : vector<1x1x16x2xbf16> to vector<1x16x2xbf16>
    %50 = arith.truncf %5 : f32 to bf16
    %51 = vector.broadcast %50 : bf16 to vector<1x16x2xbf16>
    %52 = arith.mulf %49, %51 : vector<1x16x2xbf16>
    %53 = tpu.concatenate %47, %42, %52 in 0 : vector<1x16x2xbf16>, vector<8x16x2xbf16>, vector<1x16x2xbf16> -> vector<10x16x2xbf16>
    %cst_29 = arith.constant 0.000000e+00 : bf16
    %54 = vector.broadcast %cst_29 : bf16 to vector<10x1x2xbf16>
    %55 = tpu.concatenate %54, %53, %54 in 1 : vector<10x1x2xbf16>, vector<10x16x2xbf16>, vector<10x1x2xbf16> -> vector<10x18x2xbf16>
    %cst_30 = arith.constant 0.000000e+00 : bf16
    %56 = vector.broadcast %cst_30 : bf16 to vector<10x18x2xbf16>
    %57 = arith.cmpf oge, %55, %56 : vector<10x18x2xbf16>
    %cst_31 = arith.constant 2.001950e-01 : bf16
    %58 = vector.broadcast %cst_31 : bf16 to vector<10x18x2xbf16>
    %59 = arith.mulf %58, %55 : vector<10x18x2xbf16>
    %60 = arith.select %57, %55, %59 : vector<10x18x2xi1>, vector<10x18x2xbf16>
    %61 = vector.extract_strided_slice %60 {offsets = [0, 0, 0], sizes = [8, 16, 2], strides = [1, 1, 1]} : vector<10x18x2xbf16> to vector<8x16x2xbf16>
    %62 = vector.extract_strided_slice %60 {offsets = [0, 1, 0], sizes = [8, 16, 2], strides = [1, 1, 1]} : vector<10x18x2xbf16> to vector<8x16x2xbf16>
    %63 = vector.extract_strided_slice %60 {offsets = [0, 2, 0], sizes = [8, 16, 2], strides = [1, 1, 1]} : vector<10x18x2xbf16> to vector<8x16x2xbf16>
    %64 = vector.extract_strided_slice %60 {offsets = [1, 0, 0], sizes = [8, 16, 2], strides = [1, 1, 1]} : vector<10x18x2xbf16> to vector<8x16x2xbf16>
    %65 = vector.extract_strided_slice %60 {offsets = [1, 1, 0], sizes = [8, 16, 2], strides = [1, 1, 1]} : vector<10x18x2xbf16> to vector<8x16x2xbf16>
    %66 = vector.extract_strided_slice %60 {offsets = [1, 2, 0], sizes = [8, 16, 2], strides = [1, 1, 1]} : vector<10x18x2xbf16> to vector<8x16x2xbf16>
    %67 = vector.extract_strided_slice %60 {offsets = [2, 0, 0], sizes = [8, 16, 2], strides = [1, 1, 1]} : vector<10x18x2xbf16> to vector<8x16x2xbf16>
    %68 = vector.extract_strided_slice %60 {offsets = [2, 1, 0], sizes = [8, 16, 2], strides = [1, 1, 1]} : vector<10x18x2xbf16> to vector<8x16x2xbf16>
    %69 = vector.extract_strided_slice %60 {offsets = [2, 2, 0], sizes = [8, 16, 2], strides = [1, 1, 1]} : vector<10x18x2xbf16> to vector<8x16x2xbf16>
    %70 = tpu.concatenate %61, %62, %63, %64, %65, %66, %67, %68, %69 in 2 : vector<8x16x2xbf16>, vector<8x16x2xbf16>, vector<8x16x2xbf16>, vector<8x16x2xbf16>, vector<8x16x2xbf16>, vector<8x16x2xbf16>, vector<8x16x2xbf16>, vector<8x16x2xbf16>, vector<8x16x2xbf16> -> vector<8x16x18xbf16>
    %71 = vector.shape_cast %70 : vector<8x16x18xbf16> to vector<128x18xbf16>
    %c0_32 = arith.constant 0 : index
    %c0_33 = arith.constant 0 : index
    %72 = vector.load %arg9[%c0_32, %c0_33] : memref<18x4xbf16, #tpu.memory_space<vmem>>, vector<18x4xbf16>
    %cst_34 = arith.constant dense<0.000000e+00> : vector<128x4xf32>
    %73 = tpu.matmul %71, %72, %cst_34 {dimension_numbers = #tpu.dot_dimension_numbers<[1], [0], [0], [1], [0, 0, 1, 1], [], []>} : vector<128x18xbf16>, vector<18x4xbf16>, vector<128x4xf32> -> vector<128x4xf32>
    %74 = arith.addf %40, %73 : vector<128x4xf32>
    %c0_35 = arith.constant 0 : index
    %c0_36 = arith.constant 0 : index
    %75 = vector.load %arg10[%c0_35, %c0_36] : memref<1x4xf32, #tpu.memory_space<vmem>>, vector<1x4xf32>
    %76 = vector.broadcast %75 : vector<1x4xf32> to vector<128x4xf32>
    %77 = arith.addf %74, %76 : vector<128x4xf32>
    %78 = vector.shape_cast %77 : vector<128x4xf32> to vector<8x16x4xf32>
    %79 = arith.truncf %78 : vector<8x16x4xf32> to vector<8x16x4xbf16>
    %c0_37 = arith.constant 0 : index
    %c0_38 = arith.constant 0 : index
    %c0_39 = arith.constant 0 : index
    %c0_40 = arith.constant 0 : index
    %80 = vector.load %arg11[%c0_37, %c0_38, %c0_39, %c0_40] : memref<1x8x16x4xbf16, #tpu.memory_space<vmem>>, vector<1x8x16x4xbf16>
    %81 = vector.shape_cast %80 : vector<1x8x16x4xbf16> to vector<8x16x4xbf16>
    %82 = vector.shape_cast %79 : vector<8x16x4xbf16> to vector<1x8x16x4xbf16>
    tpu.vector_store %arg11[%c0_37, %c0_38, %c0_39, %c0_40], %82 {strides = array<i32>} : memref<1x8x16x4xbf16, #tpu.memory_space<vmem>>, vector<1x8x16x4xbf16>,
    %cst_41 = arith.constant dense<0.000000e+00> : vector<4xf32>
    %83 = vector.multi_reduction <add>, %77, %cst_41 [0] : vector<128x4xf32> to vector<4xf32>
    %84 = vector.shape_cast %83 : vector<4xf32> to vector<1x4xf32>
    %85 = arith.mulf %77, %77 : vector<128x4xf32>
    %cst_42 = arith.constant dense<0.000000e+00> : vector<4xf32>
    %86 = vector.multi_reduction <add>, %85, %cst_42 [0] : vector<128x4xf32> to vector<4xf32>
    %87 = vector.shape_cast %86 : vector<4xf32> to vector<1x4xf32>
    %cst_43 = arith.constant 0.000000e+00 : f32
    %88 = vector.broadcast %cst_43 : f32 to vector<6x4xf32>
    %89 = tpu.concatenate %84, %87, %88 in 0 : vector<1x4xf32>, vector<1x4xf32>, vector<6x4xf32> -> vector<8x4xf32>
    %90 = vector.shape_cast %89 : vector<8x4xf32> to vector<1x1x8x4xf32>
    %c0_44 = arith.constant 0 : index
    %c0_45 = arith.constant 0 : index
    %c0_46 = arith.constant 0 : index
    %c0_47 = arith.constant 0 : index
    %91 = vector.load %arg12[%c0_44, %c0_45, %c0_46, %c0_47] : memref<1x1x8x4xf32, #tpu.memory_space<vmem>>, vector<1x1x8x4xf32>
    tpu.vector_store %arg12[%c0_44, %c0_45, %c0_46, %c0_47], %90 {strides = array<i32>} : memref<1x1x8x4xf32, #tpu.memory_space<vmem>>, vector<1x1x8x4xf32>,
    return
  }
  func.func @transform_0(%arg0: i32, %arg1: i32) -> (i32, i32, i32, i32) {
    %c0_i32 = arith.constant 0 : i32
    %c0_i32_0 = arith.constant 0 : i32
    %c0_i32_1 = arith.constant 0 : i32
    return %arg0, %arg1, %c0_i32, %c0_i32_0 : i32, i32, i32, i32
  }
  func.func @transform_1(%arg0: i32, %arg1: i32) -> (i32, i32, i32, i32) {
    %c8_i32 = arith.constant 8 : i32
    %0 = arith.muli %arg1, %c8_i32 : i32
    %c1_i32 = arith.constant 1 : i32
    %1 = arith.subi %0, %c1_i32 : i32
    %c0_i32 = arith.constant 0 : i32
    %2 = arith.maxsi %1, %c0_i32 : i32
    %c0_i32_0 = arith.constant 0 : i32
    %c0_i32_1 = arith.constant 0 : i32
    %c0_i32_2 = arith.constant 0 : i32
    return %arg0, %2, %c0_i32_0, %c0_i32_1 : i32, i32, i32, i32
  }
  func.func @transform_2(%arg0: i32, %arg1: i32) -> (i32, i32, i32, i32) {
    %c8_i32 = arith.constant 8 : i32
    %0 = arith.muli %arg1, %c8_i32 : i32
    %c8_i32_0 = arith.constant 8 : i32
    %1 = arith.addi %0, %c8_i32_0 : i32
    %c15_i32 = arith.constant 15 : i32
    %2 = arith.minsi %1, %c15_i32 : i32
    %c0_i32 = arith.constant 0 : i32
    %c0_i32_1 = arith.constant 0 : i32
    %c0_i32_2 = arith.constant 0 : i32
    return %arg0, %2, %c0_i32, %c0_i32_1 : i32, i32, i32, i32
  }
  func.func @transform_3(%arg0: i32, %arg1: i32) -> (i32, i32) {
    %c0_i32 = arith.constant 0 : i32
    %c0_i32_0 = arith.constant 0 : i32
    %c0_i32_1 = arith.constant 0 : i32
    return %c0_i32, %c0_i32_0 : i32, i32
  }
  func.func @transform_4(%arg0: i32, %arg1: i32) -> (i32, i32, i32, i32) {
    %c0_i32 = arith.constant 0 : i32
    %c0_i32_0 = arith.constant 0 : i32
    %c0_i32_1 = arith.constant 0 : i32
    return %arg0, %arg1, %c0_i32, %c0_i32_0 : i32, i32, i32, i32
  }
  func.func @transform_5(%arg0: i32, %arg1: i32) -> (i32, i32, i32, i32) {
    %c8_i32 = arith.constant 8 : i32
    %0 = arith.muli %arg1, %c8_i32 : i32
    %c1_i32 = arith.constant 1 : i32
    %1 = arith.subi %0, %c1_i32 : i32
    %c0_i32 = arith.constant 0 : i32
    %2 = arith.maxsi %1, %c0_i32 : i32
    %c0_i32_0 = arith.constant 0 : i32
    %c0_i32_1 = arith.constant 0 : i32
    %c0_i32_2 = arith.constant 0 : i32
    return %arg0, %2, %c0_i32_0, %c0_i32_1 : i32, i32, i32, i32
  }
  func.func @transform_6(%arg0: i32, %arg1: i32) -> (i32, i32, i32, i32) {
    %c8_i32 = arith.constant 8 : i32
    %0 = arith.muli %arg1, %c8_i32 : i32
    %c8_i32_0 = arith.constant 8 : i32
    %1 = arith.addi %0, %c8_i32_0 : i32
    %c15_i32 = arith.constant 15 : i32
    %2 = arith.minsi %1, %c15_i32 : i32
    %c0_i32 = arith.constant 0 : i32
    %c0_i32_1 = arith.constant 0 : i32
    %c0_i32_2 = arith.constant 0 : i32
    return %arg0, %2, %c0_i32, %c0_i32_1 : i32, i32, i32, i32
  }
  func.func @transform_7(%arg0: i32, %arg1: i32) -> (i32, i32) {
    %c0_i32 = arith.constant 0 : i32
    %c0_i32_0 = arith.constant 0 : i32
    %c0_i32_1 = arith.constant 0 : i32
    return %c0_i32, %c0_i32_0 : i32, i32
  }
  func.func @transform_8(%arg0: i32, %arg1: i32) -> (i32, i32) {
    %c0_i32 = arith.constant 0 : i32
    %c0_i32_0 = arith.constant 0 : i32
    %c0_i32_1 = arith.constant 0 : i32
    return %c0_i32, %c0_i32_0 : i32, i32
  }
  func.func @transform_9(%arg0: i32, %arg1: i32) -> (i32, i32, i32, i32) {
    %c0_i32 = arith.constant 0 : i32
    %c0_i32_0 = arith.constant 0 : i32
    %c0_i32_1 = arith.constant 0 : i32
    return %arg0, %arg1, %c0_i32, %c0_i32_0 : i32, i32, i32, i32
  }
  func.func @transform_10(%arg0: i32, %arg1: i32) -> (i32, i32, i32, i32) {
    %c0_i32 = arith.constant 0 : i32
    %c0_i32_0 = arith.constant 0 : i32
    %c0_i32_1 = arith.constant 0 : i32
    return %arg0, %arg1, %c0_i32, %c0_i32_0 : i32, i32, i32, i32
  }
}

module attributes {stable_mosaic.version = 11 : i64} {
  func.func @kernel(%arg0: i32, %arg1: i32, %arg2: memref<1x8x16x4xbf16, #tpu.memory_space<vmem>>, %arg3: memref<1x1x16x4xbf16, #tpu.memory_space<vmem>>, %arg4: memref<1x1x16x4xbf16, #tpu.memory_space<vmem>>, %arg5: memref<36x8xbf16, #tpu.memory_space<vmem>>, %arg6: memref<1x8x16x4xbf16, #tpu.memory_space<vmem>>, %arg7: memref<4x8xbf16, #tpu.memory_space<vmem>>, %arg8: memref<1x8xf32, #tpu.memory_space<vmem>>, %arg9: memref<1x8x16x8xf32, #tpu.memory_space<vmem>>) attributes {dimension_semantics = [#tpu.dimension_semantics<parallel>, #tpu.dimension_semantics<parallel>], iteration_bounds = array<i64: 2, 2>, scalar_prefetch = 0 : i64, scratch_operands = 0 : i64, tpu.core_type = #tpu.core_type<tc>, window_params = [{transform_indices = @transform_0, window_bounds = array<i64: 1, 8, 16, 4>}, {transform_indices = @transform_1, window_bounds = array<i64: 1, 1, 16, 4>}, {transform_indices = @transform_2, window_bounds = array<i64: 1, 1, 16, 4>}, {pipeline_mode = #tpu.pipeline_mode<synchronous>, transform_indices = @transform_3, window_bounds = array<i64: 36, 8>}, {transform_indices = @transform_4, window_bounds = array<i64: 1, 8, 16, 4>}, {pipeline_mode = #tpu.pipeline_mode<synchronous>, transform_indices = @transform_5, window_bounds = array<i64: 4, 8>}, {pipeline_mode = #tpu.pipeline_mode<synchronous>, transform_indices = @transform_6, window_bounds = array<i64: 1, 8>}, {transform_indices = @transform_7, window_bounds = array<i64: 1, 8, 16, 8>}]} {
    %c0_i32 = arith.constant 0 : i32
    %0 = arith.cmpi sgt, %arg1, %c0_i32 : i32
    %1 = arith.extui %0 : i1 to i32
    %2 = arith.sitofp %1 : i32 to f32
    %c1_i32 = arith.constant 1 : i32
    %3 = arith.cmpi slt, %arg1, %c1_i32 : i32
    %4 = arith.extui %3 : i1 to i32
    %5 = arith.sitofp %4 : i32 to f32
    %cst = arith.constant 0.000000e+00 : f32
    %6 = vector.broadcast %cst : f32 to vector<128x8xf32>
    %c0 = arith.constant 0 : index
    %c0_0 = arith.constant 0 : index
    %c0_1 = arith.constant 0 : index
    %c0_2 = arith.constant 0 : index
    %7 = vector.load %arg2[%c0, %c0_0, %c0_1, %c0_2] : memref<1x8x16x4xbf16, #tpu.memory_space<vmem>>, vector<1x8x16x4xbf16>
    %8 = vector.shape_cast %7 : vector<1x8x16x4xbf16> to vector<8x16x4xbf16>
    %c0_3 = arith.constant 0 : index
    %c0_4 = arith.constant 0 : index
    %c0_5 = arith.constant 0 : index
    %c0_6 = arith.constant 0 : index
    %9 = vector.load %arg3[%c0_3, %c0_4, %c0_5, %c0_6] : memref<1x1x16x4xbf16, #tpu.memory_space<vmem>>, vector<1x1x16x4xbf16>
    %10 = vector.shape_cast %9 : vector<1x1x16x4xbf16> to vector<1x16x4xbf16>
    %11 = arith.truncf %2 : f32 to bf16
    %12 = vector.broadcast %11 : bf16 to vector<1x16x4xbf16>
    %13 = arith.mulf %10, %12 : vector<1x16x4xbf16>
    %c0_7 = arith.constant 0 : index
    %c0_8 = arith.constant 0 : index
    %c0_9 = arith.constant 0 : index
    %c0_10 = arith.constant 0 : index
    %14 = vector.load %arg4[%c0_7, %c0_8, %c0_9, %c0_10] : memref<1x1x16x4xbf16, #tpu.memory_space<vmem>>, vector<1x1x16x4xbf16>
    %15 = vector.shape_cast %14 : vector<1x1x16x4xbf16> to vector<1x16x4xbf16>
    %16 = arith.truncf %5 : f32 to bf16
    %17 = vector.broadcast %16 : bf16 to vector<1x16x4xbf16>
    %18 = arith.mulf %15, %17 : vector<1x16x4xbf16>
    %19 = tpu.concatenate %13, %8, %18 in 0 : vector<1x16x4xbf16>, vector<8x16x4xbf16>, vector<1x16x4xbf16> -> vector<10x16x4xbf16>
    %cst_11 = arith.constant 0.000000e+00 : bf16
    %20 = vector.broadcast %cst_11 : bf16 to vector<10x1x4xbf16>
    %21 = tpu.concatenate %20, %19, %20 in 1 : vector<10x1x4xbf16>, vector<10x16x4xbf16>, vector<10x1x4xbf16> -> vector<10x18x4xbf16>
    %cst_12 = arith.constant 0.000000e+00 : bf16
    %22 = vector.broadcast %cst_12 : bf16 to vector<10x18x4xbf16>
    %23 = arith.cmpf oge, %21, %22 : vector<10x18x4xbf16>
    %cst_13 = arith.constant 2.001950e-01 : bf16
    %24 = vector.broadcast %cst_13 : bf16 to vector<10x18x4xbf16>
    %25 = arith.mulf %24, %21 : vector<10x18x4xbf16>
    %26 = arith.select %23, %21, %25 : vector<10x18x4xi1>, vector<10x18x4xbf16>
    %27 = vector.extract_strided_slice %26 {offsets = [0, 0, 0], sizes = [8, 16, 4], strides = [1, 1, 1]} : vector<10x18x4xbf16> to vector<8x16x4xbf16>
    %28 = vector.extract_strided_slice %26 {offsets = [0, 1, 0], sizes = [8, 16, 4], strides = [1, 1, 1]} : vector<10x18x4xbf16> to vector<8x16x4xbf16>
    %29 = vector.extract_strided_slice %26 {offsets = [0, 2, 0], sizes = [8, 16, 4], strides = [1, 1, 1]} : vector<10x18x4xbf16> to vector<8x16x4xbf16>
    %30 = vector.extract_strided_slice %26 {offsets = [1, 0, 0], sizes = [8, 16, 4], strides = [1, 1, 1]} : vector<10x18x4xbf16> to vector<8x16x4xbf16>
    %31 = vector.extract_strided_slice %26 {offsets = [1, 1, 0], sizes = [8, 16, 4], strides = [1, 1, 1]} : vector<10x18x4xbf16> to vector<8x16x4xbf16>
    %32 = vector.extract_strided_slice %26 {offsets = [1, 2, 0], sizes = [8, 16, 4], strides = [1, 1, 1]} : vector<10x18x4xbf16> to vector<8x16x4xbf16>
    %33 = vector.extract_strided_slice %26 {offsets = [2, 0, 0], sizes = [8, 16, 4], strides = [1, 1, 1]} : vector<10x18x4xbf16> to vector<8x16x4xbf16>
    %34 = vector.extract_strided_slice %26 {offsets = [2, 1, 0], sizes = [8, 16, 4], strides = [1, 1, 1]} : vector<10x18x4xbf16> to vector<8x16x4xbf16>
    %35 = vector.extract_strided_slice %26 {offsets = [2, 2, 0], sizes = [8, 16, 4], strides = [1, 1, 1]} : vector<10x18x4xbf16> to vector<8x16x4xbf16>
    %36 = tpu.concatenate %27, %28, %29, %30, %31, %32, %33, %34, %35 in 2 : vector<8x16x4xbf16>, vector<8x16x4xbf16>, vector<8x16x4xbf16>, vector<8x16x4xbf16>, vector<8x16x4xbf16>, vector<8x16x4xbf16>, vector<8x16x4xbf16>, vector<8x16x4xbf16>, vector<8x16x4xbf16> -> vector<8x16x36xbf16>
    %37 = vector.shape_cast %36 : vector<8x16x36xbf16> to vector<128x36xbf16>
    %c0_14 = arith.constant 0 : index
    %c0_15 = arith.constant 0 : index
    %38 = vector.load %arg5[%c0_14, %c0_15] : memref<36x8xbf16, #tpu.memory_space<vmem>>, vector<36x8xbf16>
    %cst_16 = arith.constant dense<0.000000e+00> : vector<128x8xf32>
    %39 = tpu.matmul %37, %38, %cst_16 {dimension_numbers = #tpu.dot_dimension_numbers<[1], [0], [0], [1], [0, 0, 1, 1], [], []>} : vector<128x36xbf16>, vector<36x8xbf16>, vector<128x8xf32> -> vector<128x8xf32>
    %40 = arith.addf %6, %39 : vector<128x8xf32>
    %c0_17 = arith.constant 0 : index
    %c0_18 = arith.constant 0 : index
    %c0_19 = arith.constant 0 : index
    %c0_20 = arith.constant 0 : index
    %41 = vector.load %arg6[%c0_17, %c0_18, %c0_19, %c0_20] : memref<1x8x16x4xbf16, #tpu.memory_space<vmem>>, vector<1x8x16x4xbf16>
    %42 = vector.shape_cast %41 : vector<1x8x16x4xbf16> to vector<8x16x4xbf16>
    %43 = vector.shape_cast %42 : vector<8x16x4xbf16> to vector<128x4xbf16>
    %c0_21 = arith.constant 0 : index
    %c0_22 = arith.constant 0 : index
    %44 = vector.load %arg7[%c0_21, %c0_22] : memref<4x8xbf16, #tpu.memory_space<vmem>>, vector<4x8xbf16>
    %cst_23 = arith.constant dense<0.000000e+00> : vector<128x8xf32>
    %45 = tpu.matmul %43, %44, %cst_23 {dimension_numbers = #tpu.dot_dimension_numbers<[1], [0], [0], [1], [0, 0, 1, 1], [], []>} : vector<128x4xbf16>, vector<4x8xbf16>, vector<128x8xf32> -> vector<128x8xf32>
    %46 = arith.addf %40, %45 : vector<128x8xf32>
    %c0_24 = arith.constant 0 : index
    %c0_25 = arith.constant 0 : index
    %47 = vector.load %arg8[%c0_24, %c0_25] : memref<1x8xf32, #tpu.memory_space<vmem>>, vector<1x8xf32>
    %48 = vector.broadcast %47 : vector<1x8xf32> to vector<128x8xf32>
    %49 = arith.addf %46, %48 : vector<128x8xf32>
    %50 = vector.shape_cast %49 : vector<128x8xf32> to vector<8x16x8xf32>
    %c0_26 = arith.constant 0 : index
    %c0_27 = arith.constant 0 : index
    %c0_28 = arith.constant 0 : index
    %c0_29 = arith.constant 0 : index
    %51 = vector.load %arg9[%c0_26, %c0_27, %c0_28, %c0_29] : memref<1x8x16x8xf32, #tpu.memory_space<vmem>>, vector<1x8x16x8xf32>
    %52 = vector.shape_cast %51 : vector<1x8x16x8xf32> to vector<8x16x8xf32>
    %53 = vector.shape_cast %50 : vector<8x16x8xf32> to vector<1x8x16x8xf32>
    tpu.vector_store %arg9[%c0_26, %c0_27, %c0_28, %c0_29], %53 {strides = array<i32>} : memref<1x8x16x8xf32, #tpu.memory_space<vmem>>, vector<1x8x16x8xf32>,
    return
  }
  func.func @transform_0(%arg0: i32, %arg1: i32) -> (i32, i32, i32, i32) {
    %c0_i32 = arith.constant 0 : i32
    %c0_i32_0 = arith.constant 0 : i32
    %c0_i32_1 = arith.constant 0 : i32
    return %arg0, %arg1, %c0_i32, %c0_i32_0 : i32, i32, i32, i32
  }
  func.func @transform_1(%arg0: i32, %arg1: i32) -> (i32, i32, i32, i32) {
    %c8_i32 = arith.constant 8 : i32
    %0 = arith.muli %arg1, %c8_i32 : i32
    %c1_i32 = arith.constant 1 : i32
    %1 = arith.subi %0, %c1_i32 : i32
    %c0_i32 = arith.constant 0 : i32
    %2 = arith.maxsi %1, %c0_i32 : i32
    %c0_i32_0 = arith.constant 0 : i32
    %c0_i32_1 = arith.constant 0 : i32
    %c0_i32_2 = arith.constant 0 : i32
    return %arg0, %2, %c0_i32_0, %c0_i32_1 : i32, i32, i32, i32
  }
  func.func @transform_2(%arg0: i32, %arg1: i32) -> (i32, i32, i32, i32) {
    %c8_i32 = arith.constant 8 : i32
    %0 = arith.muli %arg1, %c8_i32 : i32
    %c8_i32_0 = arith.constant 8 : i32
    %1 = arith.addi %0, %c8_i32_0 : i32
    %c15_i32 = arith.constant 15 : i32
    %2 = arith.minsi %1, %c15_i32 : i32
    %c0_i32 = arith.constant 0 : i32
    %c0_i32_1 = arith.constant 0 : i32
    %c0_i32_2 = arith.constant 0 : i32
    return %arg0, %2, %c0_i32, %c0_i32_1 : i32, i32, i32, i32
  }
  func.func @transform_3(%arg0: i32, %arg1: i32) -> (i32, i32) {
    %c0_i32 = arith.constant 0 : i32
    %c0_i32_0 = arith.constant 0 : i32
    %c0_i32_1 = arith.constant 0 : i32
    return %c0_i32, %c0_i32_0 : i32, i32
  }
  func.func @transform_4(%arg0: i32, %arg1: i32) -> (i32, i32, i32, i32) {
    %c0_i32 = arith.constant 0 : i32
    %c0_i32_0 = arith.constant 0 : i32
    %c0_i32_1 = arith.constant 0 : i32
    return %arg0, %arg1, %c0_i32, %c0_i32_0 : i32, i32, i32, i32
  }
  func.func @transform_5(%arg0: i32, %arg1: i32) -> (i32, i32) {
    %c0_i32 = arith.constant 0 : i32
    %c0_i32_0 = arith.constant 0 : i32
    %c0_i32_1 = arith.constant 0 : i32
    return %c0_i32, %c0_i32_0 : i32, i32
  }
  func.func @transform_6(%arg0: i32, %arg1: i32) -> (i32, i32) {
    %c0_i32 = arith.constant 0 : i32
    %c0_i32_0 = arith.constant 0 : i32
    %c0_i32_1 = arith.constant 0 : i32
    return %c0_i32, %c0_i32_0 : i32, i32
  }
  func.func @transform_7(%arg0: i32, %arg1: i32) -> (i32, i32, i32, i32) {
    %c0_i32 = arith.constant 0 : i32
    %c0_i32_0 = arith.constant 0 : i32
    %c0_i32_1 = arith.constant 0 : i32
    return %arg0, %arg1, %c0_i32, %c0_i32_0 : i32, i32, i32, i32
  }
}

</mosaic_0001>

<bundles_post_ra>
// kernel: spade_resnet_block.6
= control target key start
LH: loop header
LB: loop body
LE: loop exit
PB: predicated region body
PF: predicated region fallthrough
CT: control target
= control target key end

     0   :  { %vm12_vm0 = vcmask 31744   ;;  %v664_v0 = vmov 0.0   ;;  %vm494_vm1 = vcmask 1040384   ;;  %vm496_vm2 = vcmask 25600   ;;  %s1228_s0 = inlined_call_operand.vmem [shape: bf16[64,8,4], index: 0, kind: input, shape index: {}]   ;;  %s1229_s1 = inlined_call_operand.vmem [shape: f32[2,4], index: 1, kind: output, shape index: {}]  }
   0x1   :  { %13 = vst.msk [vmem:[#allocation2] sm:$0xff] %vm12_vm0, %v664_v0  ;;  %14 = vst.msk [vmem:[#allocation3] sm:$0xff] %vm12_vm0, %v664_v0  ;;  %v503_v1 = vld [vmem:[%s1228_s0] sm:$0xff]   ;;  %v630_v2 = vld [vmem:[%s1228_s0 + $0x8] sm:$0xff]  }
   0x2   :  { %v683_v3 = vunpack.c.l.bf16 %v503_v1  ;;  %v685_v4 = vunpack.c.h.bf16 %v503_v1  ;;  %v687_v5 = vunpack.c.l.bf16 %v630_v2  ;;  %v631_v6 = vld [vmem:[%s1228_s0 + $0x10] sm:$0xff]   ;;  %v692_v7 = vunpack.c.h.bf16 %v630_v2  ;;  %v632_v12 = vld [vmem:[%s1228_s0 + $0x18] sm:$0xff]   ;;  %v633_v19 = vld [vmem:[%s1228_s0 + $0x20] sm:$0xff]  }
   0x3   :  { %v694_v8 = vunpack.c.l.bf16 %v631_v6  ;;  %v705_v14 = vunpack.c.h.bf16 %v631_v6  ;;  %v709_v17 = vunpack.c.l.bf16 %v632_v12  ;;  %v716_v21 = vunpack.c.h.bf16 %v632_v12  ;;  %v634_v26 = vld [vmem:[%s1228_s0 + $0x28] sm:$0xff]   ;;  %v635_v33 = vld [vmem:[%s1228_s0 + $0x30] sm:$0xff]   ;;  %v636_v40 = vld [vmem:[%s1228_s0 + $0x38] sm:$0xff]  }
   0x4   :  { %v145_v9 = vsel %vm12_vm0, %v683_v3, 0.0  ;;  %v146_v10 = vsel %vm12_vm0, %v685_v4, 0.0  ;;  %v148_v11 = vsel %vm12_vm0, %v687_v5, 0.0  ;;  %v150_v15 = vsel %vm12_vm0, %v692_v7, 0.0  ;;  %v637_v47 = vld [vmem:[%s1228_s0 + $0x40] sm:$0xff]   ;;  %v638_v54 = vld [vmem:[%s1228_s0 + $0x48] sm:$0xff]  }
   0x5   :  { %v147_v13 = vadd.f32 %v146_v10, %v145_v9  ;;  %v152_v18 = vsel %vm12_vm0, %v694_v8, 0.0  ;;  %v154_v22 = vsel %vm12_vm0, %v705_v14, 0.0  ;;  %v720_v24 = vunpack.c.l.bf16 %v633_v19  ;;  %v639_v61 = vld [vmem:[%s1228_s0 + $0x50] sm:$0xff]   ;;  %v640_v6 = vld [vmem:[%s1228_s0 + $0x58] sm:$0xff]  }
   0x6   :  { %v156_v25 = vsel %vm12_vm0, %v709_v17, 0.0  ;;  %v727_v28 = vunpack.c.h.bf16 %v633_v19  ;;  %v158_v29 = vsel %vm12_vm0, %v716_v21, 0.0  ;;  %v731_v31 = vunpack.c.l.bf16 %v634_v26 }
   0x7   :  { %v149_v16 = vadd.f32 %v148_v11, %v147_v13  ;;  %v160_v32 = vsel %vm12_vm0, %v720_v24, 0.0  ;;  %v738_v35 = vunpack.c.h.bf16 %v634_v26  ;;  %v742_v38 = vunpack.c.l.bf16 %v635_v33 }
   0x8   :  { %v162_v36 = vsel %vm12_vm0, %v727_v28, 0.0  ;;  %v164_v39 = vsel %vm12_vm0, %v731_v31, 0.0  ;;  %v749_v42 = vunpack.c.h.bf16 %v635_v33  ;;  %v753_v45 = vunpack.c.l.bf16 %v636_v40 }
   0x9   :  { %v151_v20 = vadd.f32 %v150_v15, %v149_v16  ;;  %v166_v43 = vsel %vm12_vm0, %v738_v35, 0.0  ;;  %v168_v46 = vsel %vm12_vm0, %v742_v38, 0.0  ;;  %v760_v49 = vunpack.c.h.bf16 %v636_v40  ;;  %v642_v40 = vld [vmem:[%s1228_s0 + $0x68] sm:$0xff]  }
   0xa   :  { %v170_v50 = vsel %vm12_vm0, %v749_v42, 0.0  ;;  %v764_v52 = vunpack.c.l.bf16 %v637_v47  ;;  %v172_v53 = vsel %vm12_vm0, %v753_v45, 0.0  ;;  %v771_v56 = vunpack.c.h.bf16 %v637_v47 }
   0xb   :  { %v153_v23 = vadd.f32 %v152_v18, %v151_v20  ;;  %v174_v57 = vsel %vm12_vm0, %v760_v49, 0.0  ;;  %v775_v59 = vunpack.c.l.bf16 %v638_v54  ;;  %v782_v63 = vunpack.c.h.bf16 %v638_v54 }
   0xc   :  { %v176_v60 = vsel %vm12_vm0, %v764_v52, 0.0  ;;  %v178_v0 = vsel %vm12_vm0, %v771_v56, 0.0  ;;  %v786_v2 = vunpack.c.l.bf16 %v639_v61  ;;  %v275_v10 = vmul.f32 %v683_v3, %v683_v3 }
   0xd   :  { %v155_v27 = vadd.f32 %v154_v22, %v153_v23  ;;  %v180_v9 = vsel %vm12_vm0, %v775_v59, 0.0  ;;  %v276_v11 = vmul.f32 %v685_v4, %v685_v4  ;;  %v277_v13 = vmul.f32 %v687_v5, %v687_v5  ;;  %v641_v23 = vld [vmem:[%s1228_s0 + $0x60] sm:$0xff]  }
   0xe   :  { %v799_v15 = vunpack.c.h.bf16 %v639_v61  ;;  %v182_v16 = vsel %vm12_vm0, %v782_v63, 0.0  ;;  %v278_v18 = vmul.f32 %v692_v7, %v692_v7  ;;  %v805_v19 = vunpack.c.l.bf16 %v640_v6 }
   0xf   :  { %v157_v30 = vadd.f32 %v156_v25, %v155_v27  ;;  %v184_v3 = vsel %vm12_vm0, %v786_v2, 0.0  ;;  %v279_v4 = vmul.f32 %v694_v8, %v694_v8  ;;  %v339_v22 = vsel %vm12_vm0, %v275_v10, 0.0 }
  0x10   :  { %v340_v5 = vsel %vm12_vm0, %v276_v11, 0.0  ;;  %v342_v7 = vsel %vm12_vm0, %v277_v13, 0.0  ;;  %v817_v27 = vunpack.c.h.bf16 %v640_v6  ;;  %v280_v8 = vmul.f32 %v705_v14, %v705_v14  ;;  %v644_v11 = vld [vmem:[%s1228_s0 + $0x78] sm:$0xff]  }
  0x11   :  { %v159_v34 = vadd.f32 %v158_v29, %v157_v30  ;;  %v341_v26 = vadd.f32 %v340_v5, %v339_v22  ;;  %v186_v29 = vsel %vm12_vm0, %v799_v15, 0.0  ;;  %v344_v30 = vsel %vm12_vm0, %v278_v18, 0.0 }
  0x12   :  { %v348_v47 = vsel %vm12_vm0, %v280_v8, 0.0  ;;  %v284_v61 = vmul.f32 %v727_v28, %v727_v28  ;;  %v286_v18 = vmul.f32 %v738_v35, %v738_v35  ;;  %v287_v5 = vmul.f32 %v742_v38, %v742_v38 }
  0x13   :  { %v161_v37 = vadd.f32 %v160_v32, %v159_v34  ;;  %v343_v33 = vadd.f32 %v342_v7, %v341_v26  ;;  %v824_v34 = vunpack.c.l.bf16 %v641_v23  ;;  %v885_v7 = vunpack.c.h.bf16 %v644_v11 }
  0x14   :  { %v288_v8 = vmul.f32 %v749_v42, %v749_v42 }
  0x15   :  { %v163_v41 = vadd.f32 %v162_v36, %v161_v37  ;;  %v188_v36 = vsel %vm12_vm0, %v805_v19, 0.0  ;;  %v281_v37 = vmul.f32 %v709_v17, %v709_v17  ;;  %v345_v14 = vadd.f32 %v344_v30, %v343_v33 }
  0x16   :  { %v360_v30 = vsel %vm12_vm0, %v286_v18, 0.0  ;;  %v294_v18 = vmul.f32 %v782_v63, %v782_v63 }
  0x17   :  { %v165_v44 = vadd.f32 %v164_v39, %v163_v41  ;;  %v346_v39 = vsel %vm12_vm0, %v279_v4, 0.0  ;;  %v350_v54 = vsel %vm12_vm0, %v281_v37, 0.0  ;;  %v875_v4 = vunpack.c.l.bf16 %v644_v11  ;;  %v648_v11 = vld [vmem:[%s1228_s0 + $0x98] sm:$0xff]  }
  0x18   :  { %v347_v17 = vadd.f32 %v346_v39, %v345_v14  ;;  %v289_v37 = vmul.f32 %v753_v45, %v753_v45  ;;  %v362_v39 = vsel %vm12_vm0, %v287_v5, 0.0  ;;  %v295_v5 = vmul.f32 %v786_v2, %v786_v2 }
  0x19   :  { %v167_v48 = vadd.f32 %v166_v43, %v165_v44  ;;  %v834_v43 = vunpack.c.h.bf16 %v641_v23  ;;  %v190_v44 = vsel %vm12_vm0, %v817_v27, 0.0 }
  0x1b   :  { %v169_v51 = vadd.f32 %v168_v46, %v167_v48  ;;  %v282_v46 = vmul.f32 %v716_v21, %v716_v21  ;;  %v349_v21 = vadd.f32 %v348_v47, %v347_v17  ;;  %v364_v47 = vsel %vm12_vm0, %v288_v8, 0.0 }
  0x1c   :  { %v296_v8 = vmul.f32 %v799_v15, %v799_v15 }
  0x1d   :  { %v171_v55 = vadd.f32 %v170_v50, %v169_v51  ;;  %v841_v50 = vunpack.c.l.bf16 %v642_v40  ;;  %v192_v51 = vsel %vm12_vm0, %v824_v34, 0.0 }
  0x1f   :  { %v173_v58 = vadd.f32 %v172_v53, %v171_v55  ;;  %v283_v53 = vmul.f32 %v720_v24, %v720_v24  ;;  %v643_v55 = vld [vmem:[%s1228_s0 + $0x70] sm:$0xff]   ;;  %v351_v24 = vadd.f32 %v350_v54, %v349_v21  ;;  %v196_v6 = vsel %vm12_vm0, %v841_v50, 0.0 }
  0x20   :  { %v868_v13 = vunpack.c.h.bf16 %v643_v55  ;;  %v366_v54 = vsel %vm12_vm0, %v289_v37, 0.0  ;;  %v297_v37 = vmul.f32 %v805_v19, %v805_v19 }
  0x21   :  { %v175_v62 = vadd.f32 %v174_v57, %v173_v58  ;;  %v851_v58 = vunpack.c.h.bf16 %v642_v40  ;;  %v354_v10 = vsel %vm12_vm0, %v283_v53, 0.0  ;;  %v646_v40 = vld [vmem:[%s1228_s0 + $0x88] sm:$0xff]   ;;  %v291_v53 = vmul.f32 %v764_v52, %v764_v52 }
  0x22   :  { %v909_v17 = vunpack.c.l.bf16 %v646_v40  ;;  %v919_v21 = vunpack.c.h.bf16 %v646_v40  ;;  %v650_v40 = vld [vmem:[%s1228_s0 + $0xa8] sm:$0xff]  }
  0x23   :  { %v177_v1 = vadd.f32 %v176_v60, %v175_v62  ;;  %v194_v60 = vsel %vm12_vm0, %v834_v43, 0.0  ;;  %v352_v62 = vsel %vm12_vm0, %v282_v46, 0.0  ;;  %v290_v46 = vmul.f32 %v760_v49, %v760_v49 }
  0x24   :  { %v353_v28 = vadd.f32 %v352_v62, %v351_v24 }
  0x25   :  { %v179_v12 = vadd.f32 %v178_v0, %v177_v1  ;;  %v858_v1 = vunpack.c.l.bf16 %v643_v55  ;;  %v647_v55 = vld [vmem:[%s1228_s0 + $0x90] sm:$0xff]   ;;  %v368_v62 = vsel %vm12_vm0, %v290_v46, 0.0  ;;  %v298_v46 = vmul.f32 %v817_v27, %v817_v27 }
  0x26   :  { %v926_v24 = vunpack.c.l.bf16 %v647_v55 }
  0x27   :  { %v181_v20 = vadd.f32 %v180_v9, %v179_v12  ;;  %v285_v9 = vmul.f32 %v731_v31, %v731_v31  ;;  %v355_v31 = vadd.f32 %v354_v10, %v353_v28  ;;  %v200_v22 = vsel %vm12_vm0, %v858_v1, 0.0 }
  0x28   :  { %v370_v10 = vsel %vm12_vm0, %v291_v53, 0.0  ;;  %v936_v28 = vunpack.c.h.bf16 %v647_v55  ;;  %v299_v53 = vmul.f32 %v824_v34, %v824_v34  ;;  %v651_v55 = vld [vmem:[%s1228_s0 + $0xb0] sm:$0xff]  }
  0x29   :  { %v183_v25 = vadd.f32 %v182_v16, %v181_v20  ;;  %v198_v16 = vsel %vm12_vm0, %v851_v58, 0.0  ;;  %v356_v20 = vsel %vm12_vm0, %v284_v61, 0.0  ;;  %v358_v23 = vsel %vm12_vm0, %v285_v9, 0.0 }
  0x2a   :  { %v357_v35 = vadd.f32 %v356_v20, %v355_v31  ;;  %v292_v61 = vmul.f32 %v771_v56, %v771_v56  ;;  %v293_v9 = vmul.f32 %v775_v59, %v775_v59  ;;  %v943_v31 = vunpack.c.l.bf16 %v648_v11 }
  0x2b   :  { %v185_v32 = vadd.f32 %v184_v3, %v183_v25  ;;  %v645_v25 = vld [vmem:[%s1228_s0 + $0x80] sm:$0xff]  }
  0x2c   :  { %v359_v38 = vadd.f32 %v358_v23, %v357_v35  ;;  %v892_v33 = vunpack.c.l.bf16 %v645_v25  ;;  %v902_v14 = vunpack.c.h.bf16 %v645_v25  ;;  %v372_v20 = vsel %vm12_vm0, %v292_v61, 0.0  ;;  %v649_v25 = vld [vmem:[%s1228_s0 + $0xa0] sm:$0xff]  }
  0x2d   :  { %v187_v41 = vadd.f32 %v186_v29, %v185_v32  ;;  %v202_v29 = vsel %vm12_vm0, %v868_v13, 0.0  ;;  %v374_v23 = vsel %vm12_vm0, %v293_v9, 0.0  ;;  %v953_v35 = vunpack.c.h.bf16 %v648_v11  ;;  %v652_v11 = vld [vmem:[%s1228_s0 + $0xb8] sm:$0xff]  }
  0x2e   :  { %v361_v42 = vadd.f32 %v360_v30, %v359_v38  ;;  %v376_v30 = vsel %vm12_vm0, %v294_v18, 0.0  ;;  %v960_v38 = vunpack.c.l.bf16 %v649_v25  ;;  %v300_v61 = vmul.f32 %v834_v43, %v834_v43 }
  0x2f   :  { %v189_v48 = vadd.f32 %v188_v36, %v187_v41  ;;  %v204_v36 = vsel %vm12_vm0, %v875_v4, 0.0  ;;  %v301_v9 = vmul.f32 %v841_v50, %v841_v50  ;;  %v302_v18 = vmul.f32 %v851_v58, %v851_v58 }
  0x30   :  { %v363_v45 = vadd.f32 %v362_v39, %v361_v42  ;;  %v378_v39 = vsel %vm12_vm0, %v295_v5, 0.0  ;;  %v970_v42 = vunpack.c.h.bf16 %v649_v25  ;;  %v303_v5 = vmul.f32 %v858_v1, %v858_v1  ;;  %v653_v25 = vld [vmem:[%s1228_s0 + $0xc0] sm:$0xff]  }
  0x31   :  { %v191_v57 = vadd.f32 %v190_v44, %v189_v48  ;;  %v206_v44 = vsel %vm12_vm0, %v885_v7, 0.0 }
  0x32   :  { %v365_v49 = vadd.f32 %v364_v47, %v363_v45  ;;  %v380_v47 = vsel %vm12_vm0, %v296_v8, 0.0  ;;  %v977_v45 = vunpack.c.l.bf16 %v650_v40  ;;  %v304_v8 = vmul.f32 %v868_v13, %v868_v13 }
  0x33   :  { %v193_v0 = vadd.f32 %v192_v51, %v191_v57  ;;  %v208_v51 = vsel %vm12_vm0, %v892_v33, 0.0 }
  0x34   :  { %v367_v52 = vadd.f32 %v366_v54, %v365_v49  ;;  %v382_v54 = vsel %vm12_vm0, %v297_v37, 0.0  ;;  %v987_v49 = vunpack.c.h.bf16 %v650_v40  ;;  %v305_v37 = vmul.f32 %v875_v4, %v875_v4  ;;  %v654_v40 = vld [vmem:[%s1228_s0 + $0xc8] sm:$0xff]  }
  0x35   :  { %v195_v12 = vadd.f32 %v194_v60, %v193_v0  ;;  %v210_v60 = vsel %vm12_vm0, %v902_v14, 0.0 }
  0x36   :  { %v369_v56 = vadd.f32 %v368_v62, %v367_v52  ;;  %v384_v62 = vsel %vm12_vm0, %v298_v46, 0.0  ;;  %v994_v52 = vunpack.c.l.bf16 %v651_v55  ;;  %v306_v46 = vmul.f32 %v885_v7, %v885_v7 }
  0x37   :  { %v197_v3 = vadd.f32 %v196_v6, %v195_v12  ;;  %v212_v6 = vsel %vm12_vm0, %v909_v17, 0.0 }
  0x38   :  { %v371_v59 = vadd.f32 %v370_v10, %v369_v56  ;;  %v386_v10 = vsel %vm12_vm0, %v299_v53, 0.0  ;;  %v1004_v56 = vunpack.c.h.bf16 %v651_v55  ;;  %v307_v53 = vmul.f32 %v892_v33, %v892_v33  ;;  %v655_v55 = vld [vmem:[%s1228_s0 + $0xd0] sm:$0xff]  }
  0x39   :  { %v199_v26 = vadd.f32 %v198_v16, %v197_v3  ;;  %v214_v16 = vsel %vm12_vm0, %v919_v21, 0.0 }
  0x3a   :  { %v373_v63 = vadd.f32 %v372_v20, %v371_v59  ;;  %v388_v20 = vsel %vm12_vm0, %v300_v61, 0.0  ;;  %v1011_v59 = vunpack.c.l.bf16 %v652_v11  ;;  %v308_v61 = vmul.f32 %v902_v14, %v902_v14 }
  0x3b   :  { %v201_v32 = vadd.f32 %v200_v22, %v199_v26  ;;  %v216_v22 = vsel %vm12_vm0, %v926_v24, 0.0 }
  0x3c   :  { %v375_v2 = vadd.f32 %v374_v23, %v373_v63  ;;  %v390_v23 = vsel %vm12_vm0, %v301_v9, 0.0  ;;  %v1021_v63 = vunpack.c.h.bf16 %v652_v11  ;;  %v309_v9 = vmul.f32 %v909_v17, %v909_v17  ;;  %v656_v11 = vld [vmem:[%s1228_s0 + $0xd8] sm:$0xff]  }
  0x3d   :  { %v203_v41 = vadd.f32 %v202_v29, %v201_v32  ;;  %v218_v29 = vsel %vm12_vm0, %v936_v28, 0.0 }
  0x3e   :  { %v377_v15 = vadd.f32 %v376_v30, %v375_v2  ;;  %v392_v30 = vsel %vm12_vm0, %v302_v18, 0.0  ;;  %v1028_v2 = vunpack.c.l.bf16 %v653_v25  ;;  %v310_v18 = vmul.f32 %v919_v21, %v919_v21 }
  0x3f   :  { %v205_v48 = vadd.f32 %v204_v36, %v203_v41  ;;  %v220_v36 = vsel %vm12_vm0, %v943_v31, 0.0 }
  0x40   :  { %v379_v19 = vadd.f32 %v378_v39, %v377_v15  ;;  %v394_v39 = vsel %vm12_vm0, %v303_v5, 0.0  ;;  %v1038_v15 = vunpack.c.h.bf16 %v653_v25  ;;  %v311_v5 = vmul.f32 %v926_v24, %v926_v24  ;;  %v657_v25 = vld [vmem:[%s1228_s0 + $0xe0] sm:$0xff]  }
  0x41   :  { %v207_v57 = vadd.f32 %v206_v44, %v205_v48  ;;  %v222_v44 = vsel %vm12_vm0, %v953_v35, 0.0 }
  0x42   :  { %v381_v27 = vadd.f32 %v380_v47, %v379_v19  ;;  %v396_v47 = vsel %vm12_vm0, %v304_v8, 0.0  ;;  %v1045_v19 = vunpack.c.l.bf16 %v654_v40  ;;  %v312_v8 = vmul.f32 %v936_v28, %v936_v28 }
  0x43   :  { %v209_v0 = vadd.f32 %v208_v51, %v207_v57  ;;  %v224_v51 = vsel %vm12_vm0, %v960_v38, 0.0 }
  0x44   :  { %v383_v34 = vadd.f32 %v382_v54, %v381_v27  ;;  %v398_v54 = vsel %vm12_vm0, %v305_v37, 0.0  ;;  %v1055_v27 = vunpack.c.h.bf16 %v654_v40  ;;  %v313_v37 = vmul.f32 %v943_v31, %v943_v31  ;;  %v658_v40 = vld [vmem:[%s1228_s0 + $0xe8] sm:$0xff]  }
  0x45   :  { %v211_v12 = vadd.f32 %v210_v60, %v209_v0  ;;  %v226_v60 = vsel %vm12_vm0, %v970_v42, 0.0 }
  0x46   :  { %v385_v43 = vadd.f32 %v384_v62, %v383_v34  ;;  %v400_v62 = vsel %vm12_vm0, %v306_v46, 0.0  ;;  %v1062_v34 = vunpack.c.l.bf16 %v655_v55  ;;  %v314_v46 = vmul.f32 %v953_v35, %v953_v35 }
  0x47   :  { %v213_v3 = vadd.f32 %v212_v6, %v211_v12  ;;  %v228_v6 = vsel %vm12_vm0, %v977_v45, 0.0 }
  0x48   :  { %v387_v50 = vadd.f32 %v386_v10, %v385_v43  ;;  %v402_v10 = vsel %vm12_vm0, %v307_v53, 0.0  ;;  %v1072_v43 = vunpack.c.h.bf16 %v655_v55  ;;  %v315_v53 = vmul.f32 %v960_v38, %v960_v38  ;;  %v659_v55 = vld [vmem:[%s1228_s0 + $0xf0] sm:$0xff]  }
  0x49   :  { %v215_v26 = vadd.f32 %v214_v16, %v213_v3  ;;  %v230_v16 = vsel %vm12_vm0, %v987_v49, 0.0 }
  0x4a   :  { %v389_v58 = vadd.f32 %v388_v20, %v387_v50  ;;  %v404_v20 = vsel %vm12_vm0, %v308_v61, 0.0  ;;  %v1079_v50 = vunpack.c.l.bf16 %v656_v11  ;;  %v316_v61 = vmul.f32 %v970_v42, %v970_v42 }
  0x4b   :  { %v217_v32 = vadd.f32 %v216_v22, %v215_v26  ;;  %v232_v22 = vsel %vm12_vm0, %v994_v52, 0.0 }
  0x4c   :  { %v391_v1 = vadd.f32 %v390_v23, %v389_v58  ;;  %v406_v23 = vsel %vm12_vm0, %v309_v9, 0.0  ;;  %v1089_v58 = vunpack.c.h.bf16 %v656_v11  ;;  %v317_v9 = vmul.f32 %v977_v45, %v977_v45  ;;  %v660_v11 = vld [vmem:[%s1228_s0 + $0xf8] sm:$0xff]  }
  0x4d   :  { %v219_v41 = vadd.f32 %v218_v29, %v217_v32  ;;  %v234_v29 = vsel %vm12_vm0, %v1004_v56, 0.0 }
  0x4e   :  { %v393_v13 = vadd.f32 %v392_v30, %v391_v1  ;;  %v408_v30 = vsel %vm12_vm0, %v310_v18, 0.0  ;;  %v1096_v1 = vunpack.c.l.bf16 %v657_v25  ;;  %v318_v18 = vmul.f32 %v987_v49, %v987_v49 }
  0x4f   :  { %v221_v48 = vadd.f32 %v220_v36, %v219_v41  ;;  %v236_v36 = vsel %vm12_vm0, %v1011_v59, 0.0 }
  0x50   :  { %v395_v4 = vadd.f32 %v394_v39, %v393_v13  ;;  %v410_v39 = vsel %vm12_vm0, %v311_v5, 0.0  ;;  %v1106_v13 = vunpack.c.h.bf16 %v657_v25  ;;  %v319_v5 = vmul.f32 %v994_v52, %v994_v52 }
  0x51   :  { %v223_v57 = vadd.f32 %v222_v44, %v221_v48  ;;  %v238_v44 = vsel %vm12_vm0, %v1021_v63, 0.0  ;;  %v321_v52 = vmul.f32 %v1011_v59, %v1011_v59 }
  0x52   :  { %v397_v7 = vadd.f32 %v396_v47, %v395_v4  ;;  %v412_v47 = vsel %vm12_vm0, %v312_v8, 0.0  ;;  %v1113_v4 = vunpack.c.l.bf16 %v658_v40  ;;  %v424_v8 = vsel %vm12_vm0, %v318_v18, 0.0 }
  0x53   :  { %v225_v0 = vadd.f32 %v224_v51, %v223_v57  ;;  %v240_v51 = vsel %vm12_vm0, %v1028_v2, 0.0  ;;  %v430_v59 = vsel %vm12_vm0, %v321_v52, 0.0  ;;  %v332_v18 = vmul.f32 %v1106_v13, %v1106_v13 }
  0x54   :  { %v399_v33 = vadd.f32 %v398_v54, %v397_v7  ;;  %v414_v54 = vsel %vm12_vm0, %v313_v37, 0.0  ;;  %v1123_v7 = vunpack.c.h.bf16 %v658_v40 }
  0x55   :  { %v227_v12 = vadd.f32 %v226_v60, %v225_v0  ;;  %v242_v60 = vsel %vm12_vm0, %v1038_v15, 0.0 }
  0x56   :  { %v401_v14 = vadd.f32 %v400_v62, %v399_v33  ;;  %v416_v62 = vsel %vm12_vm0, %v314_v46, 0.0  ;;  %v1130_v33 = vunpack.c.l.bf16 %v659_v55  ;;  %v143_v46 = vld [vmem:[#allocation2] sm:$0xff] }
  0x57   :  { %v229_v3 = vadd.f32 %v228_v6, %v227_v12  ;;  %v244_v6 = vsel %vm12_vm0, %v1045_v19, 0.0 }
  0x58   :  { %v403_v17 = vadd.f32 %v402_v10, %v401_v14  ;;  %v418_v10 = vsel %vm12_vm0, %v315_v53, 0.0  ;;  %v1140_v14 = vunpack.c.h.bf16 %v659_v55 }
  0x59   :  { %v231_v26 = vadd.f32 %v230_v16, %v229_v3  ;;  %v246_v16 = vsel %vm12_vm0, %v1055_v27, 0.0 }
  0x5a   :  { %v405_v21 = vadd.f32 %v404_v20, %v403_v17  ;;  %v420_v20 = vsel %vm12_vm0, %v316_v61, 0.0  ;;  %v1147_v17 = vunpack.c.l.bf16 %v660_v11  ;;  %v266_v49 = vsel %vm12_vm0, %v1140_v14, 0.0 }
  0x5b   :  { %v233_v32 = vadd.f32 %v232_v22, %v231_v26  ;;  %v248_v22 = vsel %vm12_vm0, %v1062_v34, 0.0 }
  0x5c   :  { %v407_v24 = vadd.f32 %v406_v23, %v405_v21  ;;  %v422_v23 = vsel %vm12_vm0, %v317_v9, 0.0  ;;  %v1154_v21 = vunpack.c.h.bf16 %v660_v11  ;;  %v329_v9 = vmul.f32 %v1079_v50, %v1079_v50 }
  0x5d   :  { %v235_v41 = vadd.f32 %v234_v29, %v233_v32  ;;  %v250_v29 = vsel %vm12_vm0, %v1072_v43, 0.0  ;;  %v330_v11 = vmul.f32 %v1089_v58, %v1089_v58 }
  0x5e   :  { %v409_v28 = vadd.f32 %v408_v30, %v407_v24  ;;  %v268_v24 = vsel %vm12_vm0, %v1147_v17, 0.0  ;;  %v270_v40 = vsel %vm12_vm0, %v1154_v21, 0.0 }
  0x5f   :  { %v237_v48 = vadd.f32 %v236_v36, %v235_v41  ;;  %v252_v36 = vsel %vm12_vm0, %v1079_v50, 0.0  ;;  %v448_v50 = vsel %vm12_vm0, %v330_v11, 0.0 }
  0x60   :  { %v411_v31 = vadd.f32 %v410_v39, %v409_v28 }
  0x61   :  { %v239_v57 = vadd.f32 %v238_v44, %v237_v48  ;;  %v254_v44 = vsel %vm12_vm0, %v1089_v58, 0.0 }
  0x62   :  { %v413_v35 = vadd.f32 %v412_v47, %v411_v31  ;;  %v323_v47 = vmul.f32 %v1028_v2, %v1028_v2  ;;  %v326_v2 = vmul.f32 %v1055_v27, %v1055_v27 }
  0x63   :  { %v241_v0 = vadd.f32 %v240_v51, %v239_v57  ;;  %v256_v51 = vsel %vm12_vm0, %v1096_v1, 0.0 }
  0x64   :  { %v415_v38 = vadd.f32 %v414_v54, %v413_v35 }
  0x65   :  { %v243_v12 = vadd.f32 %v242_v60, %v241_v0  ;;  %v258_v60 = vsel %vm12_vm0, %v1106_v13, 0.0 }
  0x66   :  { %v417_v42 = vadd.f32 %v416_v62, %v415_v38  ;;  %v440_v38 = vsel %vm12_vm0, %v326_v2, 0.0 }
  0x67   :  { %v245_v3 = vadd.f32 %v244_v6, %v243_v12  ;;  %v260_v6 = vsel %vm12_vm0, %v1113_v4, 0.0 }
  0x68   :  { %v419_v45 = vadd.f32 %v418_v10, %v417_v42  ;;  %v331_v42 = vmul.f32 %v1096_v1, %v1096_v1  ;;  %v452_v1 = vsel %vm12_vm0, %v332_v18, 0.0 }
  0x69   :  { %v247_v26 = vadd.f32 %v246_v16, %v245_v3  ;;  %v262_v16 = vsel %vm12_vm0, %v1123_v7, 0.0 }
  0x6a   :  { %v450_v58 = vsel %vm12_vm0, %v331_v42, 0.0 }
  0x6b   :  { %v249_v32 = vadd.f32 %v248_v22, %v247_v26  ;;  %v264_v22 = vsel %vm12_vm0, %v1130_v33, 0.0  ;;  %v421_v26 = vadd.f32 %v420_v20, %v419_v45 }
  0x6d   :  { %v251_v41 = vadd.f32 %v250_v29, %v249_v32  ;;  %v320_v29 = vmul.f32 %v1004_v56, %v1004_v56  ;;  %v423_v32 = vadd.f32 %v422_v23, %v421_v26  ;;  %v322_v56 = vmul.f32 %v1021_v63, %v1021_v63 }
  0x6e   :  { %v325_v63 = vmul.f32 %v1045_v19, %v1045_v19  ;;  %v328_v19 = vmul.f32 %v1072_v43, %v1072_v43  ;;  %v446_v43 = vsel %vm12_vm0, %v329_v9, 0.0  ;;  %v335_v23 = vmul.f32 %v1130_v33, %v1130_v33 }
  0x6f   :  { %v253_v48 = vadd.f32 %v252_v36, %v251_v41  ;;  %v426_v36 = vsel %vm12_vm0, %v319_v5, 0.0  ;;  %v425_v39 = vadd.f32 %v424_v8, %v423_v32  ;;  %v428_v41 = vsel %vm12_vm0, %v320_v29, 0.0 }
  0x70   :  { %v432_v53 = vsel %vm12_vm0, %v322_v56, 0.0  ;;  %v438_v62 = vsel %vm12_vm0, %v325_v63, 0.0  ;;  %v336_v26 = vmul.f32 %v1140_v14, %v1140_v14  ;;  %v337_v8 = vmul.f32 %v1147_v17, %v1147_v17  ;;  %v274_v56 = vld [vmem:[#allocation3] sm:$0xff] }
  0x71   :  { %v255_v57 = vadd.f32 %v254_v44, %v253_v48  ;;  %v427_v44 = vadd.f32 %v426_v36, %v425_v39  ;;  %v338_v33 = vmul.f32 %v1154_v21, %v1154_v21 }
  0x72   :  { %v462_v14 = vsel %vm12_vm0, %v337_v8, 0.0 }
  0x73   :  { %v257_v0 = vadd.f32 %v256_v51, %v255_v57  ;;  %v429_v31 = vadd.f32 %v428_v41, %v427_v44  ;;  %v324_v51 = vmul.f32 %v1038_v15, %v1038_v15  ;;  %v434_v57 = vsel %vm12_vm0, %v323_v47, 0.0 }
  0x74   :  { %v327_v15 = vmul.f32 %v1062_v34, %v1062_v34  ;;  %v444_v34 = vsel %vm12_vm0, %v328_v19, 0.0  ;;  %v464_v39 = vsel %vm12_vm0, %v338_v33, 0.0 }
  0x75   :  { %v259_v12 = vadd.f32 %v258_v60, %v257_v0  ;;  %v431_v55 = vadd.f32 %v430_v59, %v429_v31  ;;  %v436_v60 = vsel %vm12_vm0, %v324_v51, 0.0 }
  0x76   :  { %v442_v27 = vsel %vm12_vm0, %v327_v15, 0.0 }
  0x77   :  { %v261_v3 = vadd.f32 %v260_v6, %v259_v12  ;;  %v433_v35 = vadd.f32 %v432_v53, %v431_v55 }
  0x79   :  { %v263_v25 = vadd.f32 %v262_v16, %v261_v3  ;;  %v435_v61 = vadd.f32 %v434_v57, %v433_v35  ;;  %v333_v3 = vmul.f32 %v1113_v4, %v1113_v4 }
  0x7b   :  { %v265_v30 = vadd.f32 %v264_v22, %v263_v25  ;;  %v437_v0 = vadd.f32 %v436_v60, %v435_v61  ;;  %v334_v22 = vmul.f32 %v1123_v7, %v1123_v7  ;;  %v454_v13 = vsel %vm12_vm0, %v333_v3, 0.0 }
  0x7c   :  { %v458_v7 = vsel %vm12_vm0, %v335_v23, 0.0 }
  0x7d   :  { %v267_v37 = vadd.f32 %v266_v49, %v265_v30  ;;  %v439_v6 = vadd.f32 %v438_v62, %v437_v0  ;;  %v456_v4 = vsel %vm12_vm0, %v334_v22, 0.0 }
  0x7f   :  { %v269_v28 = vadd.f32 %v268_v24, %v267_v37  ;;  %v441_v10 = vadd.f32 %v440_v38, %v439_v6  ;;  %v460_v24 = vsel %vm12_vm0, %v336_v26, 0.0 }
  0x81   :  { %v271_v48 = vadd.f32 %v270_v40, %v269_v28  ;;  %v443_v12 = vadd.f32 %v442_v27, %v441_v10 }
  0x83   :  { %v272_v54 = vadd.f32 %v271_v48, %v143_v46  ;;  %v445_v16 = vadd.f32 %v444_v34, %v443_v12 }
  0x85   :  { %273 = vst.msk [vmem:[#allocation2] sm:$0xff] %vm12_vm0, %v272_v54  ;;  %v447_v20 = vadd.f32 %v446_v43, %v445_v16 }
  0x87   :  { %v449_v45 = vadd.f32 %v448_v50, %v447_v20 }
  0x89   :  { %v451_v5 = vadd.f32 %v450_v58, %v449_v45 }
  0x8b   :  { %v453_v25 = vadd.f32 %v452_v1, %v451_v5 }
  0x8c   :  { %v471_v49 = vld [vmem:[#allocation2] sm:$0xff] }
  0x8d   :  { %v455_v29 = vadd.f32 %v454_v13, %v453_v25  ;;  %v472_v32 = vsel %vm12_vm0, %v471_v49, 0.0 }
  0x8e   :  { %v473_v36 = vrot.slane %v472_v32, 4 }
  0x8f   :  { %v457_v30 = vadd.f32 %v456_v4, %v455_v29 }
  0x90   :  { %v474_v17 = vadd.f32 %v473_v36, %v472_v32 }
  0x91   :  { %v459_v52 = vadd.f32 %v458_v7, %v457_v30 }
  0x92   :  { %v475_v44 = vrot.slane %v474_v17, 2 }
  0x93   :  { %v461_v37 = vadd.f32 %v460_v24, %v459_v52 }
  0x94   :  { %v476_v46 = vadd.f32 %v475_v44, %v474_v17 }
  0x95   :  { %v463_v40 = vadd.f32 %v462_v14, %v461_v37 }
  0x96   :  { %v477_v47 = vrot.slane %v476_v46, 1 }
  0x97   :  { %v465_v41 = vadd.f32 %v464_v39, %v463_v40 }
  0x98   :  { %v478_v31 = vadd.f32 %v477_v47, %v476_v46 }
  0x99   :  { %v466_v28 = vadd.f32 %v465_v41, %v274_v56 }
  0x9a   :  { %v479_v54 = vmul.f32 0.001953125, %v478_v31 }
  0x9b   :  { %467 = vst.msk [vmem:[#allocation3] sm:$0xff] %vm12_vm0, %v466_v28 }
  0x9c   :  { %v489_v35 = vmul.f32 %v479_v54, %v479_v54 }
  0xa2   :  { %v480_v21 = vld [vmem:[#allocation3] sm:$0xff] }
  0xa3   :  { %v481_v59 = vsel %vm12_vm0, %v480_v21, 0.0 }
  0xa4   :  { %v482_v48 = vrot.slane %v481_v59, 4 }
  0xa6   :  { %v483_v51 = vadd.f32 %v482_v48, %v481_v59 }
  0xa8   :  { %v484_v53 = vrot.slane %v483_v51, 2 }
  0xaa   :  { %v485_v55 = vadd.f32 %v484_v53, %v483_v51 }
  0xac   :  { %v486_v63 = vrot.slane %v485_v55, 1 }
  0xae   :  { %v487_v57 = vadd.f32 %v486_v63, %v485_v55 }
  0xb0   :  { %v488_v2 = vmul.f32 0.001953125, %v487_v57 }
  0xb2   :  { %v490_v60 = vsub.f32 %v488_v2, %v489_v35 }
  0xb4   :  { %v491_v61 = vmax.f32 %v490_v60, 0.0 }
  0xb6   :  { %v492_v15 = vadd.f32 1e-05, %v491_v61 }
  0xb8   :  { %662 = vrsqrt.f32 %v492_v15 }
  0xc2   :  { %v663_v62 = vpop.eup %662 }
  0xc3   :  { %v495_v0 = vsel %vm494_vm1, %v479_v54, %v663_v62 }
  0xc4   :  { %497 = vst.msk [vmem:[%s1229_s1] sm:$0x3] %vm496_vm2, %v495_v0 }

// kernel: spade_resnet_block.8
= control target key start
LH: loop header
LB: loop body
LE: loop exit
PB: predicated region body
PF: predicated region fallthrough
CT: control target
= control target key end

     0   :  { %s3227_s13 = smov 0   ;;  %s3229_s14 = smov 0   ;;  %s4343_s0 = inlined_call_operand.vmem [shape: bf16[2,16,16,4], index: 0, kind: input, shape index: {}, may-alias: {0,1,2}]   ;;  %s4344_s1 = inlined_call_operand.vmem [shape: bf16[2,16,16,4], index: 1, kind: input, shape index: {}, may-alias: {0,1,2}]   ;;  %s4345_s2 = inlined_call_operand.vmem [shape: bf16[2,16,16,4], index: 2, kind: input, shape index: {}, may-alias: {0,1,2}]   ;;  %s4346_s3 = inlined_call_operand.vmem [shape: bf16[36,4], index: 3, kind: input, shape index: {}]   ;;  %s4347_s4 = inlined_call_operand.vmem [shape: bf16[2,16,16,2], index: 4, kind: input, shape index: {}, may-alias: {4,5,6}]   ;;  %s4348_s5 = inlined_call_operand.vmem [shape: bf16[2,16,16,2], index: 5, kind: input, shape index: {}, may-alias: {4,5,6}]   ;;  %s4349_s6 = inlined_call_operand.vmem [shape: bf16[2,16,16,2], index: 6, kind: input, shape index: {}, may-alias: {4,5,6}]   ;;  %s4350_s7 = inlined_call_operand.vmem [shape: bf16[18,4], index: 7, kind: input, shape index: {}]   ;;  %s4351_s8 = inlined_call_operand.vmem [shape: f32[1,4], index: 8, kind: input, shape index: {}]   ;;  %s4352_s9 = inlined_call_operand.vmem [shape: bf16[2,16,16,4], index: 9, kind: output, shape index: {0}]   ;;  %s4353_s10 = inlined_call_operand.vmem [shape: f32[2,2,8,4], index: 10, kind: output, shape index: {1}]  }
   0x1   :  { %4382 = sst [smem:[#allocation4_spill]] %s4343_s0  ;;  %s3231_s15 = smov 0  }
   0x2   :  { %4383 = sst [smem:[#allocation5_spill]] %s4347_s4  ;;  %s3233_s16 = smov 0  }
   0x3   :  { %s3235_s17 = smov 0  }
   0x4 LB: > { %s30_s18 = sadd.s32 1, %s3150_s15  ;;  %s33_s19 = sadd.s32 1, %s3154_s16  ;;  %s3158_s17 = sphi %s3235_s17, %s21_s17   ;;  %s3154_s16 = sphi %s3233_s16, %s4442_s16   ;;  %s3150_s15 = sphi %s3231_s15, %s4441_s15   ;;  %s3146_s14 = sphi %s3229_s14, %s4440_s14   ;;  %s3142_s13 = sphi %s3227_s13, %s4439_s13  }
   0x5   : > { %p31_p0 = scmp.ge.s32.totalorder %s30_s18, 2  ;;  %p2837_p1 = scmp.ge.s32.totalorder %s3158_s17, 1 }
   0x6   : > { %p485_p2 = scmp.lt.s32.totalorder %s3158_s17, 5 }
   0x7   : > { %s4444_s18 = smov (%p31_p0, %s30_s18), 0  ;;  %s4446_s19 = smov (!%p31_p0, %s33_s19), %s3154_s16 }
   0x8   : > { %4384 = sst [smem:[#allocation2_spill]] %s4444_s18  ;;  %p486_p3 = pnand %p2837_p1, %p485_p2 }
   0x9   : > { %p35_p4 = scmp.ge.s32.totalorder %s4446_s19, 2  ;;  %s3260_s20 = sshll.u32 (!%p486_p3), %s3142_s13, 3  ;;  %vm913_vm0 = vsmask.f32 (!%p486_p3), 256  ;;  %vm4363_vm1 = vcmask (!%p486_p3), 1040384   ;;  %vm4367_vm3 = vcmask (!%p486_p3), 1046528  }
   0xa   : > { %489 = sbr.rel (%p486_p3) target bundleno = 646 (0x286), region = 56  ;;  %p604_p5 = scmp.lt.s32.totalorder (!%p486_p3), %s3146_s14, 1  ;;  %vm3290_vm2 = vmand (!%p486_p3), %vm4363_vm1, %vm913_vm0  ;;  %vm4364_vm11 = vsmask.f32 (!%p486_p3), 7424 }
   0xb   : > { %s4448_s19 = smov (%p35_p4, %s4446_s19), 0  ;;  %p606_p6 = scmp.lt.s32.totalorder (!%p486_p3), %s3260_s20, 15 }
   0xc   : > { %4385 = sst [smem:[#allocation3_spill]] %s4448_s19  ;;  %s4386_s0 = sld [smem:[#allocation4_spill]] (!%p486_p3) }
   0xd   : > { %s4387_s4 = sld [smem:[#allocation5_spill]] (!%p486_p3)  ;;  %s2843_s12 = sadd.s32 (!%p486_p3), 4294967295, %s3260_s20 }
   0xe   : > { %p616_p7 = scmp.gt.s32.totalorder (!%p486_p3), %s2843_s12, 0  ;;  %p2844_p8 = scmp.lt.s32.totalorder (!%p486_p3), %s2843_s12, 15 }
   0xf   : > { %p714_p9 = scmp.gt.s32.totalorder (!%p486_p3), %s3142_s13, 0  ;;  %s4356_s26 = smov (!%p486_p3), 12  }
  0x10   : > { %s4365_s18 = smov (!%p486_p3), 8   ;;  %p706_p11 = scmp.lt.s32.totalorder (!%p486_p3), %s3142_s13, 1 }
  0x11   : > { %s4450_s14 = smov (!%p604_p5, %s3146_s14), 1 }
  0x12   : > { %s607_s21 = scalar_select %p606_p6, %s3260_s20, 15 }
  0x13   : > { %s3267_s22 = sshll.u32 %s4450_s14, 5  ;;  %s4462_s13 = smov (!%p706_p11, %s3142_s13), 1 }
  0x14   : > { %s2839_s23 = sshll.u32 %s607_s21, 1 }
  0x15   : > { %s610_s24 = sadd.s32 %s3267_s22, %s2839_s23 }
  0x16   : > { %s3270_s25 = sshll.u32 %s610_s24, 2 }
  0x17   : > { %s3276_s28 = scalar_lea.vmem %s4386_s0, %s3270_s25  ;;  %s3283_s11 = scalar_lea.vmem %s4387_s4, %s3270_s25 }
  0x18   : > { %v3099_v0 = vld [vmem:[%s3276_s28 + $0x8] sm:$0xff]   ;;  %v3100_v1 = vld [vmem:[%s3276_s28] sm:$0xff]   ;;  %s617_s21 = scalar_select %p616_p7, %s2843_s12, 0 }
  0x19   : > { %v837_v2 = vshrl.u32 %v3099_v0, 16  ;;  %v840_v3 = vshll.u32 %v3099_v0, 16  ;;  %v830_v4 = vshrl.u32 %v3100_v1, 16  ;;  %v833_v5 = vshll.u32 %v3100_v1, 16  ;;  %v3101_v6 = vld [vmem:[%s3283_s11 + $0x8] sm:$0xff]   ;;  %v3102_v7 = vld [vmem:[%s3283_s11] sm:$0xff]  }
  0x1a   : > { %v1525_v11 = vshrl.u32 %v3101_v6, 16  ;;  %v1528_v12 = vshll.u32 %v3101_v6, 16  ;;  %v1518_v13 = vshrl.u32 %v3102_v7, 16  ;;  %v1521_v15 = vshll.u32 %v3102_v7, 16  ;;  %s4452_s21 = smov (!%p2844_p8, %s617_s21), 15 }
  0x1b   : > { %v839_v8 = vrot.slane %v837_v2, 7  ;;  %v832_v10 = vrot.slane %v830_v4, 7  ;;  %s734_s23 = scalar_select %p714_p9, 1, 0 }
  0x1c   : > { %v3295_v17 = vrot.slane %v1525_v11, 7  ;;  %v1520_v18 = vrot.slane %v1518_v13, 7  ;;  %s2849_s24 = sshll.u32 %s4452_s21, 1  ;;  %s4354_s21 = smov 6  }
  0x1d   : > { %v842_v14 = vor.u32 %v840_v3, %v839_v8  ;;  %v835_v16 = vor.u32 %v833_v5, %v832_v10  ;;  %v926_v19 = vsel %vm3290_vm2, %v832_v10, 0  ;;  %v927_v22 = vsel %vm3290_vm2, %v839_v8, 0  ;;  %s3325_s27 = sadd.s32 %s2849_s24, %s3267_s22  ;;  %s3327_s29 = scvt.s32.f32 %s734_s23  ;;  %v3103_v5 = vld [vmem:[%s3276_s28 + $0x10] sm:$0xff]  }
  0x1e   : > { %vm938_vm4 = vcmp.ge.bf16.partialorder %v926_v19, 0  ;;  %v958_v21 = vmul.bf16 1045249613, %v926_v19  ;;  %v1530_v25 = vor.u32 %v1528_v12, %v3295_v17  ;;  %v1523_v27 = vor.u32 %v1521_v15, %v1520_v18  ;;  %s2851_s30 = sshll.u32 %s3325_s27, 2  ;;  %s4376_s27 = smov 14  }
  0x1f   : > { %v917_v20 = vsel %vm3290_vm2, 0, %v842_v14  ;;  %v916_v24 = vsel %vm3290_vm2, 0, %v835_v16  ;;  %v1611_v32 = vsel %vm3290_vm2, %v1520_v18, 0  ;;  %vm940_vm10 = vcmp.ge.bf16.partialorder %v927_v22, 0  ;;  %s738_s12 = sshrl.u32 %s3327_s29, 16  ;;  %p737_p10 = scmp.ne.f32.partialorder %s3327_s29, %s3327_s29 }
  0x20   : > { %vm939_vm5 = vcmp.ge.bf16.partialorder %v917_v20, 0  ;;  %v959_v23 = vmul.bf16 1045249613, %v917_v20  ;;  %vm937_vm6 = vcmp.ge.bf16.partialorder %v916_v24, 0  ;;  %v957_v26 = vmul.bf16 1045249613, %v916_v24  ;;  %s3363_s19 = scalar_lea.vmem %s4348_s5, %s2851_s30 }
  0x21   : > { %v3307_v28 = vsel %vm938_vm4, %v926_v19, %v958_v21  ;;  %v1602_v30 = vsel %vm3290_vm2, 0, %v1530_v25  ;;  %v1601_v35 = vsel %vm3290_vm2, 0, %v1523_v27  ;;  %vm1623_vm9 = vcmp.ge.bf16.partialorder %v1611_v32, 0  ;;  %s739_s23 = sand.u32 1, %s738_s12  ;;  %v1452_v7 = vld [vmem:[%s3363_s19] sm:$0xf] }
  0x22   : > { %v3311_v29 = vsel %vm939_vm5, %v917_v20, %v959_v23  ;;  %v1129_v31 = vrot.slane %v3307_v28, 1  ;;  %v3320_v33 = vsel %vm937_vm6, %v916_v24, %v957_v26  ;;  %vm1624_vm7 = vcmp.ge.bf16.partialorder %v1602_v30, 0  ;;  %s740_s24 = sadd.s32 32767, %s739_s23  ;;  %v1453_v12 = vld [vmem:[%s3363_s19 + $0x4] sm:$0xf]  ;;  %v3104_v23 = vld [vmem:[%s3283_s11 + $0x10] sm:$0xff]  }
  0x23   : > { %1168 = vrot.lane.b32.xlu0 %v3311_v29, %s4356_s26  ;;  %v1644_v34 = vmul.bf16 1045249613, %v1602_v30  ;;  %1166 = vrot.lane.b32.xlu1 %v3320_v33, %s4356_s26  ;;  %vm1622_vm8 = vcmp.ge.bf16.partialorder %v1601_v35, 0  ;;  %v1642_v36 = vmul.bf16 1045249613, %v1601_v35  ;;  %v1128_v37 = vrot.slane %v3320_v33, 1  ;;  %s741_s26 = sadd.s32 %s740_s24, %s3327_s29 }
  0x24   : > { %v1643_v39 = vmul.bf16 1045249613, %v1611_v32  ;;  %v1011_v40 = vshll.u32 %v3320_v33, 16  ;;  %v1009_v42 = vshrl.u32 %v3320_v33, 16  ;;  %v960_v43 = vmul.bf16 1045249613, %v927_v22 }
  0x25   : > { %v3332_v38 = vsel %vm1624_vm7, %v1602_v30, %v1644_v34  ;;  %v3335_v41 = vsel %vm1622_vm8, %v1601_v35, %v1642_v36  ;;  %v1130_v44 = vsel %vm4367_vm3, %v1128_v37, %v1129_v31  ;;  %v1016_v51 = vshll.u32 %v3307_v28, 16  ;;  %s742_s0 = sand.u32 4294901760, %s741_s26  ;;  %s4368_s26 = smov 20  }
  0x26   : > { %v1663_v45 = vsel %vm1623_vm9, %v1611_v32, %v1643_v39  ;;  %v1693_v46 = vshrl.u32 %v3335_v41, 16  ;;  %v1695_v47 = vshll.u32 %v3335_v41, 16  ;;  %v1811_v48 = vrot.slane %v3335_v41, 1  ;;  %s4454_s0 = smov (%p737_p10, %s742_s0), 2143289344  ;;  %s4358_s24 = smov 10  }
  0x27   : > { %1851 = vrot.lane.b32.xlu0 %v3332_v38, %s4354_s21  ;;  %1849 = vrot.lane.b32.xlu1 %v3335_v41, %s4354_s21  ;;  %v1812_v49 = vrot.slane %v1663_v45, 1  ;;  %v1700_v50 = vshll.u32 %v1663_v45, 16  ;;  %v1013_v53 = vrot.slane %v1011_v40, 1  ;;  %v3352_v54 = vsel %vm940_vm10, %v927_v22, %v960_v43  ;;  %s626_s21 = scalar_lea.vmem %s4344_s1, %s2851_s30  ;;  %s745_s4 = sshrl.u32 %s4454_s0, 16 }
  0x28   : > { %v1697_v52 = vrot.slane %v1695_v47, 1  ;;  %v1023_v55 = vshll.u32 %v3311_v29, 16  ;;  %v1021_v56 = vshrl.u32 %v3311_v29, 16  ;;  %v1028_v59 = vshll.u32 %v3352_v54, 16  ;;  %v732_v0 = vld [vmem:[%s626_s21] sm:$0xf] }
  0x29   : > { %v1702_v58 = vrot.slane %v1700_v50, 1  ;;  %v1612_v60 = vsel %vm3290_vm2, %v3295_v17, 0  ;;  %v1813_v61 = vsel %vm4367_vm3, %v1811_v48, %v1812_v49  ;;  %v733_v1 = vld [vmem:[%s626_s21 + $0x4] sm:$0xf]  ;;  %v1014_v2 = vor.u32 %v1013_v53, %v1009_v42  ;;  %s746_s29 = sshll.u32 %s745_s4, 16  ;;  %s4370_s30 = smov 4  }
  0x2a   : > { %v1698_v57 = vor.u32 %v1697_v52, %v1693_v46  ;;  %v1025_v62 = vrot.slane %v1023_v55, 1  ;;  %vm1625_vm12 = vcmp.ge.bf16.partialorder %v1612_v60, 0  ;;  %v1645_v63 = vmul.bf16 1045249613, %v1612_v60  ;;  %s747_s21 = sor.u32 %s746_s29, %s745_s4  ;;  %s4360_s0 = smov 2  }
  0x2b   : > { %1151 = vrot.lane.b32.xlu0 %v1130_v44, %s4365_s18  ;;  %1214 = vrot.lane.b32.xlu1 %v1130_v44, %s4368_s26  ;;  %v1018_v3 = vrot.slane %v1016_v51, 1  ;;  %v1707_v4 = vshll.u32 %v3332_v38, 16  ;;  %v1030_v10 = vrot.slane %v1028_v59, 1  ;;  %v1705_v11 = vshrl.u32 %v3332_v38, 16  ;;  %s4372_s19 = smov 16   ;;  %s3168_s23 = smov 24  }
  0x2c   : > { %v3377_v6 = vsel %vm1625_vm12, %v1612_v60, %v1645_v63  ;;  %v1703_v8 = vsel %vm4364_vm11, %v1698_v57, %v1702_v58  ;;  %v1026_v13 = vor.u32 %v1025_v62, %v1021_v56  ;;  %v748_v16 = vstv %s747_s21  ;;  %s4390_s21 = smov 12   ;;  %s3169_s4 = smov 28  }
  0x2d   : > { %v1709_v14 = vrot.slane %v1707_v4, 1  ;;  %v1712_v15 = vshll.u32 %v3377_v6, 16  ;;  %v1019_v17 = vsel %vm4364_vm11, %v1014_v2, %v1018_v3  ;;  %v750_v18 = vmul.bf16 %v748_v16, %v732_v0  ;;  %s4391_s12 = smov 6   ;;  %s4392_s29 = smov 10  }
  0x2e   : > { %v751_v19 = vmul.bf16 %v748_v16, %v733_v1  ;;  %v844_v20 = vshrl.u32 %v3103_v5, 16  ;;  %v1454_v21 = vmul.bf16 %v1452_v7, %v748_v16  ;;  %v1455_v22 = vmul.bf16 %v1453_v12, %v748_v16 }
  0x2f   : > { %1834 = vrot.lane.b32.xlu0 %v1813_v61, %s4370_s30  ;;  %1897 = vrot.lane.b32.xlu1 %v1813_v61, %s4358_s24  ;;  %v1131_v24 = vrot.slane %v3311_v29, 1  ;;  %v1132_v25 = vrot.slane %v3352_v54, 1  ;;  %v3393_v27 = vsel %vm4364_vm11, %v1026_v13, %v1030_v10  ;;  %v1710_v28 = vor.u32 %v1709_v14, %v1705_v11 }
  0x30   : > { %v2886_v26 = vcombine.low %v750_v18, %v751_v19  ;;  %v1714_v30 = vrot.slane %v1712_v15, 1  ;;  %v2896_v31 = vcombine.low %v1454_v21, %v1455_v22  ;;  %v846_v35 = vrot.slane %v844_v20, 7 }
  0x31   : > { %v847_v36 = vshll.u32 %v3103_v5, 16  ;;  %v1532_v42 = vshrl.u32 %v3104_v23, 16  ;;  %v3402_v44 = vsel %vm4367_vm3, %v1131_v24, %v1132_v25  ;;  %v1535_v49 = vshll.u32 %v3104_v23, 16 }
  0x32   : > { %v823_v32 = vshrl.u32 %v2886_v26, 16  ;;  %v826_v34 = vshll.u32 %v2886_v26, 16  ;;  %v1511_v37 = vshrl.u32 %v2896_v31, 16  ;;  %v1514_v39 = vshll.u32 %v2896_v31, 16 }
  0x33   : > { %1778 = vrot.lane.b32.xlu0 %v1703_v8, %s4360_s0  ;;  %1094 = vrot.lane.b32.xlu1 %v1019_v17, %s4370_s30  ;;  %v3399_v43 = vsel %vm4364_vm11, %v1710_v28, %v1714_v30  ;;  %v849_v48 = vor.u32 %v847_v36, %v846_v35  ;;  %v1534_v55 = vrot.slane %v1532_v42, 7  ;;  %v928_v23 = vsel %vm3290_vm2, %v846_v35, 0  ;;  %v3112_v42 = vld [vmem:[%s4346_s3 + $0x8] sm:$0xff]  }
  0x34   : > { %v825_v40 = vrot.slane %v823_v32, 7  ;;  %v1513_v45 = vrot.slane %v1511_v37, 7  ;;  %v1814_v25 = vrot.slane %v3332_v38, 1  ;;  %v1815_v26 = vrot.slane %v3377_v6, 1 }
  0x35   : > { %v918_v3 = vsel %vm3290_vm2, 0, %v849_v48  ;;  %v962_v32 = vmul.bf16 1045249613, %v928_v23  ;;  %vm942_vm6 = vcmp.ge.bf16.partialorder %v928_v23, 0  ;;  %v1613_v35 = vsel %vm3290_vm2, %v1534_v55, 0 }
  0x36   : > { %v828_v46 = vor.u32 %v826_v34, %v825_v40  ;;  %v925_v47 = vsel %vm3290_vm2, %v825_v40, 0  ;;  %v1516_v51 = vor.u32 %v1514_v39, %v1513_v45  ;;  %v1610_v52 = vsel %vm3290_vm2, %v1513_v45, 0  ;;  %v3111_v34 = vld [vmem:[%s4346_s3] sm:$0xff]  }
  0x37   : > { %1196 = vrot.lane.b32.xlu0 %v3393_v27, %s4372_s19  ;;  %1194 = vrot.lane.b32.xlu1 %v1019_v17, %s4372_s19  ;;  %vm936_vm13 = vcmp.ge.bf16.partialorder %v925_v47, 0  ;;  %v956_v50 = vmul.bf16 1045249613, %v925_v47  ;;  %vm1621_vm14 = vcmp.ge.bf16.partialorder %v1610_v52, 0  ;;  %v1641_v54 = vmul.bf16 1045249613, %v1610_v52 }
  0x38   : > { %v915_v53 = vsel %vm3290_vm2, 0, %v828_v46  ;;  %v1600_v58 = vsel %vm3290_vm2, 0, %v1516_v51  ;;  %v961_v18 = vmul.bf16 1045249613, %v918_v3  ;;  %vm941_vm4 = vcmp.ge.bf16.partialorder %v918_v3, 0  ;;  %3007 = vmatprep.subr.bf16.mxu0 %v3111_v34 }
  0x39   : > { %vm935_vm15 = vcmp.ge.bf16.partialorder %v915_v53, 0  ;;  %v955_v56 = vmul.bf16 1045249613, %v915_v53  ;;  %v976_v57 = vsel %vm936_vm13, %v925_v47, %v956_v50  ;;  %vm1620_vm0 = vcmp.ge.bf16.partialorder %v1600_v58, 0  ;;  %3008 = vmatpush3.bf16.msra.mxu0 %v3111_v34  ;;  %v3113_v50 = vld [vmem:[%s4350_s7] sm:$0xff]  }
  0x3a   : > { %v1126_v59 = vrot.slane %v976_v57, 1  ;;  %v1004_v60 = vshll.u32 %v976_v57, 16  ;;  %v1640_v61 = vmul.bf16 1045249613, %v1600_v58  ;;  %v1661_v63 = vsel %vm1621_vm14, %v1610_v52, %v1641_v54  ;;  %3009 = vmatprep.subr.bf16.mxu0 %v3112_v42  ;;  %2987 = vmatprep.subr.bf16.mxu1 %v3113_v50 }
  0x3b   : > { %1879 = vrot.lane.b32.xlu0 %v3399_v43, %s4365_s18  ;;  %1877 = vrot.lane.b32.xlu1 %v1703_v8, %s4365_s18  ;;  %v3415_v62 = vsel %vm935_vm15, %v915_v53, %v955_v56  ;;  %v1809_v5 = vrot.slane %v1661_v63, 1  ;;  %v1688_v7 = vshll.u32 %v1661_v63, 16  ;;  %v1537_v8 = vor.u32 %v1535_v49, %v1534_v55  ;;  %v3116_v56 = vld [vmem:[%s4350_s7 + $0x8] ss:$0 sps:$4 sm:$0x11]  }
  0x3c   : > { %v1125_v0 = vrot.slane %v3415_v62, 1  ;;  %v997_v1 = vshrl.u32 %v3415_v62, 16  ;;  %v999_v2 = vshll.u32 %v3415_v62, 16  ;;  %v3424_v4 = vsel %vm1620_vm0, %v1600_v58, %v1640_v61  ;;  %2988 = vmatpush3.bf16.msra.mxu1 %v3113_v50 }
  0x3d   : > { %v1006_v12 = vrot.slane %v1004_v60, 1  ;;  %v1808_v13 = vrot.slane %v3424_v4, 1  ;;  %v1681_v14 = vshrl.u32 %v3424_v4, 16  ;;  %v1683_v15 = vshll.u32 %v3424_v4, 16  ;;  %3010 = vmatpush3.bf16.msra.mxu0 %v3112_v42  ;;  %3045 = vmatprep.subr.msk.bf16.mxu1 %vm4363_vm1, %v3116_v56  ;;  %v3105_v60 = vld [vmem:[%s3276_s28 + $0x18] sm:$0xff]  }
  0x3e   : > { %v1127_v10 = vsel %vm4367_vm3, %v1125_v0, %v1126_v59  ;;  %v1001_v11 = vrot.slane %v999_v2, 1  ;;  %v1690_v20 = vrot.slane %v1688_v7, 1  ;;  %v1603_v22 = vsel %vm3290_vm2, 0, %v1537_v8  ;;  %v3106_v2 = vld [vmem:[%s3283_s11 + $0x18] sm:$0xff]  }
  0x3f   : > { %1216 = vrot.lane.b32.xlu0 %v3402_v44, %s4368_s26  ;;  %1149 = vrot.lane.b32.xlu1 %v1127_v10, %s4365_s18  ;;  %v1810_v17 = vsel %vm4367_vm3, %v1808_v13, %v1809_v5  ;;  %v1685_v19 = vrot.slane %v1683_v15, 1  ;;  %v3441_v28 = vsel %vm941_vm4, %v918_v3, %v961_v18  ;;  %v1646_v31 = vmul.bf16 1045249613, %v1603_v22  ;;  %v3114_v13 = vld [vmem:[%s4346_s3 + $0x10] ss:$0 sps:$4 sm:$0x33]  }
  0x40   : > { %v1002_v16 = vor.u32 %v1001_v11, %v997_v1  ;;  %vm1626_vm5 = vcmp.ge.bf16.partialorder %v1603_v22, 0  ;;  %v1035_v6 = vshll.u32 %v3441_v28, 16  ;;  %v3454_v36 = vsel %vm4367_vm3, %v1814_v25, %v1815_v26 }
  0x41   : > { %v1686_v24 = vor.u32 %v1685_v19, %v1681_v14  ;;  %v3456_v37 = vsel %vm1626_vm5, %v1603_v22, %v1646_v31  ;;  %v982_v39 = vsel %vm942_vm6, %v928_v23, %v962_v32  ;;  %v1647_v40 = vmul.bf16 1045249613, %v1613_v35 }
  0x42   : > { %v1007_v21 = vsel %vm4364_vm11, %v1002_v16, %v1006_v12  ;;  %vm1627_vm7 = vcmp.ge.bf16.partialorder %v1613_v35, 0  ;;  %v1033_v45 = vshrl.u32 %v3441_v28, 16  ;;  %v1037_v46 = vrot.slane %v1035_v6, 1 }
  0x43   : > { %1092 = vrot.lane.b32.xlu0 %v1007_v21, %s4370_s30  ;;  %1832 = vrot.lane.b32.xlu1 %v1810_v17, %s4370_s30  ;;  %v1691_v30 = vsel %vm4364_vm11, %v1686_v24, %v1690_v20  ;;  %v1040_v47 = vshll.u32 %v982_v39, 16  ;;  %v1719_v48 = vshll.u32 %v3456_v37, 16  ;;  %v1667_v49 = vsel %vm1627_vm7, %v1613_v35, %v1647_v40  ;;  %v3107_v24 = vld [vmem:[%s3276_s28 + $0x20] sm:$0xff]  }
  0x44   : > { %v1038_v51 = vor.u32 %v1037_v46, %v1033_v45  ;;  %v1717_v53 = vshrl.u32 %v3456_v37, 16  ;;  %v1724_v55 = vshll.u32 %v1667_v49, 16  ;;  %v1134_v63 = vrot.slane %v3441_v28, 1  ;;  %v3108_v35 = vld [vmem:[%s3283_s11 + $0x20] sm:$0xff]  }
  0x45   : > { %v1042_v52 = vrot.slane %v1040_v47, 1  ;;  %v1721_v54 = vrot.slane %v1719_v48, 1  ;;  %v1135_v0 = vrot.slane %v982_v39, 1  ;;  %v851_v1 = vshrl.u32 %v3105_v60, 16 }
  0x46   : > { %v1726_v59 = vrot.slane %v1724_v55, 1  ;;  %v1817_v5 = vrot.slane %v3456_v37, 1  ;;  %v1818_v7 = vrot.slane %v1667_v49, 1  ;;  %v854_v10 = vshll.u32 %v3105_v60, 16 }
  0x47   : > { %1776 = vrot.lane.b32.xlu0 %v1691_v30, %s4360_s0  ;;  %1231 = vrot.lane.b32.xlu1 %v3311_v29, %s3168_s23  ;;  %v3483_v57 = vsel %vm4364_vm11, %v1038_v51, %v1042_v52  ;;  %v1722_v58 = vor.u32 %v1721_v54, %v1717_v53  ;;  %v3501_v3 = vsel %vm4367_vm3, %v1134_v63, %v1135_v0  ;;  %v853_v8 = vrot.slane %v851_v1, 7 }
  0x48   : > { %v1539_v11 = vshrl.u32 %v3106_v2, 16  ;;  %v3509_v12 = vsel %vm4367_vm3, %v1817_v5, %v1818_v7  ;;  %v1542_v16 = vshll.u32 %v3106_v2, 16  ;;  %vm4362_vm8 = vcmask 1041408  }
  0x49   : > { %v3492_v61 = vsel %vm4364_vm11, %v1722_v58, %v1726_v59  ;;  %v856_v14 = vor.u32 %v854_v10, %v853_v8  ;;  %3046 = vmatprep.subr.msk.bf16.mxu0 %vm4362_vm8, %v3114_v13  ;;  %v2274_v19 = vsel %vm4362_vm8, %v3114_v13, 0  ;;  %v2141_v21 = vsel %vm4363_vm1, %v3116_v56, 0 }
  0x4a   : > { %v1541_v15 = vrot.slane %v1539_v11, 7  ;;  %3012 = vmatpush3.bf16.msra.mxu0 %v2274_v19  ;;  %2990 = vmatpush3.bf16.msra.mxu1 %v2141_v21  ;;  %v858_v34 = vshrl.u32 %v3107_v24, 16  ;;  %v861_v46 = vshll.u32 %v3107_v24, 16  ;;  %v1546_v47 = vshrl.u32 %v3108_v35, 16 }
  0x4b   : > { %1899 = vrot.lane.b32.xlu0 %v3454_v36, %s4358_s24  ;;  %1914 = vrot.lane.b32.xlu1 %v3332_v38, %s4390_s21  ;;  %s4374_s24 = smov 32   ;;  %v1549_v55 = vshll.u32 %v3108_v35, 16  ;;  %vm1397_vm8 = vcmask 228352  }
  0x4c   : > { %v1544_v17 = vor.u32 %v1542_v16, %v1541_v15  ;;  %v1614_v25 = vsel %vm3290_vm2, %v1541_v15, 0  ;;  %v860_v45 = vrot.slane %v858_v34, 7  ;;  %v1548_v54 = vrot.slane %v1546_v47, 7 }
  0x4d   : > { %v1649_v32 = vmul.bf16 1045249613, %v1614_v25  ;;  %vm1629_vm13 = vcmp.ge.bf16.partialorder %v1614_v25, 0 }
  0x4e   : > { %v1604_v20 = vsel %vm3290_vm2, 0, %v1544_v17  ;;  %v863_v53 = vor.u32 %v861_v46, %v860_v45  ;;  %v1551_v60 = vor.u32 %v1549_v55, %v1548_v54  ;;  %v930_v5 = vsel %vm3290_vm2, %v860_v45, 0 }
  0x4f   : > { %1233 = vrot.lane.b32.xlu0 %v3441_v28, %s3168_s23  ;;  %1259 = vrot.lane.b32.xlu1 %v3393_v27, %s3169_s4  ;;  %v1648_v23 = vmul.bf16 1045249613, %v1604_v20  ;;  %vm1628_vm12 = vcmp.ge.bf16.partialorder %v1604_v20, 0  ;;  %v1669_v42 = vsel %vm1629_vm13, %v1614_v25, %v1649_v32  ;;  %v966_v13 = vmul.bf16 1045249613, %v930_v5 }
  0x50   : > { %v1736_v52 = vshll.u32 %v1669_v42, 16  ;;  %v920_v59 = vsel %vm3290_vm2, 0, %v863_v53  ;;  %v1605_v2 = vsel %vm3290_vm2, 0, %v1551_v60  ;;  %vm946_vm0 = vcmp.ge.bf16.partialorder %v930_v5, 0 }
  0x51   : > { %v3545_v31 = vsel %vm1628_vm12, %v1604_v20, %v1648_v23  ;;  %v965_v1 = vmul.bf16 1045249613, %v920_v59  ;;  %vm945_vm14 = vcmp.ge.bf16.partialorder %v920_v59, 0  ;;  %v1650_v11 = vmul.bf16 1045249613, %v1605_v2 }
  0x52   : > { %v1731_v40 = vshll.u32 %v3545_v31, 16  ;;  %v1729_v50 = vshrl.u32 %v3545_v31, 16  ;;  %v1820_v7 = vrot.slane %v3545_v31, 1  ;;  %vm1630_vm15 = vcmp.ge.bf16.partialorder %v1605_v2, 0 }
  0x53   : > { %1916 = vrot.lane.b32.xlu0 %v3456_v37, %s4390_s21  ;;  %1942 = vrot.lane.b32.xlu1 %v3399_v43, %s4376_s27  ;;  %v3588_v10 = vsel %vm945_vm14, %v920_v59, %v965_v1  ;;  %v3600_v16 = vsel %vm1630_vm15, %v1605_v2, %v1650_v11  ;;  %vm1978_vm12 = vcmask 15360   ;;  %vm1312_vm13 = vcmask 64512  }
  0x54   : > { %v1733_v51 = vrot.slane %v1731_v40, 1  ;;  %v1743_v20 = vshll.u32 %v3600_v16, 16  ;;  %v1741_v24 = vshrl.u32 %v3600_v16, 16  ;;  %v1140_v45 = vrot.slane %v3588_v10, 1 }
  0x55   : > { %vm1329_vm14 = vcmask 97280   ;;  %vm1346_vm15 = vcmask 130048  }
  0x56   : > { %v1734_v58 = vor.u32 %v1733_v51, %v1729_v50  ;;  %v1745_v25 = vrot.slane %v1743_v20, 1 }
  0x57   : > { %1261 = vrot.lane.b32.xlu0 %v3483_v57, %s3169_s4  ;;  %1279 = vrot.lane.b32.xlu1 %v3402_v44, %s4374_s24 }
  0x58   : > { %v1746_v35 = vor.u32 %v1745_v25, %v1741_v24 }
  0x5b   : > { %1944 = vrot.lane.b32.xlu0 %v3492_v61, %s4376_s27  ;;  %1962 = vrot.lane.b32.xlu1 %v3454_v36, %s4372_s19 }
  0x5f   : > { %1096 = vrot.lane.b32.xlu0 %v3393_v27, %s4370_s30  ;;  %1281 = vrot.lane.b32.xlu1 %v3501_v3, %s4374_s24  ;;  %v919_v27 = vsel %vm3290_vm2, 0, %v856_v14  ;;  %v1615_v14 = vsel %vm3290_vm2, %v1548_v54, 0 }
  0x60   : > { %v963_v18 = vmul.bf16 1045249613, %v919_v27  ;;  %vm943_vm9 = vcmp.ge.bf16.partialorder %v919_v27, 0  ;;  %v1651_v17 = vmul.bf16 1045249613, %v1615_v14  ;;  %vm1631_vm4 = vcmp.ge.bf16.partialorder %v1615_v14, 0 }
  0x62   : > { %v3535_v22 = vsel %vm943_vm9, %v919_v27, %v963_v18  ;;  %v986_v27 = vsel %vm946_vm0, %v930_v5, %v966_v13  ;;  %v1057_v18 = vshrl.u32 %v3588_v10, 16  ;;  %v1671_v21 = vsel %vm1631_vm4, %v1615_v14, %v1651_v17 }
  0x63   : > { %1780 = vrot.lane.b32.xlu0 %v3399_v43, %s4360_s0  ;;  %1964 = vrot.lane.b32.xlu1 %v3509_v12, %s4372_s19  ;;  %v929_v43 = vsel %vm3290_vm2, %v853_v8, 0  ;;  %v1047_v30 = vshll.u32 %v3535_v22, 16  ;;  %v1821_v8 = vrot.slane %v1669_v42, 1  ;;  %v1064_v19 = vshll.u32 %v986_v27, 16 }
  0x64   : > { %vm944_vm10 = vcmp.ge.bf16.partialorder %v929_v43, 0  ;;  %v1141_v46 = vrot.slane %v986_v27, 1  ;;  %v1824_v53 = vrot.slane %v1671_v21, 1  ;;  %vm2011_vm0 = vcmask 48128  }
  0x65   : > { %v1049_v39 = vrot.slane %v1047_v30, 1  ;;  %v3598_v15 = vsel %vm4367_vm3, %v1820_v7, %v1821_v8  ;;  %v1066_v23 = vrot.slane %v1064_v19, 1  ;;  %v3115_v19 = vld [vmem:[%s3276_s28 + $0x30] sm:$0xff]   ;;  %vm1363_vm4 = vcmask 162816  }
  0x66   : > { %v3647_v51 = vsel %vm4367_vm3, %v1140_v45, %v1141_v46  ;;  %v872_v25 = vshrl.u32 %v3115_v19, 16 }
  0x67   : > { %1098 = vrot.lane.b32.xlu0 %v3483_v57, %s4370_s30  ;;  %1153 = vrot.lane.b32.xlu1 %v3402_v44, %s4365_s18  ;;  %v964_v44 = vmul.bf16 1045249613, %v929_v43 }
  0x69   : > { %v984_v26 = vsel %vm944_vm10, %v929_v43, %v964_v44  ;;  %vm1295_vm10 = vcmask 31744  }
  0x6a   : > { %v1052_v6 = vshll.u32 %v984_v26, 16  ;;  %v1138_v0 = vrot.slane %v984_v26, 1  ;;  %v1748_v26 = vshll.u32 %v1671_v21, 16 }
  0x6b   : > { %1782 = vrot.lane.b32.xlu0 %v3492_v61, %s4360_s0  ;;  %1836 = vrot.lane.b32.xlu1 %v3454_v36, %s4370_s30  ;;  %v1045_v36 = vshrl.u32 %v3535_v22, 16 }
  0x6c   : > { %v1054_v48 = vrot.slane %v1052_v6, 1  ;;  %v1750_v6 = vrot.slane %v1748_v26, 1  ;;  %v3117_v26 = vld [vmem:[%s3283_s11 + $0x30] sm:$0xff]  }
  0x6d   : > { %v1050_v49 = vor.u32 %v1049_v39, %v1045_v36  ;;  %v3109_v39 = vld [vmem:[%s3276_s28 + $0x28] sm:$0xff]  }
  0x6e   : > { %v3634_v42 = vsel %vm4364_vm11, %v1746_v35, %v1750_v6 }
  0x6f   : > { %1155 = vrot.lane.b32.xlu0 %v3501_v3, %s4365_s18  ;;  %1170 = vrot.lane.b32.xlu1 %v3441_v28, %s4390_s21  ;;  %v3564_v56 = vsel %vm4364_vm11, %v1050_v49, %v1054_v48  ;;  %v865_v48 = vshrl.u32 %v3109_v39, 16  ;;  %v3110_v49 = vld [vmem:[%s3283_s11 + $0x28] sm:$0xff]  }
  0x70   : > { %v1556_v2 = vshll.u32 %v3110_v49, 16 }
  0x71   : > { %v867_v55 = vrot.slane %v865_v48, 7 }
  0x73   : > { %1838 = vrot.lane.b32.xlu0 %v3509_v12, %s4370_s30  ;;  %1853 = vrot.lane.b32.xlu1 %v3456_v37, %s4391_s12  ;;  %v931_v13 = vsel %vm3290_vm2, %v867_v55, 0 }
  0x74   : > { %v968_v27 = vmul.bf16 1045249613, %v931_v13  ;;  %vm948_vm6 = vcmp.ge.bf16.partialorder %v931_v13, 0 }
  0x76   : > { %v3702_v20 = vsel %vm948_vm6, %v931_v13, %v968_v27  ;;  %v1563_v27 = vshll.u32 %v3117_v26, 16  ;;  %vm1380_vm6 = vcmask 195584  }
  0x77   : > { %1172 = vrot.lane.b32.xlu0 %v3535_v22, %s4390_s21  ;;  %1198 = vrot.lane.b32.xlu1 %v3483_v57, %s4372_s19  ;;  %v1738_v57 = vrot.slane %v1736_v52, 1  ;;  %v1823_v52 = vrot.slane %v3600_v16, 1  ;;  %v1076_v35 = vshll.u32 %v3702_v20, 16 }
  0x79   : > { %v3573_v63 = vsel %vm4364_vm11, %v1734_v58, %v1738_v57  ;;  %v868_v58 = vshll.u32 %v3109_v39, 16  ;;  %v1553_v57 = vshrl.u32 %v3110_v49, 16  ;;  %v3659_v60 = vsel %vm4367_vm3, %v1823_v52, %v1824_v53 }
  0x7a   : > { %v874_v52 = vrot.slane %v872_v25, 7  ;;  %v875_v53 = vshll.u32 %v3115_v19, 16 }
  0x7b   : > { %1855 = vrot.lane.b32.xlu0 %v3545_v31, %s4391_s12  ;;  %1881 = vrot.lane.b32.xlu1 %v3492_v61, %s4365_s18  ;;  %v1137_v61 = vrot.slane %v3535_v22, 1  ;;  %v1555_v1 = vrot.slane %v1553_v57, 7 }
  0x7c   : > { %v877_v13 = vor.u32 %v875_v53, %v874_v52 }
  0x7d   : > { %v1558_v8 = vor.u32 %v1556_v2, %v1555_v1 }
  0x7e   : > { %v922_v25 = vsel %vm3290_vm2, 0, %v877_v13 }
  0x7f   : > { %1200 = vrot.lane.b32.xlu0 %v3564_v56, %s4372_s19  ;;  %1218 = vrot.lane.b32.xlu1 %v3501_v3, %s4368_s26  ;;  %v3585_v3 = vsel %vm4367_vm3, %v1137_v61, %v1138_v0  ;;  %v870_v0 = vor.u32 %v868_v58, %v867_v55  ;;  %v1560_v55 = vshrl.u32 %v3117_v26, 16 }
  0x81   : > { %v921_v7 = vsel %vm3290_vm2, 0, %v870_v0  ;;  %v1078_v0 = vrot.slane %v1076_v35, 1 }
  0x82   : > { %vm947_vm5 = vcmp.ge.bf16.partialorder %v921_v7, 0 }
  0x83   : > { %1883 = vrot.lane.b32.xlu0 %v3573_v63, %s4365_s18  ;;  %1901 = vrot.lane.b32.xlu1 %v3509_v12, %s4392_s29  ;;  %v1059_v12 = vshll.u32 %v3588_v10, 16 }
  0x85   : > { %v1061_v43 = vrot.slane %v1059_v12, 1  ;;  %v1606_v12 = vsel %vm3290_vm2, 0, %v1558_v8 }
  0x86   : > { %vm1632_vm7 = vcmp.ge.bf16.partialorder %v1606_v12, 0 }
  0x87   : > { %1220 = vrot.lane.b32.xlu0 %v3585_v3, %s4368_s26  ;;  %1235 = vrot.lane.b32.xlu1 %v3535_v22, %s3168_s23  ;;  %v1062_v44 = vor.u32 %v1061_v43, %v1057_v18  ;;  %v1652_v18 = vmul.bf16 1045249613, %v1606_v12  ;;  %v1616_v43 = vsel %vm3290_vm2, %v1555_v1, 0 }
  0x88   : > { %vm1633_vm9 = vcmp.ge.bf16.partialorder %v1616_v43, 0 }
  0x89   : > { %v3622_v34 = vsel %vm4364_vm11, %v1062_v44, %v1066_v23  ;;  %v1653_v44 = vmul.bf16 1045249613, %v1616_v43  ;;  %v3705_v24 = vsel %vm1632_vm7, %v1606_v12, %v1652_v18  ;;  %v1562_v12 = vrot.slane %v1560_v55, 7 }
  0x8a   : > { %v1755_v46 = vshll.u32 %v3705_v24, 16  ;;  %v1753_v1 = vshrl.u32 %v3705_v24, 16 }
  0x8b   : > { %1903 = vrot.lane.b32.xlu0 %v3598_v15, %s4392_s29  ;;  %1918 = vrot.lane.b32.xlu1 %v3545_v31, %s4390_s21  ;;  %v3714_v45 = vsel %vm1633_vm9, %v1616_v43, %v1653_v44  ;;  %v1565_v26 = vor.u32 %v1563_v27, %v1562_v12  ;;  %vm4381_vm9 = vcmask 80896  }
  0x8c   : > { %v1760_v58 = vshll.u32 %v3714_v45, 16  ;;  %v1757_v2 = vrot.slane %v1755_v46, 1  ;;  %v1827_v53 = vrot.slane %v3714_v45, 1 }
  0x8e   : > { %v1762_v43 = vrot.slane %v1760_v58, 1 }
  0x8f   : > { %1237 = vrot.lane.b32.xlu0 %v3588_v10, %s3168_s23  ;;  %1263 = vrot.lane.b32.xlu1 %v3564_v56, %s3169_s4 }
  0x93   : > { %1920 = vrot.lane.b32.xlu0 %v3600_v16, %s4390_s21  ;;  %1946 = vrot.lane.b32.xlu1 %v3573_v63, %s4376_s27 }
  0x95   : > { %v3613_v30 = vpop.permute.xlu0 %1168  ;;  %v3619_v32 = vpop.permute.xlu1 %1166 }
  0x97   : > { %1265 = vrot.lane.b32.xlu0 %v3622_v34, %s3169_s4  ;;  %1283 = vrot.lane.b32.xlu1 %v3585_v3, %s4374_s24 }
  0x99   : > { %v3624_v36 = vpop.permute.xlu0 %1851  ;;  %v3631_v40 = vpop.permute.xlu1 %1849 }
  0x9b   : > { %1948 = vrot.lane.b32.xlu0 %v3634_v42, %s4376_s27  ;;  %1966 = vrot.lane.b32.xlu1 %v3598_v15, %s4372_s19 }
  0x9d   : > { %v3637_v47 = vpop.permute.xlu0 %1151  ;;  %v3644_v50 = vpop.permute.xlu1 %1214 }
  0x9f   : > { %1100 = vrot.lane.b32.xlu0 %v3564_v56, %s4370_s30  ;;  %1285 = vrot.lane.b32.xlu1 %v3647_v51, %s4374_s24 }
  0xa1   : > { %v3650_v54 = vpop.permute.xlu0 %1834  ;;  %v3656_v59 = vpop.permute.xlu1 %1897 }
  0xa3   : > { %1784 = vrot.lane.b32.xlu0 %v3573_v63, %s4360_s0  ;;  %1968 = vrot.lane.b32.xlu1 %v3659_v60, %s4372_s19  ;;  %v967_v63 = vmul.bf16 1045249613, %v921_v7 }
  0xa5   : > { %v3661_v61 = vpop.permute.xlu0 %1778  ;;  %v3667_v56 = vpop.permute.xlu1 %1094  ;;  %v3691_v17 = vsel %vm947_vm5, %v921_v7, %v967_v63  ;;  %vm949_vm5 = vcmp.ge.bf16.partialorder %v922_v25, 0 }
  0xa6   : > { %v1071_v21 = vshll.u32 %v3691_v17, 16  ;;  %v1069_v6 = vshrl.u32 %v3691_v17, 16  ;;  %v1299_v58 = vsel %vm1295_vm10, %v3320_v33, %v3667_v56 }
  0xa7   : > { %1102 = vrot.lane.b32.xlu0 %v3622_v34, %s4370_s30  ;;  %1157 = vrot.lane.b32.xlu1 %v3585_v3, %s4365_s18  ;;  %v1316_v56 = vsel %vm1312_vm13, %v1299_v58, %v3637_v47 }
  0xa8   : > { %v1073_v39 = vrot.slane %v1071_v21, 1 }
  0xa9   : > { %v3669_v5 = vpop.permute.xlu0 %1196  ;;  %v3677_v11 = vpop.permute.xlu1 %1194 }
  0xaa   : > { %v1074_v57 = vor.u32 %v1073_v39, %v1069_v6  ;;  %v1143_v6 = vrot.slane %v3691_v17, 1  ;;  %v932_v39 = vsel %vm3290_vm2, %v874_v52, 0  ;;  %v1826_v52 = vrot.slane %v3705_v24, 1 }
  0xab   : > { %1786 = vrot.lane.b32.xlu0 %v3634_v42, %s4360_s0  ;;  %1840 = vrot.lane.b32.xlu1 %v3598_v15, %s4370_s30  ;;  %v970_v55 = vmul.bf16 1045249613, %v932_v39  ;;  %s754_s0 = scalar_select %p706_p11, 1, 0  ;;  %vm950_vm7 = vcmp.ge.bf16.partialorder %v932_v39, 0 }
  0xac   : > { %v3733_v18 = vsel %vm4364_vm11, %v1074_v57, %v1078_v0  ;;  %v3796_v33 = vsel %vm4367_vm3, %v1826_v52, %v1827_v53 }
  0xad   : > { %v3681_v14 = vpop.permute.xlu0 %1879  ;;  %v3689_v3 = vpop.permute.xlu1 %1877 }
  0xaf   : > { %1159 = vrot.lane.b32.xlu0 %v3647_v51, %s4365_s18  ;;  %1174 = vrot.lane.b32.xlu1 %v3588_v10, %s4390_s21 }
  0xb1   : > { %v3700_v15 = vpop.permute.xlu0 %1216  ;;  %v1150_v23 = vpop.permute.xlu1 %1149 }
  0xb3   : > { %1842 = vrot.lane.b32.xlu0 %v3659_v60, %s4370_s30  ;;  %1857 = vrot.lane.b32.xlu1 %v3600_v16, %s4391_s12 }
  0xb5   : > { %v1093_v48 = vpop.permute.xlu0 %1092  ;;  %v1833_v49 = vpop.permute.xlu1 %1832 }
  0xb6   : > { %v1297_v7 = vsel %vm1295_vm10, %v3415_v62, %v1093_v48  ;;  %v1758_v62 = vor.u32 %v1757_v2, %v1753_v1  ;;  %v1607_v48 = vsel %vm3290_vm2, 0, %v1565_v26 }
  0xb7   : > { %1176 = vrot.lane.b32.xlu0 %v3691_v17, %s4390_s21  ;;  %1202 = vrot.lane.b32.xlu1 %v3622_v34, %s4372_s19  ;;  %v1314_v34 = vsel %vm1312_vm13, %v1297_v7, %v1150_v23  ;;  %v1654_v1 = vmul.bf16 1045249613, %v1607_v48  ;;  %vm1634_vm1 = vcmp.ge.bf16.partialorder %v1607_v48, 0 }
  0xb8   : > { %v3753_v35 = vsel %vm4364_vm11, %v1758_v62, %v1762_v43  ;;  %vm1414_vm11 = vcmask 261120  }
  0xb9   : > { %v1777_v8 = vpop.permute.xlu0 %1776  ;;  %v3725_v63 = vpop.permute.xlu1 %1231  ;;  %v3812_v62 = vsel %vm1634_vm1, %v1607_v48, %v1654_v1  ;;  %vm4378_vm1 = vcmask 146432  }
  0xba   : > { %v1980_v19 = vsel %vm1978_vm12, %v3424_v4, %v1777_v8  ;;  %v1144_v4 = vrot.slane %v3702_v20, 1 }
  0xbb   : > { %1859 = vrot.lane.b32.xlu0 %v3705_v24, %s4391_s12  ;;  %1885 = vrot.lane.b32.xlu1 %v3634_v42, %s4365_s18  ;;  %v1331_v42 = vsel %vm1329_vm14, %v1314_v34, %v3619_v32  ;;  %v1996_v23 = vsel %vm1295_vm10, %v1980_v19, %v1833_v49 }
  0xbc   : > { %v1348_v20 = vsel %vm1346_vm15, %v1331_v42, %v3677_v11  ;;  %v2013_v49 = vsel %vm2011_vm0, %v1996_v23, %v3631_v40  ;;  %v3775_v11 = vsel %vm4367_vm3, %v1143_v6, %v1144_v4  ;;  %v1617_v40 = vsel %vm3290_vm2, %v1562_v12, 0 }
  0xbd   : > { %v3737_v21 = vpop.permute.xlu0 %1899  ;;  %v3739_v44 = vpop.permute.xlu1 %1914  ;;  %v2029_v2 = vsel %vm1312_vm13, %v2013_v49, %v3689_v3  ;;  %v1655_v8 = vmul.bf16 1045249613, %v1617_v40  ;;  %vm4379_vm3 = vcmask 113664  }
  0xbe   : > { %v2046_v13 = vsel %vm4381_vm9, %v2029_v2, %v3656_v59  ;;  %v1333_v59 = vsel %vm1329_vm14, %v1316_v56, %v3613_v30  ;;  %v1767_v30 = vshll.u32 %v3812_v62, 16  ;;  %v3118_v56 = vld [vmem:[%s3276_s28 + $0x38] sm:$0xff]   ;;  %s4395_s28 = smov 16  }
  0xbf   : > { %1204 = vrot.lane.b32.xlu0 %v3733_v18, %s4372_s19  ;;  %1222 = vrot.lane.b32.xlu1 %v3647_v51, %s4368_s26  ;;  %v969_v51 = vmul.bf16 1045249613, %v922_v25  ;;  %v1350_v23 = vsel %vm1346_vm15, %v1333_v59, %v3669_v5 }
  0xc0   : > { %v1769_v48 = vrot.slane %v1767_v30, 1 }
  0xc1   : > { %v3758_v32 = vpop.permute.xlu0 %1233  ;;  %v1260_v46 = vpop.permute.xlu1 %1259  ;;  %v3787_v0 = vsel %vm949_vm5, %v922_v25, %v969_v51  ;;  %vm4380_vm5 = vcmask 293888   ;;  %v2062_v25 = vsel %vm1329_vm14, %v2046_v13, %v3739_v44 }
  0xc2   : > { %v1083_v7 = vshll.u32 %v3787_v0, 16  ;;  %v1081_v43 = vshrl.u32 %v3787_v0, 16 }
  0xc3   : > { %1887 = vrot.lane.b32.xlu0 %v3753_v35, %s4365_s18  ;;  %1905 = vrot.lane.b32.xlu1 %v3659_v60, %s4392_s29  ;;  %v1365_v60 = vsel %vm1363_vm4, %v1348_v20, %v3644_v50  ;;  %v3799_v50 = vsel %vm950_vm7, %v932_v39, %v970_v55  ;;  %s3801_s18 = scvt.s32.f32 %s754_s0  ;;  %vm1635_vm7 = vcmp.ge.bf16.partialorder %v1617_v40, 0  ;;  %s632_s0 = sadd.s32 8, %s3260_s20  ;;  %v1367_v39 = vsel %vm1363_vm4, %v1350_v23, %v3700_v15 }
  0xc4   : > { %v1382_v3 = vsel %vm1380_vm6, %v1365_v60, %v3725_v63  ;;  %v1982_v63 = vsel %vm1978_vm12, %v3335_v41, %v3661_v61  ;;  %v1088_v19 = vshll.u32 %v3799_v50, 16  ;;  %v1085_v41 = vrot.slane %v1083_v7, 1  ;;  %p3836_p12 = scmp.lt.s32.totalorder %s632_s0, 15 }
  0xc5   : > { %v3784_v57 = vpop.permute.xlu0 %1916  ;;  %v1943_v45 = vpop.permute.xlu1 %1942  ;;  %v1399_v12 = vsel %vm1397_vm8, %v1382_v3, %v1260_v46  ;;  %v3831_v61 = vsel %vm1635_vm7, %v1617_v40, %v1655_v8  ;;  %v1998_v44 = vsel %vm1295_vm10, %v1982_v63, %v3650_v54  ;;  %v1384_v54 = vsel %vm1380_vm6, %v1367_v39, %v3758_v32  ;;  %p757_p13 = scmp.ne.f32.partialorder %s3801_s18, %s3801_s18 }
  0xc6   : > { %v2079_v26 = vsel %vm4379_vm3, %v2062_v25, %v1943_v45  ;;  %v1090_v46 = vrot.slane %v1088_v19, 1  ;;  %v1772_v51 = vshll.u32 %v3831_v61, 16  ;;  %v1086_v5 = vor.u32 %v1085_v41, %v1081_v43  ;;  %s4456_s0 = smov (!%p3836_p12, %s632_s0), 15 }
  0xc7   : > { %1224 = vrot.lane.b32.xlu0 %v3775_v11, %s4368_s26  ;;  %1239 = vrot.lane.b32.xlu1 %v3691_v17, %s3168_s23  ;;  %s758_s26 = sshrl.u32 %s3801_s18, 16  ;;  %v1765_v20 = vshrl.u32 %v3812_v62, 16  ;;  %v2015_v15 = vsel %vm2011_vm0, %v1998_v44, %v3624_v36  ;;  %vm4394_vm7 = vsmask.f32 7424  ;;  %s4458_s0 = smov (!%p3836_p12, %s4456_s0), 15  ;;  %v1146_v3 = vrot.slane %v3787_v0, 1 }
  0xc8   : > { %s759_s19 = sand.u32 1, %s758_s26  ;;  %v2031_v32 = vsel %vm1312_vm13, %v2015_v15, %v3681_v14  ;;  %v3881_v14 = vsel %vm4394_vm7, %v1086_v5, %v1090_v46  ;;  %v1774_v60 = vrot.slane %v1772_v51, 1  ;;  %v1147_v7 = vrot.slane %v3799_v50, 1 }
  0xc9   : > { %v1262_v27 = vpop.permute.xlu0 %1261  ;;  %v1280_v34 = vpop.permute.xlu1 %1279  ;;  %s760_s26 = sadd.s32 32767, %s759_s19  ;;  %v2048_v40 = vsel %vm4381_vm9, %v2031_v32, %v3737_v21  ;;  %v1770_v58 = vor.u32 %v1769_v48, %v1765_v20  ;;  %v1830_v50 = vrot.slane %v3831_v61, 1  ;;  %v882_v19 = vshll.u32 %v3118_v56, 16 }
  0xca   : > { %v1416_v47 = vsel %vm1414_vm11, %v1399_v12, %v1280_v34  ;;  %v1401_v49 = vsel %vm1397_vm8, %v1384_v54, %v1262_v27  ;;  %v2064_v36 = vsel %vm1329_vm14, %v2048_v40, %v3784_v57  ;;  %s761_s20 = sadd.s32 %s760_s26, %s3801_s18  ;;  %s2856_s18 = sshll.u32 %s4458_s0, 1  ;;  %v879_v12 = vshrl.u32 %v3118_v56, 16  ;;  %v3119_v27 = vld [vmem:[%s3283_s11 + $0x38] sm:$0xff]  }
  0xcb   : > { %1907 = vrot.lane.b32.xlu0 %v3796_v33, %s4392_s29  ;;  %1922 = vrot.lane.b32.xlu1 %v3705_v24, %s4390_s21  ;;  %s762_s19 = sand.u32 4294901760, %s761_s20  ;;  %v3900_v57 = vsel %vm4394_vm7, %v1770_v58, %v1774_v60  ;;  %vm4396_vm7 = vcmask 1046528   ;;  %s641_s30 = sadd.s32 %s2856_s18, %s3267_s22  ;;  %v1567_v25 = vshrl.u32 %v3119_v27, 16 }
  0xcc   : > { %3013 = vmatprep.mubr.msk.bf16.mxu0 %vm4380_vm5, %v1416_v47  ;;  %s4460_s19 = smov (%p757_p13, %s762_s19), 2143289344  ;;  %v3914_v34 = vsel %vm4396_vm7, %v1146_v3, %v1147_v7  ;;  %v1829_v47 = vrot.slane %v3812_v62, 1  ;;  %v881_v43 = vrot.slane %v879_v12, 7  ;;  %s4397_s0 = smov 4  }
  0xcd   : > { %v1945_v42 = vpop.permute.xlu0 %1944  ;;  %v1963_v4 = vpop.permute.xlu1 %1962  ;;  %s765_s11 = sshrl.u32 %s4460_s19, 16  ;;  %s2858_s26 = sshll.u32 %s641_s30, 2 }
  0xce   : > { %v2095_v6 = vsel %vm1346_vm15, %v2079_v26, %v1963_v4  ;;  %v2081_v45 = vsel %vm4379_vm3, %v2064_v36, %v1945_v42  ;;  %v3928_v41 = vsel %vm4396_vm7, %v1829_v47, %v1830_v50  ;;  %s766_s20 = sshll.u32 %s765_s11, 16  ;;  %v884_v26 = vor.u32 %v882_v19, %v881_v43  ;;  %s4398_s22 = smov 2  }
  0xcf   : > { %1241 = vrot.lane.b32.xlu0 %v3787_v0, %s3168_s23  ;;  %1267 = vrot.lane.b32.xlu1 %v3733_v18, %s3169_s4  ;;  %v1569_v42 = vrot.slane %v1567_v25, 7  ;;  %v1570_v4 = vshll.u32 %v3119_v27, 16  ;;  %s4399_s30 = smov 8   ;;  %v933_v20 = vsel %vm3290_vm2, %v881_v43, 0 }
  0xd0   : > { %2991 = vmatprep.mubr.msk.bf16.mxu1 %vm4378_vm1, %v2095_v6  ;;  %v923_v23 = vsel %vm3290_vm2, 0, %v884_v26  ;;  %v972_v32 = vmul.bf16 1045249613, %v933_v20 }
  0xd1   : > { %v3866_v52 = vpop.permute.xlu0 %1096  ;;  %v1282_v53 = vpop.permute.xlu1 %1281  ;;  %v1572_v6 = vor.u32 %v1570_v4, %v1569_v42  ;;  %v971_v5 = vmul.bf16 1045249613, %v923_v23  ;;  %vm951_vm7 = vcmp.ge.bf16.partialorder %v923_v23, 0 }
  0xd2   : > { %v1418_v55 = vsel %vm1414_vm11, %v1401_v49, %v1282_v53 }
  0xd3   : > { %1924 = vrot.lane.b32.xlu0 %v3812_v62, %s4390_s21  ;;  %1950 = vrot.lane.b32.xlu1 %v3753_v35, %s4376_s27  ;;  %v1608_v48 = vsel %vm3290_vm2, 0, %v1572_v6  ;;  %v3970_v36 = vsel %vm951_vm7, %v923_v23, %v971_v5 }
  0xd4   : > { %3014 = vmatmul.mubr.msk.bf16.vlgmr.msra.gmra.mrb[0].mxu0 %vm4380_vm5, %v1418_v55  ;;  %v1656_v58 = vmul.bf16 1045249613, %v1608_v48  ;;  %vm1636_vm3 = vcmp.ge.bf16.partialorder %v1608_v48, 0  ;;  %v1185_v56 = vshll.u32 %v3970_v36, 16  ;;  %v1183_v19 = vshrl.u32 %v3970_v36, 16 }
  0xd5   : > { %v3885_v21 = vpop.permute.xlu0 %1780  ;;  %v1965_v1 = vpop.permute.xlu1 %1964 }
  0xd6   : > { %v2097_v2 = vsel %vm1346_vm15, %v2081_v45, %v1965_v1  ;;  %v1618_v1 = vsel %vm3290_vm2, %v1569_v42, 0  ;;  %v3983_v12 = vsel %vm1636_vm3, %v1608_v48, %v1656_v58  ;;  %v1187_v25 = vrot.slane %v1185_v56, 1 }
  0xd7   : > { %1269 = vrot.lane.b32.xlu0 %v3881_v14, %s3169_s4  ;;  %1287 = vrot.lane.b32.xlu1 %v3775_v11, %s4374_s24  ;;  %v1657_v27 = vmul.bf16 1045249613, %v1618_v1  ;;  %vm1637_vm7 = vcmp.ge.bf16.partialorder %v1618_v1, 0  ;;  %v1868_v26 = vshll.u32 %v3983_v12, 16  ;;  %vm4400_vm3 = vsmask.f32 7424 }
  0xd8   : > { %2992 = vmatmul.mubr.msk.bf16.vlgmr.msra.gmra.mrb[0].mxu1 %vm4378_vm1, %v2097_v2  ;;  %vm952_vm1 = vcmp.ge.bf16.partialorder %v933_v20, 0  ;;  %v1188_v5 = vor.u32 %v1187_v25, %v1183_v19 }
  0xd9   : > { %v3904_v8 = vpop.permute.xlu0 %1098  ;;  %v3906_v13 = vpop.permute.xlu1 %1153  ;;  %v1677_v23 = vsel %vm1637_vm7, %v1618_v1, %v1657_v27  ;;  %v1870_v48 = vrot.slane %v1868_v26, 1 }
  0xdb   : > { %1952 = vrot.lane.b32.xlu0 %v3900_v57, %s4376_s27  ;;  %1970 = vrot.lane.b32.xlu1 %v3796_v33, %s4395_s28  ;;  %s767_s27 = sor.u32 %s766_s20, %s765_s11  ;;  %s688_s11 = scalar_lea.vmem %s4349_s6, %s2858_s26 }
  0xdc   : > { %v768_v46 = vstv %s767_s27  ;;  %v1456_v49 = vld [vmem:[%s688_s11] sm:$0xf]  ;;  %v1457_v53 = vld [vmem:[%s688_s11 + $0x4] sm:$0xf]  ;;  %s4401_s27 = smov 20  }
  0xdd   : > { %v3918_v63 = vpop.permute.xlu0 %1782  ;;  %v3920_v59 = vpop.permute.xlu1 %1836  ;;  %v1458_v60 = vmul.bf16 %v1456_v49, %v768_v46  ;;  %v1459_v45 = vmul.bf16 %v1457_v53, %v768_v46 }
  0xdf   : > { %1104 = vrot.lane.b32.xlu0 %v3733_v18, %s4397_s0  ;;  %1289 = vrot.lane.b32.xlu1 %v3914_v34, %s4374_s24  ;;  %s643_s24 = scalar_lea.vmem %s4345_s2, %s2858_s26  ;;  %v2905_v47 = vcombine.low %v1458_v60, %v1459_v45 }
  0xe0   : > { %v752_v39 = vld [vmem:[%s643_s24] sm:$0xf] }
  0xe1   : > { %v3930_v61 = vpop.permute.xlu0 %1155  ;;  %v3932_v30 = vpop.permute.xlu1 %1170  ;;  %v770_v15 = vmul.bf16 %v768_v46, %v752_v39  ;;  %v1574_v6 = vshrl.u32 %v2905_v47, 16 }
  0xe3   : > { %1788 = vrot.lane.b32.xlu0 %v3753_v35, %s4398_s22  ;;  %1972 = vrot.lane.b32.xlu1 %v3928_v41, %s4395_s28  ;;  %v753_v35 = vld [vmem:[%s643_s24 + $0x4] sm:$0xf]  ;;  %v1576_v53 = vrot.slane %v1574_v6, 7 }
  0xe5   : > { %v3941_v18 = vpop.permute.xlu0 %1838  ;;  %v3943_v44 = vpop.permute.xlu1 %1853 }
  0xe7   : > { %1106 = vrot.lane.b32.xlu0 %v3881_v14, %s4397_s0  ;;  %1161 = vrot.lane.b32.xlu1 %v3775_v11, %s4399_s30  ;;  %v771_v11 = vmul.bf16 %v768_v46, %v753_v35 }
  0xe9   : > { %v3954_v51 = vpop.permute.xlu0 %1172  ;;  %v3956_v54 = vpop.permute.xlu1 %1198  ;;  %v2895_v2 = vcombine.low %v770_v15, %v771_v11  ;;  %v1873_v15 = vshll.u32 %v1677_v23, 16 }
  0xeb   : > { %1790 = vrot.lane.b32.xlu0 %v3900_v57, %s4398_s22  ;;  %1844 = vrot.lane.b32.xlu1 %v3796_v33, %s4397_s0  ;;  %v992_v33 = vsel %vm952_vm1, %v933_v20, %v972_v32  ;;  %v886_v50 = vshrl.u32 %v2895_v2, 16  ;;  %v889_v35 = vshll.u32 %v2895_v2, 16  ;;  %v1866_v20 = vshrl.u32 %v3983_v12, 16  ;;  %vm4402_vm1 = vmmov %vm4400_vm3 }
  0xec   : > { %v1190_v43 = vshll.u32 %v992_v33, 16  ;;  %v1577_v32 = vshll.u32 %v2905_v47, 16  ;;  %v1875_v45 = vrot.slane %v1873_v15, 1  ;;  %v1211_v47 = vrot.slane %v3970_v36, 1 }
  0xed   : > { %v3966_v55 = vpop.permute.xlu0 %1855  ;;  %v3968_v40 = vpop.permute.xlu1 %1881  ;;  %v888_v39 = vrot.slane %v886_v50, 7  ;;  %v1871_v60 = vor.u32 %v1870_v48, %v1866_v20  ;;  %v1212_v50 = vrot.slane %v992_v33, 1 }
  0xee   : > { %v1192_v46 = vrot.slane %v1190_v43, 1  ;;  %v1579_v56 = vor.u32 %v1577_v32, %v1576_v53  ;;  %v1984_v32 = vsel %vm1978_vm12, %v3332_v38, %v3885_v21 }
  0xef   : > { %1163 = vrot.lane.b32.xlu0 %v3914_v34, %s4399_s30  ;;  %1178 = vrot.lane.b32.xlu1 %v3787_v0, %s4390_s21  ;;  %v891_v58 = vor.u32 %v889_v35, %v888_v39  ;;  %v934_v43 = vsel %vm3290_vm2, %v888_v39, 0  ;;  %v1894_v35 = vrot.slane %v3983_v12, 1 }
  0xf0   : > { %v1609_v6 = vsel %vm3290_vm2, 0, %v1579_v56  ;;  %v974_v33 = vmul.bf16 1045249613, %v934_v43 }
  0xf1   : > { %v3979_v3 = vpop.permute.xlu0 %1200  ;;  %v3981_v7 = vpop.permute.xlu1 %1218  ;;  %v924_v27 = vsel %vm3290_vm2, 0, %v891_v58  ;;  %v1658_v20 = vmul.bf16 1045249613, %v1609_v6  ;;  %vm1638_vm5 = vcmp.ge.bf16.partialorder %v1609_v6, 0  ;;  %v2000_v58 = vsel %vm1295_vm10, %v1984_v32, %v3920_v59 }
  0xf2   : > { %v973_v26 = vmul.bf16 1045249613, %v924_v27  ;;  %vm953_vm7 = vcmp.ge.bf16.partialorder %v924_v27, 0  ;;  %v2017_v38 = vsel %vm2011_vm0, %v2000_v58, %v3943_v44  ;;  %v1303_v59 = vsel %vm1295_vm10, %v3441_v28, %v3904_v8 }
  0xf3   : > { %1846 = vrot.lane.b32.xlu0 %v3928_v41, %s4397_s0  ;;  %1861 = vrot.lane.b32.xlu1 %v3812_v62, %s4391_s12 }
  0xf5   : > { %v3991_v42 = vpop.permute.xlu0 %1883  ;;  %v3993_v4 = vpop.permute.xlu1 %1901 }
  0xf7   : > { %1180 = vrot.lane.b32.xlu0 %v3970_v36, %s4390_s21  ;;  %1206 = vrot.lane.b32.xlu1 %v3881_v14, %s4395_s28  ;;  %v4007_v14 = vsel %vm4400_vm3, %v1188_v5, %v1192_v46  ;;  %v1895_v46 = vrot.slane %v1677_v23, 1  ;;  %vm4403_vm3 = vcmask 1046528  }
  0xf8   : > { %v4038_v5 = vsel %vm4403_vm3, %v1211_v47, %v1212_v50  ;;  %vm4404_vm9 = vmmov %vm4403_vm3  ;;  %v1320_v47 = vsel %vm1312_vm13, %v1303_v59, %v3930_v61  ;;  %vm4408_vm3 = vcmask 146432  }
  0xf9   : > { %v4000_v11 = vpop.permute.xlu0 %1220  ;;  %v1236_v49 = vpop.permute.xlu1 %1235  ;;  %v4049_v15 = vsel %vm4404_vm9, %v1894_v35, %v1895_v46  ;;  %vm4405_vm9 = vcmask 80896   ;;  %v1986_v35 = vsel %vm1978_vm12, %v3456_v37, %v3918_v63 }
  0xfb   : > { %1863 = vrot.lane.b32.xlu0 %v3983_v12, %s4391_s12  ;;  %1889 = vrot.lane.b32.xlu1 %v3900_v57, %s4399_s30  ;;  %v4018_v57 = vsel %vm4402_vm1, %v1871_v60, %v1875_v45  ;;  %vm954_vm1 = vcmp.ge.bf16.partialorder %v934_v43, 0  ;;  %v4068_v60 = vsel %vm1638_vm5, %v1609_v6, %v1658_v20  ;;  %vm4406_vm5 = vcmask 293888  }
  0xfc   : > { %v1933_v44 = vshll.u32 %v4068_v60, 16 }
  0xfd   : > { %v4009_v1 = vpop.permute.xlu0 %1903  ;;  %v1919_v2 = vpop.permute.xlu1 %1918 }
  0xfe   : > { %v1935_v46 = vrot.slane %v1933_v44, 1 }
  0xff   : > { %1208 = vrot.lane.b32.xlu0 %v4007_v14, %s4395_s28  ;;  %1226 = vrot.lane.b32.xlu1 %v3914_v34, %s4401_s27  ;;  %v1301_v34 = vsel %vm1295_vm10, %v3311_v29, %v3866_v52  ;;  %v4044_v52 = vsel %vm953_vm7, %v924_v27, %v973_v26  ;;  %vm4407_vm7 = vcmask 113664  }
 0x100   : > { %v1318_v39 = vsel %vm1312_vm13, %v1301_v34, %v3906_v13  ;;  %v1619_v13 = vsel %vm3290_vm2, %v1576_v53, 0  ;;  %v1250_v53 = vshll.u32 %v4044_v52, 16  ;;  %v1248_v28 = vshrl.u32 %v4044_v52, 16 }
 0x101   : > { %v4023_v19 = vpop.permute.xlu0 %1237  ;;  %v1264_v25 = vpop.permute.xlu1 %1263  ;;  %v1335_v23 = vsel %vm1329_vm14, %v1318_v39, %v3932_v30  ;;  %v1659_v56 = vmul.bf16 1045249613, %v1619_v13  ;;  %vm1639_vm2 = vcmp.ge.bf16.partialorder %v1619_v13, 0  ;;  %v1276_v58 = vrot.slane %v4044_v52, 1 }
 0x102   : > { %v1252_v8 = vrot.slane %v1250_v53, 1 }
 0x103   : > { %1891 = vrot.lane.b32.xlu0 %v4018_v57, %s4399_s30  ;;  %1909 = vrot.lane.b32.xlu1 %v3928_v41, %s4392_s29  ;;  %v1352_v41 = vsel %vm1346_vm15, %v1335_v23, %v3956_v54  ;;  %v4062_v54 = vsel %vm954_vm1, %v934_v43, %v974_v33  ;;  %v1679_v26 = vsel %vm1639_vm2, %v1619_v13, %v1659_v56  ;;  %vm4409_vm1 = vmmov %vm4405_vm9 }
 0x104   : > { %v1369_v30 = vsel %vm1363_vm4, %v1352_v41, %v3981_v7  ;;  %v1253_v37 = vor.u32 %v1252_v8, %v1248_v28  ;;  %v1938_v63 = vshll.u32 %v1679_v26, 16  ;;  %vm4411_vm2 = vmmov %vm4406_vm5  ;;  %v1960_v53 = vrot.slane %v1679_v26, 1 }
 0x105   : > { %v4042_v48 = vpop.permute.xlu0 %1920  ;;  %v1947_v29 = vpop.permute.xlu1 %1946  ;;  %v1386_v9 = vsel %vm1380_vm6, %v1369_v30, %v1236_v49 }
 0x106   : > { %v1403_v21 = vsel %vm1397_vm8, %v1386_v9, %v1264_v25  ;;  %v1277_v9 = vrot.slane %v4062_v54, 1 }
 0x107   : > { %1228 = vrot.lane.b32.xlu0 %v4038_v5, %s4401_s27  ;;  %1243 = vrot.lane.b32.xlu1 %v3970_v36, %s3168_s23  ;;  %v2033_v36 = vsel %vm1312_vm13, %v2017_v38, %v3968_v40  ;;  %v1255_v40 = vshll.u32 %v4062_v54, 16 }
 0x108   : > { %v2050_v49 = vsel %vm4405_vm9, %v2033_v36, %v3993_v4  ;;  %v1337_v4 = vsel %vm1329_vm14, %v1320_v47, %v3954_v51  ;;  %vm4412_vm9 = vsmask.f32 7424 }
 0x109   : > { %v1266_v7 = vpop.permute.xlu0 %1265  ;;  %v1284_v45 = vpop.permute.xlu1 %1283  ;;  %v2066_v50 = vsel %vm1329_vm14, %v2050_v49, %v1919_v2  ;;  %v1354_v6 = vsel %vm1346_vm15, %v1337_v4, %v3979_v3  ;;  %v1931_v2 = vshrl.u32 %v4068_v60, 16  ;;  %v1257_v34 = vrot.slane %v1255_v40, 1 }
 0x10a   : > { %v1420_v27 = vsel %vm1414_vm11, %v1403_v21, %v1284_v45  ;;  %v2083_v43 = vsel %vm4407_vm7, %v2066_v50, %v1947_v29  ;;  %v1371_v51 = vsel %vm1363_vm4, %v1354_v6, %v4000_v11  ;;  %v2002_v3 = vsel %vm1295_vm10, %v1986_v35, %v3941_v18 }
 0x10b   : > { %1911 = vrot.lane.b32.xlu0 %v4049_v15, %s4392_s29  ;;  %1926 = vrot.lane.b32.xlu1 %v3983_v12, %s4390_s21  ;;  %v1388_v33 = vsel %vm1380_vm6, %v1371_v51, %v4023_v19  ;;  %v2019_v11 = vsel %vm2011_vm0, %v2002_v3, %v3966_v55  ;;  %v1258_v19 = vsel %vm4412_vm9, %v1253_v37, %v1257_v34 }
 0x10c   : > { %3017 = vmatprep.mubr.msk.bf16.mxu0 %vm4406_vm5, %v1420_v27  ;;  %v1405_v39 = vsel %vm1397_vm8, %v1388_v33, %v1266_v7  ;;  %v1936_v41 = vor.u32 %v1935_v46, %v1931_v2  ;;  %vm4413_vm5 = vmmov %vm4407_vm7 }
 0x10d   : > { %v1949_v12 = vpop.permute.xlu0 %1948  ;;  %v1967_v25 = vpop.permute.xlu1 %1966  ;;  %vm4415_vm7 = vmmov %vm4408_vm3 }
 0x10e   : > { %v2099_v61 = vsel %vm1346_vm15, %v2083_v43, %v1967_v25 }
 0x10f   : > { %1245 = vrot.lane.b32.xlu0 %v4044_v52, %s3168_s23  ;;  %1271 = vrot.lane.b32.xlu1 %v4007_v14, %s3169_s4  ;;  %v2035_v14 = vsel %vm1312_vm13, %v2019_v11, %v3991_v42  ;;  %s4410_s23 = smov 14   ;;  %v1940_v42 = vrot.slane %v1938_v63, 1 }
 0x110   : > { %2995 = vmatprep.mubr.msk.bf16.mxu1 %vm4408_vm3, %v2099_v61  ;;  %v2052_v18 = vsel %vm4409_vm1, %v2035_v14, %v4009_v1  ;;  %vm4416_vm3 = vmmov %vm4412_vm9  ;;  %vm4417_vm1 = vcmask 1046528   ;;  %vm4419_vm9 = vcmask 80896  }
 0x111   : > { %v1101_v20 = vpop.permute.xlu0 %1100  ;;  %v1286_v23 = vpop.permute.xlu1 %1285  ;;  %v2068_v55 = vsel %vm1329_vm14, %v2052_v18, %v4042_v48  ;;  %v1941_v48 = vsel %vm4416_vm3, %v1936_v41, %v1940_v42  ;;  %v1278_v52 = vsel %vm4417_vm1, %v1276_v58, %v1277_v9  ;;  %vm4422_vm3 = vcmask 146432  }
 0x112   : > { %v1422_v29 = vsel %vm1414_vm11, %v1405_v39, %v1286_v23  ;;  %v2085_v13 = vsel %vm4413_vm5, %v2068_v55, %v1949_v12  ;;  %v1305_v26 = vsel %vm1295_vm10, %v3535_v22, %v1101_v20  ;;  %vm4420_vm5 = vcmask 293888  }
 0x113   : > { %1928 = vrot.lane.b32.xlu0 %v4068_v60, %s4390_s21  ;;  %1954 = vrot.lane.b32.xlu1 %v4018_v57, %s4410_s23  ;;  %s4414_s21 = smov 32   ;;  %v1959_v57 = vrot.slane %v4068_v60, 1 }
 0x114   : > { %3018 = vmatmul.mubr.msk.bf16.gmra.mrb[4].mxu0 %vm4411_vm2, %v1422_v29  ;;  %vm4418_vm2 = vmmov %vm4417_vm1 }
 0x115   : > { %v1785_v32 = vpop.permute.xlu0 %1784  ;;  %v1969_v30 = vpop.permute.xlu1 %1968  ;;  %vm4423_vm1 = vmmov %vm4419_vm9 }
 0x116   : > { %v2101_v1 = vsel %vm1346_vm15, %v2085_v13, %v1969_v30  ;;  %v1988_v46 = vsel %vm1978_vm12, %v3545_v31, %v1785_v32 }
 0x117   : > { %1273 = vrot.lane.b32.xlu0 %v1258_v19, %s3169_s4  ;;  %1291 = vrot.lane.b32.xlu1 %v4038_v5, %s4414_s21  ;;  %v1961_v5 = vsel %vm4418_vm2, %v1959_v57, %v1960_v53  ;;  %vm4424_vm2 = vmmov %vm4420_vm5 }
 0x118   : > { %2996 = vmatmul.mubr.msk.bf16.gmra.mrb[4].mxu1 %vm4415_vm7, %v2101_v1  ;;  %vm4421_vm7 = vcmask 113664  }
 0x119   : > { %v1103_v38 = vpop.permute.xlu0 %1102  ;;  %v1158_v21 = vpop.permute.xlu1 %1157 }
 0x11a   : > { %v1322_v6 = vsel %vm1312_vm13, %v1305_v26, %v1158_v21  ;;  %v1307_v23 = vsel %vm1295_vm10, %v3588_v10, %v1103_v38 }
 0x11b   : > { %1956 = vrot.lane.b32.xlu0 %v1941_v48, %s4410_s23  ;;  %1974 = vrot.lane.b32.xlu1 %v4049_v15, %s4395_s28 }
 0x11d   : > { %v1787_v7 = vpop.permute.xlu0 %1786  ;;  %v1841_v60 = vpop.permute.xlu1 %1840 }
 0x11e   : > { %v2004_v3 = vsel %vm1295_vm10, %v1988_v46, %v1841_v60  ;;  %v1990_v10 = vsel %vm1978_vm12, %v3600_v16, %v1787_v7 }
 0x11f   : > { %1293 = vrot.lane.b32.xlu0 %v1278_v52, %s4414_s21  ;;  %1976 = vrot.lane.b32.xlu1 %v1961_v5, %s4395_s28  ;;  %s4237_s28 = scalar_lea.vmem %s4352_s9, %s3270_s25  ;;  %s2884_s25 = sshll.u32 %s4450_s14, 1 }
 0x120   : > { %s709_s0 = sadd.s32 %s2884_s25, %s4462_s13 }
 0x121   : > { %v1160_v45 = vpop.permute.xlu0 %1159  ;;  %v1175_v54 = vpop.permute.xlu1 %1174  ;;  %s2885_s26 = sshll.u32 %s709_s0, 3 }
 0x122   : > { %v1339_v61 = vsel %vm1329_vm14, %v1322_v6, %v1175_v54  ;;  %v1324_v14 = vsel %vm1312_vm13, %v1307_v23, %v1160_v45  ;;  %s711_s30 = scalar_lea.vmem %s4353_s10, %s2885_s26 }
 0x125   : > { %v1843_v56 = vpop.permute.xlu0 %1842  ;;  %v1858_v36 = vpop.permute.xlu1 %1857 }
 0x126   : > { %v2021_v37 = vsel %vm2011_vm0, %v2004_v3, %v1858_v36  ;;  %v2006_v30 = vsel %vm1295_vm10, %v1990_v10, %v1843_v56 }
 0x129   : > { %v1177_v27 = vpop.permute.xlu0 %1176  ;;  %v1203_v59 = vpop.permute.xlu1 %1202 }
 0x12a   : > { %v1356_v51 = vsel %vm1346_vm15, %v1339_v61, %v1203_v59  ;;  %v1341_v18 = vsel %vm1329_vm14, %v1324_v14, %v1177_v27 }
 0x12d   : > { %v1860_v49 = vpop.permute.xlu0 %1859  ;;  %v1886_v44 = vpop.permute.xlu1 %1885 }
 0x12e   : > { %v2037_v39 = vsel %vm1312_vm13, %v2021_v37, %v1886_v44  ;;  %v2023_v58 = vsel %vm2011_vm0, %v2006_v30, %v1860_v49 }
 0x131   : > { %v1205_v40 = vpop.permute.xlu0 %1204  ;;  %v1223_v15 = vpop.permute.xlu1 %1222 }
 0x132   : > { %v1373_v34 = vsel %vm1363_vm4, %v1356_v51, %v1223_v15  ;;  %v1358_v42 = vsel %vm1346_vm15, %v1341_v18, %v1205_v40 }
 0x135   : > { %v1888_v47 = vpop.permute.xlu0 %1887  ;;  %v1906_v50 = vpop.permute.xlu1 %1905 }
 0x136   : > { %v2054_v31 = vsel %vm4419_vm9, %v2037_v39, %v1906_v50  ;;  %v2039_v53 = vsel %vm1312_vm13, %v2023_v58, %v1888_v47  ;;  %vm4425_vm9 = vmmov %vm4421_vm7 }
 0x139   : > { %v1225_v28 = vpop.permute.xlu0 %1224  ;;  %v1240_v8 = vpop.permute.xlu1 %1239 }
 0x13a   : > { %v1390_v33 = vsel %vm1380_vm6, %v1373_v34, %v1240_v8  ;;  %v1375_v32 = vsel %vm1363_vm4, %v1358_v42, %v1225_v28 }
 0x13d   : > { %v1908_v4 = vpop.permute.xlu0 %1907  ;;  %v1923_v43 = vpop.permute.xlu1 %1922 }
 0x13e   : > { %v2070_v29 = vsel %vm1329_vm14, %v2054_v31, %v1923_v43  ;;  %v2056_v16 = vsel %vm4423_vm1, %v2039_v53, %v1908_v4 }
 0x141   : > { %v1242_v12 = vpop.permute.xlu0 %1241  ;;  %v1268_v25 = vpop.permute.xlu1 %1267 }
 0x142   : > { %v1407_v22 = vsel %vm1397_vm8, %v1390_v33, %v1268_v25  ;;  %v1392_v1 = vsel %vm1380_vm6, %v1375_v32, %v1242_v12 }
 0x145   : > { %v1925_v2 = vpop.permute.xlu0 %1924  ;;  %v1951_v35 = vpop.permute.xlu1 %1950 }
 0x146   : > { %v2087_v55 = vsel %vm4421_vm7, %v2070_v29, %v1951_v35  ;;  %v2072_v21 = vsel %vm1329_vm14, %v2056_v16, %v1925_v2  ;;  %vm4427_vm7 = vmmov %vm4423_vm1 }
 0x147   : > { %vm4429_vm1 = vmmov %vm4425_vm9 }
 0x149   : > { %v1270_v63 = vpop.permute.xlu0 %1269  ;;  %v1288_v11 = vpop.permute.xlu1 %1287 }
 0x14a   : > { %v1424_v20 = vsel %vm1414_vm11, %v1407_v22, %v1288_v11  ;;  %v1409_v57 = vsel %vm1397_vm8, %v1392_v1, %v1270_v63 }
 0x14b   : > { %3021 = vmatprep.mubr.msk.bf16.mxu0 %vm4420_vm5, %v1424_v20  ;;  %vm4426_vm5 = vmmov %vm4422_vm3 }
 0x14d   : > { %v1953_v19 = vpop.permute.xlu0 %1952  ;;  %v1971_v41 = vpop.permute.xlu1 %1970 }
 0x14e   : > { %v2103_v13 = vsel %vm1346_vm15, %v2087_v55, %v1971_v41  ;;  %v2089_v52 = vsel %vm4425_vm9, %v2072_v21, %v1953_v19 }
 0x14f   : > { %2999 = vmatprep.mubr.msk.bf16.mxu1 %vm4422_vm3, %v2103_v13  ;;  %vm4428_vm3 = vmmov %vm4424_vm2 }
 0x151   : > { %v1105_v48 = vpop.permute.xlu0 %1104  ;;  %v1290_v9 = vpop.permute.xlu1 %1289 }
 0x152   : > { %v1426_v38 = vsel %vm1414_vm11, %v1409_v57, %v1290_v9  ;;  %v1309_v35 = vsel %vm1295_vm10, %v3691_v17, %v1105_v48 }
 0x153   : > { %3022 = vmatmul.mubr.msk.bf16.gmra.mrb[8].mxu0 %vm4424_vm2, %v1426_v38  ;;  %vm4431_vm2 = vmmov %vm4426_vm5 }
 0x155   : > { %v1789_v5 = vpop.permute.xlu0 %1788  ;;  %v1973_v7 = vpop.permute.xlu1 %1972 }
 0x156   : > { %v2105_v60 = vsel %vm1346_vm15, %v2089_v52, %v1973_v7  ;;  %v1992_v37 = vsel %vm1978_vm12, %v3705_v24, %v1789_v5 }
 0x157   : > { %3000 = vmatmul.mubr.msk.bf16.gmra.mrb[8].mxu1 %vm4426_vm5, %v2105_v60 }
 0x159   : > { %v1107_v45 = vpop.permute.xlu0 %1106  ;;  %v1162_v54 = vpop.permute.xlu1 %1161 }
 0x15a   : > { %v1326_v51 = vsel %vm1312_vm13, %v1309_v35, %v1162_v54  ;;  %v1311_v29 = vsel %vm1295_vm10, %v3787_v0, %v1107_v45 }
 0x15d   : > { %v1791_v56 = vpop.permute.xlu0 %1790  ;;  %v1845_v36 = vpop.permute.xlu1 %1844 }
 0x15e   : > { %v2008_v63 = vsel %vm1295_vm10, %v1992_v37, %v1845_v36  ;;  %v1994_v24 = vsel %vm1978_vm12, %v3812_v62, %v1791_v56  ;;  %vm4430_vm12 = vmmov %vm4427_vm7  ;;  %v4230_v36 = vld [vmem:[%s4351_s8] ss:$0 sm:$0xff] }
 0x161   : > { %v1164_v27 = vpop.permute.xlu0 %1163  ;;  %v1179_v59 = vpop.permute.xlu1 %1178 }
 0x162   : > { %v1343_v46 = vsel %vm1329_vm14, %v1326_v51, %v1179_v59  ;;  %v1328_v55 = vsel %vm1312_vm13, %v1311_v29, %v1164_v27 }
 0x165   : > { %v1847_v49 = vpop.permute.xlu0 %1846  ;;  %v1862_v44 = vpop.permute.xlu1 %1861 }
 0x166   : > { %v2025_v39 = vsel %vm2011_vm0, %v2008_v63, %v1862_v44  ;;  %v2010_v19 = vsel %vm1295_vm10, %v1994_v24, %v1847_v49 }
 0x169   : > { %v1181_v40 = vpop.permute.xlu0 %1180  ;;  %v1207_v15 = vpop.permute.xlu1 %1206 }
 0x16a   : > { %v1360_v33 = vsel %vm1346_vm15, %v1343_v46, %v1207_v15  ;;  %v1345_v42 = vsel %vm1329_vm14, %v1328_v55, %v1181_v40 }
 0x16d   : > { %v1864_v47 = vpop.permute.xlu0 %1863  ;;  %v1890_v50 = vpop.permute.xlu1 %1889 }
 0x16e   : > { %v2041_v31 = vsel %vm1312_vm13, %v2025_v39, %v1890_v50  ;;  %v2027_v13 = vsel %vm2011_vm0, %v2010_v19, %v1864_v47  ;;  %vm4432_vm0 = vmmov %vm4429_vm1 }
 0x171   : > { %v1209_v28 = vpop.permute.xlu0 %1208  ;;  %v1227_v8 = vpop.permute.xlu1 %1226 }
 0x172   : > { %v1377_v22 = vsel %vm1363_vm4, %v1360_v33, %v1227_v8  ;;  %v1362_v62 = vsel %vm1346_vm15, %v1345_v42, %v1209_v28 }
 0x175   : > { %v1892_v4 = vpop.permute.xlu0 %1891  ;;  %v1910_v43 = vpop.permute.xlu1 %1909 }
 0x176   : > { %v2058_v18 = vsel %vm4427_vm7, %v2041_v31, %v1910_v43  ;;  %v2043_v30 = vsel %vm1312_vm13, %v2027_v13, %v1892_v4  ;;  %vm4433_vm13 = vmmov %vm4431_vm2 }
 0x179   : > { %v1229_v12 = vpop.permute.xlu0 %1228  ;;  %v1244_v25 = vpop.permute.xlu1 %1243 }
 0x17a   : > { %v1394_v11 = vsel %vm1380_vm6, %v1377_v22, %v1244_v25  ;;  %v1379_v58 = vsel %vm1363_vm4, %v1362_v62, %v1229_v12  ;;  %vm4434_vm4 = vmmov %vm4428_vm3 }
 0x17d   : > { %v1912_v26 = vpop.permute.xlu0 %1911  ;;  %v1927_v6 = vpop.permute.xlu1 %1926 }
 0x17e   : > { %v2074_v41 = vsel %vm1329_vm14, %v2058_v18, %v1927_v6  ;;  %v2060_v57 = vsel %vm4430_vm12, %v2043_v30, %v1912_v26 }
 0x181   : > { %v1246_v61 = vpop.permute.xlu0 %1245  ;;  %v1272_v2 = vpop.permute.xlu1 %1271 }
 0x182   : > { %v1411_v17 = vsel %vm1397_vm8, %v1394_v11, %v1272_v2  ;;  %v1396_v48 = vsel %vm1380_vm6, %v1379_v58, %v1246_v61 }
 0x185   : > { %v1929_v34 = vpop.permute.xlu0 %1928  ;;  %v1955_v3 = vpop.permute.xlu1 %1954 }
 0x186   : > { %v2091_v10 = vsel %vm4429_vm1, %v2074_v41, %v1955_v3  ;;  %v2076_v9 = vsel %vm1329_vm14, %v2060_v57, %v1929_v34  ;;  %vm4436_vm14 = vcmask 1041408  }
 0x189   : > { %v1274_v20 = vpop.permute.xlu0 %1273  ;;  %v1292_v23 = vpop.permute.xlu1 %1291 }
 0x18a   : > { %v1428_v14 = vsel %vm1414_vm11, %v1411_v17, %v1292_v23  ;;  %v1413_v53 = vsel %vm1397_vm8, %v1396_v48, %v1274_v20  ;;  %vm4435_vm8 = vcmask 1040384  }
 0x18b   : > { %3025 = vmatprep.mubr.msk.bf16.mxu0 %vm4428_vm3, %v1428_v14 }
 0x18d   : > { %v1957_v0 = vpop.permute.xlu0 %1956  ;;  %v1975_v32 = vpop.permute.xlu1 %1974 }
 0x18e   : > { %v2107_v1 = vsel %vm1346_vm15, %v2091_v10, %v1975_v32  ;;  %v2093_v38 = vsel %vm4432_vm0, %v2076_v9, %v1957_v0 }
 0x18f   : > { %3003 = vmatprep.mubr.msk.bf16.mxu1 %vm4431_vm2, %v2107_v1 }
 0x191   : > { %v1294_v16 = vpop.permute.xlu0 %1293  ;;  %v1977_v21 = vpop.permute.xlu1 %1976 }
 0x192   : > { %v1430_v52 = vsel %vm1414_vm11, %v1413_v53, %v1294_v16  ;;  %v2109_v5 = vsel %vm1346_vm15, %v2093_v38, %v1977_v21  ;;  %vm2460_vm11 = vcmask 27648  }
 0x193   : > { %3004 = vmatmul.mubr.msk.bf16.gmra.mrb[12].mxu1 %vm4433_vm13, %v2109_v5  ;;  %3026 = vmatmul.mubr.msk.bf16.gmra.mrb[12].mxu0 %vm4434_vm4, %v1430_v52 }
 0x1a7   : > { %v3015_v7 = vpop.f32.mrb[0].mxu0 }
 0x1a8   : > { %v2310_v60 = vpop.f32.mrb[1].mxu0 }
 0x1a9   : > { %v3016_v45 = vpop.f32.mrb[2].mxu0 }
 0x1aa   : > { %v2313_v54 = vpop.f32.mrb[3].mxu0 }
 0x1ab   : > { %v2993_v56 = vpop.f32.mrb[0].mxu1 }
 0x1ac   : > { %v2319_v27 = vadd.f32 %v3015_v7, %v2993_v56  ;;  %v2177_v59 = vpop.f32.mrb[1].mxu1 }
 0x1ad   : > { %v2311_v49 = vadd.f32 %v2310_v60, %v2177_v59  ;;  %v2994_v44 = vpop.f32.mrb[2].mxu1 }
 0x1ae   : > { %v2382_v40 = vadd.f32 %v4230_v36, %v2319_v27  ;;  %v2322_v15 = vadd.f32 %v3016_v45, %v2994_v44  ;;  %v2180_v47 = vpop.f32.mrb[3].mxu1 }
 0x1af   : > { %v2380_v50 = vadd.f32 %v4230_v36, %v2311_v49  ;;  %v2314_v28 = vadd.f32 %v2313_v54, %v2180_v47 }
 0x1b0   : > { %v2952_v8 = vpack.c.bf16 %v2382_v40, %v2382_v40  ;;  %v2383_v4 = vadd.f32 %v4230_v36, %v2322_v15  ;;  %v2516_v26 = vmul.f32 %v2382_v40, %v2382_v40  ;;  %v2480_v34 = vsel %vm1295_vm10, %v2382_v40, 0.0 }
 0x1b1   : > { %v2950_v43 = vpack.c.bf16 %v2380_v50, %v2380_v50  ;;  %v2514_v12 = vmul.f32 %v2380_v50, %v2380_v50  ;;  %v2381_v25 = vadd.f32 %v4230_v36, %v2314_v28  ;;  %v2477_v61 = vsel %vm1295_vm10, %v2380_v50, 0.0 }
 0x1b2   : > { %2463 = vst.msk [vmem:[%s4237_s28 + $0x8] sm:$0xf] %vm2460_vm11, %v2952_v8  ;;  %v2953_v6 = vpack.c.bf16 %v2383_v4, %v2383_v4  ;;  %v2517_v33 = vmul.f32 %v2383_v4, %v2383_v4  ;;  %v2533_v11 = vsel %vm1295_vm10, %v2516_v26, 0.0  ;;  %v2482_v39 = vsel %vm1295_vm10, %v2383_v4, 0.0 }
 0x1b3   : > { %2461 = vst.msk [vmem:[%s4237_s28] sm:$0xf] %vm2460_vm11, %v2950_v43  ;;  %v2951_v2 = vpack.c.bf16 %v2381_v25, %v2381_v25  ;;  %v2478_v35 = vsel %vm1295_vm10, %v2381_v25, 0.0  ;;  %v2515_v51 = vmul.f32 %v2381_v25, %v2381_v25  ;;  %v2530_v3 = vsel %vm1295_vm10, %v2514_v12, 0.0 }
 0x1b4   : > { %2464 = vst.msk [vmem:[%s4237_s28 + $0xc] sm:$0xf] %vm2460_vm11, %v2953_v6  ;;  %v2479_v46 = vadd.f32 %v2478_v35, %v2477_v61  ;;  %v2535_v23 = vsel %vm1295_vm10, %v2517_v33, 0.0 }
 0x1b5   : > { %2462 = vst.msk [vmem:[%s4237_s28 + $0x4] sm:$0xf] %vm2460_vm11, %v2951_v2  ;;  %v2531_v37 = vsel %vm1295_vm10, %v2515_v51, 0.0 }
 0x1b6   : > { %v2481_v22 = vadd.f32 %v2480_v34, %v2479_v46  ;;  %v2532_v63 = vadd.f32 %v2531_v37, %v2530_v3 }
 0x1b8   : > { %v2534_v17 = vadd.f32 %v2533_v11, %v2532_v63  ;;  %v2483_v20 = vadd.f32 %v2482_v39, %v2481_v22 }
 0x1ba   : > { %v2536_v31 = vadd.f32 %v2535_v23, %v2534_v17 }
 0x1e7   : > { %v3019_v14 = vpop.f32.mrb[4].mxu0 }
 0x1e8   : > { %v2326_v29 = vpop.f32.mrb[5].mxu0 }
 0x1e9   : > { %v3020_v24 = vpop.f32.mrb[6].mxu0 }
 0x1ea   : > { %v2329_v18 = vpop.f32.mrb[7].mxu0 }
 0x1eb   : > { %v2997_v55 = vpop.f32.mrb[4].mxu1 }
 0x1ec   : > { %v2335_v19 = vadd.f32 %v3019_v14, %v2997_v55  ;;  %v2193_v41 = vpop.f32.mrb[5].mxu1 }
 0x1ed   : > { %v2327_v42 = vadd.f32 %v2326_v29, %v2193_v41  ;;  %v2998_v13 = vpop.f32.mrb[6].mxu1 }
 0x1ee   : > { %v2386_v10 = vadd.f32 %v4230_v36, %v2335_v19  ;;  %v2338_v0 = vadd.f32 %v3020_v24, %v2998_v13  ;;  %v2196_v32 = vpop.f32.mrb[7].mxu1 }
 0x1ef   : > { %v2384_v62 = vadd.f32 %v4230_v36, %v2327_v42  ;;  %v2330_v30 = vadd.f32 %v2329_v18, %v2196_v32 }
 0x1f0   : > { %v2956_v1 = vpack.c.bf16 %v2386_v10, %v2386_v10  ;;  %v2387_v58 = vadd.f32 %v4230_v36, %v2338_v0  ;;  %v2520_v7 = vmul.f32 %v2386_v10, %v2386_v10  ;;  %v2488_v56 = vsel %vm1295_vm10, %v2386_v10, 0.0 }
 0x1f1   : > { %v2954_v57 = vpack.c.bf16 %v2384_v62, %v2384_v62  ;;  %v2484_v48 = vsel %vm1295_vm10, %v2384_v62, 0.0  ;;  %v2518_v9 = vmul.f32 %v2384_v62, %v2384_v62  ;;  %v2385_v53 = vadd.f32 %v4230_v36, %v2330_v30 }
 0x1f2   : > { %2467 = vst.msk [vmem:[%s4237_s28 + $0x18] sm:$0xf] %vm2460_vm11, %v2956_v1  ;;  %v2485_v38 = vadd.f32 %v2484_v48, %v2483_v20  ;;  %v2957_v16 = vpack.c.bf16 %v2387_v58, %v2387_v58  ;;  %v2521_v27 = vmul.f32 %v2387_v58, %v2387_v58  ;;  %v2490_v44 = vsel %vm1295_vm10, %v2387_v58, 0.0 }
 0x1f3   : > { %2465 = vst.msk [vmem:[%s4237_s28 + $0x10] sm:$0xf] %vm2460_vm11, %v2954_v57  ;;  %v2537_v21 = vsel %vm1295_vm10, %v2518_v9, 0.0  ;;  %v2955_v52 = vpack.c.bf16 %v2385_v53, %v2385_v53  ;;  %v2486_v5 = vsel %vm1295_vm10, %v2385_v53, 0.0  ;;  %v2519_v54 = vmul.f32 %v2385_v53, %v2385_v53 }
 0x1f4   : > { %v2538_v60 = vadd.f32 %v2537_v21, %v2536_v31  ;;  %2468 = vst.msk [vmem:[%s4237_s28 + $0x1c] sm:$0xf] %vm2460_vm11, %v2957_v16  ;;  %v2487_v45 = vadd.f32 %v2486_v5, %v2485_v38  ;;  %v2541_v15 = vsel %vm1295_vm10, %v2520_v7, 0.0  ;;  %v2543_v28 = vsel %vm1295_vm10, %v2521_v27, 0.0 }
 0x1f5   : > { %2466 = vst.msk [vmem:[%s4237_s28 + $0x14] sm:$0xf] %vm2460_vm11, %v2955_v52  ;;  %v2539_v49 = vsel %vm1295_vm10, %v2519_v54, 0.0 }
 0x1f6   : > { %v2489_v59 = vadd.f32 %v2488_v56, %v2487_v45  ;;  %v2540_v40 = vadd.f32 %v2539_v49, %v2538_v60 }
 0x1f8   : > { %v2491_v47 = vadd.f32 %v2490_v44, %v2489_v59  ;;  %v2542_v50 = vadd.f32 %v2541_v15, %v2540_v40 }
 0x1fa   : > { %v2544_v8 = vadd.f32 %v2543_v28, %v2542_v50 }
 0x226   : > { %v3023_v4 = vpop.f32.mrb[8].mxu0 }
 0x227   : > { %v2342_v43 = vpop.f32.mrb[9].mxu0 }
 0x228   : > { %v3024_v12 = vpop.f32.mrb[10].mxu0 }
 0x229   : > { %v2345_v25 = vpop.f32.mrb[11].mxu0 }
 0x22a   : > { %v3001_v26 = vpop.f32.mrb[8].mxu1 }
 0x22b   : > { %v2351_v6 = vadd.f32 %v3023_v4, %v3001_v26  ;;  %v2209_v61 = vpop.f32.mrb[9].mxu1 }
 0x22c   : > { %v2343_v2 = vadd.f32 %v2342_v43, %v2209_v61  ;;  %v3002_v35 = vpop.f32.mrb[10].mxu1 }
 0x22d   : > { %v2390_v51 = vadd.f32 %v4230_v36, %v2351_v6  ;;  %v2354_v46 = vadd.f32 %v3024_v12, %v3002_v35  ;;  %v2212_v34 = vpop.f32.mrb[11].mxu1 }
 0x22e   : > { %v2388_v3 = vadd.f32 %v4230_v36, %v2343_v2  ;;  %v2346_v33 = vadd.f32 %v2345_v25, %v2212_v34 }
 0x22f   : > { %v2960_v37 = vpack.c.bf16 %v2390_v51, %v2390_v51  ;;  %v2391_v22 = vadd.f32 %v4230_v36, %v2354_v46  ;;  %v2524_v24 = vmul.f32 %v2390_v51, %v2390_v51  ;;  %v2496_v41 = vsel %vm1295_vm10, %v2390_v51, 0.0 }
 0x230   : > { %v2958_v63 = vpack.c.bf16 %v2388_v3, %v2388_v3  ;;  %v2492_v11 = vsel %vm1295_vm10, %v2388_v3, 0.0  ;;  %v2522_v39 = vmul.f32 %v2388_v3, %v2388_v3  ;;  %v2389_v17 = vadd.f32 %v4230_v36, %v2346_v33 }
 0x231   : > { %2471 = vst.msk [vmem:[%s4237_s28 + $0x28] sm:$0xf] %vm2460_vm11, %v2960_v37  ;;  %v2493_v20 = vadd.f32 %v2492_v11, %v2491_v47  ;;  %v2961_v23 = vpack.c.bf16 %v2391_v22, %v2391_v22  ;;  %v2525_v42 = vmul.f32 %v2391_v22, %v2391_v22  ;;  %v2498_v0 = vsel %vm1295_vm10, %v2391_v22, 0.0 }
 0x232   : > { %2469 = vst.msk [vmem:[%s4237_s28 + $0x20] sm:$0xf] %vm2460_vm11, %v2958_v63  ;;  %v2545_v31 = vsel %vm1295_vm10, %v2522_v39, 0.0  ;;  %v2959_v14 = vpack.c.bf16 %v2389_v17, %v2389_v17  ;;  %v2494_v29 = vsel %vm1295_vm10, %v2389_v17, 0.0  ;;  %v2523_v19 = vmul.f32 %v2389_v17, %v2389_v17 }
 0x233   : > { %v2546_v18 = vadd.f32 %v2545_v31, %v2544_v8  ;;  %2472 = vst.msk [vmem:[%s4237_s28 + $0x2c] sm:$0xf] %vm2460_vm11, %v2961_v23  ;;  %v2495_v55 = vadd.f32 %v2494_v29, %v2493_v20  ;;  %v2549_v62 = vsel %vm1295_vm10, %v2524_v24, 0.0  ;;  %v2551_v58 = vsel %vm1295_vm10, %v2525_v42, 0.0 }
 0x234   : > { %2470 = vst.msk [vmem:[%s4237_s28 + $0x24] sm:$0xf] %vm2460_vm11, %v2959_v14  ;;  %v2547_v10 = vsel %vm1295_vm10, %v2523_v19, 0.0 }
 0x235   : > { %v2497_v13 = vadd.f32 %v2496_v41, %v2495_v55  ;;  %v2548_v32 = vadd.f32 %v2547_v10, %v2546_v18 }
 0x237   : > { %v2499_v30 = vadd.f32 %v2498_v0, %v2497_v13  ;;  %v2550_v1 = vadd.f32 %v2549_v62, %v2548_v32 }
 0x239   : > { %v2552_v57 = vadd.f32 %v2551_v58, %v2550_v1 }
 0x266   : > { %v3005_v48 = vpop.f32.mrb[12].mxu1  ;;  %v3027_v9 = vpop.f32.mrb[12].mxu0 }
 0x267   : > { %v2367_v53 = vadd.f32 %v3027_v9, %v3005_v48  ;;  %v2225_v38 = vpop.f32.mrb[13].mxu1  ;;  %v2358_v16 = vpop.f32.mrb[13].mxu0 }
 0x268   : > { %v2359_v21 = vadd.f32 %v2358_v16, %v2225_v38  ;;  %v3006_v52 = vpop.f32.mrb[14].mxu1  ;;  %v3028_v5 = vpop.f32.mrb[14].mxu0 }
 0x269   : > { %v2394_v7 = vadd.f32 %v4230_v36, %v2367_v53  ;;  %v2370_v60 = vadd.f32 %v3028_v5, %v3006_v52  ;;  %v2228_v45 = vpop.f32.mrb[15].mxu1  ;;  %v2361_v54 = vpop.f32.mrb[15].mxu0 }
 0x26a   : > { %v2392_v56 = vadd.f32 %v4230_v36, %v2359_v21  ;;  %v2362_v27 = vadd.f32 %v2361_v54, %v2228_v45 }
 0x26b   : > { %v2964_v59 = vpack.c.bf16 %v2394_v7, %v2394_v7  ;;  %v2395_v49 = vadd.f32 %v4230_v36, %v2370_v60  ;;  %v2528_v12 = vmul.f32 %v2394_v7, %v2394_v7 }
 0x26c   : > { %v2962_v44 = vpack.c.bf16 %v2392_v56, %v2392_v56  ;;  %v2500_v40 = vsel %vm1295_vm10, %v2392_v56, 0.0  ;;  %v2526_v15 = vmul.f32 %v2392_v56, %v2392_v56  ;;  %v2393_v47 = vadd.f32 %v4230_v36, %v2362_v27 }
 0x26d   : > { %2475 = vst.msk [vmem:[%s4237_s28 + $0x38] sm:$0xf] %vm2460_vm11, %v2964_v59  ;;  %v2501_v50 = vadd.f32 %v2500_v40, %v2499_v30  ;;  %v2965_v28 = vpack.c.bf16 %v2395_v49, %v2395_v49  ;;  %v2504_v36 = vsel %vm1295_vm10, %v2394_v7, 0.0  ;;  %v2529_v61 = vmul.f32 %v2395_v49, %v2395_v49 }
 0x26e   : > { %2473 = vst.msk [vmem:[%s4237_s28 + $0x30] sm:$0xf] %vm2460_vm11, %v2962_v44  ;;  %v2553_v8 = vsel %vm1295_vm10, %v2526_v15, 0.0  ;;  %v2963_v4 = vpack.c.bf16 %v2393_v47, %v2393_v47  ;;  %v2502_v43 = vsel %vm1295_vm10, %v2393_v47, 0.0  ;;  %v2527_v6 = vmul.f32 %v2393_v47, %v2393_v47 }
 0x26f   : > { %v2554_v25 = vadd.f32 %v2553_v8, %v2552_v57  ;;  %2476 = vst.msk [vmem:[%s4237_s28 + $0x3c] sm:$0xf] %vm2460_vm11, %v2965_v28  ;;  %v2503_v26 = vadd.f32 %v2502_v43, %v2501_v50  ;;  %v2506_v51 = vsel %vm1295_vm10, %v2395_v49, 0.0  ;;  %v2557_v34 = vsel %vm1295_vm10, %v2528_v12, 0.0 }
 0x270   : > { %2474 = vst.msk [vmem:[%s4237_s28 + $0x34] sm:$0xf] %vm2460_vm11, %v2963_v4  ;;  %v2555_v35 = vsel %vm1295_vm10, %v2527_v6, 0.0  ;;  %v2559_v37 = vsel %vm1295_vm10, %v2529_v61, 0.0 }
 0x271   : > { %v2505_v2 = vadd.f32 %v2504_v36, %v2503_v26  ;;  %v2556_v46 = vadd.f32 %v2555_v35, %v2554_v25 }
 0x273   : > { %v2507_v3 = vadd.f32 %v2506_v51, %v2505_v2  ;;  %v2558_v33 = vadd.f32 %v2557_v34, %v2556_v46 }
 0x275   : > { %v2508_v22 = vrot.slane %v2507_v3, 4  ;;  %v2560_v63 = vadd.f32 %v2559_v37, %v2558_v33 }
 0x277   : > { %v2509_v11 = vadd.f32 %v2508_v22, %v2507_v3  ;;  %v2561_v39 = vrot.slane %v2560_v63, 4 }
 0x279   : > { %v2510_v17 = vrot.slane %v2509_v11, 2  ;;  %v2562_v20 = vadd.f32 %v2561_v39, %v2560_v63 }
 0x27b   : > { %v2511_v23 = vadd.f32 %v2510_v17, %v2509_v11  ;;  %v2563_v31 = vrot.slane %v2562_v20, 2 }
 0x27d   : > { %v2512_v14 = vrot.slane %v2511_v23, 1  ;;  %v2564_v29 = vadd.f32 %v2563_v31, %v2562_v20 }
 0x27f   : > { %v2565_v24 = vrot.slane %v2564_v29, 1  ;;  %v2513_v18 = vadd.f32 %v2512_v14, %v2511_v23 }
 0x281   : > { %v2566_v55 = vadd.f32 %v2565_v24, %v2564_v29 }
 0x283   : > { %v2567_v19 = vsel %vm4435_vm8, %v2513_v18, %v2566_v55 }
 0x284   : > { %v2568_v41 = vsel %vm4436_vm14, %v2567_v19, 0.0 }
 0x285   : > { %2569 = vst.msk [vmem:[%s711_s30] sm:$0xff] %vm1295_vm10, %v2568_v41 }
 0x286 PF: > { %s21_s17 = sadd.s32 1, %s3158_s17   ;;  %s4437_s19 = sld [smem:[#allocation2_spill]] }
 0x287   : > { %p18_p0 = scmp.ge.s32.totalorder %s21_s17, 6   ;;  %s4438_s18 = sld [smem:[#allocation3_spill]] }
 0x288   : > { %s4439_s13 = smov %s3150_s15  ;;  %s4440_s14 = smov %s3154_s16 }
 0x289   :  { %20 = sbr.rel (!%p18_p0) target bundleno = 4 (0x4), region = 113 }
 0x28c   : > { %s4441_s15 = smov %s4437_s19 }
 0x28d   : > { %s4442_s16 = smov %s4438_s18 }

// kernel: spade_resnet_block.11
= control target key start
LH: loop header
LB: loop body
LE: loop exit
PB: predicated region body
PF: predicated region fallthrough
CT: control target
= control target key end

     0   :  { %s2040_s24 = smov 0   ;;  %s2042_s25 = smov 0   ;;  %s2615_s0 = inlined_call_operand.vmem [shape: bf16[2,16,16,4], index: 0, kind: input, shape index: {}, may-alias: {0,1,2}]   ;;  %s2616_s1 = inlined_call_operand.vmem [shape: bf16[2,16,16,4], index: 1, kind: input, shape index: {}, may-alias: {0,1,2}]   ;;  %s2617_s2 = inlined_call_operand.vmem [shape: bf16[2,16,16,4], index: 2, kind: input, shape index: {}, may-alias: {0,1,2}]   ;;  %s2618_s3 = inlined_call_operand.vmem [shape: bf16[36,8], index: 3, kind: input, shape index: {}]   ;;  %s2619_s4 = inlined_call_operand.vmem [shape: bf16[2,16,16,4], index: 4, kind: input, shape index: {}]   ;;  %s2620_s5 = inlined_call_operand.vmem [shape: bf16[4,8], index: 5, kind: input, shape index: {}]   ;;  %s2621_s6 = inlined_call_operand.vmem [shape: f32[1,8], index: 6, kind: input, shape index: {}]   ;;  %s2622_s7 = inlined_call_operand.vmem [shape: f32[2,16,16,8], index: 7, kind: output, shape index: {}]  }
   0x1   :  { %s2044_s26 = smov 0   ;;  %s2046_s27 = smov 0  }
   0x2   :  { %s2048_s28 = smov 0  }
   0x3 LB: > { %s26_s29 = sadd.s32 1, %s1982_s26  ;;  %s29_s30 = sadd.s32 1, %s1986_s27  ;;  %s1990_s28 = sphi %s2048_s28, %s17_s28   ;;  %s1986_s27 = sphi %s2046_s27, %s2638_s27   ;;  %s1982_s26 = sphi %s2044_s26, %s2637_s26   ;;  %s1978_s25 = sphi %s2042_s25, %s2636_s25   ;;  %s1974_s24 = sphi %s2040_s24, %s2635_s24  }
   0x4   : > { %p27_p0 = scmp.ge.s32.totalorder %s26_s29, 2  ;;  %p1735_p1 = scmp.ge.s32.totalorder %s1990_s28, 1 }
   0x5   : > { %p341_p2 = scmp.lt.s32.totalorder %s1990_s28, 5 }
   0x6   : > { %s2640_s29 = smov (%p27_p0, %s26_s29), 0  ;;  %s2642_s30 = smov (!%p27_p0, %s29_s30), %s1986_s27 }
   0x7   : > { %p342_p3 = pnand %p1735_p1, %p341_p2  ;;  %p31_p4 = scmp.ge.s32.totalorder %s2642_s30, 2 }
   0x8   : > { %s2073_s8 = sshll.u32 (!%p342_p3), %s1974_s24, 3  ;;  %p420_p5 = scmp.lt.s32.totalorder (!%p342_p3), %s1978_s25, 1  ;;  %vm686_vm0 = vcmask (!%p342_p3), 1040384   ;;  %vm687_vm1 = vsmask.f32 (!%p342_p3), 256  ;;  %vm898_vm3 = vcmask (!%p342_p3), 1046528  }
   0x9   : > { %s2644_s30 = smov (%p31_p4, %s2642_s30), 0  ;;  %345 = sbr.rel (%p342_p3) target bundleno = 495 (0x1ef), region = 48 }
   0xa   : > { %p422_p6 = scmp.lt.s32.totalorder (!%p342_p3), %s2073_s8, 15  ;;  %s1741_s17 = sadd.s32 (!%p342_p3), 4294967295, %s2073_s8  ;;  %vm2095_vm2 = vmand (!%p342_p3), %vm686_vm0, %vm687_vm1  ;;  %vm769_vm9 = vsmask.f32 (!%p342_p3), 7424 }
   0xb   : > { %p488_p7 = scmp.gt.s32.totalorder (!%p342_p3), %s1974_s24, 0  ;;  %p432_p8 = scmp.gt.s32.totalorder (!%p342_p3), %s1741_s17, 0 }
   0xc   : > { %p1742_p9 = scmp.lt.s32.totalorder (!%p342_p3), %s1741_s17, 15  ;;  %p489_p12 = scmp.lt.s32.totalorder (!%p342_p3), %s1974_s24, 1 }
  0x10   : > { %s2646_s25 = smov (!%p420_p5, %s1978_s25), 1 }
  0x11   : > { %s423_s9 = scalar_select %p422_p6, %s2073_s8, 15 }
  0x12   : > { %s2077_s10 = sshll.u32 %s2646_s25, 5  ;;  %s1992_s25 = smov 12  }
  0x13   : > { %s1737_s11 = sshll.u32 %s423_s9, 1 }
  0x14   : > { %s2080_s12 = sadd.s32 %s2077_s10, %s1737_s11 }
  0x15   : > { %s1739_s13 = sshll.u32 %s2080_s12, 2 }
  0x16   : > { %s2088_s16 = scalar_lea.vmem %s2615_s0, %s1739_s13 }
  0x17   : > { %v1933_v0 = vld [vmem:[%s2088_s16 + $0x8] sm:$0xff]   ;;  %v1934_v1 = vld [vmem:[%s2088_s16] sm:$0xff]   ;;  %v1935_v6 = vld [vmem:[%s2088_s16 + $0x10] sm:$0xff]   ;;  %s508_s18 = scalar_select %p488_p7, 1, 0 }
  0x18   : > { %v611_v2 = vshrl.u32 %v1933_v0, 16  ;;  %v614_v3 = vshll.u32 %v1933_v0, 16  ;;  %v604_v4 = vshrl.u32 %v1934_v1, 16  ;;  %v607_v5 = vshll.u32 %v1934_v1, 16  ;;  %s433_s19 = scalar_select %p432_p8, %s1741_s17, 0  ;;  %v2106_v17 = vld [vmem:[%s2088_s16 + $0x18] sm:$0xff]  }
  0x19   : > { %v618_v10 = vshrl.u32 %v1935_v6, 16  ;;  %v621_v11 = vshll.u32 %v1935_v6, 16  ;;  %s2103_s20 = scvt.s32.f32 %s508_s18  ;;  %v2114_v24 = vld [vmem:[%s2088_s16 + $0x20] sm:$0xff]   ;;  %v625_v30 = vshrl.u32 %v2106_v17, 16  ;;  %v628_v33 = vshll.u32 %v2106_v17, 16  ;;  %s2627_s17 = smov 32  }
  0x1a   : > { %v613_v7 = vrot.slane %v611_v2, 7  ;;  %v606_v9 = vrot.slane %v604_v4, 7  ;;  %s2648_s19 = smov (!%p1742_p9, %s433_s19), 15  ;;  %v632_v41 = vshrl.u32 %v2114_v24, 16  ;;  %v635_v2 = vshll.u32 %v2114_v24, 16 }
  0x1b   : > { %v620_v15 = vrot.slane %v618_v10, 7  ;;  %p511_p10 = scmp.ne.f32.partialorder %s2103_s20, %s2103_s20  ;;  %s512_s21 = sshrl.u32 %s2103_s20, 16  ;;  %v627_v55 = vrot.slane %v625_v30, 7 }
  0x1c   : > { %v616_v12 = vor.u32 %v614_v3, %v613_v7  ;;  %v701_v13 = vsel %vm2095_vm2, %v613_v7, 0  ;;  %v609_v14 = vor.u32 %v607_v5, %v606_v9  ;;  %v700_v16 = vsel %vm2095_vm2, %v606_v9, 0  ;;  %s1747_s22 = sshll.u32 %s2648_s19, 1  ;;  %s513_s23 = sand.u32 1, %s512_s21 }
  0x1d   : > { %vm714_vm4 = vcmp.ge.bf16.partialorder %v701_v13, 0  ;;  %vm712_vm5 = vcmp.ge.bf16.partialorder %v700_v16, 0  ;;  %v732_v19 = vmul.bf16 1045249613, %v700_v16  ;;  %v734_v20 = vmul.bf16 1045249613, %v701_v13  ;;  %s440_s9 = sadd.s32 %s1747_s22, %s2077_s10 }
  0x1e   : > { %v691_v18 = vsel %vm2095_vm2, 0, %v616_v12  ;;  %v690_v22 = vsel %vm2095_vm2, 0, %v609_v14  ;;  %v623_v23 = vor.u32 %v621_v11, %v620_v15  ;;  %s514_s11 = sadd.s32 32767, %s513_s23  ;;  %s1749_s14 = sshll.u32 %s440_s9, 2  ;;  %v702_v48 = vsel %vm2095_vm2, %v620_v15, 0 }
  0x1f   : > { %vm713_vm6 = vcmp.ge.bf16.partialorder %v691_v18, 0  ;;  %v733_v21 = vmul.bf16 1045249613, %v691_v18  ;;  %vm711_vm7 = vcmp.ge.bf16.partialorder %v690_v22, 0  ;;  %v731_v25 = vmul.bf16 1045249613, %v690_v22  ;;  %s515_s15 = sadd.s32 %s514_s11, %s2103_s20  ;;  %s442_s19 = scalar_lea.vmem %s2616_s1, %s1749_s14 }
  0x20   : > { %v752_v26 = vsel %vm712_vm5, %v700_v16, %v732_v19  ;;  %v692_v28 = vsel %vm2095_vm2, 0, %v623_v23  ;;  %v754_v29 = vsel %vm714_vm4, %v701_v13, %v734_v20  ;;  %s516_s21 = sand.u32 4294901760, %s515_s15  ;;  %s2623_s22 = smov 24   ;;  %vm716_vm10 = vcmp.ge.bf16.partialorder %v702_v48, 0  ;;  %v506_v52 = vld [vmem:[%s442_s19] sm:$0xf] }
  0x21   : > { %v2119_v27 = vsel %vm713_vm6, %v691_v18, %v733_v21  ;;  %v2127_v31 = vsel %vm711_vm7, %v690_v22, %v731_v25  ;;  %vm715_vm8 = vcmp.ge.bf16.partialorder %v692_v28, 0  ;;  %v735_v32 = vmul.bf16 1045249613, %v692_v28  ;;  %s2650_s21 = smov (%p511_p10, %s516_s21), 2143289344  ;;  %v507_v53 = vld [vmem:[%s442_s19 + $0x4] sm:$0xf] }
  0x22   : > { %942 = vrot.lane.b32.xlu1 %v2119_v27, %s1992_s25  ;;  %940 = vrot.lane.b32.xlu0 %v2127_v31, %s1992_s25  ;;  %v902_v34 = vrot.slane %v2127_v31, 1  ;;  %v903_v35 = vrot.slane %v752_v26, 1  ;;  %v797_v36 = vshll.u32 %v2119_v27, 16  ;;  %v802_v37 = vshll.u32 %v754_v29, 16  ;;  %s519_s20 = sshrl.u32 %s2650_s21, 16  ;;  %s448_s9 = sadd.s32 8, %s2073_s8 }
  0x23   : > { %v2136_v38 = vsel %vm715_vm8, %v692_v28, %v735_v32  ;;  %v906_v39 = vrot.slane %v754_v29, 1  ;;  %v785_v40 = vshll.u32 %v2127_v31, 16  ;;  %v905_v42 = vrot.slane %v2119_v27, 1  ;;  %s520_s23 = sshll.u32 %s519_s20, 16  ;;  %s1994_s14 = smov 8   ;;  %v1938_v32 = vld [vmem:[%s2088_s16 + $0x28] sm:$0xff]  }
  0x24   : > { %v795_v43 = vshrl.u32 %v2119_v27, 16  ;;  %v783_v44 = vshrl.u32 %v2127_v31, 16  ;;  %v790_v45 = vshll.u32 %v752_v26, 16  ;;  %v799_v46 = vrot.slane %v797_v36, 1  ;;  %s521_s11 = sor.u32 %s520_s23, %s519_s20  ;;  %s2625_s15 = smov 20   ;;  %v1939_v36 = vld [vmem:[%s2088_s16 + $0x30] sm:$0xff]  }
  0x25   : > { %v804_v47 = vrot.slane %v802_v37, 1  ;;  %v809_v49 = vshll.u32 %v2136_v38, 16  ;;  %v904_v50 = vsel %vm898_vm3, %v902_v34, %v903_v35  ;;  %v736_v51 = vmul.bf16 1045249613, %v702_v48  ;;  %p2167_p11 = scmp.lt.s32.totalorder %s448_s9, 15  ;;  %s1997_s21 = smov 16  }
  0x26   : > { %1007 = vrot.lane.b32.xlu1 %v2136_v38, %s2623_s22  ;;  %1005 = vrot.lane.b32.xlu0 %v2119_v27, %s2623_s22  ;;  %v787_v54 = vrot.slane %v785_v40, 1  ;;  %v792_v56 = vrot.slane %v790_v45, 1  ;;  %v807_v58 = vshrl.u32 %v2136_v38, 16  ;;  %v2161_v59 = vsel %vm898_vm3, %v905_v42, %v906_v39  ;;  %s528_s24 = scalar_select %p489_p12, 1, 0 }
  0x27   : > { %v756_v57 = vsel %vm716_vm10, %v702_v48, %v736_v51  ;;  %v800_v60 = vor.u32 %v799_v46, %v795_v43  ;;  %v811_v61 = vrot.slane %v809_v49, 1  ;;  %v2163_v62 = vrot.slane %v632_v41, 7  ;;  %s2652_s9 = smov (!%p2167_p11, %s448_s9), 15  ;;  %s1998_s23 = smov 4   ;;  %v1941_v41 = vld [vmem:[%s2618_s3] sm:$0xff]   ;;  %v2239_v46 = vld [vmem:[%s2088_s16 + $0x38] sm:$0xff]  }
  0x28   : > { %v814_v63 = vshll.u32 %v756_v57, 16  ;;  %v522_v0 = vstv %s521_s11  ;;  %v630_v1 = vor.u32 %v628_v33, %v627_v55  ;;  %v788_v3 = vor.u32 %v787_v54, %v783_v44  ;;  %s2654_s9 = smov (!%p2167_p11, %s2652_s9), 15  ;;  %s2189_s18 = scvt.s32.f32 %s528_s24  ;;  %1845 = vmatprep.subr.bf16.mxu0 %v1941_v41  ;;  %v1942_v51 = vld [vmem:[%s2618_s3 + $0x8] sm:$0xff]  }
  0x29   : > { %v524_v4 = vmul.bf16 %v522_v0, %v506_v52  ;;  %v525_v5 = vmul.bf16 %v522_v0, %v507_v53  ;;  %v703_v6 = vsel %vm2095_vm2, %v627_v55, 0  ;;  %v2179_v7 = vsel %vm769_vm9, %v800_v60, %v804_v47  ;;  %s2192_s19 = sshll.u32 %s2654_s9, 1  ;;  %s1999_s24 = smov 28   ;;  %1846 = vmatpush3.bf16.msra.mxu0 %v1941_v41 }
  0x2a   : > { %925 = vrot.lane.b32.xlu1 %v904_v50, %s1994_s14  ;;  %988 = vrot.lane.b32.xlu0 %v904_v50, %s2625_s15  ;;  %v693_v10 = vsel %vm2095_vm2, 0, %v630_v1  ;;  %v812_v11 = vor.u32 %v811_v61, %v807_v58  ;;  %v816_v12 = vrot.slane %v814_v63, 1  ;;  %v738_v13 = vmul.bf16 1045249613, %v703_v6  ;;  %s457_s20 = sadd.s32 %s2192_s19, %s2077_s10  ;;  %s532_s9 = sshrl.u32 %s2189_s18, 16 }
  0x2b   : > { %v1765_v9 = vcombine.low %v524_v4, %v525_v5  ;;  %v637_v14 = vor.u32 %v635_v2, %v2163_v62  ;;  %v793_v15 = vsel %vm769_vm9, %v788_v3, %v792_v56  ;;  %vm718_vm11 = vcmp.ge.bf16.partialorder %v703_v6, 0  ;;  %p531_p13 = scmp.ne.f32.partialorder %s2189_s18, %s2189_s18  ;;  %s533_s11 = sand.u32 1, %s532_s9  ;;  %1847 = vmatprep.subr.bf16.mxu0 %v1942_v51 }
  0x2c   : > { %v908_v18 = vrot.slane %v2136_v38, 1  ;;  %v909_v19 = vrot.slane %v756_v57, 1  ;;  %v737_v20 = vmul.bf16 1045249613, %v693_v10  ;;  %vm717_vm12 = vcmp.ge.bf16.partialorder %v693_v10, 0  ;;  %s534_s8 = sadd.s32 32767, %s533_s11 }
  0x2d   : > { %v597_v16 = vshrl.u32 %v1765_v9, 16  ;;  %v600_v17 = vshll.u32 %v1765_v9, 16  ;;  %v2200_v22 = vsel %vm769_vm9, %v812_v11, %v816_v12  ;;  %v2202_v23 = vsel %vm718_vm11, %v703_v6, %v738_v13  ;;  %s535_s9 = sadd.s32 %s534_s8, %s2189_s18  ;;  %s1756_s18 = sshll.u32 %s457_s20, 2  ;;  %1848 = vmatpush3.bf16.msra.mxu0 %v1942_v51 }
  0x2e   : > { %990 = vrot.lane.b32.xlu1 %v2161_v59, %s2625_s15  ;;  %1053 = vrot.lane.b32.xlu0 %v2161_v59, %s2627_s17  ;;  %v694_v24 = vsel %vm2095_vm2, 0, %v637_v14  ;;  %v2212_v28 = vsel %vm898_vm3, %v908_v18, %v909_v19  ;;  %v2214_v30 = vsel %vm717_vm12, %v693_v10, %v737_v20  ;;  %v826_v34 = vshll.u32 %v2202_v23, 16  ;;  %s536_s11 = sand.u32 4294901760, %s535_s9  ;;  %s2288_s20 = scalar_lea.vmem %s2619_s4, %s1739_s13 }
  0x2f   : > { %v599_v21 = vrot.slane %v597_v16, 7  ;;  %vm719_vm14 = vcmp.ge.bf16.partialorder %v694_v24, 0  ;;  %v739_v35 = vmul.bf16 1045249613, %v694_v24  ;;  %v2229_v40 = vsel %vm2095_vm2, %v2163_v62, 0  ;;  %s2656_s11 = smov (%p531_p13, %s536_s11), 2143289344  ;;  %s459_s15 = scalar_lea.vmem %s2617_s2, %s1756_s18 }
  0x30   : > { %v819_v42 = vshrl.u32 %v2214_v30, 16  ;;  %v821_v43 = vshll.u32 %v2214_v30, 16  ;;  %v911_v44 = vrot.slane %v2214_v30, 1  ;;  %v912_v45 = vrot.slane %v2202_v23, 1  ;;  %s539_s16 = sshrl.u32 %s2656_s11, 16  ;;  %s2632_s18 = smov 20  }
  0x31   : > { %v602_v25 = vor.u32 %v600_v17, %v599_v21  ;;  %v699_v26 = vsel %vm2095_vm2, %v599_v21, 0  ;;  %v639_v49 = vshrl.u32 %v1938_v32, 16  ;;  %v642_v50 = vshll.u32 %v1938_v32, 16  ;;  %s540_s8 = sshll.u32 %s539_s16, 16  ;;  %s2634_s10 = smov 32  }
  0x32   : > { %970 = vrot.lane.b32.xlu1 %v2179_v7, %s1997_s21  ;;  %868 = vrot.lane.b32.xlu0 %v793_v15, %s1998_s23  ;;  %vm710_vm13 = vcmp.ge.bf16.partialorder %v699_v26, 0  ;;  %v730_v29 = vmul.bf16 1045249613, %v699_v26  ;;  %v2255_v55 = vrot.slane %v826_v34, 1  ;;  %v646_v58 = vshrl.u32 %v1939_v36, 16 }
  0x33   : > { %v689_v33 = vsel %vm2095_vm2, 0, %v602_v25  ;;  %v641_v57 = vrot.slane %v639_v49, 7  ;;  %v649_v60 = vshll.u32 %v1939_v36, 16  ;;  %v2262_v62 = vsel %vm719_vm14, %v694_v24, %v739_v35 }
  0x34   : > { %vm709_vm15 = vcmp.ge.bf16.partialorder %v689_v33, 0  ;;  %v729_v37 = vmul.bf16 1045249613, %v689_v33  ;;  %v750_v39 = vsel %vm710_vm13, %v699_v26, %v730_v29  ;;  %v740_v63 = vmul.bf16 1045249613, %v2229_v40 }
  0x35   : > { %v778_v48 = vshll.u32 %v750_v39, 16  ;;  %v900_v53 = vrot.slane %v750_v39, 1  ;;  %v653_v0 = vshrl.u32 %v2239_v46, 16  ;;  %v644_v2 = vor.u32 %v642_v50, %v641_v57  ;;  %v526_v29 = vld [vmem:[%s459_s15] sm:$0xf] }
  0x36   : > { %1035 = vrot.lane.b32.xlu1 %v2200_v22, %s1999_s24  ;;  %968 = vrot.lane.b32.xlu0 %v793_v15, %s1997_s21  ;;  %v2246_v47 = vsel %vm709_vm15, %v689_v33, %v729_v37  ;;  %v705_v3 = vsel %vm2095_vm2, %v641_v57, 0  ;;  %v648_v4 = vrot.slane %v646_v58, 7  ;;  %v823_v16 = vrot.slane %v821_v43, 1  ;;  %v527_v43 = vld [vmem:[%s459_s15 + $0x4] sm:$0xf] }
  0x37   : > { %v899_v52 = vrot.slane %v2246_v47, 1  ;;  %v773_v54 = vshll.u32 %v2246_v47, 16  ;;  %v771_v56 = vshrl.u32 %v2246_v47, 16  ;;  %v780_v1 = vrot.slane %v778_v48, 1 }
  0x38   : > { %vm722_vm0 = vcmp.ge.bf16.partialorder %v705_v3, 0  ;;  %v742_v6 = vmul.bf16 1045249613, %v705_v3  ;;  %v695_v10 = vsel %vm2095_vm2, 0, %v644_v2  ;;  %v651_v11 = vor.u32 %v649_v60, %v648_v4 }
  0x39   : > { %v775_v61 = vrot.slane %v773_v54, 1  ;;  %v901_v5 = vsel %vm898_vm3, %v899_v52, %v900_v53  ;;  %v706_v12 = vsel %vm2095_vm2, %v648_v4, 0  ;;  %vm721_vm1 = vcmp.ge.bf16.partialorder %v695_v10, 0  ;;  %v1944_v53 = vld [vmem:[%s2288_s20] sm:$0xff]  }
  0x3a   : > { %870 = vrot.lane.b32.xlu1 %v2179_v7, %s1998_s23  ;;  %1033 = vrot.lane.b32.xlu0 %v2179_v7, %s1999_s24  ;;  %v656_v7 = vshll.u32 %v2239_v46, 16  ;;  %v741_v13 = vmul.bf16 1045249613, %v695_v10  ;;  %v2290_v14 = vsel %vm722_vm0, %v705_v3, %v742_v6  ;;  %v655_v15 = vrot.slane %v653_v0, 7 }
  0x3b   : > { %v776_v9 = vor.u32 %v775_v61, %v771_v56  ;;  %vm720_vm4 = vcmp.ge.bf16.partialorder %v2229_v40, 0  ;;  %v918_v17 = vrot.slane %v2290_v14, 1  ;;  %v696_v18 = vsel %vm2095_vm2, 0, %v651_v11 }
  0x3c   : > { %vm724_vm5 = vcmp.ge.bf16.partialorder %v706_v12, 0  ;;  %v2304_v19 = vsel %vm721_vm1, %v695_v10, %v741_v13  ;;  %vm723_vm6 = vcmp.ge.bf16.partialorder %v696_v18, 0  ;;  %v743_v20 = vmul.bf16 1045249613, %v696_v18 }
  0x3d   : > { %v744_v21 = vmul.bf16 1045249613, %v706_v12  ;;  %v781_v24 = vsel %vm769_vm9, %v776_v9, %v780_v1  ;;  %v833_v25 = vshll.u32 %v2262_v62, 16  ;;  %v917_v26 = vrot.slane %v2304_v19, 1 }
  0x3e   : > { %872 = vrot.lane.b32.xlu1 %v2200_v22, %s1998_s23  ;;  %1055 = vrot.lane.b32.xlu0 %v2212_v28, %s2627_s17  ;;  %s2297_s17 = sor.u32 %s540_s8, %s539_s16  ;;  %v2312_v33 = vsel %vm723_vm6, %v696_v18, %v743_v20  ;;  %v658_v35 = vor.u32 %v656_v7, %v655_v15  ;;  %v707_v36 = vsel %vm2095_vm2, %v655_v15, 0  ;;  %v824_v37 = vor.u32 %v823_v16, %v819_v42  ;;  %s2633_s8 = smov 24  }
  0x3f   : > { %v542_v32 = vstv %s2297_s17  ;;  %v764_v34 = vsel %vm724_vm5, %v706_v12, %v744_v21  ;;  %v855_v39 = vshrl.u32 %v2312_v33, 16  ;;  %v857_v41 = vshll.u32 %v2312_v33, 16 }
  0x40   : > { %v862_v46 = vshll.u32 %v764_v34, 16  ;;  %v920_v48 = vrot.slane %v2312_v33, 1  ;;  %v921_v49 = vrot.slane %v764_v34, 1  ;;  %v697_v50 = vsel %vm2095_vm2, 0, %v658_v35 }
  0x41   : > { %v859_v42 = vrot.slane %v857_v41, 1  ;;  %vm725_vm7 = vcmp.ge.bf16.partialorder %v697_v50, 0  ;;  %v745_v51 = vmul.bf16 1045249613, %v697_v50  ;;  %v544_v52 = vmul.bf16 %v542_v32, %v526_v29 }
  0x42   : > { %923 = vrot.lane.b32.xlu1 %v901_v5, %s1994_s14  ;;  %927 = vrot.lane.b32.xlu0 %v2161_v59, %s1994_s14  ;;  %v2319_v59 = vsel %vm898_vm3, %v917_v26, %v918_v17  ;;  %v864_v54 = vrot.slane %v862_v46, 1  ;;  %v2331_v56 = vsel %vm898_vm3, %v920_v48, %v921_v49  ;;  %vm726_vm8 = vcmp.ge.bf16.partialorder %v707_v36, 0  ;;  %v1943_v5 = vld [vmem:[%s2618_s3 + $0x10] ss:$0 sps:$4 sm:$0x33]  }
  0x43   : > { %v746_v57 = vmul.bf16 1045249613, %v707_v36  ;;  %v2335_v58 = vsel %vm769_vm9, %v824_v37, %v2255_v55  ;;  %v860_v60 = vor.u32 %v859_v42, %v855_v39  ;;  %v2337_v61 = vsel %vm725_vm7, %v697_v50, %v745_v51  ;;  %v1226_v17 = vld [vmem:[%s2620_s5] sm:$0x3]  ;;  %v1946_v39 = vld [vmem:[%s2288_s20 + $0x10] sm:$0xff]   ;;  %v1947_v50 = vld [vmem:[%s2288_s20 + $0x18] sm:$0xff]  }
  0x44   : > { %v545_v0 = vmul.bf16 %v542_v32, %v527_v43  ;;  %v957_v2 = vshrl.u32 %v2337_v61, 16  ;;  %v959_v3 = vshll.u32 %v2337_v61, 16  ;;  %v985_v4 = vrot.slane %v2337_v61, 1  ;;  %v1945_v32 = vld [vmem:[%s2288_s20 + $0x8] sm:$0xff]  }
  0x45   : > { %v766_v1 = vsel %vm726_vm8, %v707_v36, %v746_v57  ;;  %v2350_v55 = vsel %vm769_vm9, %v860_v60, %v864_v54  ;;  %v2357_v10 = vsel %vm720_vm4, %v2229_v40, %v740_v63  ;;  %vm1069_vm10 = vcmask 31744  }
  0x46   : > { %929 = vrot.lane.b32.xlu1 %v2212_v28, %s1994_s14  ;;  %866 = vrot.lane.b32.xlu0 %v781_v24, %s1998_s23  ;;  %v964_v6 = vshll.u32 %v766_v1, 16  ;;  %v986_v7 = vrot.slane %v766_v1, 1  ;;  %v1774_v9 = vcombine.low %v544_v52, %v545_v0  ;;  %v961_v11 = vrot.slane %v959_v3, 1 }
  0x47   : > { %1829 = vmatprep.mubr.msk.bf16.mxu1 %vm1069_vm10, %v1944_v53  ;;  %v913_v40 = vsel %vm898_vm3, %v911_v44, %v912_v45  ;;  %v831_v63 = vshrl.u32 %v2262_v62, 16  ;;  %v835_v20 = vrot.slane %v833_v25, 1  ;;  %v838_v21 = vshll.u32 %v2357_v10, 16 }
  0x48   : > { %v966_v12 = vrot.slane %v964_v6, 1  ;;  %v2360_v13 = vsel %vm898_vm3, %v985_v4, %v986_v7  ;;  %v660_v15 = vshrl.u32 %v1774_v9, 16  ;;  %v663_v16 = vshll.u32 %v1774_v9, 16  ;;  %v1949_v7 = vld [vmem:[%s2288_s20 + $0x28] sm:$0xff]   ;;  %v1950_v9 = vld [vmem:[%s2288_s20 + $0x30] sm:$0xff]  }
  0x49   : > { %v962_v18 = vor.u32 %v961_v11, %v957_v2  ;;  %vm1291_vm11 = vcmask 1041408   ;;  %v836_v25 = vor.u32 %v835_v20, %v831_v63  ;;  %v840_v34 = vrot.slane %v838_v21, 1 }
  0x4a   : > { %946 = vrot.lane.b32.xlu1 %v2214_v30, %s1992_s25  ;;  %944 = vrot.lane.b32.xlu0 %v2136_v38, %s1992_s25  ;;  %v662_v24 = vrot.slane %v660_v15, 7  ;;  %v1293_v23 = vsel %vm1291_vm11, %v1226_v17, 0  ;;  %v1425_v29 = vsel %vm1291_vm11, %v1943_v5, 0  ;;  %v914_v54 = vrot.slane %v2262_v62, 1 }
  0x4b   : > { %v2378_v26 = vsel %vm769_vm9, %v962_v18, %v966_v12  ;;  %1883 = vmatprep.subr.msk.bf16.mxu1 %vm1291_vm11, %v1226_v17  ;;  %1884 = vmatprep.subr.msk.bf16.mxu0 %vm1291_vm11, %v1943_v5  ;;  %v841_v8 = vsel %vm769_vm9, %v836_v25, %v840_v34  ;;  %v915_v57 = vrot.slane %v2357_v10, 1  ;;  %v845_v0 = vshll.u32 %v2304_v19, 16  ;;  %v1951_v10 = vld [vmem:[%s2288_s20 + $0x38] sm:$0xff]  }
  0x4c   : > { %v665_v44 = vor.u32 %v663_v16, %v662_v24  ;;  %v708_v45 = vsel %vm2095_vm2, %v662_v24, 0  ;;  %1828 = vmatpush3.bf16.msra.mxu1 %v1293_v23  ;;  %1850 = vmatpush3.bf16.msra.mxu0 %v1425_v29  ;;  %v843_v2 = vshrl.u32 %v2304_v19, 16  ;;  %v850_v4 = vshll.u32 %v2290_v14, 16  ;;  %v1948_v14 = vld [vmem:[%s2288_s20 + $0x20] sm:$0xff]  }
  0x4d   : > { %vm728_vm12 = vcmp.ge.bf16.partialorder %v708_v45, 0  ;;  %v916_v1 = vsel %vm898_vm3, %v914_v54, %v915_v57  ;;  %v847_v3 = vrot.slane %v845_v0, 1  ;;  %vm1137_vm14 = vcmask 162816  }
  0x4e   : > { %974 = vrot.lane.b32.xlu1 %v2335_v58, %s1997_s21  ;;  %972 = vrot.lane.b32.xlu0 %v2200_v22, %s1997_s21  ;;  %v748_v22 = vmul.bf16 1045249613, %v708_v45  ;;  %v698_v35 = vsel %vm2095_vm2, 0, %v665_v44  ;;  %v852_v5 = vrot.slane %v850_v4, 1  ;;  %vm1086_vm2 = vcmask 64512  }
  0x4f   : > { %vm727_vm13 = vcmp.ge.bf16.partialorder %v698_v35, 0  ;;  %v747_v36 = vmul.bf16 1045249613, %v698_v35  ;;  %1830 = vmatmul.mubr.msk.bf16.vlgmr.msra.gmra.mrb[0].mxu1 %vm1069_vm10, %v1945_v32  ;;  %vm1154_vm15 = vcmask 195584   ;;  %vm1171_vm0 = vcmask 228352  }
  0x50   : > { %v768_v37 = vsel %vm728_vm12, %v708_v45, %v748_v22  ;;  %1833 = vmatprep.mubr.msk.bf16.mxu1 %vm1069_vm10, %v1946_v39  ;;  %vm1188_vm1 = vcmask 261120   ;;  %vm1407_vm4 = vcmask 293888  }
  0x51   : > { %v1029_v41 = vshll.u32 %v768_v37, 16  ;;  %v1051_v43 = vrot.slane %v768_v37, 1  ;;  %v2392_v46 = vsel %vm727_vm13, %v698_v35, %v747_v36 }
  0x52   : > { %994 = vrot.lane.b32.xlu1 %v913_v40, %s2632_s18  ;;  %992 = vrot.lane.b32.xlu0 %v2212_v28, %s2632_s18  ;;  %v1022_v28 = vshrl.u32 %v2392_v46, 16  ;;  %v1024_v48 = vshll.u32 %v2392_v46, 16  ;;  %v1050_v49 = vrot.slane %v2392_v46, 1 }
  0x53   : > { %v1031_v51 = vrot.slane %v1029_v41, 1 }
  0x54   : > { %v1026_v42 = vrot.slane %v1024_v48, 1  ;;  %v1052_v52 = vsel %vm898_vm3, %v1050_v49, %v1051_v43  ;;  %vm1103_vm3 = vcmask 97280  }
  0x56   : > { %1011 = vrot.lane.b32.xlu1 %v2262_v62, %s2633_s8  ;;  %1009 = vrot.lane.b32.xlu0 %v2214_v30, %s2633_s8  ;;  %v1027_v53 = vor.u32 %v1026_v42, %v1022_v28 }
  0x57   : > { %1834 = vmatmul.mubr.msk.bf16.gmra.mrb[4].mxu1 %vm1069_vm10, %v1947_v50 }
  0x58   : > { %v1032_v60 = vsel %vm769_vm9, %v1027_v53, %v1031_v51  ;;  %1837 = vmatprep.mubr.msk.bf16.mxu1 %vm1069_vm10, %v1948_v14 }
  0x5a   : > { %1039 = vrot.lane.b32.xlu1 %v841_v8, %s1999_s24  ;;  %1037 = vrot.lane.b32.xlu0 %v2335_v58, %s1999_s24 }
  0x5e   : > { %874 = vrot.lane.b32.xlu1 %v2335_v58, %s1998_s23  ;;  %1057 = vrot.lane.b32.xlu0 %v913_v40, %s2634_s10  ;;  %v848_v58 = vor.u32 %v847_v3, %v843_v2 }
  0x5f   : > { %1838 = vmatmul.mubr.msk.bf16.gmra.mrb[8].mxu1 %vm1069_vm10, %v1949_v7 }
  0x60   : > { %v853_v6 = vsel %vm769_vm9, %v848_v58, %v852_v5  ;;  %1841 = vmatprep.mubr.msk.bf16.mxu1 %vm1069_vm10, %v1950_v9  ;;  %vm1120_vm9 = vcmask 130048  }
  0x62   : > { %876 = vrot.lane.b32.xlu1 %v841_v8, %s1998_s23  ;;  %1059 = vrot.lane.b32.xlu0 %v916_v1, %s2634_s10 }
  0x66   : > { %933 = vrot.lane.b32.xlu1 %v916_v1, %s1994_s14  ;;  %931 = vrot.lane.b32.xlu0 %v913_v40, %s1994_s14 }
  0x67   : > { %1842 = vmatmul.mubr.msk.bf16.gmra.mrb[12].mxu1 %vm1069_vm10, %v1951_v10 }
  0x6a   : > { %950 = vrot.lane.b32.xlu1 %v2304_v19, %s1992_s25  ;;  %948 = vrot.lane.b32.xlu0 %v2262_v62, %s1992_s25 }
  0x6e   : > { %978 = vrot.lane.b32.xlu1 %v853_v6, %s1997_s21  ;;  %976 = vrot.lane.b32.xlu0 %v841_v8, %s1997_s21 }
  0x72   : > { %998 = vrot.lane.b32.xlu1 %v2319_v59, %s2632_s18  ;;  %996 = vrot.lane.b32.xlu0 %v916_v1, %s2632_s18 }
  0x76   : > { %1015 = vrot.lane.b32.xlu1 %v2312_v33, %s2633_s8  ;;  %1013 = vrot.lane.b32.xlu0 %v2304_v19, %s2633_s8 }
  0x7a   : > { %1043 = vrot.lane.b32.xlu1 %v2350_v55, %s1999_s24  ;;  %1041 = vrot.lane.b32.xlu0 %v853_v6, %s1999_s24 }
  0x7e   : > { %878 = vrot.lane.b32.xlu1 %v853_v6, %s1998_s23  ;;  %1061 = vrot.lane.b32.xlu0 %v2319_v59, %s2634_s10 }
  0x82   : > { %880 = vrot.lane.b32.xlu1 %v2350_v55, %s1998_s23  ;;  %1063 = vrot.lane.b32.xlu0 %v2331_v56, %s2634_s10 }
  0x86   : > { %937 = vrot.lane.b32.xlu1 %v2331_v56, %s1994_s14  ;;  %935 = vrot.lane.b32.xlu0 %v2319_v59, %s1994_s14 }
  0x8a   : > { %954 = vrot.lane.b32.xlu1 %v2337_v61, %s1992_s25  ;;  %952 = vrot.lane.b32.xlu0 %v2312_v33, %s1992_s25  ;;  %s1764_s25 = sshll.u32 %s2080_s12, 3 }
  0x8b   : > { %s2566_s19 = scalar_lea.vmem %s2622_s7, %s1764_s25 }
  0x8e   : > { %982 = vrot.lane.b32.xlu1 %v2378_v26, %s1997_s21  ;;  %980 = vrot.lane.b32.xlu0 %v2350_v55, %s1997_s21 }
  0x92   : > { %1002 = vrot.lane.b32.xlu1 %v2360_v13, %s2632_s18  ;;  %1000 = vrot.lane.b32.xlu0 %v2331_v56, %s2632_s18 }
  0x94   : > { %v943_v59 = vpop.permute.xlu1 %942  ;;  %v941_v11 = vpop.permute.xlu0 %940 }
  0x96   : > { %1019 = vrot.lane.b32.xlu1 %v2392_v46, %s2633_s8  ;;  %1017 = vrot.lane.b32.xlu0 %v2337_v61, %s2633_s8 }
  0x98   : > { %v1008_v12 = vpop.permute.xlu1 %1007  ;;  %v1006_v55 = vpop.permute.xlu0 %1005 }
  0x9a   : > { %1047 = vrot.lane.b32.xlu1 %v1032_v60, %s1999_s24  ;;  %1045 = vrot.lane.b32.xlu0 %v2378_v26, %s1999_s24 }
  0x9c   : > { %v926_v15 = vpop.permute.xlu1 %925  ;;  %v989_v16 = vpop.permute.xlu0 %988 }
  0x9e   : > { %1067 = vrot.lane.b32.xlu1 %v1052_v52, %s2634_s10  ;;  %1065 = vrot.lane.b32.xlu0 %v2360_v13, %s2634_s10 }
  0xa0   : > { %v991_v56 = vpop.permute.xlu1 %990  ;;  %v1054_v17 = vpop.permute.xlu0 %1053 }
  0xa4   : > { %v971_v40 = vpop.permute.xlu1 %970  ;;  %v869_v63 = vpop.permute.xlu0 %868 }
  0xa5   : > { %v1073_v24 = vsel %vm1069_vm10, %v2127_v31, %v869_v63 }
  0xa6   : > { %v1090_v29 = vsel %vm1086_vm2, %v1073_v24, %v926_v15 }
  0xa7   : > { %v1107_v13 = vsel %vm1103_vm3, %v1090_v29, %v943_v59 }
  0xa8   : > { %v1036_v18 = vpop.permute.xlu1 %1035  ;;  %v969_v61 = vpop.permute.xlu0 %968  ;;  %v1124_v45 = vsel %vm1120_vm9, %v1107_v13, %v971_v40 }
  0xa9   : > { %v1141_v31 = vsel %vm1137_vm14, %v1124_v45, %v991_v56 }
  0xaa   : > { %v1158_v43 = vsel %vm1154_vm15, %v1141_v31, %v1008_v12 }
  0xab   : > { %v1175_v48 = vsel %vm1171_vm0, %v1158_v43, %v1036_v18 }
  0xac   : > { %v871_v20 = vpop.permute.xlu1 %870  ;;  %v1034_v21 = vpop.permute.xlu0 %1033 }
  0xad   : > { %v1075_v57 = vsel %vm1069_vm10, %v2119_v27, %v871_v20 }
  0xb0   : > { %v873_v26 = vpop.permute.xlu1 %872  ;;  %v1056_v23 = vpop.permute.xlu0 %1055 }
  0xb1   : > { %v1192_v42 = vsel %vm1188_vm1, %v1175_v48, %v1056_v23  ;;  %v1077_v4 = vsel %vm1069_vm10, %v2136_v38, %v873_v26 }
  0xb4   : > { %v924_v32 = vpop.permute.xlu1 %923  ;;  %v928_v44 = vpop.permute.xlu0 %927 }
  0xb5   : > { %v1092_v60 = vsel %vm1086_vm2, %v1075_v57, %v928_v44 }
  0xb8   : > { %v930_v22 = vpop.permute.xlu1 %929  ;;  %v867_v25 = vpop.permute.xlu0 %866 }
  0xb9   : > { %v1071_v34 = vsel %vm1069_vm10, %v2246_v47, %v867_v25  ;;  %v1094_v5 = vsel %vm1086_vm2, %v1077_v4, %v930_v22 }
  0xba   : > { %v1088_v35 = vsel %vm1086_vm2, %v1071_v34, %v924_v32 }
  0xbb   : > { %v1105_v36 = vsel %vm1103_vm3, %v1088_v35, %v941_v11 }
  0xbc   : > { %v947_v37 = vpop.permute.xlu1 %946  ;;  %v1122_v39 = vsel %vm1120_vm9, %v1105_v36, %v969_v61  ;;  %v945_v41 = vpop.permute.xlu0 %944 }
  0xbd   : > { %v1139_v46 = vsel %vm1137_vm14, %v1122_v39, %v989_v16  ;;  %v1109_v1 = vsel %vm1103_vm3, %v1092_v60, %v945_v41  ;;  %v1111_v27 = vsel %vm1103_vm3, %v1094_v5, %v947_v37 }
  0xbe   : > { %v1156_v8 = vsel %vm1154_vm15, %v1139_v46, %v1006_v55 }
  0xbf   : > { %v1173_v28 = vsel %vm1171_vm0, %v1156_v8, %v1034_v21 }
  0xc0   : > { %v975_v47 = vpop.permute.xlu1 %974  ;;  %v973_v49 = vpop.permute.xlu0 %972  ;;  %v1190_v50 = vsel %vm1188_vm1, %v1173_v28, %v1054_v17 }
  0xc1   : > { %1851 = vmatprep.mubr.msk.bf16.mxu0 %vm1407_vm4, %v1190_v50  ;;  %v1126_v3 = vsel %vm1120_vm9, %v1109_v1, %v973_v49  ;;  %v1128_v10 = vsel %vm1120_vm9, %v1111_v27, %v975_v47 }
  0xc2   : > { %1852 = vmatmul.mubr.msk.bf16.vlgmr.msra.gmra.mrb[0].mxu0 %vm1407_vm4, %v1192_v42 }
  0xc4   : > { %v995_v51 = vpop.permute.xlu1 %994  ;;  %v993_v52 = vpop.permute.xlu0 %992 }
  0xc5   : > { %v1143_v58 = vsel %vm1137_vm14, %v1126_v3, %v993_v52  ;;  %v1145_v11 = vsel %vm1137_vm14, %v1128_v10, %v995_v51 }
  0xc8   : > { %v1012_v53 = vpop.permute.xlu1 %1011  ;;  %v1010_v54 = vpop.permute.xlu0 %1009 }
  0xc9   : > { %v1160_v6 = vsel %vm1154_vm15, %v1143_v58, %v1010_v54  ;;  %v1162_v38 = vsel %vm1154_vm15, %v1145_v11, %v1012_v53 }
  0xcc   : > { %v1040_v0 = vpop.permute.xlu1 %1039  ;;  %v1038_v2 = vpop.permute.xlu0 %1037 }
  0xcd   : > { %v1177_v7 = vsel %vm1171_vm0, %v1160_v6, %v1038_v2  ;;  %v1179_v55 = vsel %vm1171_vm0, %v1162_v38, %v1040_v0 }
  0xd0   : > { %v875_v14 = vpop.permute.xlu1 %874  ;;  %v1058_v9 = vpop.permute.xlu0 %1057 }
  0xd1   : > { %v1194_v59 = vsel %vm1188_vm1, %v1177_v7, %v1058_v9  ;;  %v1079_v23 = vsel %vm1069_vm10, %v2214_v30, %v875_v14 }
  0xd2   : > { %1855 = vmatprep.mubr.msk.bf16.mxu0 %vm1407_vm4, %v1194_v59 }
  0xd4   : > { %v877_v12 = vpop.permute.xlu1 %876  ;;  %v1060_v15 = vpop.permute.xlu0 %1059 }
  0xd5   : > { %v1196_v16 = vsel %vm1188_vm1, %v1179_v55, %v1060_v15  ;;  %v1081_v22 = vsel %vm1069_vm10, %v2262_v62, %v877_v12 }
  0xd6   : > { %1856 = vmatmul.mubr.msk.bf16.gmra.mrb[4].mxu0 %vm1407_vm4, %v1196_v16 }
  0xd8   : > { %v934_v56 = vpop.permute.xlu1 %933  ;;  %v932_v17 = vpop.permute.xlu0 %931 }
  0xd9   : > { %v1096_v29 = vsel %vm1086_vm2, %v1079_v23, %v932_v17  ;;  %v1098_v34 = vsel %vm1086_vm2, %v1081_v22, %v934_v56 }
  0xdc   : > { %v951_v40 = vpop.permute.xlu1 %950  ;;  %v949_v63 = vpop.permute.xlu0 %948 }
  0xdd   : > { %v1113_v13 = vsel %vm1103_vm3, %v1096_v29, %v949_v63  ;;  %v1115_v30 = vsel %vm1103_vm3, %v1098_v34, %v951_v40 }
  0xe0   : > { %v979_v18 = vpop.permute.xlu1 %978  ;;  %v977_v61 = vpop.permute.xlu0 %976 }
  0xe1   : > { %v1130_v45 = vsel %vm1120_vm9, %v1113_v13, %v977_v61  ;;  %v1132_v39 = vsel %vm1120_vm9, %v1115_v30, %v979_v18 }
  0xe4   : > { %v999_v20 = vpop.permute.xlu1 %998  ;;  %v997_v21 = vpop.permute.xlu0 %996 }
  0xe5   : > { %v1147_v25 = vsel %vm1137_vm14, %v1130_v45, %v997_v21  ;;  %v1149_v43 = vsel %vm1137_vm14, %v1132_v39, %v999_v20  ;;  %v1802_v45 = vld [vmem:[%s2621_s6] ss:$0 sm:$0xff] }
  0xe8   : > { %v1016_v24 = vpop.permute.xlu1 %1015  ;;  %v1014_v26 = vpop.permute.xlu0 %1013 }
  0xe9   : > { %v1164_v31 = vsel %vm1154_vm15, %v1147_v25, %v1014_v26  ;;  %v1166_v62 = vsel %vm1154_vm15, %v1149_v43, %v1016_v24 }
  0xec   : > { %v1044_v32 = vpop.permute.xlu1 %1043  ;;  %v1042_v44 = vpop.permute.xlu0 %1041 }
  0xed   : > { %v1181_v36 = vsel %vm1171_vm0, %v1164_v31, %v1042_v44  ;;  %v1183_v8 = vsel %vm1171_vm0, %v1166_v62, %v1044_v32 }
  0xf0   : > { %v879_v35 = vpop.permute.xlu1 %878  ;;  %v1062_v37 = vpop.permute.xlu0 %1061 }
  0xf1   : > { %v1198_v41 = vsel %vm1188_vm1, %v1181_v36, %v1062_v37  ;;  %v1083_v1 = vsel %vm1069_vm10, %v2304_v19, %v879_v35 }
  0xf2   : > { %1859 = vmatprep.mubr.msk.bf16.mxu0 %vm1407_vm4, %v1198_v41 }
  0xf4   : > { %v881_v46 = vpop.permute.xlu1 %880  ;;  %v1064_v47 = vpop.permute.xlu0 %1063 }
  0xf5   : > { %v1200_v28 = vsel %vm1188_vm1, %v1183_v8, %v1064_v47  ;;  %v1085_v0 = vsel %vm1069_vm10, %v2312_v33, %v881_v46 }
  0xf6   : > { %1860 = vmatmul.mubr.msk.bf16.gmra.mrb[8].mxu0 %vm1407_vm4, %v1200_v28 }
  0xf8   : > { %v938_v48 = vpop.permute.xlu1 %937  ;;  %v936_v49 = vpop.permute.xlu0 %935 }
  0xf9   : > { %v1102_v2 = vsel %vm1086_vm2, %v1085_v0, %v938_v48  ;;  %v1100_v3 = vsel %vm1086_vm2, %v1083_v1, %v936_v49 }
  0xfc   : > { %v955_v50 = vpop.permute.xlu1 %954  ;;  %v953_v42 = vpop.permute.xlu0 %952 }
  0xfd   : > { %v1119_v4 = vsel %vm1103_vm3, %v1102_v2, %v955_v50  ;;  %v1117_v5 = vsel %vm1103_vm3, %v1100_v3, %v953_v42 }
 0x100   : > { %v983_v51 = vpop.permute.xlu1 %982  ;;  %v981_v52 = vpop.permute.xlu0 %980 }
 0x101   : > { %v1136_v6 = vsel %vm1120_vm9, %v1119_v4, %v983_v51  ;;  %v1134_v27 = vsel %vm1120_vm9, %v1117_v5, %v981_v52 }
 0x104   : > { %v1003_v53 = vpop.permute.xlu1 %1002  ;;  %v1001_v54 = vpop.permute.xlu0 %1000 }
 0x105   : > { %v1153_v7 = vsel %vm1137_vm14, %v1136_v6, %v1003_v53  ;;  %v1151_v33 = vsel %vm1137_vm14, %v1134_v27, %v1001_v54 }
 0x108   : > { %v1020_v57 = vpop.permute.xlu1 %1019  ;;  %v1018_v60 = vpop.permute.xlu0 %1017 }
 0x109   : > { %v1170_v19 = vsel %vm1154_vm15, %v1153_v7, %v1020_v57  ;;  %v1168_v9 = vsel %vm1154_vm15, %v1151_v33, %v1018_v60 }
 0x10c   : > { %v1048_v58 = vpop.permute.xlu1 %1047  ;;  %v1046_v14 = vpop.permute.xlu0 %1045 }
 0x10d   : > { %v1187_v10 = vsel %vm1171_vm0, %v1170_v19, %v1048_v58  ;;  %v1185_v11 = vsel %vm1171_vm0, %v1168_v9, %v1046_v14 }
 0x110   : > { %v1068_v59 = vpop.permute.xlu1 %1067  ;;  %v1066_v12 = vpop.permute.xlu0 %1065 }
 0x111   : > { %v1204_v38 = vsel %vm1188_vm1, %v1187_v10, %v1068_v59  ;;  %v1202_v55 = vsel %vm1188_vm1, %v1185_v11, %v1066_v12 }
 0x112   : > { %1863 = vmatprep.mubr.msk.bf16.mxu0 %vm1407_vm4, %v1202_v55 }
 0x113   : > { %1864 = vmatmul.mubr.msk.bf16.gmra.mrb[12].mxu0 %vm1407_vm4, %v1204_v38 }
 0x122   : > { %v1831_v15 = vpop.f32.mrb[0].mxu1 }
 0x123   : > { %v1329_v16 = vpop.f32.mrb[1].mxu1 }
 0x124   : > { %v1832_v56 = vpop.f32.mrb[2].mxu1 }
 0x125   : > { %v1332_v17 = vpop.f32.mrb[3].mxu1 }
 0x12a   : > { %v1835_v40 = vpop.f32.mrb[4].mxu1 }
 0x12b   : > { %v1345_v63 = vpop.f32.mrb[5].mxu1 }
 0x12c   : > { %v1836_v18 = vpop.f32.mrb[6].mxu1 }
 0x12d   : > { %v1348_v61 = vpop.f32.mrb[7].mxu1 }
 0x132   : > { %v1839_v20 = vpop.f32.mrb[8].mxu1 }
 0x133   : > { %v1361_v21 = vpop.f32.mrb[9].mxu1 }
 0x134   : > { %v1840_v24 = vpop.f32.mrb[10].mxu1 }
 0x135   : > { %v1364_v26 = vpop.f32.mrb[11].mxu1 }
 0x13a   : > { %v1843_v23 = vpop.f32.mrb[12].mxu1 }
 0x13b   : > { %v1377_v29 = vpop.f32.mrb[13].mxu1 }
 0x13c   : > { %v1844_v32 = vpop.f32.mrb[14].mxu1 }
 0x13d   : > { %v1380_v13 = vpop.f32.mrb[15].mxu1 }
 0x195   : > { %v1853_v44 = vpop.f32.mrb[0].mxu0 }
 0x196   : > { %v1470_v22 = vadd.f32 %v1853_v44, %v1831_v15  ;;  %v1461_v25 = vpop.f32.mrb[1].mxu0 }
 0x197   : > { %v1462_v34 = vadd.f32 %v1461_v25, %v1329_v16  ;;  %v1854_v31 = vpop.f32.mrb[2].mxu0 }
 0x198   : > { %v1533_v35 = vadd.f32 %v1802_v45, %v1470_v22  ;;  %v1473_v30 = vadd.f32 %v1854_v31, %v1832_v56  ;;  %v1464_v36 = vpop.f32.mrb[3].mxu0 }
 0x199   : > { %v1531_v37 = vadd.f32 %v1802_v45, %v1462_v34  ;;  %v1465_v39 = vadd.f32 %v1464_v36, %v1332_v17 }
 0x19a   : > { %1549 = vst.msk [vmem:[%s2566_s19 + $0x10] sm:$0xff] %vm1086_vm2, %v1533_v35  ;;  %v1534_v41 = vadd.f32 %v1802_v45, %v1473_v30 }
 0x19b   : > { %1547 = vst.msk [vmem:[%s2566_s19] sm:$0xff] %vm1086_vm2, %v1531_v37  ;;  %v1532_v43 = vadd.f32 %v1802_v45, %v1465_v39 }
 0x19c   : > { %1550 = vst.msk [vmem:[%s2566_s19 + $0x18] sm:$0xff] %vm1086_vm2, %v1534_v41 }
 0x19d   : > { %1548 = vst.msk [vmem:[%s2566_s19 + $0x8] sm:$0xff] %vm1086_vm2, %v1532_v43 }
 0x1a9   : > { %v1857_v62 = vpop.f32.mrb[4].mxu0 }
 0x1aa   : > { %v1486_v46 = vadd.f32 %v1857_v62, %v1835_v40  ;;  %v1477_v8 = vpop.f32.mrb[5].mxu0 }
 0x1ab   : > { %v1478_v47 = vadd.f32 %v1477_v8, %v1345_v63  ;;  %v1858_v28 = vpop.f32.mrb[6].mxu0 }
 0x1ac   : > { %v1537_v48 = vadd.f32 %v1802_v45, %v1486_v46  ;;  %v1489_v49 = vadd.f32 %v1858_v28, %v1836_v18  ;;  %v1480_v50 = vpop.f32.mrb[7].mxu0 }
 0x1ad   : > { %v1535_v42 = vadd.f32 %v1802_v45, %v1478_v47  ;;  %v1481_v51 = vadd.f32 %v1480_v50, %v1348_v61 }
 0x1ae   : > { %1553 = vst.msk [vmem:[%s2566_s19 + $0x30] sm:$0xff] %vm1086_vm2, %v1537_v48  ;;  %v1538_v52 = vadd.f32 %v1802_v45, %v1489_v49 }
 0x1af   : > { %1551 = vst.msk [vmem:[%s2566_s19 + $0x20] sm:$0xff] %vm1086_vm2, %v1535_v42  ;;  %v1536_v53 = vadd.f32 %v1802_v45, %v1481_v51 }
 0x1b0   : > { %1554 = vst.msk [vmem:[%s2566_s19 + $0x38] sm:$0xff] %vm1086_vm2, %v1538_v52 }
 0x1b1   : > { %1552 = vst.msk [vmem:[%s2566_s19 + $0x28] sm:$0xff] %vm1086_vm2, %v1536_v53 }
 0x1c9   : > { %v1861_v54 = vpop.f32.mrb[8].mxu0 }
 0x1ca   : > { %v1502_v57 = vadd.f32 %v1861_v54, %v1839_v20  ;;  %v1493_v60 = vpop.f32.mrb[9].mxu0 }
 0x1cb   : > { %v1494_v0 = vadd.f32 %v1493_v60, %v1361_v21  ;;  %v1862_v1 = vpop.f32.mrb[10].mxu0 }
 0x1cc   : > { %v1541_v2 = vadd.f32 %v1802_v45, %v1502_v57  ;;  %v1505_v3 = vadd.f32 %v1862_v1, %v1840_v24  ;;  %v1496_v4 = vpop.f32.mrb[11].mxu0 }
 0x1cd   : > { %v1539_v58 = vadd.f32 %v1802_v45, %v1494_v0  ;;  %v1497_v5 = vadd.f32 %v1496_v4, %v1364_v26 }
 0x1ce   : > { %1557 = vst.msk [vmem:[%s2566_s19 + $0x50] sm:$0xff] %vm1086_vm2, %v1541_v2  ;;  %v1542_v6 = vadd.f32 %v1802_v45, %v1505_v3 }
 0x1cf   : > { %1555 = vst.msk [vmem:[%s2566_s19 + $0x40] sm:$0xff] %vm1086_vm2, %v1539_v58  ;;  %v1540_v14 = vadd.f32 %v1802_v45, %v1497_v5 }
 0x1d0   : > { %1558 = vst.msk [vmem:[%s2566_s19 + $0x58] sm:$0xff] %vm1086_vm2, %v1542_v6 }
 0x1d1   : > { %1556 = vst.msk [vmem:[%s2566_s19 + $0x48] sm:$0xff] %vm1086_vm2, %v1540_v14 }
 0x1e6   : > { %v1865_v27 = vpop.f32.mrb[12].mxu0 }
 0x1e7   : > { %v1518_v7 = vadd.f32 %v1865_v27, %v1843_v23  ;;  %v1509_v33 = vpop.f32.mrb[13].mxu0 }
 0x1e8   : > { %v1510_v19 = vadd.f32 %v1509_v33, %v1377_v29  ;;  %v1866_v9 = vpop.f32.mrb[14].mxu0 }
 0x1e9   : > { %v1545_v10 = vadd.f32 %v1802_v45, %v1518_v7  ;;  %v1521_v59 = vadd.f32 %v1866_v9, %v1844_v32  ;;  %v1512_v11 = vpop.f32.mrb[15].mxu0 }
 0x1ea   : > { %v1543_v38 = vadd.f32 %v1802_v45, %v1510_v19  ;;  %v1513_v12 = vadd.f32 %v1512_v11, %v1380_v13 }
 0x1eb   : > { %1561 = vst.msk [vmem:[%s2566_s19 + $0x70] sm:$0xff] %vm1086_vm2, %v1545_v10  ;;  %v1546_v55 = vadd.f32 %v1802_v45, %v1521_v59 }
 0x1ec   : > { %1559 = vst.msk [vmem:[%s2566_s19 + $0x60] sm:$0xff] %vm1086_vm2, %v1543_v38  ;;  %v1544_v15 = vadd.f32 %v1802_v45, %v1513_v12 }
 0x1ed   : > { %1562 = vst.msk [vmem:[%s2566_s19 + $0x78] sm:$0xff] %vm1086_vm2, %v1546_v55 }
 0x1ee   : > { %1560 = vst.msk [vmem:[%s2566_s19 + $0x68] sm:$0xff] %vm1086_vm2, %v1544_v15 }
 0x1ef PF: > { %s17_s28 = sadd.s32 1, %s1990_s28   ;;  %s2635_s24 = smov %s1982_s26 }
 0x1f0   : > { %p14_p0 = scmp.ge.s32.totalorder %s17_s28, 6   ;;  %s2636_s25 = smov %s1986_s27 }
 0x1f1   : > { %s2637_s26 = smov %s2640_s29  ;;  %s2638_s27 = smov %s2644_s30 }
 0x1f2   :  { %16 = sbr.rel (!%p14_p0) target bundleno = 3 (0x3), region = 87 }

// kernel: spade_resnet_block.7
= control target key start
LH: loop header
LB: loop body
LE: loop exit
PB: predicated region body
PF: predicated region fallthrough
CT: control target
= control target key end

     0   :  { %s7470_s27 = smov 0   ;;  %s7472_s28 = smov 0   ;;  %s9748_s0 = inlined_call_operand.vmem [shape: bf16[2,20,20,3], index: 0, kind: input, shape index: {}, may-alias: {0,1}]   ;;  %s9749_s1 = inlined_call_operand.vmem [shape: bf16[2,20,20,3], index: 1, kind: input, shape index: {}, may-alias: {0,1}]   ;;  %s9750_s2 = inlined_call_operand.vmem [shape: bf16[27,128], index: 2, kind: input, shape index: {}]   ;;  %s9751_s3 = inlined_call_operand.vmem [shape: f32[1,128], index: 3, kind: input, shape index: {}]   ;;  %s9752_s4 = inlined_call_operand.vmem [shape: bf16[1152,8], index: 4, kind: input, shape index: {}]   ;;  %s9753_s5 = inlined_call_operand.vmem [shape: f32[1,8], index: 5, kind: input, shape index: {}]   ;;  %s9754_s6 = inlined_call_operand.vmem [shape: bf16[2,16,16,4], index: 6, kind: input, shape index: {}]   ;;  %s9755_s7 = inlined_call_operand.vmem [shape: f32[2,4], index: 7, kind: input, shape index: {}]   ;;  %s9756_s8 = inlined_call_operand.vmem [shape: bf16[2,16,16,4], index: 8, kind: output, shape index: {}]  }
   0x1   :  { %s7474_s29 = smov 0   ;;  %s7476_s30 = smov 0  }
   0x2   :  { %s7478_s9 = smov 0  }
   0x3 LB: > { %s27_s10 = sadd.s32 1, %s7398_s29  ;;  %s30_s11 = sadd.s32 1, %s7402_s30  ;;  %s7406_s9 = sphi %s7478_s9, %s18_s9   ;;  %s7402_s30 = sphi %s7476_s30, %s9806_s30   ;;  %s7398_s29 = sphi %s7474_s29, %s9805_s29   ;;  %s7394_s28 = sphi %s7472_s28, %s9804_s28   ;;  %s7390_s27 = sphi %s7470_s27, %s9803_s27  }
   0x4   : > { %p28_p0 = scmp.ge.s32.totalorder %s27_s10, 2  ;;  %p6626_p1 = scmp.ge.s32.totalorder %s7406_s9, 1 }
   0x5   : > { %p338_p2 = scmp.lt.s32.totalorder %s7406_s9, 5 }
   0x6   : > { %s9808_s10 = smov (%p28_p0, %s27_s10), 0  ;;  %s9810_s11 = smov (!%p28_p0, %s30_s11), %s7402_s30 }
   0x7   : > { %p339_p3 = pnand %p6626_p1, %p338_p2  ;;  %p32_p4 = scmp.ge.s32.totalorder %s9810_s11, 2 }
   0x9   : > { %s9812_s11 = smov (%p32_p4, %s9810_s11), 0  ;;  %342 = sbr.rel (%p339_p3) target bundleno = 1107 (0x453), region = 52 }
  0x10   : > { %s7503_s12 = sshll.u32 %s7390_s27, 3  ;;  %p415_p5 = scmp.lt.s32.totalorder %s7394_s28, 1  ;;  %vm9763_vm0 = vcmask 1046528   ;;  %vm584_vm1 = vsmask.f32 7424  ;;  %v7270_v59 = vld [vmem:[%s9750_s2] sm:$0xff]  }
  0x11   : > { %p417_p6 = scmp.lt.s32.totalorder %s7503_s12, 19  ;;  %s7408_s21 = smov 9   ;;  %vm2729_vm2 = vcmask 1044480   ;;  %7134 = vmatprep.subr.bf16.mxu0 %v7270_v59  ;;  %v7271_v61 = vld [vmem:[%s9750_s2 + $0x8] sm:$0x3f]   ;;  %vm2730_vm3 = vcmask 1045504  }
  0x12   : > { %s9814_s28 = smov (!%p415_p5, %s7394_s28), 1  ;;  %s7409_s22 = smov 18   ;;  %v7416_v62 = vmov 65535   ;;  %7135 = vmatpush3.bf16.msra.mxu0 %v7270_v59  ;;  %vm1138_vm4 = vcmask 23552   ;;  %vm1179_vm5 = vcmask 48128   ;;  %vm1220_vm6 = vcmask 72704  }
  0x13   : > { %s418_s13 = scalar_select %p417_p6, %s7503_s12, 19  ;;  %v2731_v63 = vsel %vm2729_vm2, 4294967295, %v7416_v62  ;;  %vm1261_vm7 = vcmask 97280   ;;  %vm1302_vm8 = vcmask 121856   ;;  %vm1343_vm9 = vcmask 146432  }
  0x14   : > { %s7195_s14 = smul.u32 60, %s9814_s28  ;;  %s7410_s23 = smov 15   ;;  %vm1384_vm10 = vcmask 171008   ;;  %vm1425_vm11 = vcmask 195584   ;;  %vm2692_vm12 = vcmask 220160  }
  0x15   : > { %s7194_s15 = smul.u32 3, %s418_s13  ;;  %s7411_s24 = smov 6  }
  0x16   : > { %s7412_s25 = smov 3   ;;  %s9759_s26 = smov 12  }
  0x17   : > { %s421_s16 = sadd.s32 %s7195_s14, %s7194_s15  ;;  %s9761_s13 = smov 21  }
  0x18   : > { %s6628_s17 = sshll.u32 %s421_s16, 2  ;;  %s9757_s15 = smov 24  }
  0x19   : > { %s7515_s20 = scalar_lea.vmem %s9748_s0, %s6628_s17  ;;  %s6840_s16 = sadd.s32 8, %s7503_s12 }
  0x1a   : > { %v7254_v0 = vld [vmem:[%s7515_s20 + $0x18] sm:$0xff]   ;;  %v7519_v1 = vld [vmem:[%s7515_s20 + $0xc] sm:$0xff]   ;;  %v7523_v2 = vld [vmem:[%s7515_s20 + $0x14] ss:$0 sps:$4 sm:$0x33]   ;;  %p435_p7 = scmp.lt.s32.totalorder %s6840_s16, 19 }
  0x1b   : > { %858 = vrot.lane.b32.xlu1 %v7254_v0, %s7408_s21  ;;  %v782_v3 = vrot.slane %v7254_v0, 1  ;;  %854 = vrot.lane.b32.xlu0 %v7519_v1, %s7408_s21  ;;  %v779_v4 = vrot.slane %v7519_v1, 1  ;;  %v7529_v5 = vld [vmem:[%s7515_s20 + $0x20] ss:$0 sps:$4 sm:$0x33]   ;;  %v7532_v6 = vrot.slane %v7523_v2, 1 }
  0x1c   : > { %v7535_v7 = vld [vmem:[%s7515_s20] sm:$0xff]   ;;  %v7538_v8 = vrot.slane %v7529_v5, 1  ;;  %v7541_v9 = vld [vmem:[%s7515_s20 + $0x8] ss:$0 sps:$4 sm:$0x33]   ;;  %v601_v18 = vshrl.u32 %v7519_v1, 16 }
  0x1d   : > { %v781_v10 = vsel %vm9763_vm0, %v779_v4, %v7532_v6  ;;  %v776_v11 = vrot.slane %v7535_v7, 1  ;;  %v586_v12 = vshrl.u32 %v7535_v7, 16  ;;  %v588_v13 = vshll.u32 %v7535_v7, 16  ;;  %v7570_v37 = vld [vmem:[%s7515_s20 + $0x24] sm:$0xff]   ;;  %v7589_v46 = vld [vmem:[%s7515_s20 + $0x30] sm:$0xff]   ;;  %s9816_s16 = smov (!%p435_p7, %s6840_s16), 19 }
  0x1e   : > { %v7552_v14 = vsel %vm9763_vm0, %v782_v3, %v7538_v8  ;;  %v777_v15 = vrot.slane %v7541_v9, 1  ;;  %v593_v16 = vshll.u32 %v7541_v9, 16  ;;  %v603_v19 = vshll.u32 %v7519_v1, 16  ;;  %v7576_v39 = vld [vmem:[%s7515_s20 + $0x2c] ss:$0 sps:$4 sm:$0x33]  }
  0x1f   : > { %1000 = vrot.lane.b32.xlu1 %v7254_v0, %s7409_s22  ;;  %952 = vrot.lane.b32.xlu0 %v781_v10, %s7410_s23  ;;  %v590_v17 = vrot.slane %v588_v13, 1  ;;  %v608_v20 = vshll.u32 %v7523_v2, 16  ;;  %v618_v23 = vshll.u32 %v7254_v0, 16  ;;  %v597_v25 = vshrl.u32 %v7541_v9, 16  ;;  %v7648_v13 = vld [vmem:[%s7515_s20 + $0x3c] sm:$0xff]   ;;  %s7196_s17 = smul.u32 3, %s9816_s16 }
  0x20   : > { %v778_v21 = vsel %vm9763_vm0, %v776_v11, %v777_v15  ;;  %v595_v22 = vrot.slane %v593_v16, 1  ;;  %v605_v26 = vrot.slane %v603_v19, 1  ;;  %v616_v27 = vshrl.u32 %v7254_v0, 16  ;;  %v7606_v53 = vld [vmem:[%s7515_s20 + $0x38] ss:$0 sps:$4 sm:$0x33]  }
  0x21   : > { %v591_v24 = vor.u32 %v590_v17, %v586_v12  ;;  %v620_v28 = vrot.slane %v618_v23, 1  ;;  %v623_v29 = vshll.u32 %v7529_v5, 16  ;;  %v610_v32 = vrot.slane %v608_v20, 1  ;;  %s439_s18 = sadd.s32 %s7196_s17, %s7195_s14  ;;  %s9774_s14 = smov 21  }
  0x22   : > { %v606_v31 = vor.u32 %v605_v26, %v601_v18  ;;  %v599_v33 = vor.u32 %v597_v25, %v595_v22  ;;  %v633_v40 = vshll.u32 %v7570_v37, 16  ;;  %v631_v41 = vshrl.u32 %v7570_v37, 16  ;;  %s6631_s19 = sshll.u32 %s439_s18, 2  ;;  %p3392_p8 = scmp.gt.s32.totalorder %s7390_s27, 0 }
  0x23   : > { %806 = vrot.lane.b32.xlu1 %v778_v21, %s7411_s24  ;;  %956 = vrot.lane.b32.xlu0 %v7552_v14, %s7410_s23  ;;  %v596_v30 = vsel %vm584_vm1, %v591_v24, %v595_v22  ;;  %v621_v34 = vor.u32 %v620_v28, %v616_v27  ;;  %v625_v35 = vrot.slane %v623_v29, 1  ;;  %v638_v43 = vshll.u32 %v7576_v39, 16  ;;  %v7266_v29 = vld [vmem:[%s7515_s20 + $0x48] sm:$0xff]   ;;  %p3402_p9 = scmp.lt.s32.totalorder %s7390_s27, 1  ;;  %p448_p10 = scmp.lt.s32.totalorder %s7503_s12, 15 }
  0x24   : > { %v611_v36 = vsel %vm584_vm1, %v606_v31, %v610_v32  ;;  %v635_v42 = vrot.slane %v633_v40, 1  ;;  %v785_v47 = vrot.slane %v7570_v37, 1  ;;  %v7596_v48 = vrot.slane %v7576_v39, 1  ;;  %s3393_s16 = scalar_select %p3392_p8, 1, 0 }
  0x25   : > { %v626_v38 = vsel %vm584_vm1, %v621_v34, %v625_v35  ;;  %v7586_v45 = vrot.slane %v638_v43, 1  ;;  %v612_v49 = vshrl.u32 %v7523_v2, 16  ;;  %v627_v51 = vshrl.u32 %v7529_v5, 16  ;;  %s9818_s12 = smov (!%p448_p10, %s7503_s12), 15 }
  0x26   : > { %v636_v44 = vor.u32 %v635_v42, %v631_v41  ;;  %v648_v52 = vshll.u32 %v7589_v46, 16  ;;  %v787_v54 = vsel %vm9763_vm0, %v785_v47, %v7596_v48  ;;  %v653_v56 = vshll.u32 %v7606_v53, 16  ;;  %s6633_s17 = sshll.u32 %s9818_s12, 1 }
  0x27   : > { %810 = vrot.lane.b32.xlu1 %v781_v10, %s7411_s24  ;;  %735 = vrot.lane.b32.xlu0 %v596_v30, %s7412_s25  ;;  %v614_v55 = vor.u32 %v612_v49, %v610_v32  ;;  %v646_v57 = vshrl.u32 %v7589_v46, 16  ;;  %v629_v60 = vor.u32 %v627_v51, %v625_v35  ;;  %v788_v11 = vrot.slane %v7589_v46, 1  ;;  %v7726_v32 = vld [vmem:[%s7515_s20 + $0x50] ss:$0 sps:$4 sm:$0x33]  }
  0x28   : > { %v641_v50 = vsel %vm584_vm1, %v636_v44, %v7586_v45  ;;  %v650_v58 = vrot.slane %v648_v52, 1  ;;  %v655_v0 = vrot.slane %v653_v56, 1  ;;  %v7645_v12 = vrot.slane %v7606_v53, 1 }
  0x29   : > { %v661_v16 = vshrl.u32 %v7648_v13, 16  ;;  %v791_v23 = vrot.slane %v7648_v13, 1  ;;  %v657_v26 = vshrl.u32 %v7606_v53, 16  ;;  %v7756_v56 = vrot.slane %v7726_v32, 1 }
  0x2a   : > { %v651_v4 = vor.u32 %v650_v58, %v646_v57 }
  0x2b   : > { %737 = vrot.lane.b32.xlu1 %v599_v33, %s7412_s25  ;;  %739 = vrot.lane.b32.xlu0 %v611_v36, %s7412_s25  ;;  %v7704_v27 = vor.u32 %v657_v26, %v655_v0  ;;  %v678_v33 = vshll.u32 %v7266_v29, 16 }
  0x2c   : > { %v656_v10 = vsel %vm584_vm1, %v651_v4, %v655_v0 }
  0x2f   : > { %913 = vrot.lane.b32.xlu1 %v626_v38, %s9759_s26  ;;  %909 = vrot.lane.b32.xlu0 %v611_v36, %s9759_s26  ;;  %v676_v36 = vshrl.u32 %v7266_v29, 16 }
  0x33   : > { %1004 = vrot.lane.b32.xlu1 %v7570_v37, %s7409_s22  ;;  %808 = vrot.lane.b32.xlu0 %v777_v15, %s7411_s24  ;;  %v7665_v15 = vld [vmem:[%s7515_s20 + $0x44] ss:$0 sps:$4 sm:$0x33]  }
  0x34   : > { %v668_v18 = vshll.u32 %v7665_v15, 16  ;;  %v7691_v24 = vrot.slane %v7665_v15, 1 }
  0x36   : > { %v7678_v20 = vrot.slane %v668_v18, 1  ;;  %v793_v25 = vsel %vm9763_vm0, %v791_v23, %v7691_v24  ;;  %v7792_v18 = vld [vmem:[%s7515_s20 + $0x5c] ss:$0 sps:$4 sm:$0x33]  }
  0x37   : > { %856 = vrot.lane.b32.xlu1 %v7523_v2, %s7408_s21  ;;  %1055 = vrot.lane.b32.xlu0 %v626_v38, %s9761_s13  ;;  %v2732_v2 = vsel %vm2730_vm3, %v2731_v63, 0  ;;  %v672_v63 = vshrl.u32 %v7665_v15, 16 }
  0x38   : > { %v2734_v3 = vand.u32 %v7271_v61, %v2732_v2  ;;  %v7762_v61 = vld [vmem:[%s7515_s20 + $0x54] sm:$0xff]  }
  0x39   : > { %v691_v23 = vshrl.u32 %v7762_v61, 16 }
  0x3a   : > { %7136 = vmatprep.subr.bf16.mxu0 %v2734_v3 }
  0x3b   : > { %1098 = vrot.lane.b32.xlu1 %v7552_v14, %s9757_s15  ;;  %1059 = vrot.lane.b32.xlu0 %v641_v50, %s9761_s13 }
  0x3c   : > { %7137 = vmatpush3.bf16.msra.mxu0 %v2734_v3 }
  0x3f   : > { %1102 = vrot.lane.b32.xlu1 %v787_v54, %s9757_s15  ;;  %911 = vrot.lane.b32.xlu0 %v614_v55, %s9759_s26 }
  0x43   : > { %1002 = vrot.lane.b32.xlu1 %v7529_v5, %s7409_s22  ;;  %954 = vrot.lane.b32.xlu0 %v7532_v6, %s7410_s23 }
  0x47   : > { %1100 = vrot.lane.b32.xlu1 %v7538_v8, %s9757_s15  ;;  %1057 = vrot.lane.b32.xlu0 %v629_v60, %s9761_s13  ;;  %s7660_s13 = scalar_lea.vmem %s9749_s1, %s6631_s19  ;;  %s9776_s15 = smov 24  }
  0x4b   : > { %747 = vrot.lane.b32.xlu1 %v641_v50, %s7412_s25  ;;  %743 = vrot.lane.b32.xlu0 %v626_v38, %s7412_s25  ;;  %v680_v38 = vrot.slane %v678_v33, 1 }
  0x4d   : > { %v681_v42 = vor.u32 %v680_v38, %v676_v36 }
  0x4f   : > { %818 = vrot.lane.b32.xlu1 %v787_v54, %s7411_s24  ;;  %814 = vrot.lane.b32.xlu0 %v7552_v14, %s7411_s24  ;;  %v790_v14 = vsel %vm9763_vm0, %v788_v11, %v7645_v12  ;;  %v693_v11 = vshll.u32 %v7762_v61, 16 }
  0x53   : > { %866 = vrot.lane.b32.xlu1 %v7589_v46, %s7408_s21  ;;  %862 = vrot.lane.b32.xlu0 %v7570_v37, %s7408_s21 }
  0x57   : > { %741 = vrot.lane.b32.xlu1 %v614_v55, %s7412_s25  ;;  %917 = vrot.lane.b32.xlu0 %v641_v50, %s9759_s26  ;;  %v794_v55 = vrot.slane %v7266_v29, 1 }
  0x59   : > { %v7773_v0 = vsel %vm9763_vm0, %v794_v55, %v7756_v56 }
  0x5b   : > { %960 = vrot.lane.b32.xlu1 %v787_v54, %s7410_s23  ;;  %921 = vrot.lane.b32.xlu0 %v656_v10, %s9759_s26  ;;  %s9775_s26 = smov 12   ;;  %v1490_v54 = vlaneseq }
  0x5f   : > { %812 = vrot.lane.b32.xlu1 %v7532_v6, %s7411_s24  ;;  %745 = vrot.lane.b32.xlu0 %v629_v60, %s7412_s25  ;;  %v663_v6 = vshll.u32 %v7648_v13, 16 }
  0x61   : > { %v665_v17 = vrot.slane %v663_v6, 1  ;;  %v7784_v6 = vor.u32 %v672_v63, %v7678_v20 }
  0x63   : > { %1008 = vrot.lane.b32.xlu1 %v7589_v46, %s7409_s22  ;;  %964 = vrot.lane.b32.xlu0 %v790_v14, %s7410_s23  ;;  %v666_v19 = vor.u32 %v665_v17, %v661_v16 }
  0x65   : > { %v671_v21 = vsel %vm584_vm1, %v666_v19, %v7678_v20  ;;  %v695_v20 = vrot.slane %v693_v11, 1 }
  0x67   : > { %860 = vrot.lane.b32.xlu1 %v7529_v5, %s7408_s21  ;;  %816 = vrot.lane.b32.xlu0 %v7538_v8, %s7411_s24  ;;  %v642_v5 = vshrl.u32 %v7576_v39, 16 }
  0x69   : > { %v644_v22 = vor.u32 %v642_v5, %v7586_v45 }
  0x6b   : > { %1063 = vrot.lane.b32.xlu1 %v656_v10, %s9774_s14  ;;  %1012 = vrot.lane.b32.xlu0 %v7648_v13, %s7409_s22 }
  0x6f   : > { %915 = vrot.lane.b32.xlu1 %v629_v60, %s9775_s26  ;;  %864 = vrot.lane.b32.xlu0 %v7576_v39, %s7408_s21 }
  0x73   : > { %1106 = vrot.lane.b32.xlu1 %v790_v14, %s9776_s15  ;;  %1067 = vrot.lane.b32.xlu0 %v671_v21, %s9774_s14 }
  0x77   : > { %958 = vrot.lane.b32.xlu1 %v7538_v8, %s7410_s23  ;;  %919 = vrot.lane.b32.xlu0 %v644_v22, %s9775_s26 }
  0x7b   : > { %962 = vrot.lane.b32.xlu1 %v7596_v48, %s7410_s23  ;;  %1110 = vrot.lane.b32.xlu0 %v793_v25, %s9776_s15 }
  0x7f   : > { %1010 = vrot.lane.b32.xlu1 %v7606_v53, %s7409_s22  ;;  %1006 = vrot.lane.b32.xlu0 %v7576_v39, %s7409_s22  ;;  %v683_v39 = vshll.u32 %v7726_v32, 16 }
  0x81   : > { %v7737_v43 = vrot.slane %v683_v39, 1  ;;  %v696_v39 = vor.u32 %v695_v20, %v691_v23 }
  0x83   : > { %1065 = vrot.lane.b32.xlu1 %v7704_v27, %s9774_s14  ;;  %1061 = vrot.lane.b32.xlu0 %v644_v22, %s9774_s14  ;;  %v7746_v47 = vsel %vm584_vm1, %v681_v42, %v7737_v43 }
  0x87   : > { %1108 = vrot.lane.b32.xlu1 %v7645_v12, %s9776_s15  ;;  %1104 = vrot.lane.b32.xlu0 %v7596_v48, %s9776_s15 }
  0x8b   : > { %822 = vrot.lane.b32.xlu1 %v790_v14, %s7411_s24  ;;  %751 = vrot.lane.b32.xlu0 %v656_v10, %s7412_s25 }
  0x8d   : > { %v859_v8 = vpop.permute.xlu1 %858  ;;  %v855_v28 = vpop.permute.xlu0 %854 }
  0x8f   : > { %870 = vrot.lane.b32.xlu1 %v7648_v13, %s7408_s21  ;;  %755 = vrot.lane.b32.xlu0 %v671_v21, %s7412_s25 }
  0x91   : > { %v7721_v30 = vpop.permute.xlu1 %1000  ;;  %v953_v31 = vpop.permute.xlu0 %952 }
  0x93   : > { %826 = vrot.lane.b32.xlu1 %v793_v25, %s7411_s24  ;;  %749 = vrot.lane.b32.xlu0 %v644_v22, %s7412_s25 }
  0x95   : > { %v807_v34 = vpop.permute.xlu1 %806  ;;  %v7728_v35 = vpop.permute.xlu0 %956 }
  0x97   : > { %753 = vrot.lane.b32.xlu1 %v7704_v27, %s7412_s25  ;;  %925 = vrot.lane.b32.xlu0 %v671_v21, %s9775_s26 }
  0x99   : > { %v811_v40 = vpop.permute.xlu1 %810  ;;  %v736_v41 = vpop.permute.xlu0 %735 }
  0x9a   : > { %v1140_v46 = vsel %vm1138_vm4, %v7535_v7, %v736_v41  ;;  %v7417_v7 = vmov 1966171168  }
  0x9b   : > { %874 = vrot.lane.b32.xlu1 %v7266_v29, %s7408_s21  ;;  %820 = vrot.lane.b32.xlu0 %v7596_v48, %s7411_s24  ;;  %v1181_v48 = vsel %vm1179_vm5, %v1140_v46, %v807_v34  ;;  %v1488_v52 = vunpack.c.l.s4 %v7417_v7 }
  0x9c   : > { %v1222_v57 = vsel %vm1220_vm6, %v1181_v48, %v855_v28  ;;  %v698_v28 = vshll.u32 %v7792_v18, 16 }
  0x9d   : > { %v738_v44 = vpop.permute.xlu1 %737  ;;  %v740_v45 = vpop.permute.xlu0 %739  ;;  %v1489_v62 = vunpack.c.0.s8 %v1488_v52 }
  0x9e   : > { %v1144_v51 = vsel %vm1138_vm4, %v7519_v1, %v740_v45 }
  0x9f   : > { %824 = vrot.lane.b32.xlu1 %v7645_v12, %s7411_s24  ;;  %968 = vrot.lane.b32.xlu0 %v793_v25, %s7410_s23  ;;  %v1185_v59 = vsel %vm1179_vm5, %v1144_v51, %v811_v40 }
  0xa0   : > { %v1226_v2 = vsel %vm1220_vm6, %v1185_v59, %v859_v8 }
  0xa1   : > { %v914_v49 = vpop.permute.xlu1 %913  ;;  %v910_v50 = vpop.permute.xlu0 %909 }
  0xa2   : > { %v1263_v1 = vsel %vm1261_vm7, %v1222_v57, %v910_v50  ;;  %v1267_v16 = vsel %vm1261_vm7, %v1226_v2, %v914_v49  ;;  %v7821_v49 = vrot.slane %v698_v28, 1 }
  0xa3   : > { %929 = vrot.lane.b32.xlu1 %v7746_v47, %s9775_s26  ;;  %868 = vrot.lane.b32.xlu0 %v7606_v53, %s7408_s21  ;;  %v7767_v53 = vshrl.u32 %v1490_v54, 7  ;;  %v1304_v3 = vsel %vm1302_vm8, %v1263_v1, %v953_v31  ;;  %v1308_v25 = vsel %vm1302_vm8, %v1267_v16, %v7728_v35 }
  0xa4   : > { %v1345_v17 = vsel %vm1343_vm9, %v1304_v3, %v7721_v30  ;;  %v7836_v3 = vsel %vm584_vm1, %v696_v39, %v7821_v49 }
  0xa5   : > { %v1005_v58 = vpop.permute.xlu1 %1004  ;;  %v809_v60 = vpop.permute.xlu0 %808  ;;  %v7781_v14 = vsub.s32 %v1489_v62, %v7767_v53  ;;  %vm3390_vm15 = vcmp.ge.s32.totalorder %v7767_v53, 1 }
  0xa7   : > { %872 = vrot.lane.b32.xlu1 %v7665_v15, %s7408_s21  ;;  %1016 = vrot.lane.b32.xlu0 %v7266_v29, %s7409_s22  ;;  %v1142_v29 = vsel %vm1138_vm4, %v7541_v9, %v738_v44 }
  0xa8   : > { %v1183_v35 = vsel %vm1179_vm5, %v1142_v29, %v809_v60 }
  0xa9   : > { %v857_v4 = vpop.permute.xlu1 %856  ;;  %v1056_v10 = vpop.permute.xlu0 %1055 }
  0xaa   : > { %v1386_v19 = vsel %vm1384_vm10, %v1345_v17, %v1056_v10  ;;  %v1224_v9 = vsel %vm1220_vm6, %v1183_v35, %v857_v4  ;;  %v7859_v35 = vrot.slane %v7792_v18, 1 }
  0xab   : > { %972 = vrot.lane.b32.xlu1 %v7773_v0, %s7410_s23  ;;  %923 = vrot.lane.b32.xlu0 %v7704_v27, %s9775_s26  ;;  %v1349_v27 = vsel %vm1343_vm9, %v1308_v25, %v1005_v58 }
  0xad   : > { %v1099_v5 = vpop.permute.xlu1 %1098  ;;  %v1060_v22 = vpop.permute.xlu0 %1059 }
  0xae   : > { %v1427_v21 = vsel %vm1425_vm11, %v1386_v19, %v1099_v5  ;;  %v1390_v33 = vsel %vm1384_vm10, %v1349_v27, %v1060_v22  ;;  %v687_v19 = vshrl.u32 %v7726_v32, 16 }
  0xaf   : > { %v1486_v26 = vcombine.high %v1427_v21, %v1427_v21  ;;  %v1493_v8 = vrot.slane %v1427_v21, %v7781_v14  ;;  %927 = vrot.lane.b32.xlu1 %v7784_v6, %s9775_s26  ;;  %1071 = vrot.lane.b32.xlu0 %v7746_v47, %s9774_s14 }
  0xb1   : > { %v1500_v30 = vrot.slane %v1486_v26, %v7781_v14  ;;  %v1501_v31 = vcombine.high %v1493_v8, %v1493_v8  ;;  %v1103_v34 = vpop.permute.xlu1 %1102  ;;  %v912_v38 = vpop.permute.xlu0 %911  ;;  %v1509_v41 = vrot.slane %v1493_v8, %v7781_v14 }
  0xb2   : > { %v1431_v36 = vsel %vm1425_vm11, %v1390_v33, %v1103_v34  ;;  %v1265_v58 = vsel %vm1261_vm7, %v1224_v9, %v912_v38  ;;  %v797_v34 = vrot.slane %v7762_v61, 1 }
  0xb3   : > { %v1502_v40 = vcombine.high %v1500_v30, %v1500_v30  ;;  %v1523_v42 = vrot.slane %v1501_v31, %v7781_v14  ;;  %v1549_v45 = vcombine.high %v1431_v36, %v1431_v36  ;;  %1020 = vrot.lane.b32.xlu1 %v7762_v61, %s7409_s22  ;;  %v1516_v44 = vrot.slane %v1500_v30, %v7781_v14 }
  0xb4   : > { %v1556_v46 = vrot.slane %v1431_v36, %v7781_v14  ;;  %966 = vrot.lane.b32.xlu0 %v7645_v12, %s7410_s23 }
  0xb5   : > { %v1530_v48 = vrot.slane %v1502_v40, %v7781_v14  ;;  %v2127_v50 = vcombine.low %v1509_v41, %v1523_v42  ;;  %v6665_v51 = vcombine.high %v1509_v41, %v1523_v42  ;;  %v1563_v7 = vrot.slane %v1549_v45, %v7781_v14  ;;  %v1003_v52 = vpop.permute.xlu1 %1002  ;;  %v955_v59 = vpop.permute.xlu0 %954 }
  0xb6   : > { %v1564_v55 = vcombine.high %v1556_v46, %v1556_v46  ;;  %v1572_v57 = vrot.slane %v1556_v46, %v7781_v14  ;;  %v1306_v2 = vsel %vm1302_vm8, %v1265_v58, %v955_v59  ;;  %v7864_v40 = vor.u32 %v687_v19, %v7737_v43 }
  0xb7   : > { %v2129_v1 = vcombine.low %v1516_v44, %v1530_v48  ;;  %v6666_v60 = vcombine.high %v1516_v44, %v1530_v48  ;;  %v1565_v62 = vcombine.high %v1563_v7, %v1563_v7  ;;  %v1579_v12 = vrot.slane %v1563_v7, %v7781_v14  ;;  %970 = vrot.lane.b32.xlu1 %v7691_v24, %s7410_s23 }
  0xb8   : > { %v1586_v63 = vrot.slane %v1564_v55, %v7781_v14  ;;  %1114 = vrot.lane.b32.xlu0 %v7773_v0, %s9776_s15  ;;  %v2137_v4 = vrot.slane %v2127_v50, %v7781_v14  ;;  %v2144_v17 = vrot.slane %v6665_v51, %v7781_v14  ;;  %v1347_v21 = vsel %vm1343_vm9, %v1306_v2, %v1003_v52 }
  0xb9   : > { %v7840_v10 = vrot.slane %v1565_v62, %v7781_v14  ;;  %v1595_v11 = vcombine.high %v1579_v12, %v1579_v12  ;;  %v1101_v16 = vpop.permute.xlu1 %1100  ;;  %v1058_v22 = vpop.permute.xlu0 %1057  ;;  %v2151_v23 = vrot.slane %v2129_v1, %v7781_v14  ;;  %v2158_v20 = vrot.slane %v6666_v60, %v7781_v14 }
  0xba   : > { %v1596_v5 = vcombine.high %v1586_v63, %v1586_v63  ;;  %v1594_v25 = vcombine.high %v1572_v57, %v1572_v57  ;;  %v1388_v8 = vsel %vm1384_vm10, %v1347_v21, %v1058_v22  ;;  %v2159_v27 = vcombine.low %v2137_v4, %v2144_v17  ;;  %v7923_v17 = vld [vmem:[%s7660_s13 + $0x8] ss:$0 sps:$4 sm:$0x33]  }
  0xbb   : > { %v2179_v26 = vcombine.low %v7840_v10, %v1595_v11  ;;  %1075 = vrot.lane.b32.xlu1 %v7836_v3, %s9774_s14  ;;  %v1429_v29 = vsel %vm1425_vm11, %v1388_v8, %v1101_v16  ;;  %v2160_v30 = vcombine.low %v2151_v23, %v2158_v20  ;;  %v799_v43 = vsel %vm9763_vm0, %v797_v34, %v7859_v35 }
  0xbc   : > { %v2178_v28 = vcombine.low %v1596_v5, %v1579_v12  ;;  %1014 = vrot.lane.b32.xlu0 %v7665_v15, %s7409_s22  ;;  %v1541_v31 = vrot.slane %v1429_v29, %v7781_v14  ;;  %v2167_v38 = vrot.slane %v2159_v27, %v7781_v14  ;;  %v2177_v15 = vcombine.low %v1586_v63, %v1594_v25 }
  0xbd   : > { %v7855_v33 = vpop.permute.xlu1 %747  ;;  %v744_v36 = vpop.permute.xlu0 %743  ;;  %v2174_v39 = vrot.slane %v2160_v30, %v7781_v14  ;;  %v2207_v42 = vrot.slane %v2179_v26, %v7781_v14  ;;  %v713_v25 = vshll.u32 %v7923_v17, 16 }
  0xbe   : > { %v2200_v41 = vrot.slane %v2178_v28, %v7781_v14  ;;  %v1548_v45 = vrot.slane %v1541_v31, %v7781_v14  ;;  %v2193_v50 = vrot.slane %v2177_v15, %v7781_v14 }
  0xbf   : > { %1069 = vrot.lane.b32.xlu1 %v7784_v6, %s9774_s14  ;;  %v2175_v9 = vcombine.low %v2167_v38, %v2174_v39  ;;  %v7942_v34 = vrot.slane %v713_v25, 1 }
  0xc0   : > { %1018 = vrot.lane.b32.xlu0 %v7726_v32, %s7409_s22  ;;  %v2176_v44 = vcombine.low %v1548_v45, %v1572_v57  ;;  %v2209_v7 = vcombine.low %v2200_v41, %v2207_v42  ;;  %v1152_v41 = vsel %vm1138_vm4, %v7570_v37, %v7855_v33 }
  0xc1   : > { %v7873_v46 = vpop.permute.xlu1 %818  ;;  %7138 = vmatprep.mubr.msk.bf16.mxu0 %vm2692_vm12, %v2175_v9  ;;  %v815_v48 = vpop.permute.xlu0 %814 }
  0xc2   : > { %v2186_v51 = vrot.slane %v2176_v44, %v7781_v14  ;;  %v2223_v59 = vrot.slane %v2209_v7, %v7781_v14  ;;  %v1193_v9 = vsel %vm1179_vm5, %v1152_v41, %v7873_v46  ;;  %v7970_v46 = vrot.slane %v7923_v17, 1 }
  0xc3   : > { %1073 = vrot.lane.b32.xlu1 %v7864_v40, %s9774_s14 }
  0xc4   : > { %1118 = vrot.lane.b32.xlu0 %v799_v43, %s9776_s15  ;;  %v2208_v55 = vcombine.low %v2186_v51, %v2193_v50 }
  0xc5   : > { %v7883_v52 = vpop.permute.xlu1 %866  ;;  %v863_v57 = vpop.permute.xlu0 %862 }
  0xc6   : > { %v2216_v58 = vrot.slane %v2208_v55, %v7781_v14 }
  0xc7   : > { %1116 = vrot.lane.b32.xlu1 %v7756_v56, %s9776_s15 }
  0xc8   : > { %1112 = vrot.lane.b32.xlu0 %v7691_v24, %s9776_s15  ;;  %v2224_v60 = vcombine.low %v2216_v58, %v2223_v59 }
  0xc9   : > { %v7891_v1 = vpop.permute.xlu1 %741  ;;  %v918_v62 = vpop.permute.xlu0 %917 }
  0xca   : > { %7139 = vmatmul.mubr.msk.bf16.vlgmr.msra.gmra.mrb[0].mxu0 %vm2692_vm12, %v2224_v60 }
  0xcb   : > { %830 = vrot.lane.b32.xlu1 %v7773_v0, %s7411_s24 }
  0xcc   : > { %759 = vrot.lane.b32.xlu0 %v7746_v47, %s7412_s25 }
  0xcd   : > { %v961_v12 = vpop.permute.xlu1 %960  ;;  %v922_v63 = vpop.permute.xlu0 %921 }
  0xcf   : > { %757 = vrot.lane.b32.xlu1 %v7784_v6, %s7412_s25  ;;  %v7272_v6 = vld [vmem:[%s7660_s13] sm:$0xff]  }
  0xd0   : > { %878 = vrot.lane.b32.xlu0 %v7762_v61, %s7408_s21  ;;  %v708_v19 = vshll.u32 %v7272_v6, 16  ;;  %v706_v23 = vshrl.u32 %v7272_v6, 16 }
  0xd1   : > { %v7902_v2 = vpop.permute.xlu1 %812  ;;  %v7904_v4 = vpop.permute.xlu0 %745 }
  0xd2   : > { %v710_v20 = vrot.slane %v708_v19, 1 }
  0xd3   : > { %761 = vrot.lane.b32.xlu1 %v7864_v40, %s7412_s25 }
  0xd4   : > { %933 = vrot.lane.b32.xlu0 %v7836_v3, %s9775_s26  ;;  %v711_v31 = vor.u32 %v710_v20, %v706_v23 }
  0xd5   : > { %v1009_v47 = vpop.permute.xlu1 %1008  ;;  %v965_v0 = vpop.permute.xlu0 %964 }
  0xd6   : > { %v7957_v45 = vsel %vm584_vm1, %v711_v31, %v7942_v34 }
  0xd7   : > { %828 = vrot.lane.b32.xlu1 %v7691_v24, %s7411_s24  ;;  %v7352_v24 = vld [vmem:[%s7515_s20 + $0x18] sm:$0xff]  }
  0xd8   : > { %763 = vrot.lane.b32.xlu0 %v7836_v3, %s7412_s25  ;;  %v1148_v3 = vsel %vm1138_vm4, %v7352_v24, %v744_v36 }
  0xd9   : > { %v7914_v61 = vpop.permute.xlu1 %860  ;;  %v7917_v11 = vpop.permute.xlu0 %816  ;;  %v1189_v21 = vsel %vm1179_vm5, %v1148_v3, %v815_v48  ;;  %v800_v48 = vrot.slane %v7272_v6, 1 }
  0xda   : > { %v1230_v26 = vsel %vm1220_vm6, %v1189_v21, %v863_v57 }
  0xdb   : > { %832 = vrot.lane.b32.xlu1 %v7756_v56, %s7411_s24  ;;  %v1271_v27 = vsel %vm1261_vm7, %v1230_v26, %v918_v62 }
  0xdc   : > { %976 = vrot.lane.b32.xlu0 %v799_v43, %s7410_s23  ;;  %v1312_v28 = vsel %vm1302_vm8, %v1271_v27, %v961_v12  ;;  %v7987_v12 = vsel %vm9763_vm0, %v800_v48, %v7970_v46 }
  0xdd   : > { %v1064_v16 = vpop.permute.xlu1 %1063  ;;  %v1013_v5 = vpop.permute.xlu0 %1012  ;;  %v1353_v29 = vsel %vm1343_vm9, %v1312_v28, %v1009_v47 }
  0xde   : > { %v1394_v36 = vsel %vm1384_vm10, %v1353_v29, %v1064_v16  ;;  %v7354_v16 = vld [vmem:[%s7515_s20 + $0x20] ss:$0 sps:$4 sm:$0x33]  }
  0xdf   : > { %876 = vrot.lane.b32.xlu1 %v7726_v32, %s7408_s21  ;;  %v702_v32 = vshrl.u32 %v7792_v18, 16  ;;  %v1150_v19 = vsel %vm1138_vm4, %v7354_v16, %v7904_v4  ;;  %v717_v4 = vshrl.u32 %v7923_v17, 16  ;;  %v1597_v16 = vcombine.high %v7840_v10, %v7840_v10 }
  0xe0   : > { %834 = vrot.lane.b32.xlu0 %v799_v43, %s7411_s24  ;;  %v1191_v21 = vsel %vm1179_vm5, %v1150_v19, %v7917_v11 }
  0xe1   : > { %v7931_v22 = vpop.permute.xlu1 %915  ;;  %v865_v8 = vpop.permute.xlu0 %864  ;;  %v7949_v15 = vor.u32 %v702_v32, %v7821_v49  ;;  %v1234_v49 = vsel %vm1220_vm6, %v1193_v9, %v7883_v52  ;;  %v7975_v52 = vld [vmem:[%s7660_s13 + $0xc] sm:$0xff]   ;;  %v8016_v32 = vld [vmem:[%s7660_s13 + $0x14] ss:$0 sps:$4 sm:$0x33]  }
  0xe2   : > { %v1275_v43 = vsel %vm1261_vm7, %v1234_v49, %v922_v63  ;;  %v7353_v63 = vld [vmem:[%s7515_s20 + $0x14] ss:$0 sps:$4 sm:$0x33]   ;;  %v1232_v25 = vsel %vm1220_vm6, %v1191_v21, %v865_v8  ;;  %v8076_v10 = vrot.slane %v8016_v32, 1 }
  0xe3   : > { %880 = vrot.lane.b32.xlu1 %v7792_v18, %s7408_s21  ;;  %v1316_v37 = vsel %vm1302_vm8, %v1275_v43, %v965_v0  ;;  %v1146_v47 = vsel %vm1138_vm4, %v7353_v63, %v7891_v1 }
  0xe4   : > { %1024 = vrot.lane.b32.xlu0 %v7272_v6, %s7409_s22  ;;  %v1357_v50 = vsel %vm1343_vm9, %v1316_v37, %v1013_v5  ;;  %v1187_v1 = vsel %vm1179_vm5, %v1146_v47, %v7902_v2  ;;  %v721_v2 = vshrl.u32 %v7975_v52, 16 }
  0xe5   : > { %v1107_v30 = vpop.permute.xlu1 %1106  ;;  %v1068_v38 = vpop.permute.xlu0 %1067  ;;  %v1228_v20 = vsel %vm1220_vm6, %v1187_v1, %v7914_v61 }
  0xe6   : > { %v1435_v39 = vsel %vm1425_vm11, %v1394_v36, %v1107_v30  ;;  %v1398_v55 = vsel %vm1384_vm10, %v1357_v50, %v1068_v38  ;;  %v1269_v11 = vsel %vm1261_vm7, %v1228_v20, %v7931_v22  ;;  %v803_v20 = vrot.slane %v7975_v52, 1 }
  0xe7   : > { %931 = vrot.lane.b32.xlu1 %v7864_v40, %s9775_s26  ;;  %v1612_v44 = vcombine.high %v1435_v39, %v1435_v39  ;;  %v1619_v57 = vrot.slane %v1435_v39, %v7781_v14 }
  0xe8   : > { %882 = vrot.lane.b32.xlu0 %v7272_v6, %s7408_s21  ;;  %v723_v6 = vshll.u32 %v7975_v52, 16 }
  0xe9   : > { %v959_v42 = vpop.permute.xlu1 %958  ;;  %v920_v40 = vpop.permute.xlu0 %919  ;;  %v1626_v51 = vrot.slane %v1612_v44, %v7781_v14  ;;  %v1627_v23 = vcombine.high %v1619_v57, %v1619_v57  ;;  %v1635_v37 = vrot.slane %v1619_v57, %v7781_v14 }
  0xea   : > { %v1273_v29 = vsel %vm1261_vm7, %v1232_v25, %v920_v40  ;;  %v725_v31 = vrot.slane %v723_v6, 1  ;;  %v1310_v41 = vsel %vm1302_vm8, %v1269_v11, %v959_v42 }
  0xeb   : > { %935 = vrot.lane.b32.xlu1 %v7949_v15, %s9775_s26  ;;  %v1642_v22 = vrot.slane %v1626_v51, %v7781_v14  ;;  %v1649_v39 = vrot.slane %v1627_v23, %v7781_v14 }
  0xec   : > { %1079 = vrot.lane.b32.xlu0 %v7957_v45, %s9774_s14 }
  0xed   : > { %v963_v33 = vpop.permute.xlu1 %962  ;;  %v1111_v7 = vpop.permute.xlu0 %1110  ;;  %v2226_v6 = vcombine.low %v1635_v37, %v1649_v39 }
  0xee   : > { %v1439_v58 = vsel %vm1425_vm11, %v1398_v55, %v1111_v7  ;;  %v1314_v61 = vsel %vm1302_vm8, %v1273_v29, %v963_v33 }
  0xef   : > { %974 = vrot.lane.b32.xlu1 %v7756_v56, %s7410_s23  ;;  %v1675_v59 = vcombine.high %v1439_v58, %v1439_v58  ;;  %v1682_v60 = vrot.slane %v1439_v58, %v7781_v14  ;;  %v1628_v56 = vcombine.high %v1626_v51, %v1626_v51  ;;  %v8050_v58 = vor.u32 %v717_v4, %v7942_v34 }
  0xf0   : > { %937 = vrot.lane.b32.xlu0 %v7957_v45, %s9775_s26  ;;  %v2242_v11 = vrot.slane %v2226_v6, %v7781_v14 }
  0xf1   : > { %v1011_v62 = vpop.permute.xlu1 %1010  ;;  %v1007_v0 = vpop.permute.xlu0 %1006  ;;  %v7997_v5 = vrot.slane %v1675_v59, %v7781_v14  ;;  %v1690_v24 = vcombine.high %v1682_v60, %v1682_v60  ;;  %v8000_v3 = vrot.slane %v1682_v60, %v7781_v14  ;;  %v1656_v28 = vrot.slane %v1628_v56, %v7781_v14 }
  0xf2   : > { %v1355_v9 = vsel %vm1343_vm9, %v1314_v61, %v1011_v62  ;;  %v1351_v40 = vsel %vm1343_vm9, %v1310_v41, %v1007_v0  ;;  %v6667_v59 = vcombine.high %v1635_v37, %v1649_v39  ;;  %v726_v60 = vor.u32 %v725_v31, %v721_v2 }
  0xf3   : > { %978 = vrot.lane.b32.xlu1 %v7859_v35, %s7410_s23  ;;  %v1712_v26 = vrot.slane %v1690_v24, %v7781_v14  ;;  %v8026_v8 = vrot.slane %v7997_v5, %v7781_v14  ;;  %v1720_v36 = vcombine.high %v8000_v3, %v8000_v3  ;;  %v2228_v33 = vcombine.low %v1642_v22, %v1656_v28 }
  0xf4   : > { %1122 = vrot.lane.b32.xlu0 %v7987_v12, %s9776_s15  ;;  %v6668_v62 = vcombine.high %v1642_v22, %v1656_v28  ;;  %v2249_v23 = vrot.slane %v6667_v59, %v7781_v14 }
  0xf5   : > { %v1066_v27 = vpop.permute.xlu1 %1065  ;;  %v1062_v30 = vpop.permute.xlu0 %1061  ;;  %v1722_v38 = vcombine.high %v1712_v26, %v1712_v26  ;;  %v2276_v51 = vcombine.low %v1712_v26, %v1720_v36  ;;  %v2256_v34 = vrot.slane %v2228_v33, %v7781_v14  ;;  %v8096_v36 = vsel %vm9763_vm0, %v803_v20, %v8076_v10  ;;  %v8121_v33 = vld [vmem:[%s7660_s13 + $0x18] sm:$0xff]   ;;  %v8185_v20 = vld [vmem:[%s7660_s13 + $0x24] sm:$0xff]  }
  0xf6   : > { %v1396_v49 = vsel %vm1384_vm10, %v1355_v9, %v1066_v27  ;;  %v1392_v48 = vsel %vm1384_vm10, %v1351_v40, %v1062_v30  ;;  %v2284_v25 = vrot.slane %v6668_v62, %v7781_v14 }
  0xf7   : > { %1022 = vrot.lane.b32.xlu1 %v7792_v18, %s7409_s22  ;;  %v2277_v44 = vcombine.low %v1722_v38, %v8026_v8  ;;  %v728_v18 = vshll.u32 %v8016_v32, 16  ;;  %v2298_v1 = vrot.slane %v2276_v51, %v7781_v14  ;;  %v2258_v28 = vcombine.low %v2249_v23, %v2256_v34 }
  0xf8   : > { %980 = vrot.lane.b32.xlu0 %v7987_v12, %s7410_s23  ;;  %v732_v34 = vshrl.u32 %v8016_v32, 16 }
  0xf9   : > { %v1109_v43 = vpop.permute.xlu1 %1108  ;;  %v1105_v50 = vpop.permute.xlu0 %1104  ;;  %v2305_v63 = vrot.slane %v2277_v44, %v7781_v14  ;;  %v8059_v0 = vrot.slane %v728_v18, 1  ;;  %v2272_v44 = vrot.slane %v2258_v28, %v7781_v14 }
  0xfa   : > { %v1437_v42 = vsel %vm1425_vm11, %v1396_v49, %v1109_v43  ;;  %v1433_v55 = vsel %vm1425_vm11, %v1392_v48, %v1105_v50  ;;  %v8132_v50 = vld [vmem:[%s7660_s13 + $0x20] ss:$0 sps:$4 sm:$0x33]  }
  0xfb   : > { %v1667_v7 = vrot.slane %v1437_v42, %v7781_v14  ;;  %1028 = vrot.lane.b32.xlu1 %v7975_v52, %s7409_s22  ;;  %v1604_v57 = vrot.slane %v1433_v55, %v7781_v14  ;;  %v2307_v2 = vcombine.low %v2298_v1, %v2305_v63  ;;  %v949_v63 = vrot.slane %v8121_v33, 1  ;;  %v7355_v1 = vld [vmem:[%s7515_s20 + $0x30] sm:$0xff]  }
  0xfc   : > { %1026 = vrot.lane.b32.xlu0 %v7923_v17, %s7409_s22 }
  0xfd   : > { %v1674_v47 = vrot.slane %v1667_v7, %v7781_v14  ;;  %v8057_v56 = vpop.permute.xlu1 %822  ;;  %v1611_v19 = vrot.slane %v1604_v57, %v7781_v14  ;;  %v8065_v24 = vpop.permute.xlu0 %751  ;;  %v2321_v39 = vrot.slane %v2307_v2, %v7781_v14 }
  0xff   : > { %v2275_v21 = vcombine.low %v1674_v47, %v8000_v3  ;;  %1081 = vrot.lane.b32.xlu1 %v8050_v58, %s9774_s14  ;;  %v2225_v4 = vcombine.low %v1597_v16, %v1611_v19  ;;  %v8084_v3 = vsel %vm584_vm1, %v726_v60, %v8059_v0  ;;  %v8163_v47 = vrot.slane %v8132_v50, 1 }
 0x100   : > { %1077 = vrot.lane.b32.xlu0 %v7949_v15, %s9774_s14 }
 0x101   : > { %v2291_v26 = vrot.slane %v2275_v21, %v7781_v14  ;;  %v8080_v27 = vpop.permute.xlu1 %870  ;;  %v2235_v29 = vrot.slane %v2225_v4, %v7781_v14  ;;  %v8088_v30 = vpop.permute.xlu0 %755  ;;  %v951_v19 = vsel %vm9763_vm0, %v949_v63, %v8163_v47  ;;  %v1156_v21 = vsel %vm1138_vm4, %v7355_v1, %v8065_v24  ;;  %v7356_v63 = vld [vmem:[%s7515_s20 + $0x2c] ss:$0 sps:$4 sm:$0x33]   ;;  %v7357_v1 = vld [vmem:[%s7515_s20 + $0x38] ss:$0 sps:$4 sm:$0x33]  }
 0x102   : > { %v8182_v4 = vor.u32 %v732_v34, %v8059_v0  ;;  %v8198_v0 = vld [vmem:[%s7660_s13 + $0x2c] ss:$0 sps:$4 sm:$0x33]  }
 0x103   : > { %v2306_v31 = vcombine.low %v2284_v25, %v2291_v26  ;;  %1120 = vrot.lane.b32.xlu1 %v7859_v35, %s9776_s15  ;;  %v2257_v61 = vcombine.low %v2235_v29, %v2242_v11  ;;  %v1197_v25 = vsel %vm1179_vm5, %v1156_v21, %v8057_v56  ;;  %v1043_v29 = vshll.u32 %v8185_v20, 16 }
 0x104   : > { %1083 = vrot.lane.b32.xlu0 %v8084_v3, %s9774_s14  ;;  %v1238_v2 = vsel %vm1220_vm6, %v1197_v25, %v8080_v27  ;;  %v1096_v34 = vrot.slane %v8198_v0, 1 }
 0x105   : > { %v8098_v38 = vpop.permute.xlu1 %826  ;;  %v2314_v22 = vrot.slane %v2306_v31, %v7781_v14  ;;  %v8102_v41 = vpop.permute.xlu0 %749  ;;  %v2265_v9 = vrot.slane %v2257_v61, %v7781_v14 }
 0x107   : > { %1126 = vrot.lane.b32.xlu1 %v8096_v36, %s9776_s15  ;;  %v2322_v40 = vcombine.low %v2314_v22, %v2321_v39  ;;  %v2273_v49 = vcombine.low %v2265_v9, %v2272_v44  ;;  %v1041_v9 = vshrl.u32 %v8185_v20, 16  ;;  %v1045_v44 = vrot.slane %v1043_v29, 1 }
 0x108   : > { %1124 = vrot.lane.b32.xlu0 %v7970_v46, %s9776_s15 }
 0x109   : > { %v8110_v43 = vpop.permute.xlu1 %753  ;;  %7142 = vmatprep.mubr.msk.bf16.mxu0 %vm2692_vm12, %v2273_v49  ;;  %v926_v18 = vpop.permute.xlu0 %925 }
 0x10a   : > { %7143 = vmatmul.mubr.msk.bf16.gmra.mrb[4].mxu0 %vm2692_vm12, %v2322_v40  ;;  %v1279_v24 = vsel %vm1261_vm7, %v1238_v2, %v926_v18  ;;  %v1048_v40 = vshll.u32 %v8198_v0, 16 }
 0x10b   : > { %838 = vrot.lane.b32.xlu1 %v7987_v12, %s7411_s24  ;;  %v897_v12 = vshll.u32 %v8121_v33, 16 }
 0x10c   : > { %767 = vrot.lane.b32.xlu0 %v7957_v45, %s7412_s25 }
 0x10d   : > { %v8118_v37 = vpop.permute.xlu1 %874  ;;  %v8123_v48 = vpop.permute.xlu0 %820  ;;  %v899_v7 = vrot.slane %v897_v12, 1 }
 0x10f   : > { %765 = vrot.lane.b32.xlu1 %v7949_v15, %s7412_s25  ;;  %v895_v15 = vshrl.u32 %v8121_v33, 16 }
 0x110   : > { %886 = vrot.lane.b32.xlu0 %v7975_v52, %s7408_s21  ;;  %v902_v52 = vshll.u32 %v8132_v50, 16 }
 0x111   : > { %v8129_v42 = vpop.permute.xlu1 %824  ;;  %v969_v51 = vpop.permute.xlu0 %968 }
 0x112   : > { %v8151_v57 = vrot.slane %v902_v52, 1  ;;  %v1320_v28 = vsel %vm1302_vm8, %v1279_v24, %v969_v51 }
 0x113   : > { %836 = vrot.lane.b32.xlu1 %v7859_v35, %s7411_s24  ;;  %v900_v35 = vor.u32 %v899_v7, %v895_v15  ;;  %v8218_v15 = vrot.slane %v1048_v40, 1 }
 0x114   : > { %941 = vrot.lane.b32.xlu0 %v8084_v3, %s9775_s26 }
 0x115   : > { %v8139_v45 = vpop.permute.xlu1 %929  ;;  %v8143_v55 = vpop.permute.xlu0 %868 }
 0x117   : > { %884 = vrot.lane.b32.xlu1 %v7923_v17, %s7408_s21  ;;  %v905_v17 = vsel %vm584_vm1, %v900_v35, %v8151_v57 }
 0x118   : > { %984 = vrot.lane.b32.xlu0 %v8096_v36, %s7410_s23 }
 0x119   : > { %v8149_v59 = vpop.permute.xlu1 %872  ;;  %v1017_v60 = vpop.permute.xlu0 %1016 }
 0x11a   : > { %v1361_v56 = vsel %vm1343_vm9, %v1320_v28, %v1017_v60  ;;  %v1095_v60 = vrot.slane %v8185_v20, 1 }
 0x11b   : > { %939 = vrot.lane.b32.xlu1 %v8050_v58, %s9775_s26 }
 0x11c   : > { %1032 = vrot.lane.b32.xlu0 %v8121_v33, %s7409_s22 }
 0x11d   : > { %v8157_v62 = vpop.permute.xlu1 %972  ;;  %v8165_v6 = vpop.permute.xlu0 %923 }
 0x11f   : > { %982 = vrot.lane.b32.xlu1 %v7970_v46, %s7410_s23 }
 0x120   : > { %1087 = vrot.lane.b32.xlu0 %v905_v17, %s9774_s14 }
 0x121   : > { %v8171_v16 = vpop.permute.xlu1 %927  ;;  %v1072_v23 = vpop.permute.xlu0 %1071 }
 0x122   : > { %v1402_v27 = vsel %vm1384_vm10, %v1361_v56, %v1072_v23 }
 0x123   : > { %1030 = vrot.lane.b32.xlu1 %v8016_v32, %s7409_s22 }
 0x124   : > { %1130 = vrot.lane.b32.xlu0 %v951_v19, %s9776_s15 }
 0x125   : > { %v1021_v26 = vpop.permute.xlu1 %1020 }
 0x126   : > { %v967_v11 = vpop.permute.xlu0 %966 }
 0x127   : > { %1128 = vrot.lane.b32.xlu1 %v8076_v10, %s9776_s15 }
 0x128   : > { %1085 = vrot.lane.b32.xlu0 %v8182_v4, %s9774_s14 }
 0x129   : > { %v971_v31 = vpop.permute.xlu1 %970 }
 0x12a   : > { %v1115_v61 = vpop.permute.xlu0 %1114 }
 0x12b   : > { %v1443_v22 = vsel %vm1425_vm11, %v1402_v27, %v1115_v61  ;;  %842 = vrot.lane.b32.xlu1 %v8096_v36, %s7411_s24  ;;  %v1160_v36 = vsel %vm1138_vm4, %v7648_v13, %v8088_v30  ;;  %v1154_v13 = vsel %vm1138_vm4, %v7356_v63, %v8102_v41 }
 0x12c   : > { %v1738_v39 = vcombine.high %v1443_v22, %v1443_v22  ;;  %771 = vrot.lane.b32.xlu0 %v8084_v3, %s7412_s25  ;;  %v1745_v51 = vrot.slane %v1443_v22, %v7781_v14  ;;  %v1046_v3 = vor.u32 %v1045_v44, %v1041_v9  ;;  %v1201_v7 = vsel %vm1179_vm5, %v1160_v36, %v8098_v38 }
 0x12d   : > { %v1076_v49 = vpop.permute.xlu1 %1075  ;;  %v1242_v30 = vsel %vm1220_vm6, %v1201_v7, %v8118_v37  ;;  %v1158_v38 = vsel %vm1138_vm4, %v7357_v1, %v8110_v43  ;;  %v1195_v21 = vsel %vm1179_vm5, %v1154_v13, %v8123_v48  ;;  %v1097_v7 = vsel %vm9763_vm0, %v1095_v60, %v1096_v34 }
 0x12e   : > { %v1752_v18 = vrot.slane %v1738_v39, %v7781_v14  ;;  %v1015_v12 = vpop.permute.xlu0 %1014  ;;  %v1753_v23 = vcombine.high %v1745_v51, %v1745_v51  ;;  %v1199_v41 = vsel %vm1179_vm5, %v1158_v38, %v8129_v42  ;;  %v1236_v37 = vsel %vm1220_vm6, %v1195_v21, %v8143_v55 }
 0x12f   : > { %945 = vrot.lane.b32.xlu1 %v905_v17, %s9775_s26  ;;  %v1691_v17 = vcombine.high %v7997_v5, %v7997_v5  ;;  %v1283_v5 = vsel %vm1261_vm7, %v1242_v30, %v8139_v45  ;;  %v1051_v43 = vsel %vm584_vm1, %v1046_v3, %v8218_v15  ;;  %v1240_v48 = vsel %vm1220_vm6, %v1199_v41, %v8149_v59 }
 0x130   : > { %890 = vrot.lane.b32.xlu0 %v8121_v33, %s7408_s21  ;;  %v1754_v52 = vcombine.high %v1752_v18, %v1752_v18  ;;  %v1324_v25 = vsel %vm1302_vm8, %v1283_v5, %v8157_v62  ;;  %v1277_v45 = vsel %vm1261_vm7, %v1236_v37, %v8165_v6  ;;  %v1281_v62 = vsel %vm1261_vm7, %v1240_v48, %v8171_v16 }
 0x131   : > { %v1070_v35 = vpop.permute.xlu1 %1069  ;;  %v1365_v42 = vsel %vm1343_vm9, %v1324_v25, %v1021_v26  ;;  %v1719_v2 = vrot.slane %v1691_v17, %v7781_v14  ;;  %v1322_v59 = vsel %vm1302_vm8, %v1281_v62, %v971_v31  ;;  %v1768_v29 = vrot.slane %v1752_v18, %v7781_v14 }
 0x132   : > { %v1019_v33 = vpop.permute.xlu0 %1018  ;;  %v1406_v24 = vsel %vm1384_vm10, %v1365_v42, %v1076_v49  ;;  %v1775_v6 = vrot.slane %v1753_v23, %v7781_v14  ;;  %v1721_v16 = vcombine.high %v8026_v8, %v8026_v8  ;;  %v1761_v27 = vrot.slane %v1745_v51, %v7781_v14 }
 0x133   : > { %988 = vrot.lane.b32.xlu1 %v951_v19, %s7410_s23  ;;  %v1782_v19 = vrot.slane %v1754_v52, %v7781_v14  ;;  %v1363_v56 = vsel %vm1343_vm9, %v1322_v59, %v1019_v33  ;;  %v1723_v1 = vcombine.high %v1719_v2, %v1719_v2 }
 0x134   : > { %769 = vrot.lane.b32.xlu0 %v8050_v58, %s7412_s25  ;;  %v1318_v58 = vsel %vm1302_vm8, %v1277_v45, %v967_v11  ;;  %v2325_v18 = vcombine.low %v1761_v27, %v1775_v6  ;;  %v2323_v52 = vcombine.low %v1719_v2, %v1721_v16  ;;  %v906_v2 = vshrl.u32 %v8132_v50, 16  ;;  %v7280_v16 = vld [vmem:[%s9752_s4 + $0x40] sm:$0xff]  }
 0x135   : > { %v1074_v55 = vpop.permute.xlu1 %1073  ;;  %v1359_v11 = vsel %vm1343_vm9, %v1318_v58, %v1015_v12  ;;  %v2372_v61 = vcombine.low %v1768_v29, %v1782_v19  ;;  %v6670_v9 = vcombine.high %v1768_v29, %v1782_v19  ;;  %v6669_v12 = vcombine.high %v1761_v27, %v1775_v6  ;;  %6862 = vmatprep.subr.bf16.mxu1 %v7280_v16 }
 0x136   : > { %v1119_v28 = vpop.permute.xlu0 %1118  ;;  %v1400_v22 = vsel %vm1384_vm10, %v1359_v11, %v1070_v35  ;;  %v2347_v38 = vrot.slane %v2325_v18, %v7781_v14  ;;  %v2333_v19 = vrot.slane %v2323_v52, %v7781_v14  ;;  %v3386_v29 = vand.u32 127, %v1490_v54  ;;  %v7281_v54 = vld [vmem:[%s9752_s4] sm:$0xff]   ;;  %v7287_v52 = vld [vmem:[%s9752_s4 + $0x18] sm:$0xff]  }
 0x137   : > { %v8264_v26 = vsel %vm1425_vm11, %v1406_v24, %v1119_v28  ;;  %1036 = vrot.lane.b32.xlu1 %v8185_v20, %s7409_s22  ;;  %v1404_v20 = vsel %vm1384_vm10, %v1363_v56, %v1074_v55  ;;  %v2382_v13 = vrot.slane %v2372_v61, %v7781_v14  ;;  %v2389_v30 = vrot.slane %v6670_v9, %v7781_v14 }
 0x138   : > { %v1808_v31 = vrot.slane %v8264_v26, %v7781_v14  ;;  %840 = vrot.lane.b32.xlu0 %v7970_v46, %s7411_s24  ;;  %v2354_v60 = vrot.slane %v6669_v12, %v7781_v14  ;;  %v908_v56 = vor.u32 %v906_v2, %v8151_v57  ;;  %vm3387_vm13 = vcmp.ge.s32.totalorder %v3386_v29, 1  ;;  %6863 = vmatpush3.bf16.msra.mxu1 %v7281_v54  ;;  %v7282_v57 = vld [vmem:[%s9752_s4 + $0x48] sm:$0xff]   ;;  %v7302_v54 = vld [vmem:[%s9752_s4 + $0x78] sm:$0xff]  }
 0x139   : > { %v1117_v39 = vpop.permute.xlu1 %1116  ;;  %v2404_v48 = vcombine.low %v2382_v13, %v2389_v30  ;;  %vm3388_vm14 = vcmp.le.s32.totalorder %v3386_v29, 16  ;;  %6864 = vmatprep.subr.bf16.mxu1 %v7282_v57  ;;  %v3416_v12 = vsub.s32 0, %v7767_v53  ;;  %v3431_v30 = vsub.s32 1, %v7767_v53 }
 0x13a   : > { %v1816_v8 = vcombine.high %v1808_v31, %v1808_v31  ;;  %v1824_v44 = vrot.slane %v1808_v31, %v7781_v14  ;;  %v1445_v40 = vsel %vm1425_vm11, %v1404_v20, %v1117_v39  ;;  %v1113_v49 = vpop.permute.xlu0 %1112  ;;  %v2356_v45 = vcombine.low %v2347_v38, %v2354_v60  ;;  %vm8361_vm3 = vmand %vm3387_vm13, %vm3388_vm14  ;;  %v7293_v60 = vld [vmem:[%s9752_s4 + $0x88] sm:$0xff]  }
 0x13b   : > { %v1793_v36 = vrot.slane %v1445_v40, %v7781_v14  ;;  %v1441_v46 = vsel %vm1425_vm11, %v1400_v22, %v1113_v49  ;;  %1091 = vrot.lane.b32.xlu1 %v1051_v43, %s9774_s14  ;;  %v2412_v59 = vrot.slane %v2404_v48, %v7781_v14  ;;  %v3394_v31 = vstv %s3393_s16  ;;  %v7283_v22 = vld [vmem:[%s9752_s4 + $0x8] sm:$0xff]   ;;  %v7285_v40 = vld [vmem:[%s9752_s4 + $0x10] sm:$0xff]  }
 0x13c   : > { %v8285_v51 = vrot.slane %v1816_v8, %v7781_v14  ;;  %v1846_v3 = vcombine.high %v1824_v44, %v1824_v44  ;;  %888 = vrot.lane.b32.xlu0 %v8016_v32, %s7408_s21  ;;  %v1730_v17 = vrot.slane %v1441_v46, %v7781_v14  ;;  %v2370_v6 = vrot.slane %v2356_v45, %v7781_v14  ;;  %v7284_v8 = vld [vmem:[%s9752_s4 + $0x50] sm:$0xff]   ;;  %v7295_v45 = vld [vmem:[%s9752_s4 + $0x28] sm:$0xff]  }
 0x13d   : > { %v1800_v35 = vrot.slane %v1793_v36, %v7781_v14  ;;  %v8294_v63 = vpop.permute.xlu1 %830  ;;  %vm3395_vm2 = vcmp.eq.s32.totalorder %v3394_v31, 1  ;;  %6865 = vmatpush3.bf16.msra.mxu1 %v7283_v22  ;;  %v7286_v36 = vld [vmem:[%s9752_s4 + $0x58] sm:$0xff]   ;;  %v1801_v2 = vcombine.high %v8264_v26, %v8264_v26 }
 0x13e   : > { %v2375_v33 = vcombine.low %v8285_v51, %v1846_v3  ;;  %v8299_v32 = vpop.permute.xlu0 %759  ;;  %v1737_v5 = vrot.slane %v1730_v17, %v7781_v14  ;;  %vm8367_vm0 = vmor %vm3390_vm15, %vm3395_vm2  ;;  %6866 = vmatprep.subr.bf16.mxu1 %v7284_v8  ;;  %v7418_v3 = vmov 0.0   ;;  %v7288_v17 = vld [vmem:[%s9752_s4 + $0xc0] sm:$0xff]   ;;  %v7303_v22 = vld [vmem:[%s9752_s4 + $0x38] sm:$0xff]  }
 0x13f   : > { %v2374_v21 = vcombine.low %v1800_v35, %v1824_v44  ;;  %1134 = vrot.lane.b32.xlu1 %v1097_v7, %s9776_s15  ;;  %v1052_v44 = vshrl.u32 %v8198_v0, 16  ;;  %vm3398_vm13 = vmand %vm8361_vm3, %vm8367_vm0  ;;  %6926 = vmatprep.subr.bf16.mxu0 %v7288_v17  ;;  %v7304_v8 = vld [vmem:[%s9752_s4 + $0xe0] sm:$0xff]  }
 0x140   : > { %943 = vrot.lane.b32.xlu0 %v8182_v4, %s9775_s26  ;;  %v2403_v23 = vrot.slane %v2375_v33, %v7781_v14  ;;  %v2324_v37 = vcombine.low %v1723_v1, %v1737_v5  ;;  %v8399_v7 = vsel %vm3398_vm13, 1.0, %v7418_v3  ;;  %v7290_v33 = vld [vmem:[%s9752_s4 + $0x60] sm:$0xff]   ;;  %v7292_v1 = vld [vmem:[%s9752_s4 + $0xc8] sm:$0xff]  }
 0x141   : > { %v2396_v41 = vrot.slane %v2374_v21, %v7781_v14  ;;  %v8310_v25 = vpop.permute.xlu1 %757  ;;  %6867 = vmatpush3.bf16.msra.mxu1 %v7285_v40  ;;  %v1054_v46 = vor.u32 %v1052_v44, %v8218_v15  ;;  %v3417_v15 = vrot.slane %v8399_v7, %v3416_v12  ;;  %v3432_v21 = vrot.slane %v8399_v7, %v3431_v30 }
 0x142   : > { %v8312_v43 = vpop.permute.xlu0 %878  ;;  %v2340_v55 = vrot.slane %v2324_v37, %v7781_v14  ;;  %6868 = vmatprep.subr.bf16.mxu1 %v7286_v36 }
 0x143   : > { %v2405_v42 = vcombine.low %v2396_v41, %v2403_v23  ;;  %773 = vrot.lane.b32.xlu1 %v8182_v4, %s7412_s25  ;;  %v7294_v23 = vld [vmem:[%s9752_s4 + $0x68] sm:$0xff]   ;;  %s7424_s25 = smov 124  }
 0x144   : > { %986 = vrot.lane.b32.xlu0 %v8076_v10, %s7410_s23  ;;  %v2355_v62 = vcombine.low %v2333_v19, %v2340_v55  ;;  %v7358_v41 = vld [vmem:[%s7515_s20 + $0x48] sm:$0xff]   ;;  %v7296_v19 = vld [vmem:[%s9752_s4 + $0xd0] sm:$0xff]  }
 0x145   : > { %v8323_v58 = vpop.permute.xlu1 %761  ;;  %v2419_v24 = vrot.slane %v2405_v42, %v7781_v14  ;;  %6869 = vmatpush3.bf16.msra.mxu1 %v7287_v52  ;;  %v1164_v37 = vsel %vm1138_vm4, %v7358_v41, %v8299_v32  ;;  %v3446_v42 = vsub.s32 2, %v7767_v53  ;;  %v7297_v55 = vld [vmem:[%s9752_s4 + $0x90] sm:$0xff]   ;;  %v7359_v41 = vld [vmem:[%s7515_s20 + $0x44] ss:$0 sps:$4 sm:$0x33]  }
 0x146   : > { %v8326_v28 = vpop.permute.xlu0 %933  ;;  %v2363_v4 = vrot.slane %v2355_v62, %v7781_v14  ;;  %6870 = vmatprep.subr.bf16.mxu1 %v7290_v33  ;;  %v7298_v32 = vld [vmem:[%s9752_s4 + $0x70] sm:$0xff]  }
 0x147   : > { %844 = vrot.lane.b32.xlu1 %v8076_v10, %s7411_s24  ;;  %v2420_v11 = vcombine.low %v2412_v59, %v2419_v24  ;;  %v7299_v62 = vld [vmem:[%s9752_s4 + $0x30] sm:$0xff]   ;;  %v7300_v24 = vld [vmem:[%s9752_s4 + $0xd8] sm:$0xff]   ;;  %v1205_v59 = vsel %vm1179_vm5, %v1164_v37, %v8294_v63  ;;  %v3447_v16 = vrot.slane %v8399_v7, %v3446_v42  ;;  %v1815_v63 = vrot.slane %v1801_v2, %v7781_v14 }
 0x148   : > { %1034 = vrot.lane.b32.xlu0 %v8132_v50, %s7409_s22  ;;  %v2371_v27 = vcombine.low %v2363_v4, %v2370_v6  ;;  %v1246_v26 = vsel %vm1220_vm6, %v1205_v59, %v8312_v43  ;;  %v7301_v43 = vld [vmem:[%s9752_s4 + $0x98] sm:$0xff]   ;;  %v1162_v37 = vsel %vm1138_vm4, %v7359_v41, %v8310_v25 }
 0x149   : > { %v8343_v10 = vpop.permute.xlu1 %828  ;;  %v1287_v6 = vsel %vm1261_vm7, %v1246_v26, %v8326_v28  ;;  %v1817_v44 = vcombine.high %v1815_v63, %v1815_v63  ;;  %v1831_v40 = vrot.slane %v1815_v63, %v7781_v14 }
 0x14a   : > { %v8345_v61 = vpop.permute.xlu0 %763  ;;  %7146 = vmatprep.mubr.msk.bf16.mxu0 %vm2692_vm12, %v2371_v27 }
 0x14b   : > { %892 = vrot.lane.b32.xlu1 %v8132_v50, %s7408_s21  ;;  %7147 = vmatmul.mubr.msk.bf16.gmra.mrb[8].mxu0 %vm2692_vm12, %v2420_v11  ;;  %v3461_v11 = vsub.s32 3, %v7767_v53 }
 0x14c   : > { %1089 = vrot.lane.b32.xlu0 %v908_v56, %s9774_s14 }
 0x14d   : > { %v8359_v20 = vpop.permute.xlu1 %832  ;;  %v3462_v9 = vrot.slane %v8399_v7, %v3461_v11  ;;  %v7361_v11 = vld [vmem:[%s7515_s20 + $0x54] sm:$0xff]  }
 0x14e   : > { %v8365_v50 = vpop.permute.xlu0 %976  ;;  %v1168_v63 = vsel %vm1138_vm4, %v7361_v11, %v8345_v61  ;;  %v7308_v61 = vld [vmem:[%s9752_s4 + $0xf0] sm:$0xff]  }
 0x14f   : > { %947 = vrot.lane.b32.xlu1 %v908_v56, %s9775_s26  ;;  %v1328_v56 = vsel %vm1302_vm8, %v1287_v6, %v8365_v50 }
 0x150   : > { %1132 = vrot.lane.b32.xlu0 %v8163_v47, %s9776_s15 }
 0x151   : > { %v8381_v49 = vpop.permute.xlu1 %876 }
 0x152   : > { %v8387_v18 = vpop.permute.xlu0 %834 }
 0x153   : > { %1038 = vrot.lane.b32.xlu1 %v8198_v0, %s7409_s22  ;;  %v7291_v0 = vld [vmem:[%s9752_s4 + $0x20] sm:$0xff]   ;;  %s6634_s22 = sshll.u32 %s9814_s28, 5 }
 0x154   : > { %990 = vrot.lane.b32.xlu0 %v8163_v47, %s7410_s23  ;;  %v7289_v47 = vld [vmem:[%s9752_s4 + $0x80] sm:$0xff]   ;;  %6871 = vmatpush3.bf16.msra.mxu1 %v7291_v0 }
 0x155   : > { %v8404_v35 = vpop.permute.xlu1 %880  ;;  %6927 = vmatpush3.bf16.msra.mxu0 %v7289_v47  ;;  %6872 = vmatprep.subr.bf16.mxu1 %v7294_v23  ;;  %v1847_v47 = vcombine.high %v1831_v40, %v1831_v40 }
 0x156   : > { %v1025_v13 = vpop.permute.xlu0 %1024  ;;  %6928 = vmatprep.subr.bf16.mxu0 %v7292_v1  ;;  %v3491_v1 = vsub.s32 5, %v7767_v53 }
 0x157   : > { %1136 = vrot.lane.b32.xlu1 %v1096_v34, %s9776_s15  ;;  %v1369_v31 = vsel %vm1343_vm9, %v1328_v56, %v1025_v13  ;;  %v8505_v13 = vrot.slane %v1817_v44, %v7781_v14 }
 0x158   : > { %1093 = vrot.lane.b32.xlu0 %v1054_v46, %s9774_s14  ;;  %6873 = vmatpush3.bf16.msra.mxu1 %v7295_v45  ;;  %v1848_v46 = vcombine.high %v8285_v51, %v8285_v51  ;;  %v1203_v45 = vsel %vm1179_vm5, %v1162_v37, %v8343_v10  ;;  %v3492_v2 = vrot.slane %v8399_v7, %v3491_v1  ;;  %s3403_s14 = scalar_select %p3402_p9, 1, 0 }
 0x159   : > { %v8426_v34 = vpop.permute.xlu1 %931  ;;  %6929 = vmatpush3.bf16.msra.mxu0 %v7293_v60  ;;  %6874 = vmatprep.subr.bf16.mxu1 %v7298_v32  ;;  %v7305_v60 = vld [vmem:[%s9752_s4 + $0xa0] sm:$0xff]   ;;  %v1244_v25 = vsel %vm1220_vm6, %v1203_v45, %v8381_v49  ;;  %v1849_v6 = vcombine.high %v8505_v13, %v8505_v13  ;;  %v7360_v49 = vld [vmem:[%s7515_s20 + $0x50] ss:$0 sps:$4 sm:$0x33]  }
 0x15a   : > { %v8431_v38 = vpop.permute.xlu0 %882  ;;  %6930 = vmatprep.subr.bf16.mxu0 %v7296_v19  ;;  %v8513_v51 = vcombine.low %v1848_v46, %v1831_v40  ;;  %v7306_v19 = vld [vmem:[%s9752_s4 + $0xe8] sm:$0xff]   ;;  %v7310_v46 = vld [vmem:[%s9752_s4 + $0xf8] sm:$0xff]  }
 0x15b   : > { %3423 = vbcast.lane.b32.xlu1 %v3417_v15, 264 }
 0x15c   : > { %3419 = vbcast.lane.b32.xlu0 %v3417_v15, 256  ;;  %6875 = vmatpush3.bf16.msra.mxu1 %v7299_v62  ;;  %v7307_v62 = vld [vmem:[%s9752_s4 + $0xa8] sm:$0xff]   ;;  %v2431_v10 = vrot.slane %v8513_v51, %v7781_v14 }
 0x15d   : > { %v8439_v5 = vpop.permute.xlu1 %935  ;;  %6931 = vmatpush3.bf16.msra.mxu0 %v7297_v55  ;;  %6876 = vmatprep.subr.bf16.mxu1 %v7302_v54 }
 0x15e   : > { %v1080_v48 = vpop.permute.xlu0 %1079  ;;  %6932 = vmatprep.subr.bf16.mxu0 %v7300_v24  ;;  %v1285_v24 = vsel %vm1261_vm7, %v1244_v25, %v8426_v34 }
 0x15f   : > { %3434 = vbcast.lane.b32.xlu1 %v3432_v21, 256  ;;  %v1410_v27 = vsel %vm1384_vm10, %v1369_v31, %v1080_v48  ;;  %v8520_v48 = vcombine.low %v8505_v13, %v1847_v47  ;;  %v1209_v31 = vsel %vm1179_vm5, %v1168_v63, %v8387_v18  ;;  %v7309_v18 = vld [vmem:[%s9752_s4 + $0xb0] sm:$0xff]  }
 0x160   : > { %3427 = vbcast.lane.b32.xlu0 %v3417_v15, 272  ;;  %6877 = vmatpush3.bf16.msra.mxu1 %v7303_v22  ;;  %v3476_v15 = vsub.s32 4, %v7767_v53  ;;  %v1250_v54 = vsel %vm1220_vm6, %v1209_v31, %v8431_v38 }
 0x161   : > { %v8470_v29 = vpop.permute.xlu1 %974  ;;  %6933 = vmatpush3.bf16.msra.mxu0 %v7301_v43  ;;  %v2438_v34 = vrot.slane %v8520_v48, %v7781_v14  ;;  %v3521_v48 = vsub.s32 7, %v7767_v53 }
 0x162   : > { %v8474_v4 = vpop.permute.xlu0 %937  ;;  %6934 = vmatprep.subr.bf16.mxu0 %v7304_v8  ;;  %v3477_v42 = vrot.slane %v8399_v7, %v3476_v15  ;;  %v1326_v56 = vsel %vm1302_vm8, %v1285_v24, %v8470_v29 }
 0x163   : > { %3442 = vbcast.lane.b32.xlu1 %v3432_v21, 272  ;;  %v2453_v24 = vcombine.low %v2431_v10, %v2438_v34 }
 0x164   : > { %3438 = vbcast.lane.b32.xlu0 %v3432_v21, 264 }
 0x165   : > { %v8487_v28 = vpop.permute.xlu1 %978  ;;  %6935 = vmatpush3.bf16.msra.mxu0 %v7305_v60  ;;  %v2461_v51 = vrot.slane %v2453_v24, %v7781_v14 }
 0x166   : > { %v1123_v57 = vpop.permute.xlu0 %1122  ;;  %6936 = vmatprep.subr.bf16.mxu0 %v7306_v19 }
 0x167   : > { %v1451_v50 = vsel %vm1425_vm11, %v1410_v27, %v1123_v57  ;;  %3453 = vbcast.lane.b32.xlu1 %v3447_v16, 264 }
 0x168   : > { %3449 = vbcast.lane.b32.xlu0 %v3447_v16, 256  ;;  %v1864_v52 = vcombine.high %v1451_v50, %v1451_v50  ;;  %v1871_v33 = vrot.slane %v1451_v50, %v7781_v14  ;;  %v1291_v50 = vsel %vm1261_vm7, %v1250_v54, %v8474_v4 }
 0x169   : > { %v1023_v36 = vpop.permute.xlu1 %1022  ;;  %6937 = vmatpush3.bf16.msra.mxu0 %v7307_v62 }
 0x16a   : > { %v981_v17 = vpop.permute.xlu0 %980  ;;  %v1878_v21 = vrot.slane %v1864_v52, %v7781_v14  ;;  %v1879_v55 = vcombine.high %v1871_v33, %v1871_v33  ;;  %6938 = vmatprep.subr.bf16.mxu0 %v7308_v61  ;;  %v1887_v8 = vrot.slane %v1871_v33, %v7781_v14  ;;  %v7311_v52 = vld [vmem:[%s9752_s4 + $0xb8] sm:$0xff]  }
 0x16b   : > { %3464 = vbcast.lane.b32.xlu1 %v3462_v9, 256  ;;  %v1332_v44 = vsel %vm1302_vm8, %v1291_v50, %v981_v17  ;;  %v3506_v17 = vsub.s32 6, %v7767_v53 }
 0x16c   : > { %3457 = vbcast.lane.b32.xlu0 %v3447_v16, 272  ;;  %v1880_v59 = vcombine.high %v1878_v21, %v1878_v21  ;;  %v1166_v16 = vsel %vm1138_vm4, %v7360_v49, %v8323_v58  ;;  %v1367_v58 = vsel %vm1343_vm9, %v1326_v56, %v1023_v36  ;;  %v1901_v27 = vrot.slane %v1879_v55, %v7781_v14 }
 0x16d   : > { %v1029_v0 = vpop.permute.xlu1 %1028  ;;  %v1207_v43 = vsel %vm1179_vm5, %v1166_v16, %v8359_v20  ;;  %6939 = vmatpush3.bf16.msra.mxu0 %v7309_v18  ;;  %v1894_v36 = vrot.slane %v1878_v21, %v7781_v14  ;;  %v3507_v19 = vrot.slane %v8399_v7, %v3506_v17  ;;  %v3522_v16 = vrot.slane %v8399_v7, %v3521_v48 }
 0x16e   : > { %v1027_v23 = vpop.permute.xlu0 %1026  ;;  %v1248_v29 = vsel %vm1220_vm6, %v1207_v43, %v8404_v35  ;;  %v1908_v35 = vrot.slane %v1880_v59, %v7781_v14  ;;  %v1373_v4 = vsel %vm1343_vm9, %v1332_v44, %v1029_v0  ;;  %v2424_v13 = vcombine.low %v1887_v8, %v1901_v27  ;;  %6940 = vmatprep.subr.bf16.mxu0 %v7310_v46  ;;  %v7362_v44 = vld [vmem:[%s7660_s13] sm:$0xff]  }
 0x16f   : > { %3472 = vbcast.lane.b32.xlu1 %v3462_v9, 272  ;;  %v1289_v22 = vsel %vm1261_vm7, %v1248_v29, %v8439_v5  ;;  %v6671_v45 = vcombine.high %v1887_v8, %v1901_v27  ;;  %v3384_v29 = vadd.s32 8, %v7767_v53  ;;  %v3404_v18 = vstv %s3403_s14  ;;  %s9618_s14 = sadd.s32 %s6634_s22, %s6633_s17 }
 0x170   : > { %3468 = vbcast.lane.b32.xlu0 %v3462_v9, 264  ;;  %v1330_v5 = vsel %vm1302_vm8, %v1289_v22, %v8487_v28  ;;  %v2471_v0 = vcombine.low %v1894_v36, %v1908_v35  ;;  %v2452_v25 = vrot.slane %v2424_v13, %v7781_v14  ;;  %v6672_v59 = vcombine.high %v1894_v36, %v1908_v35  ;;  %s6635_s27 = sshll.u32 %s9618_s14, 2 }
 0x171   : > { %v1082_v32 = vpop.permute.xlu1 %1081  ;;  %v1371_v47 = vsel %vm1343_vm9, %v1330_v5, %v1027_v23  ;;  %6941 = vmatpush3.bf16.msra.mxu0 %v7311_v52  ;;  %v2480_v11 = vrot.slane %v6671_v45, %v7781_v14  ;;  %vm3401_vm0 = vcmp.le.s32.totalorder %v3384_v29, 8  ;;  %vm3405_vm14 = vcmp.eq.s32.totalorder %v3404_v18, 1  ;;  %s9626_s21 = scalar_lea.vmem %s9754_s6, %s6635_s27  ;;  %s9662_s26 = scalar_lea.vmem %s9756_s8, %s6635_s27 }
 0x172   : > { %v1078_v26 = vpop.permute.xlu0 %1077  ;;  %v1412_v1 = vsel %vm1384_vm10, %v1371_v47, %v1082_v32  ;;  %v2494_v10 = vrot.slane %v6672_v59, %v7781_v14  ;;  %vm3407_vm15 = vmor %vm3401_vm0, %vm3405_vm14  ;;  %v7363_v47 = vld [vmem:[%s7515_s20 + $0x5c] ss:$0 sps:$4 sm:$0x33]  }
 0x173   : > { %3483 = vbcast.lane.b32.xlu1 %v3477_v42, 264  ;;  %v1408_v20 = vsel %vm1384_vm10, %v1367_v58, %v1078_v26  ;;  %v2487_v26 = vrot.slane %v2471_v0, %v7781_v14  ;;  %vm3409_vm2 = vmand %vm8361_vm3, %vm3407_vm15 }
 0x174   : > { %3479 = vbcast.lane.b32.xlu0 %v3477_v42, 256 }
 0x175   : > { %v1121_v57 = vpop.permute.xlu1 %1120  ;;  %v2502_v34 = vcombine.low %v2480_v11, %v2487_v26 }
 0x176   : > { %v1449_v9 = vsel %vm1425_vm11, %v1408_v20, %v1121_v57  ;;  %v1084_v38 = vpop.permute.xlu0 %1083 }
 0x177   : > { %v1856_v40 = vrot.slane %v1449_v9, %v7781_v14  ;;  %3494 = vbcast.lane.b32.xlu1 %v3492_v2, 256  ;;  %v1414_v15 = vsel %vm1384_vm10, %v1373_v4, %v1084_v38  ;;  %v2510_v20 = vrot.slane %v2502_v34, %v7781_v14  ;;  %v8629_v9 = vsel %vm3409_vm2, 1.0, %v7418_v3 }
 0x178   : > { %3487 = vbcast.lane.b32.xlu0 %v3477_v42, 272  ;;  %v3537_v38 = vrot.slane %v8629_v9, %v3416_v12 }
 0x179   : > { %v1863_v28 = vrot.slane %v1856_v40, %v7781_v14  ;;  %v1127_v33 = vpop.permute.xlu1 %1126 }
 0x17a   : > { %v8592_v60 = vsel %vm1425_vm11, %v1414_v15, %v1127_v33  ;;  %v1125_v21 = vpop.permute.xlu0 %1124 }
 0x17b   : > { %v2423_v41 = vcombine.low %v1849_v6, %v1863_v28  ;;  %v8596_v37 = vrot.slane %v8592_v60, %v7781_v14  ;;  %v1453_v23 = vsel %vm1425_vm11, %v1412_v1, %v1125_v21  ;;  %3502 = vbcast.lane.b32.xlu1 %v3492_v2, 272  ;;  %v1927_v36 = vcombine.high %v8592_v60, %v8592_v60 }
 0x17c   : > { %v1919_v42 = vrot.slane %v1453_v23, %v7781_v14  ;;  %3498 = vbcast.lane.b32.xlu0 %v3492_v2, 264 }
 0x17d   : > { %v2445_v55 = vrot.slane %v2423_v41, %v7781_v14  ;;  %v8606_v32 = vrot.slane %v8596_v37, %v7781_v14  ;;  %v839_v62 = vpop.permute.xlu1 %838  ;;  %v1941_v12 = vrot.slane %v1927_v36, %v7781_v14  ;;  %v1942_v52 = vcombine.high %v8596_v37, %v8596_v37 }
 0x17e   : > { %v1926_v2 = vrot.slane %v1919_v42, %v7781_v14  ;;  %v768_v6 = vpop.permute.xlu0 %767 }
 0x17f   : > { %v2454_v49 = vcombine.low %v2445_v55, %v2452_v25  ;;  %3513 = vbcast.lane.b32.xlu1 %v3507_v19, 264  ;;  %v1172_v40 = vsel %vm1138_vm4, %v7362_v44, %v768_v6  ;;  %v1943_v21 = vcombine.high %v1941_v12, %v1941_v12  ;;  %v1964_v41 = vrot.slane %v1942_v52, %v7781_v14 }
 0x180   : > { %v2473_v63 = vcombine.low %v1926_v2, %v8606_v32  ;;  %3509 = vbcast.lane.b32.xlu0 %v3507_v19, 256  ;;  %v1213_v39 = vsel %vm1179_vm5, %v1172_v40, %v839_v62  ;;  %v1957_v26 = vrot.slane %v1941_v12, %v7781_v14 }
 0x181   : > { %v766_v56 = vpop.permute.xlu1 %765  ;;  %v2468_v58 = vrot.slane %v2454_v49, %v7781_v14  ;;  %v1971_v2 = vrot.slane %v1943_v21, %v7781_v14  ;;  %v1974_v6 = vcombine.high %v1964_v41, %v1964_v41 }
 0x182   : > { %v2501_v43 = vrot.slane %v2473_v63, %v7781_v14  ;;  %v887_v31 = vpop.permute.xlu0 %886  ;;  %v1170_v28 = vsel %vm1138_vm4, %v7363_v47, %v766_v56  ;;  %v1972_v56 = vcombine.high %v8606_v32, %v8606_v32 }
 0x183   : > { %3524 = vbcast.lane.b32.xlu1 %v3522_v16, 256  ;;  %v2469_v7 = vcombine.low %v2461_v51, %v2468_v58  ;;  %v1254_v3 = vsel %vm1220_vm6, %v1213_v39, %v887_v31  ;;  %v1975_v29 = vcombine.high %v1971_v2, %v1971_v2 }
 0x184   : > { %v2503_v61 = vcombine.low %v2494_v10, %v2501_v43  ;;  %3517 = vbcast.lane.b32.xlu0 %v3507_v19, 272 }
 0x185   : > { %v837_v54 = vpop.permute.xlu1 %836  ;;  %7150 = vmatprep.mubr.msk.bf16.mxu0 %vm2692_vm12, %v2469_v7  ;;  %v1973_v7 = vcombine.high %v1957_v26, %v1957_v26 }
 0x186   : > { %v942_v27 = vpop.permute.xlu0 %941  ;;  %v2517_v57 = vrot.slane %v2503_v61, %v7781_v14  ;;  %v1211_v0 = vsel %vm1179_vm5, %v1170_v28, %v837_v54  ;;  %v2520_v54 = vcombine.low %v1974_v6, %v1957_v26  ;;  %v7365_v26 = vld [vmem:[%s7660_s13 + $0x8] ss:$0 sps:$4 sm:$0x33]  }
 0x187   : > { %3532 = vbcast.lane.b32.xlu1 %v3522_v16, 272  ;;  %v1295_v17 = vsel %vm1261_vm7, %v1254_v3, %v942_v27  ;;  %v2521_v39 = vcombine.low %v1971_v2, %v1973_v7 }
 0x188   : > { %v2518_v22 = vcombine.low %v2510_v20, %v2517_v57  ;;  %3528 = vbcast.lane.b32.xlu0 %v3522_v16, 264 }
 0x189   : > { %v885_v50 = vpop.permute.xlu1 %884 }
 0x18a   : > { %7151 = vmatmul.mubr.msk.bf16.gmra.mrb[12].mxu0 %vm2692_vm12, %v2518_v22  ;;  %v985_v35 = vpop.permute.xlu0 %984  ;;  %v1252_v37 = vsel %vm1220_vm6, %v1211_v0, %v885_v50 }
 0x18b   : > { %3543 = vbcast.lane.b32.xlu1 %v3537_v38, 264  ;;  %v1336_v13 = vsel %vm1302_vm8, %v1295_v17, %v985_v35  ;;  %v2519_v35 = vcombine.low %v1964_v41, %v1972_v56 }
 0x18c   : > { %3539 = vbcast.lane.b32.xlu0 %v3537_v38, 256 }
 0x18d   : > { %v940_v8 = vpop.permute.xlu1 %939 }
 0x18e   : > { %v1033_v5 = vpop.permute.xlu0 %1032  ;;  %v1293_v48 = vsel %vm1261_vm7, %v1252_v37, %v940_v8  ;;  %v7364_v8 = vld [vmem:[%s7660_s13 + $0xc] sm:$0xff]  }
 0x18f   : > { %v1377_v15 = vsel %vm1343_vm9, %v1336_v13, %v1033_v5  ;;  %v2529_v13 = vrot.slane %v2519_v35, %v7781_v14 }
 0x190   : > { %3547 = vbcast.lane.b32.xlu0 %v3537_v38, 272 }
 0x191   : > { %v983_v4 = vpop.permute.xlu1 %982 }
 0x192   : > { %v1088_v46 = vpop.permute.xlu0 %1087  ;;  %v1334_v19 = vsel %vm1302_vm8, %v1293_v48, %v983_v4  ;;  %v2536_v4 = vrot.slane %v2520_v54, %v7781_v14  ;;  %v8710_v54 = vld [vmem:[%s9751_s3] ss:$0 sm:$0xff] }
 0x193   : > { %v1418_v1 = vsel %vm1384_vm10, %v1377_v15, %v1088_v46 }
 0x195   : > { %v1031_v33 = vpop.permute.xlu1 %1030 }
 0x196   : > { %v1131_v60 = vpop.permute.xlu0 %1130  ;;  %v1375_v55 = vsel %vm1343_vm9, %v1334_v19, %v1031_v33  ;;  %v2543_v33 = vrot.slane %v2521_v39, %v7781_v14 }
 0x197   : > { %v1459_v23 = vsel %vm1425_vm11, %v1418_v1, %v1131_v60  ;;  %v2551_v1 = vcombine.low %v2529_v13, %v2536_v4  ;;  %v7420_v4 = vmov 269488144  }
 0x198   : > { %v1990_v45 = vcombine.high %v1459_v23, %v1459_v23  ;;  %v1997_v42 = vrot.slane %v1459_v23, %v7781_v14 }
 0x199   : > { %v1129_v25 = vpop.permute.xlu1 %1128 }
 0x19a   : > { %v2004_v62 = vrot.slane %v1990_v45, %v7781_v14  ;;  %v2005_v24 = vcombine.high %v1997_v42, %v1997_v42  ;;  %v1086_v59 = vpop.permute.xlu0 %1085  ;;  %v2013_v34 = vrot.slane %v1997_v42, %v7781_v14  ;;  %v2559_v42 = vrot.slane %v2551_v1, %v7781_v14 }
 0x19b   : > { %v1416_v49 = vsel %vm1384_vm10, %v1375_v55, %v1086_v59 }
 0x19c   : > { %v2006_v16 = vcombine.high %v2004_v62, %v2004_v62  ;;  %v2027_v11 = vrot.slane %v2005_v24, %v7781_v14  ;;  %v1457_v63 = vsel %vm1425_vm11, %v1416_v49, %v1129_v25  ;;  %v2020_v43 = vrot.slane %v2004_v62, %v7781_v14 }
 0x19d   : > { %v1982_v51 = vrot.slane %v1457_v63, %v7781_v14  ;;  %v843_v10 = vpop.permute.xlu1 %842  ;;  %v8669_v58 = vpop.f32.mrb[0].mxu0 }
 0x19e   : > { %v2034_v31 = vrot.slane %v2006_v16, %v7781_v14  ;;  %v772_v61 = vpop.permute.xlu0 %771  ;;  %v8672_v20 = vpop.f32.mrb[1].mxu0  ;;  %v2568_v32 = vcombine.low %v2013_v34, %v2027_v11  ;;  %v6673_v57 = vcombine.high %v2013_v34, %v2027_v11  ;;  %v2779_v35 = vadd.f32 %v8669_v58, %v8710_v54 }
 0x19f   : > { %v1989_v27 = vrot.slane %v1982_v51, %v7781_v14  ;;  %v8674_v50 = vpop.f32.mrb[2].mxu0  ;;  %v1176_v44 = vsel %vm1138_vm4, %v7364_v8, %v772_v61  ;;  %v3552_v58 = vrot.slane %v8629_v9, %v3431_v30 }
 0x1a0   : > { %v2570_v18 = vcombine.low %v2020_v43, %v2034_v31  ;;  %v6674_v22 = vcombine.high %v2020_v43, %v2034_v31  ;;  %v8678_v40 = vpop.f32.mrb[3].mxu0  ;;  %v2578_v12 = vrot.slane %v2568_v32, %v7781_v14  ;;  %v2585_v52 = vrot.slane %v6673_v57, %v7781_v14 }
 0x1a1   : > { %v2522_v38 = vcombine.low %v1975_v29, %v1989_v27  ;;  %v946_v5 = vpop.permute.xlu1 %945  ;;  %v1217_v17 = vsel %vm1179_vm5, %v1176_v44, %v843_v10  ;;  %3554 = vbcast.lane.b32.xlu1 %v3552_v58, 256  ;;  %3558 = vbcast.lane.b32.xlu0 %v3552_v58, 264  ;;  %v2782_v30 = vadd.f32 %v8674_v50, %v8710_v54 }
 0x1a2   : > { %v891_v36 = vpop.permute.xlu0 %890  ;;  %v2592_v3 = vrot.slane %v2570_v18, %v7781_v14  ;;  %v2599_v46 = vrot.slane %v6674_v22, %v7781_v14  ;;  %v2600_v21 = vcombine.low %v2578_v12, %v2585_v52  ;;  %v2774_v12 = vadd.f32 %v8710_v54, %v8678_v40 }
 0x1a3   : > { %v2550_v47 = vrot.slane %v2522_v38, %v7781_v14  ;;  %v1258_v0 = vsel %vm1220_vm6, %v1217_v17, %v891_v36  ;;  %v7419_v38 = vmov 1983009808   ;;  %v7366_v36 = vld [vmem:[%s7660_s13 + $0x14] ss:$0 sps:$4 sm:$0x33]  }
 0x1a4   : > { %v2601_v60 = vcombine.low %v2592_v3, %v2599_v46  ;;  %v1299_v41 = vsel %vm1261_vm7, %v1258_v0, %v946_v5  ;;  %v2608_v62 = vrot.slane %v2600_v21, %v7781_v14  ;;  %v2912_v8 = vunpack.c.l.s4 %v7419_v38 }
 0x1a5   : > { %v989_v28 = vpop.permute.xlu1 %988  ;;  %v2552_v23 = vcombine.low %v2543_v33, %v2550_v47  ;;  %v3595_v3 = vunpack.c.l.s4 %v7420_v4  ;;  %v2771_v46 = vadd.f32 %v8710_v54, %v8672_v20  ;;  %v7421_v40 = vmov 842150450   ;;  %3562 = vbcast.lane.b32.xlu1 %v3552_v58, 272 }
 0x1a6   : > { %v770_v15 = vpop.permute.xlu0 %769  ;;  %v1340_v48 = vsel %vm1302_vm8, %v1299_v41, %v989_v28  ;;  %v2615_v25 = vrot.slane %v2601_v60, %v7781_v14  ;;  %v2913_v33 = vunpack.c.0.s8 %v2912_v8  ;;  %v3602_v1 = vunpack.c.l.s4 %v7421_v40 }
 0x1a7   : > { %v2566_v19 = vrot.slane %v2552_v23, %v7781_v14  ;;  %v1174_v2 = vsel %vm1138_vm4, %v7365_v26, %v770_v15  ;;  %v2866_v15 = vmax.f32 %v2779_v35, 0.0  ;;  %v3596_v9 = vunpack.c.0.s8 %v3595_v3 }
 0x1a8   : > { %v2616_v6 = vcombine.low %v2608_v62, %v2615_v25  ;;  %v7422_v60 = vmov 1414812756   ;;  %v2864_v41 = vmax.f32 %v2771_v46, 0.0  ;;  %v3603_v26 = vunpack.c.0.s8 %v3602_v1 }
 0x1a9   : > { %v1037_v37 = vpop.permute.xlu1 %1036  ;;  %v2567_v24 = vcombine.low %v2559_v42, %v2566_v19  ;;  %v3609_v21 = vunpack.c.l.s4 %v7422_v60  ;;  %v2944_v50 = vcombine.high %v2866_v15, %v2866_v15 }
 0x1aa   : > { %v841_v45 = vpop.permute.xlu0 %840  ;;  %v1381_v55 = vsel %vm1343_vm9, %v1340_v48, %v1037_v37  ;;  %v2865_v37 = vmax.f32 %v2774_v12, 0.0  ;;  %v7423_v48 = vmov 1987475062  }
 0x1ab   : > { %7154 = vmatprep.mubr.msk.bf16.mxu0 %vm2692_vm12, %v2567_v24  ;;  %v1215_v11 = vsel %vm1179_vm5, %v1174_v2, %v841_v45  ;;  %v3616_v45 = vunpack.c.l.s4 %v7423_v48  ;;  %v8743_v24 = vsub.s32 %v2913_v33, %v7767_v53  ;;  %v2867_v2 = vmax.f32 %v2782_v30, 0.0 }
 0x1ac   : > { %7155 = vmatmul.mubr.msk.bf16.gmra.mrb[16].mxu0 %vm2692_vm12, %v2616_v6 }
 0x1ad   : > { %v1092_v59 = vpop.permute.xlu1 %1091  ;;  %v8762_v35 = vrot.slane %v2867_v2, %v8743_v24  ;;  %v2934_v38 = vrot.slane %v2865_v37, %v8743_v24 }
 0x1ae   : > { %v889_v49 = vpop.permute.xlu0 %888  ;;  %v1422_v16 = vsel %vm1384_vm10, %v1381_v55, %v1092_v59 }
 0x1af   : > { %v1256_v43 = vsel %vm1220_vm6, %v1215_v11, %v889_v49  ;;  %v8747_v49 = vsub.s32 %v3596_v9, %v7767_v53  ;;  %v2910_v11 = vcombine.high %v2864_v41, %v2864_v41  ;;  %v2976_v33 = vcombine.high %v8762_v35, %v8762_v35 }
 0x1b1   : > { %v1135_v63 = vpop.permute.xlu1 %1134 }
 0x1b2   : > { %v1463_v56 = vsel %vm1425_vm11, %v1422_v16, %v1135_v63  ;;  %v944_v51 = vpop.permute.xlu0 %943  ;;  %v3610_v16 = vunpack.c.0.s8 %v3609_v21  ;;  %v2927_v63 = vcombine.high %v2865_v37, %v2865_v37 }
 0x1b3   : > { %v2053_v10 = vcombine.high %v1463_v56, %v1463_v56  ;;  %v2060_v34 = vrot.slane %v1463_v56, %v7781_v14  ;;  %v1297_v27 = vsel %vm1261_vm7, %v1256_v43, %v944_v51 }
 0x1b4   : > { %v8774_v12 = vsub.s32 %v3610_v16, %v7767_v53 }
 0x1b5   : > { %v2067_v31 = vrot.slane %v2053_v10, %v7781_v14  ;;  %v2068_v61 = vcombine.high %v2060_v34, %v2060_v34  ;;  %v774_v7 = vpop.permute.xlu1 %773  ;;  %v2076_v42 = vrot.slane %v2060_v34, %v7781_v14 }
 0x1b6   : > { %v987_v29 = vpop.permute.xlu0 %986  ;;  %v1178_v39 = vsel %vm1138_vm4, %v7366_v36, %v774_v7  ;;  %v8754_v7 = vrot.slane %v2866_v15, %v8743_v24  ;;  %vm9781_vm4 = vcmask 1046528  }
 0x1b7   : > { %v2069_v32 = vcombine.high %v2067_v31, %v2067_v31  ;;  %v2083_v57 = vrot.slane %v2067_v31, %v7781_v14  ;;  %v8715_v18 = vrot.slane %v2068_v61, %v7781_v14  ;;  %v1338_v44 = vsel %vm1302_vm8, %v1297_v27, %v987_v29  ;;  %vm9802_vm3 = vmmov %vm9781_vm4 }
 0x1b8   : > { %v2098_v10 = vcombine.high %v2076_v42, %v2076_v42  ;;  %v3617_v61 = vunpack.c.0.s8 %v3616_v45  ;;  %v8757_v29 = vrot.slane %v2944_v50, %v8743_v24  ;;  %v2917_v27 = vrot.slane %v2864_v41, %v8743_v24 }
 0x1b9   : > { %v845_v22 = vpop.permute.xlu1 %844  ;;  %v8730_v52 = vrot.slane %v2069_v32, %v7781_v14  ;;  %v2099_v17 = vcombine.high %v2083_v57, %v2083_v57  ;;  %v2100_v13 = vcombine.high %v8715_v18, %v8715_v18 }
 0x1ba   : > { %v1035_v5 = vpop.permute.xlu0 %1034  ;;  %v1219_v20 = vsel %vm1179_vm5, %v1178_v39, %v845_v22  ;;  %v2961_v22 = vcombine.high %v2867_v2, %v2867_v2  ;;  %v8770_v39 = vsub.s32 %v3603_v26, %v7767_v53  ;;  %v2618_v4 = vcombine.low %v8715_v18, %v2098_v10  ;;  %vm9782_vm5 = vmmov %vm9781_vm4 }
 0x1bb   : > { %v1379_v47 = vsel %vm1343_vm9, %v1338_v44, %v1035_v5  ;;  %v2619_v19 = vcombine.low %v2100_v13, %v2083_v57  ;;  %v2620_v25 = vcombine.low %v8730_v52, %v2099_v17  ;;  %v2924_v44 = vrot.slane %v2910_v11, %v8743_v24 }
 0x1bc   : > { %v2941_v5 = vrot.slane %v2927_v63, %v8743_v24  ;;  %v2959_v17 = vcombine.high %v8754_v7, %v8754_v7  ;;  %v2960_v13 = vcombine.high %v8757_v29, %v8757_v29  ;;  %v8783_v15 = vsub.s32 %v3617_v61, %v7767_v53 }
 0x1bd   : > { %v893_v28 = vpop.permute.xlu1 %892  ;;  %v2641_v34 = vrot.slane %v2619_v19, %v7781_v14  ;;  %v2648_v43 = vrot.slane %v2620_v25, %v7781_v14  ;;  %v8786_v18 = vrot.slane %v2961_v22, %v8743_v24  ;;  %v2926_v40 = vcombine.high %v2924_v44, %v2924_v44 }
 0x1be   : > { %v1090_v0 = vpop.permute.xlu0 %1089  ;;  %v1260_v55 = vsel %vm1220_vm6, %v1219_v20, %v893_v28  ;;  %v2942_v20 = vcombine.high %v2934_v38, %v2934_v38  ;;  %v2943_v1 = vcombine.high %v2941_v5, %v2941_v5  ;;  %v2101_v30 = vcombine.high %v8730_v52, %v8730_v52  ;;  %vm9783_vm6 = vmmov %vm9781_vm4 }
 0x1bf   : > { %v1420_v23 = vsel %vm1384_vm10, %v1379_v47, %v1090_v0  ;;  %v8776_v58 = vcombine.low %v2641_v34, %v2648_v43  ;;  %v2925_v47 = vcombine.high %v2917_v27, %v2917_v27  ;;  %v2634_v60 = vrot.slane %v2618_v4, %v7781_v14 }
 0x1c1   : > { %v948_v62 = vpop.permute.xlu1 %947  ;;  %v2664_v37 = vrot.slane %v8776_v58, %v7781_v14 }
 0x1c2   : > { %v1133_v59 = vpop.permute.xlu0 %1132  ;;  %v1301_v56 = vsel %vm1261_vm7, %v1260_v55, %v948_v62  ;;  %vm9785_vm7 = vmmov %vm9781_vm4 }
 0x1c3   : > { %v1461_v6 = vsel %vm1425_vm11, %v1420_v23, %v1133_v59 }
 0x1c4   : > { %v2045_v51 = vrot.slane %v1461_v6, %v7781_v14 }
 0x1c5   : > { %v1039_v31 = vpop.permute.xlu1 %1038 }
 0x1c6   : > { %v2052_v32 = vrot.slane %v2045_v51, %v7781_v14  ;;  %v991_v57 = vpop.permute.xlu0 %990 }
 0x1c7   : > { %v1342_v8 = vsel %vm1302_vm8, %v1301_v56, %v991_v57  ;;  %vm9787_vm8 = vmmov %vm9781_vm4 }
 0x1c8   : > { %v1383_v36 = vsel %vm1343_vm9, %v1342_v8, %v1039_v31  ;;  %v2617_v3 = vcombine.low %v2052_v32, %v2076_v42  ;;  %vm9790_vm9 = vmmov %vm9781_vm4 }
 0x1c9   : > { %v1137_v46 = vpop.permute.xlu1 %1136 }
 0x1ca   : > { %v1094_v28 = vpop.permute.xlu0 %1093  ;;  %v2627_v53 = vrot.slane %v2617_v3, %v7781_v14 }
 0x1cb   : > { %v1424_v0 = vsel %vm1384_vm10, %v1383_v36, %v1094_v28  ;;  %vm9793_vm10 = vmmov %vm9781_vm4 }
 0x1cc   : > { %v1465_v9 = vsel %vm1425_vm11, %v1424_v0, %v1137_v46  ;;  %v2649_v6 = vcombine.low %v2627_v53, %v2634_v60  ;;  %vm9794_vm11 = vmmov %vm9781_vm4 }
 0x1cd   : > { %v2108_v21 = vrot.slane %v1465_v9, %v7781_v14  ;;  %v3424_v41 = vpop.permute.xlu1 %3423 }
 0x1ce   : > { %v3628_v23 = vrot.slane %v3424_v41, %v8747_v49  ;;  %v3635_v48 = vrot.slane %v3424_v41, %v8770_v39  ;;  %v3642_v45 = vrot.slane %v3424_v41, %v8774_v12  ;;  %v3649_v52 = vrot.slane %v3424_v41, %v8783_v15  ;;  %v3420_v42 = vpop.permute.xlu0 %3419 }
 0x1cf   : > { %v2115_v19 = vrot.slane %v2108_v21, %v7781_v14  ;;  %v3600_v25 = vrot.slane %v3420_v42, %v8747_v49  ;;  %v3607_v55 = vrot.slane %v3420_v42, %v8770_v39  ;;  %v3614_v62 = vrot.slane %v3420_v42, %v8774_v12 }
 0x1d0   : > { %v4318_v50 = vmul.f32 %v3628_v23, %v2934_v38  ;;  %v4319_v59 = vmul.f32 %v3635_v48, %v2942_v20  ;;  %v4320_v26 = vmul.f32 %v3642_v45, %v2941_v5  ;;  %v4321_v2 = vmul.f32 %v3649_v52, %v2943_v1 }
 0x1d1   : > { %v3621_v16 = vrot.slane %v3420_v42, %v8783_v15  ;;  %v4314_v11 = vmul.f32 %v3600_v25, %v2917_v27  ;;  %v4315_v63 = vmul.f32 %v3607_v55, %v2925_v47  ;;  %v3435_v56 = vpop.permute.xlu1 %3434  ;;  %v4316_v34 = vmul.f32 %v3614_v62, %v2924_v44 }
 0x1d2   : > { %v4511_v51 = vcombine.low %v4318_v50, %v4319_v59  ;;  %v4512_v10 = vcombine.low %v4320_v26, %v4321_v2  ;;  %v3663_v43 = vrot.slane %v3435_v56, %v8747_v49  ;;  %v3428_v31 = vpop.permute.xlu0 %3427  ;;  %v3670_v57 = vrot.slane %v3435_v56, %v8770_v39 }
 0x1d3   : > { %v4317_v61 = vmul.f32 %v3621_v16, %v2926_v40  ;;  %v4494_v32 = vcombine.low %v4314_v11, %v4315_v63  ;;  %v3677_v22 = vrot.slane %v3435_v56, %v8774_v12  ;;  %v2666_v38 = vcombine.low %v2101_v30, %v2115_v19 }
 0x1d4   : > { %v4519_v8 = vrot.slane %v4511_v51, %v8743_v24  ;;  %v3684_v5 = vrot.slane %v3435_v56, %v8783_v15  ;;  %v4323_v27 = vmul.f32 %v3663_v43, %v2959_v17  ;;  %v4526_v36 = vrot.slane %v4512_v10, %v8743_v24 }
 0x1d5   : > { %v4495_v4 = vcombine.low %v4316_v34, %v4317_v61  ;;  %v4324_v44 = vmul.f32 %v3670_v57, %v8757_v29  ;;  %v4325_v3 = vmul.f32 %v3677_v22, %v2960_v13  ;;  %v8815_v46 = vpop.permute.xlu1 %3442  ;;  %v4502_v58 = vrot.slane %v4494_v32, %v8743_v24 }
 0x1d6   : > { %v4326_v47 = vmul.f32 %v3684_v5, %v8762_v35  ;;  %v3656_v28 = vrot.slane %v3428_v31, %v8747_v49  ;;  %v2657_v20 = vrot.slane %v2649_v6, %v7781_v14  ;;  %v8821_v0 = vpop.permute.xlu0 %3438  ;;  %v2673_v52 = vrot.slane %v2666_v38, %v7781_v14 }
 0x1d7   : > { %v4509_v17 = vrot.slane %v4495_v4, %v8743_v24  ;;  %v4535_v40 = vcombine.low %v4323_v27, %v4324_v44  ;;  %v3691_v1 = vrot.slane %v8821_v0, %v8747_v49  ;;  %v3698_v29 = vrot.slane %v8821_v0, %v8770_v39 }
 0x1d8   : > { %v4536_v13 = vcombine.low %v4325_v3, %v4326_v47  ;;  %v4322_v30 = vmul.f32 %v3656_v28, %v8754_v7  ;;  %v2665_v9 = vcombine.low %v2657_v20, %v2664_v37  ;;  %v3705_v60 = vrot.slane %v8821_v0, %v8774_v12 }
 0x1d9   : > { %v8830_v35 = vrot.slane %v4535_v40, %v8743_v24  ;;  %v4327_v53 = vmul.f32 %v3691_v1, %v2976_v33  ;;  %v8834_v21 = vpop.permute.xlu1 %3453  ;;  %v4328_v48 = vmul.f32 %v3698_v29, %v8786_v18  ;;  %v2977_v7 = vcombine.high %v8786_v18, %v8786_v18 }
 0x1da   : > { %v8837_v41 = vrot.slane %v4536_v13, %v8743_v24  ;;  %v4534_v23 = vrot.slane %v4322_v30, %v8743_v24  ;;  %7158 = vmatprep.mubr.msk.bf16.mxu0 %vm2692_vm12, %v2665_v9  ;;  %v4527_v37 = vcombine.low %v4519_v8, %v4526_v36  ;;  %v4510_v45 = vcombine.low %v4502_v58, %v4509_v17  ;;  %v3450_v16 = vpop.permute.xlu0 %3449 }
 0x1db   : > { %v3712_v42 = vrot.slane %v8821_v0, %v8783_v15  ;;  %v4552_v19 = vcombine.low %v4327_v53, %v4328_v48  ;;  %v4329_v55 = vmul.f32 %v3705_v60, %v2977_v7  ;;  %v2680_v62 = vrot.slane %v2673_v52, %v7781_v14 }
 0x1dc   : > { %v4551_v33 = vcombine.low %v8830_v35, %v8837_v41  ;;  %v8849_v25 = vpack.c.bf16 %v4534_v23, %v4534_v23  ;;  %v3719_v50 = vrot.slane %v8815_v46, %v8747_v49  ;;  %v3754_v59 = vrot.slane %v8834_v21, %v8747_v49 }
 0x1dd   : > { %v7144_v18 = vpop.f32.mrb[4].mxu0  ;;  %v3761_v26 = vrot.slane %v8834_v21, %v8770_v39  ;;  %v3768_v2 = vrot.slane %v8834_v21, %v8774_v12  ;;  %v3775_v6 = vrot.slane %v8834_v21, %v8783_v15  ;;  %7159 = vmatmul.mubr.msk.bf16.gmra.mrb[20].mxu0 %vm2692_vm12, %v2680_v62  ;;  %v3726_v63 = vrot.slane %v3450_v16, %v8747_v49  ;;  %v8868_v10 = vpop.permute.xlu1 %3464  ;;  %vm9798_vm12 = vmmov %vm9781_vm4 }
 0x1de   : > { %v2795_v14 = vadd.f32 %v7144_v18, %v8710_v54  ;;  %v2786_v11 = vpop.f32.mrb[5].mxu0  ;;  %v3733_v56 = vrot.slane %v3450_v16, %v8770_v39  ;;  %v8866_v51 = vpack.c.bf16 %v4527_v37, %v4510_v45  ;;  %v8871_v34 = vrot.slane %v4552_v19, %v8743_v24  ;;  %v3458_v40 = vpop.permute.xlu0 %3457 }
 0x1df   : > { %v2787_v43 = vadd.f32 %v8710_v54, %v2786_v11  ;;  %v7145_v31 = vpop.f32.mrb[6].mxu0  ;;  %v3740_v61 = vrot.slane %v3450_v16, %v8774_v12  ;;  %v3747_v32 = vrot.slane %v3450_v16, %v8783_v15  ;;  %v4962_v8 = vshll.u32 %v8849_v25, 16 }
 0x1e0   : > { %v2870_v57 = vmax.f32 %v2795_v14, 0.0  ;;  %v2798_v22 = vadd.f32 %v7145_v31, %v8710_v54  ;;  %v2789_v38 = vpop.f32.mrb[7].mxu0  ;;  %v3789_v5 = vrot.slane %v8868_v10, %v8747_v49  ;;  %v3796_v4 = vrot.slane %v8868_v10, %v8770_v39 }
 0x1e1   : > { %v2868_v27 = vmax.f32 %v2787_v43, 0.0  ;;  %v2790_v36 = vadd.f32 %v8710_v54, %v2789_v38  ;;  %v3803_v44 = vrot.slane %v8868_v10, %v8774_v12  ;;  %v4955_v58 = vshrl.u32 %v8866_v51, 16 }
 0x1e2   : > { %v3019_v3 = vrot.slane %v2870_v57, %v8743_v24  ;;  %v2871_v46 = vmax.f32 %v2798_v22, 0.0  ;;  %v3810_v47 = vrot.slane %v8868_v10, %v8783_v15  ;;  %v4957_v17 = vshll.u32 %v8866_v51, 16 }
 0x1e3   : > { %v2978_v28 = vcombine.high %v2868_v27, %v2868_v27  ;;  %v2985_v20 = vrot.slane %v2868_v27, %v8743_v24  ;;  %v2869_v0 = vmax.f32 %v2790_v36, 0.0  ;;  %v4964_v30 = vrot.slane %v4962_v8, 1 }
 0x1e4   : > { %v3027_v1 = vcombine.high %v3019_v3, %v3019_v3  ;;  %v3029_v29 = vcombine.high %v2871_v46, %v2871_v46  ;;  %v3036_v13 = vrot.slane %v2871_v46, %v8743_v24  ;;  %v3012_v48 = vcombine.high %v2870_v57, %v2870_v57 }
 0x1e5   : > { %v2992_v9 = vrot.slane %v2978_v28, %v8743_v24  ;;  %v2993_v60 = vcombine.high %v2985_v20, %v2985_v20  ;;  %v4330_v53 = vmul.f32 %v3712_v42, %v2985_v20  ;;  %v2995_v23 = vcombine.high %v2869_v0, %v2869_v0 }
 0x1e6   : > { %v4339_v7 = vmul.f32 %v3775_v6, %v3027_v1  ;;  %v3002_v37 = vrot.slane %v2869_v0, %v8743_v24  ;;  %v3782_v45 = vrot.slane %v3458_v40, %v8747_v49  ;;  %v4338_v62 = vmul.f32 %v3768_v2, %v3019_v3 }
 0x1e7   : > { %v2994_v52 = vcombine.high %v2992_v9, %v2992_v9  ;;  %v4553_v19 = vcombine.low %v4329_v55, %v4330_v53  ;;  %v4959_v18 = vrot.slane %v4957_v17, 1  ;;  %v8896_v16 = vrot.slane %v3029_v29, %v8743_v24 }
 0x1e8   : > { %v3044_v14 = vcombine.high %v3036_v13, %v3036_v13  ;;  %v3009_v11 = vrot.slane %v2995_v23, %v8743_v24  ;;  %v3010_v43 = vcombine.high %v3002_v37, %v3002_v37  ;;  %v4331_v31 = vmul.f32 %v3719_v50, %v2993_v60 }
 0x1e9   : > { %v4567_v42 = vrot.slane %v4553_v19, %v8743_v24  ;;  %v4332_v57 = vmul.f32 %v3726_v63, %v2992_v9  ;;  %v4333_v6 = vmul.f32 %v3733_v56, %v2994_v52  ;;  %v4594_v22 = vcombine.low %v4338_v62, %v4339_v7  ;;  %v7312_v7 = vld [vmem:[%s9752_s4 + $0x140] sm:$0xff]  }
 0x1ea   : > { %v3011_v38 = vcombine.high %v3009_v11, %v3009_v11  ;;  %v4334_v8 = vmul.f32 %v3740_v61, %v3002_v37  ;;  %v4335_v27 = vmul.f32 %v3747_v32, %v3010_v43  ;;  %v4336_v36 = vmul.f32 %v3754_v59, %v3009_v11  ;;  %v7313_v37 = vld [vmem:[%s9752_s4 + $0x100] sm:$0xff]   ;;  %6990 = vmatprep.subr.bf16.mxu1 %v7312_v7 }
 0x1eb   : > { %v4568_v55 = vcombine.low %v8871_v34, %v4567_v42  ;;  %v4576_v2 = vcombine.low %v4332_v57, %v4333_v6  ;;  %v4960_v3 = vor.u32 %v4959_v18, %v4955_v58  ;;  %v4343_v28 = vmul.f32 %v3803_v44, %v3044_v14 }
 0x1ec   : > { %v4337_v50 = vmul.f32 %v3761_v26, %v3011_v38  ;;  %v4577_v46 = vcombine.low %v4334_v8, %v4335_v27  ;;  %v4344_v63 = vmul.f32 %v3810_v47, %v8896_v16  ;;  %v4575_v56 = vrot.slane %v4331_v31, %v8743_v24  ;;  %v7315_v31 = vld [vmem:[%s9752_s4 + $0x108] sm:$0xff]   ;;  %v7316_v8 = vld [vmem:[%s9752_s4 + $0x150] sm:$0xff]  }
 0x1ed   : > { %v4584_v61 = vrot.slane %v4576_v2, %v8743_v24  ;;  %v4965_v34 = vsel %vm584_vm1, %v4960_v3, %v4964_v30  ;;  %v3026_v32 = vrot.slane %v3012_v48, %v8743_v24  ;;  %v5075_v21 = vrot.slane %v8849_v25, 1  ;;  %v7317_v27 = vld [vmem:[%s9752_s4 + $0x110] sm:$0xff]   ;;  %v7318_v2 = vld [vmem:[%s9752_s4 + $0x158] sm:$0xff]   ;;  %v7320_v3 = vld [vmem:[%s9752_s4 + $0x160] sm:$0xff]  }
 0x1ee   : > { %v4591_v20 = vrot.slane %v4577_v46, %v8743_v24  ;;  %v4593_v59 = vcombine.low %v4336_v36, %v4337_v50  ;;  %5759 = vmatprep.mubr.bf16.mxu1 %v4965_v34  ;;  %v4618_v58 = vcombine.low %v4343_v28, %v4344_v63  ;;  %v4608_v26 = vrot.slane %v4594_v22, %v8743_v24  ;;  %v7319_v36 = vld [vmem:[%s9752_s4 + $0x118] sm:$0xff]   ;;  %v7321_v50 = vld [vmem:[%s9752_s4 + $0x1c0] sm:$0xff]   ;;  %v8985_v46 = vpop.permute.xlu0 %3468  ;;  %v7326_v34 = vld [vmem:[%s9752_s4 + $0x168] sm:$0xff]  }
 0x1ef   : > { %5760 = vmatmul.mubr.bf16.vlgmr.msra.gmra.mrb[0].mxu1 %v8866_v51  ;;  %v3028_v44 = vcombine.high %v3026_v32, %v3026_v32  ;;  %v4340_v47 = vmul.f32 %v3782_v45, %v3026_v32  ;;  %v4342_v40 = vmul.f32 %v3796_v4, %v3036_v13  ;;  %v4936_v1 = vpack.c.bf16 %v4568_v55, %v4551_v33  ;;  %v7314_v45 = vld [vmem:[%s9752_s4 + $0x148] sm:$0xff]   ;;  %v7322_v28 = vld [vmem:[%s9752_s4 + $0x120] sm:$0xff]  }
 0x1f0   : > { %v4592_v0 = vcombine.low %v4584_v61, %v4591_v20  ;;  %v4601_v17 = vrot.slane %v4593_v59, %v8743_v24  ;;  %v5074_v30 = vrot.slane %v8866_v51, 1  ;;  %v4937_v9 = vpack.c.bf16 %v4575_v56, %v4575_v56  ;;  %6991 = vmatpush3.bf16.msra.mxu1 %v7313_v37  ;;  %7054 = vmatprep.subr.bf16.mxu0 %v7321_v50  ;;  %v7323_v63 = vld [vmem:[%s9752_s4 + $0x180] sm:$0xff]   ;;  %v7324_v56 = vld [vmem:[%s9752_s4 + $0x1c8] sm:$0xff]   ;;  %v8996_v61 = vpop.permute.xlu1 %3472 }
 0x1f1   : > { %v4341_v29 = vmul.f32 %v3789_v5, %v3028_v44  ;;  %v4616_v25 = vrot.slane %v4340_v47, %v8743_v24  ;;  %v8926_v53 = vrot.slane %v4618_v58, %v8743_v24  ;;  %5856 = vmatprep.mubr.bf16.mxu0 %v4936_v1  ;;  %v4969_v23 = vshll.u32 %v4936_v1, 16  ;;  %6992 = vmatprep.subr.bf16.mxu1 %v7314_v45  ;;  %v7325_v32 = vld [vmem:[%s9752_s4 + $0x188] sm:$0xff]   ;;  %v7328_v58 = vld [vmem:[%s9752_s4 + $0x1d0] sm:$0xff]  }
 0x1f2   : > { %v4609_v60 = vcombine.low %v4601_v17, %v4608_v26  ;;  %v5077_v4 = vrot.slane %v4936_v1, 1  ;;  %v5076_v35 = vsel %vm9781_vm4, %v5074_v30, %v5075_v21  ;;  %v4974_v41 = vshll.u32 %v4937_v9, 16  ;;  %v7327_v20 = vld [vmem:[%s9752_s4 + $0x128] sm:$0xff]   ;;  %v9007_v59 = vpop.permute.xlu0 %3479  ;;  %v7332_v21 = vld [vmem:[%s9752_s4 + $0x170] sm:$0xff]  }
 0x1f3   : > { %v4617_v13 = vcombine.low %v4341_v29, %v4342_v40  ;;  %v8928_v48 = vpack.c.bf16 %v4616_v25, %v4616_v25  ;;  %5857 = vmatmul.mubr.bf16.vlgmr.msra.gmra.mrb[24].mxu0 %v5076_v35  ;;  %v4967_v10 = vshrl.u32 %v4936_v1, 16  ;;  %v4971_v5 = vrot.slane %v4969_v23, 1  ;;  %v7330_v23 = vld [vmem:[%s9752_s4 + $0x1d8] sm:$0xff]  }
 0x1f4   : > { %v8931_v33 = vpack.c.bf16 %v4609_v60, %v4592_v0  ;;  %v5078_v51 = vrot.slane %v4937_v9, 1  ;;  %v4976_v19 = vrot.slane %v4974_v41, 1  ;;  %6993 = vmatpush3.bf16.msra.mxu1 %v7315_v31  ;;  %7055 = vmatpush3.bf16.msra.mxu0 %v7323_v63  ;;  %v3045_v26 = vcombine.high %v8896_v16, %v8896_v16  ;;  %v7333_v16 = vld [vmem:[%s9752_s4 + $0x130] sm:$0xff]   ;;  %v9033_v60 = vpop.permute.xlu1 %3483 }
 0x1f5   : > { %v8943_v52 = vrot.slane %v4617_v13, %v8743_v24  ;;  %v4972_v62 = vor.u32 %v4971_v5, %v4967_v10  ;;  %v4986_v11 = vshll.u32 %v8928_v48, 16  ;;  %6994 = vmatprep.subr.bf16.mxu1 %v7316_v8  ;;  %7056 = vmatprep.subr.bf16.mxu0 %v7324_v56  ;;  %v3817_v44 = vrot.slane %v8985_v46, %v8747_v49 }
 0x1f6   : > { %5864 = vmatprep.mubr.bf16.mxu0 %v8931_v33  ;;  %v8947_v18 = vsel %vm9782_vm5, %v5077_v4, %v5078_v51  ;;  %v4981_v14 = vshll.u32 %v8931_v33, 16  ;;  %v4979_v57 = vshrl.u32 %v8931_v33, 16  ;;  %v3824_v0 = vrot.slane %v8985_v46, %v8770_v39  ;;  %v7338_v4 = vld [vmem:[%s9752_s4 + $0x178] sm:$0xff]  }
 0x1f7   : > { %v4633_v43 = vcombine.low %v8943_v52, %v8926_v53  ;;  %v8957_v42 = vsel %vm584_vm1, %v4972_v62, %v4976_v19  ;;  %v4988_v38 = vrot.slane %v4986_v11, 1  ;;  %v3831_v29 = vrot.slane %v8985_v46, %v8774_v12  ;;  %v3488_v19 = vpop.permute.xlu0 %3487  ;;  %v7342_v53 = vld [vmem:[%s9752_s4 + $0x1f8] sm:$0xff]  }
 0x1f8   : > { %v4983_v6 = vrot.slane %v4981_v14, 1  ;;  %5767 = vmatprep.mubr.bf16.mxu1 %v8957_v42  ;;  %6995 = vmatpush3.bf16.msra.mxu1 %v7317_v27  ;;  %v3838_v25 = vrot.slane %v8985_v46, %v8783_v15  ;;  %v4345_v13 = vmul.f32 %v3817_v44, %v3045_v26  ;;  %v3845_v35 = vrot.slane %v8996_v61, %v8747_v49  ;;  %v7334_v27 = vld [vmem:[%s9752_s4 + $0x1e0] sm:$0xff]   ;;  %v7339_v46 = vld [vmem:[%s9752_s4 + $0x138] sm:$0xff]  }
 0x1f9   : > { %5768 = vmatmul.mubr.bf16.gmra.mrb[4].mxu1 %v4936_v1  ;;  %6996 = vmatprep.subr.bf16.mxu1 %v7318_v2  ;;  %v7329_v1 = vld [vmem:[%s9752_s4 + $0x190] sm:$0xff]   ;;  %v3852_v7 = vrot.slane %v9007_v59, %v8747_v49  ;;  %v3859_v37 = vrot.slane %v9007_v59, %v8770_v39  ;;  %v3880_v31 = vrot.slane %v9033_v60, %v8747_v49  ;;  %v7335_v26 = vld [vmem:[%s9752_s4 + $0x1a0] sm:$0xff]  }
 0x1fa   : > { %v4984_v22 = vor.u32 %v4983_v6, %v4979_v57  ;;  %7057 = vmatpush3.bf16.msra.mxu0 %v7325_v32  ;;  %v7331_v57 = vld [vmem:[%s9752_s4 + $0x198] sm:$0xff]   ;;  %v3887_v8 = vrot.slane %v9033_v60, %v8770_v39  ;;  %v3908_v50 = vrot.slane %v3488_v19, %v8747_v49 }
 0x1fb   : > { %5865 = vmatmul.mubr.bf16.gmra.mrb[28].mxu0 %v8947_v18  ;;  %7058 = vmatprep.subr.bf16.mxu0 %v7328_v58 }
 0x1fc   : > { %v8969_v55 = vsel %vm584_vm1, %v4984_v22, %v4988_v38  ;;  %6997 = vmatpush3.bf16.msra.mxu1 %v7319_v36  ;;  %v3894_v36 = vrot.slane %v9033_v60, %v8774_v12 }
 0x1fd   : > { %5775 = vmatprep.mubr.bf16.mxu1 %v8969_v55  ;;  %6998 = vmatprep.subr.bf16.mxu1 %v7320_v3  ;;  %v3901_v3 = vrot.slane %v9033_v60, %v8783_v15 }
 0x1fe   : > { %7059 = vmatpush3.bf16.msra.mxu0 %v7329_v1  ;;  %v3866_v1 = vrot.slane %v9007_v59, %v8774_v12 }
 0x1ff   : > { %7060 = vmatprep.subr.bf16.mxu0 %v7330_v23 }
 0x200   : > { %6999 = vmatpush3.bf16.msra.mxu1 %v7322_v28 }
 0x201   : > { %5776 = vmatmul.mubr.bf16.gmra.mrb[8].mxu1 %v8931_v33  ;;  %7000 = vmatprep.subr.bf16.mxu1 %v7326_v34  ;;  %v9076_v34 = vld [vmem:[%s9752_s4 + $0x200] sm:$0xff]  }
 0x202   : > { %7061 = vmatpush3.bf16.msra.mxu0 %v7331_v57 }
 0x203   : > { %7062 = vmatprep.subr.bf16.mxu0 %v7334_v27 }
 0x204   : > { %7001 = vmatpush3.bf16.msra.mxu1 %v7327_v20 }
 0x205   : > { %7002 = vmatprep.subr.bf16.mxu1 %v7332_v21 }
 0x206   : > { %7063 = vmatpush3.bf16.msra.mxu0 %v7335_v26 }
 0x208   : > { %7003 = vmatpush3.bf16.msra.mxu1 %v7333_v16  ;;  %v3873_v16 = vrot.slane %v9007_v59, %v8783_v15  ;;  %v7337_v59 = vld [vmem:[%s9752_s4 + $0x1a8] sm:$0xff]  }
 0x209   : > { %7004 = vmatprep.subr.bf16.mxu1 %v7338_v4 }
 0x20c   : > { %7005 = vmatpush3.bf16.msra.mxu1 %v7339_v46 }
 0x20d   : > { %7162 = vmatprep.subr.bf16.mxu1 %v9076_v34 }
 0x21e   : > { %v7148_v47 = vpop.f32.mrb[8].mxu0 }
 0x21f   : > { %v2811_v17 = vadd.f32 %v7148_v47, %v8710_v54  ;;  %v2802_v40 = vpop.f32.mrb[9].mxu0 }
 0x220   : > { %v2803_v30 = vadd.f32 %v8710_v54, %v2802_v40  ;;  %v7149_v9 = vpop.f32.mrb[10].mxu0  ;;  %v7336_v40 = vld [vmem:[%s9752_s4 + $0x1e8] sm:$0xff]  }
 0x221   : > { %v2874_v41 = vmax.f32 %v2811_v17, 0.0  ;;  %v2814_v10 = vadd.f32 %v7149_v9, %v8710_v54  ;;  %v2805_v5 = vpop.f32.mrb[11].mxu0  ;;  %7064 = vmatprep.subr.bf16.mxu0 %v7336_v40 }
 0x222   : > { %v2872_v51 = vmax.f32 %v2803_v30, 0.0  ;;  %v2806_v45 = vadd.f32 %v8710_v54, %v2805_v5  ;;  %7065 = vmatpush3.bf16.msra.mxu0 %v7337_v59 }
 0x223   : > { %v3080_v62 = vcombine.high %v2874_v41, %v2874_v41  ;;  %v3087_v14 = vrot.slane %v2874_v41, %v8743_v24  ;;  %v9050_v11 = vmax.f32 %v2814_v10, 0.0 }
 0x224   : > { %v3046_v6 = vcombine.high %v2872_v51, %v2872_v51  ;;  %v3053_v22 = vrot.slane %v2872_v51, %v8743_v24  ;;  %v2873_v38 = vmax.f32 %v2806_v45, 0.0 }
 0x225   : > { %v3094_v2 = vrot.slane %v3080_v62, %v8743_v24  ;;  %v3095_v32 = vcombine.high %v3087_v14, %v3087_v14  ;;  %v9080_v58 = vrot.slane %v9050_v11, %v8743_v24  ;;  %v4354_v41 = vmul.f32 %v3880_v31, %v3087_v14 }
 0x226   : > { %v3060_v28 = vrot.slane %v3046_v6, %v8743_v24  ;;  %v3061_v63 = vcombine.high %v3053_v22, %v3053_v22  ;;  %v4346_v56 = vmul.f32 %v3824_v0, %v3053_v22  ;;  %v3063_v61 = vcombine.high %v2873_v38, %v2873_v38 }
 0x227   : > { %v3096_v20 = vcombine.high %v3094_v2, %v3094_v2  ;;  %v3070_v21 = vrot.slane %v2873_v38, %v8743_v24  ;;  %v4355_v10 = vmul.f32 %v3887_v8, %v3095_v32  ;;  %v4356_v51 = vmul.f32 %v3894_v36, %v3094_v2  ;;  %v7341_v36 = vld [vmem:[%s9752_s4 + $0x1b0] sm:$0xff]  }
 0x228   : > { %v3062_v44 = vcombine.high %v3060_v28, %v3060_v28  ;;  %v4347_v47 = vmul.f32 %v3831_v29, %v3061_v63  ;;  %v4348_v0 = vmul.f32 %v3838_v25, %v3060_v28  ;;  %v4634_v17 = vcombine.low %v4345_v13, %v4346_v56 }
 0x229   : > { %v3077_v30 = vrot.slane %v3063_v61, %v8743_v24  ;;  %v3078_v9 = vcombine.high %v3070_v21, %v3070_v21  ;;  %v4350_v25 = vmul.f32 %v3852_v7, %v3070_v21  ;;  %v4357_v45 = vmul.f32 %v3901_v3, %v3096_v20  ;;  %v7340_v7 = vld [vmem:[%s9752_s4 + $0x1f0] sm:$0xff]   ;;  %v7343_v21 = vld [vmem:[%s9752_s4 + $0x1b8] sm:$0xff]  }
 0x22a   : > { %v4349_v60 = vmul.f32 %v3845_v35, %v3062_v44  ;;  %v4635_v23 = vcombine.low %v4347_v47, %v4348_v0  ;;  %v4642_v29 = vrot.slane %v4634_v17, %v8743_v24  ;;  %v4358_v35 = vmul.f32 %v3908_v50, %v9080_v58  ;;  %7066 = vmatprep.subr.bf16.mxu0 %v7340_v7 }
 0x22b   : > { %v3079_v4 = vcombine.high %v3077_v30, %v3077_v30  ;;  %v4351_v13 = vmul.f32 %v3859_v37, %v3078_v9  ;;  %v4352_v19 = vmul.f32 %v3866_v1, %v3077_v30  ;;  %v4675_v14 = vcombine.low %v4354_v41, %v4355_v10  ;;  %7067 = vmatpush3.bf16.msra.mxu0 %v7341_v36  ;;  %v9156_v41 = vpop.permute.xlu0 %3498 }
 0x22c   : > { %v4649_v5 = vrot.slane %v4635_v23, %v8743_v24  ;;  %v4676_v57 = vcombine.low %v4356_v51, %v4357_v45  ;;  %v5080_v6 = vrot.slane %v8931_v33, 1  ;;  %v4698_v38 = vrot.slane %v4358_v35, %v8743_v24  ;;  %7068 = vmatprep.subr.bf16.mxu0 %v7342_v53 }
 0x22d   : > { %v4353_v37 = vmul.f32 %v3873_v16, %v3079_v4  ;;  %v4658_v62 = vcombine.low %v4350_v25, %v4351_v13  ;;  %v5081_v2 = vrot.slane %v8928_v48, 1  ;;  %v4683_v46 = vrot.slane %v4675_v14, %v8743_v24  ;;  %v3495_v13 = vpop.permute.xlu1 %3494 }
 0x22e   : > { %v4650_v31 = vcombine.low %v4642_v29, %v4649_v5  ;;  %v4690_v27 = vrot.slane %v4676_v57, %v8743_v24  ;;  %v4657_v28 = vrot.slane %v4349_v60, %v8743_v24  ;;  %v9128_v56 = vpack.c.bf16 %v4698_v38, %v4698_v38 }
 0x22f   : > { %v4659_v22 = vcombine.low %v4352_v19, %v4353_v37  ;;  %v4666_v3 = vrot.slane %v4658_v62, %v8743_v24  ;;  %v9125_v48 = vsel %vm9783_vm6, %v5080_v6, %v5081_v2  ;;  %7069 = vmatpush3.bf16.msra.mxu0 %v7343_v21  ;;  %v3097_v10 = vcombine.high %v9050_v11, %v9050_v11  ;;  %v9167_v7 = vpop.permute.xlu0 %3509 }
 0x230   : > { %v9109_v8 = vpack.c.bf16 %v4650_v31, %v4633_v43  ;;  %v4691_v63 = vcombine.low %v4683_v46, %v4690_v27  ;;  %v4941_v61 = vpack.c.bf16 %v4657_v28, %v4657_v28  ;;  %v5010_v1 = vshll.u32 %v9128_v56, 16 }
 0x231   : > { %v4673_v50 = vrot.slane %v4659_v22, %v8743_v24  ;;  %v9160_v59 = vpop.permute.xlu1 %3502  ;;  %v3111_v5 = vrot.slane %v3097_v10, %v8743_v24  ;;  %v3112_v51 = vcombine.high %v9080_v58, %v9080_v58  ;;  %v3915_v45 = vrot.slane %v3495_v13, %v8747_v49 }
 0x232   : > { %5872 = vmatprep.mubr.bf16.mxu0 %v9109_v8  ;;  %v4993_v52 = vshll.u32 %v9109_v8, 16  ;;  %v4991_v32 = vshrl.u32 %v9109_v8, 16  ;;  %v4998_v44 = vshll.u32 %v4941_v61, 16  ;;  %v5083_v0 = vrot.slane %v9109_v8, 1 }
 0x233   : > { %v4674_v43 = vcombine.low %v4666_v3, %v4673_v50  ;;  %5873 = vmatmul.mubr.bf16.gmra.mrb[32].mxu0 %v9125_v48  ;;  %v5084_v16 = vrot.slane %v4941_v61, 1  ;;  %v5012_v25 = vrot.slane %v5010_v1, 1  ;;  %v3922_v35 = vrot.slane %v3495_v13, %v8770_v39 }
 0x234   : > { %v4995_v20 = vrot.slane %v4993_v52, 1  ;;  %v5000_v17 = vrot.slane %v4998_v44, 1  ;;  %v3929_v19 = vrot.slane %v3495_v13, %v8774_v12  ;;  %v3936_v37 = vrot.slane %v3495_v13, %v8783_v15 }
 0x235   : > { %v9135_v26 = vpack.c.bf16 %v4691_v63, %v4674_v43  ;;  %v9147_v23 = vsel %vm9785_vm7, %v5083_v0, %v5084_v16  ;;  %v4359_v62 = vmul.f32 %v3915_v45, %v3112_v51  ;;  %v4360_v14 = vmul.f32 %v3922_v35, %v3111_v5  ;;  %v9173_v31 = vpop.permute.xlu1 %3513  ;;  %v9195_v63 = vpop.permute.xlu0 %3517 }
 0x236   : > { %v4996_v47 = vor.u32 %v4995_v20, %v4991_v32  ;;  %v3943_v11 = vrot.slane %v9156_v41, %v8747_v49  ;;  %v3950_v58 = vrot.slane %v9156_v41, %v8770_v39  ;;  %v3957_v6 = vrot.slane %v9156_v41, %v8774_v12 }
 0x237   : > { %9784 = vst [vmem:[#allocation2_spill] sm:$0xff] %v9135_v26  ;;  %5880 = vmatprep.mubr.bf16.mxu0 %v9135_v26  ;;  %v5005_v40 = vshll.u32 %v9135_v26, 16  ;;  %v5003_v9 = vshrl.u32 %v9135_v26, 16  ;;  %v3964_v22 = vrot.slane %v9156_v41, %v8783_v15  ;;  %v3971_v38 = vrot.slane %v9160_v59, %v8747_v49 }
 0x238   : > { %v9142_v30 = vsel %vm584_vm1, %v4996_v47, %v5000_v17  ;;  %v3978_v36 = vrot.slane %v9167_v7, %v8747_v49  ;;  %v3985_v3 = vrot.slane %v9167_v7, %v8770_v39  ;;  %v3992_v50 = vrot.slane %v9167_v7, %v8774_v12 }
 0x239   : > { %v5007_v60 = vrot.slane %v5005_v40, 1  ;;  %5783 = vmatprep.mubr.bf16.mxu1 %v9142_v30  ;;  %v3113_v46 = vcombine.high %v3111_v5, %v3111_v5  ;;  %v3999_v52 = vrot.slane %v9167_v7, %v8783_v15  ;;  %v4006_v43 = vrot.slane %v9173_v31, %v8747_v49 }
 0x23a   : > { %5784 = vmatmul.mubr.bf16.gmra.mrb[12].mxu1 %v9109_v8  ;;  %v4699_v61 = vcombine.low %v4359_v62, %v4360_v14  ;;  %v4013_v44 = vrot.slane %v9173_v31, %v8770_v39  ;;  %v4020_v17 = vrot.slane %v9173_v31, %v8774_v12  ;;  %v4027_v40 = vrot.slane %v9173_v31, %v8783_v15 }
 0x23b   : > { %5881 = vmatmul.mubr.bf16.gmra.mrb[36].mxu0 %v9147_v23  ;;  %v5008_v29 = vor.u32 %v5007_v60, %v5003_v9  ;;  %v4034_v60 = vrot.slane %v9195_v63, %v8747_v49 }
 0x23d   : > { %v9152_v4 = vsel %vm584_vm1, %v5008_v29, %v5012_v25  ;;  %v4361_v29 = vmul.f32 %v3929_v19, %v3113_v46 }
 0x23e   : > { %5791 = vmatprep.mubr.bf16.mxu1 %v9152_v4 }
 0x242   : > { %5792 = vmatmul.mubr.bf16.gmra.mrb[16].mxu1 %v9135_v26 }
 0x25d   : > { %v7152_v57 = vpop.f32.mrb[12].mxu0 }
 0x25e   : > { %v2827_v27 = vadd.f32 %v7152_v57, %v8710_v54  ;;  %v2818_v2 = vpop.f32.mrb[13].mxu0 }
 0x25f   : > { %v2819_v28 = vadd.f32 %v8710_v54, %v2818_v2  ;;  %v7153_v53 = vpop.f32.mrb[14].mxu0 }
 0x260   : > { %v2878_v32 = vmax.f32 %v2827_v27, 0.0  ;;  %v2830_v20 = vadd.f32 %v7153_v53, %v8710_v54  ;;  %v2821_v21 = vpop.f32.mrb[15].mxu0 }
 0x261   : > { %v2876_v47 = vmax.f32 %v2819_v28, 0.0  ;;  %v2822_v0 = vadd.f32 %v8710_v54, %v2821_v21  ;;  %v4707_v54 = vrot.slane %v4699_v61, %v8743_v24 }
 0x262   : > { %v3148_v1 = vcombine.high %v2878_v32, %v2878_v32  ;;  %v3155_v16 = vrot.slane %v2878_v32, %v8743_v24  ;;  %v2879_v9 = vmax.f32 %v2830_v20, 0.0 }
 0x263   : > { %v3114_v25 = vcombine.high %v2876_v47, %v2876_v47  ;;  %v3121_v13 = vrot.slane %v2876_v47, %v8743_v24  ;;  %v2877_v41 = vmax.f32 %v2822_v0, 0.0 }
 0x264   : > { %v3162_v10 = vrot.slane %v3148_v1, %v8743_v24  ;;  %v3163_v59 = vcombine.high %v3155_v16, %v3155_v16  ;;  %v3172_v5 = vrot.slane %v2879_v9, %v8743_v24  ;;  %v3165_v14 = vcombine.high %v2879_v9, %v2879_v9 }
 0x265   : > { %v3128_v51 = vrot.slane %v3114_v25, %v8743_v24  ;;  %v3129_v45 = vcombine.high %v3121_v13, %v3121_v13  ;;  %v4362_v35 = vmul.f32 %v3936_v37, %v3121_v13  ;;  %v3131_v7 = vcombine.high %v2877_v41, %v2877_v41 }
 0x266   : > { %v3164_v62 = vcombine.high %v3162_v10, %v3162_v10  ;;  %v3180_v31 = vcombine.high %v3172_v5, %v3172_v5  ;;  %v3138_v19 = vrot.slane %v2877_v41, %v8743_v24  ;;  %v4370_v63 = vmul.f32 %v3992_v50, %v3155_v16 }
 0x267   : > { %v3130_v57 = vcombine.high %v3128_v51, %v3128_v51  ;;  %v4363_v27 = vmul.f32 %v3943_v11, %v3129_v45  ;;  %v4364_v2 = vmul.f32 %v3950_v58, %v3128_v51  ;;  %v4700_v46 = vcombine.low %v4361_v29, %v4362_v35 }
 0x268   : > { %v3145_v28 = vrot.slane %v3131_v7, %v8743_v24  ;;  %v3146_v53 = vcombine.high %v3138_v19, %v3138_v19  ;;  %v4371_v61 = vmul.f32 %v3999_v52, %v3163_v59  ;;  %v4366_v37 = vmul.f32 %v3964_v22, %v3138_v19 }
 0x269   : > { %v4714_v32 = vrot.slane %v4700_v46, %v8743_v24  ;;  %v4716_v20 = vcombine.low %v4363_v27, %v4364_v2  ;;  %v4365_v21 = vmul.f32 %v3957_v6, %v3130_v57  ;;  %v4372_v9 = vmul.f32 %v4006_v43, %v3162_v10 }
 0x26a   : > { %v3147_v47 = vcombine.high %v3145_v28, %v3145_v28  ;;  %v4367_v0 = vmul.f32 %v3971_v38, %v3146_v53  ;;  %v4368_v1 = vmul.f32 %v3978_v36, %v3145_v28  ;;  %v4741_v41 = vcombine.low %v4370_v63, %v4371_v61  ;;  %v9247_v61 = vpop.permute.xlu1 %3524 }
 0x26b   : > { %v4715_v25 = vcombine.low %v4707_v54, %v4714_v32  ;;  %v4717_v13 = vcombine.low %v4365_v21, %v4366_v37  ;;  %v4373_v11 = vmul.f32 %v4013_v44, %v3164_v62  ;;  %v4724_v58 = vrot.slane %v4716_v20, %v8743_v24 }
 0x26c   : > { %v4739_v29 = vrot.slane %v4367_v0, %v8743_v24  ;;  %v4369_v51 = vmul.f32 %v3985_v3, %v3147_v47  ;;  %v4374_v50 = vmul.f32 %v4020_v17, %v3172_v5  ;;  %v4375_v16 = vmul.f32 %v4027_v40, %v3180_v31 }
 0x26d   : > { %v4731_v52 = vrot.slane %v4717_v13, %v8743_v24  ;;  %v4757_v59 = vcombine.low %v4372_v9, %v4373_v11  ;;  %v9220_v6 = vrot.slane %v3165_v14, %v8743_v24  ;;  %v5086_v44 = vrot.slane %v9135_v26, 1  ;;  %v9258_v9 = vpop.permute.xlu0 %3528 }
 0x26e   : > { %v4740_v22 = vcombine.low %v4368_v1, %v4369_v51  ;;  %v4945_v38 = vpack.c.bf16 %v4739_v29, %v4739_v29  ;;  %v4758_v43 = vcombine.low %v4374_v50, %v4375_v16  ;;  %v4755_v3 = vrot.slane %v4741_v41, %v8743_v24  ;;  %v9264_v13 = vpop.permute.xlu1 %3532 }
 0x26f   : > { %v4732_v36 = vcombine.low %v4724_v58, %v4731_v52  ;;  %v4765_v54 = vrot.slane %v4757_v59, %v8743_v24  ;;  %v4376_v17 = vmul.f32 %v4034_v60, %v9220_v6  ;;  %v5087_v45 = vrot.slane %v9128_v56, 1 }
 0x270   : > { %v4748_v10 = vrot.slane %v4740_v22, %v8743_v24  ;;  %v4772_v40 = vrot.slane %v4758_v43, %v8743_v24  ;;  %v5022_v62 = vshll.u32 %v4945_v38, 16  ;;  %v5090_v37 = vrot.slane %v4945_v38, 1  ;;  %v9289_v38 = vld [vmem:[%s9751_s3] ss:$0 sm:$0xff] }
 0x271   : > { %v9227_v5 = vpack.c.bf16 %v4732_v36, %v4715_v25  ;;  %v4780_v7 = vrot.slane %v4376_v17, %v8743_v24  ;;  %v9234_v31 = vsel %vm9787_vm8, %v5086_v44, %v5087_v45  ;;  %v9267_v41 = vpop.permute.xlu0 %3539  ;;  %v4041_v11 = vrot.slane %v9247_v61, %v8747_v49 }
 0x272   : > { %v4756_v35 = vcombine.low %v4748_v10, %v4755_v3  ;;  %v4773_v14 = vcombine.low %v4765_v54, %v4772_v40  ;;  %9788 = vst [vmem:[#allocation4_spill] sm:$0xff] %v9234_v31  ;;  %v5024_v2 = vrot.slane %v5022_v62, 1  ;;  %v4048_v58 = vrot.slane %v9247_v61, %v8770_v39  ;;  %v9284_v22 = vpop.permute.xlu1 %3543 }
 0x273   : > { %9786 = vst [vmem:[#allocation3_spill] sm:$0xff] %v9227_v5  ;;  %5888 = vmatprep.mubr.bf16.mxu0 %v9227_v5  ;;  %v5017_v19 = vshll.u32 %v9227_v5, 16  ;;  %v9237_v57 = vpack.c.bf16 %v4780_v7, %v4780_v7  ;;  %v5015_v56 = vshrl.u32 %v9227_v5, 16  ;;  %v5089_v63 = vrot.slane %v9227_v5, 1 }
 0x274   : > { %5889 = vmatmul.mubr.bf16.gmra.mrb[40].mxu0 %v9234_v31  ;;  %v9240_v60 = vpack.c.bf16 %v4773_v14, %v4756_v35  ;;  %v4055_v29 = vrot.slane %v9247_v61, %v8774_v12  ;;  %v4062_v51 = vrot.slane %v9247_v61, %v8783_v15  ;;  %v4069_v52 = vrot.slane %v9258_v9, %v8747_v49 }
 0x275   : > { %v5019_v27 = vrot.slane %v5017_v19, 1  ;;  %v5034_v53 = vshll.u32 %v9237_v57, 16  ;;  %v9256_v1 = vsel %vm9790_vm9, %v5089_v63, %v5090_v37  ;;  %v4076_v16 = vrot.slane %v9258_v9, %v8770_v39 }
 0x276   : > { %5896 = vmatprep.mubr.bf16.mxu0 %v9240_v60  ;;  %v5029_v28 = vshll.u32 %v9240_v60, 16  ;;  %v5027_v20 = vshrl.u32 %v9240_v60, 16  ;;  %9791 = vst [vmem:[#allocation6_spill] sm:$0xff] %v9256_v1  ;;  %v4083_v59 = vrot.slane %v9258_v9, %v8774_v12  ;;  %v4090_v43 = vrot.slane %v9258_v9, %v8783_v15 }
 0x277   : > { %v5020_v46 = vor.u32 %v5019_v27, %v5015_v56  ;;  %v5036_v0 = vrot.slane %v5034_v53, 1  ;;  %v4097_v44 = vrot.slane %v9264_v13, %v8747_v49  ;;  %v4104_v10 = vrot.slane %v9267_v41, %v8747_v49 }
 0x278   : > { %v5031_v21 = vrot.slane %v5029_v28, 1  ;;  %v3181_v3 = vcombine.high %v9220_v6, %v9220_v6  ;;  %v4111_v45 = vrot.slane %v9267_v41, %v8770_v39  ;;  %v4118_v35 = vrot.slane %v9267_v41, %v8774_v12 }
 0x279   : > { %v9250_v32 = vsel %vm584_vm1, %v5020_v46, %v5024_v2  ;;  %v4125_v19 = vrot.slane %v9267_v41, %v8783_v15  ;;  %v4132_v56 = vrot.slane %v9284_v22, %v8747_v49  ;;  %v4139_v2 = vrot.slane %v9284_v22, %v8770_v39 }
 0x27a   : > { %9789 = vst [vmem:[#allocation5_spill] sm:$0xff] %v9250_v32  ;;  %5799 = vmatprep.mubr.bf16.mxu1 %v9250_v32  ;;  %v5032_v47 = vor.u32 %v5031_v21, %v5027_v20  ;;  %v4146_v46 = vrot.slane %v9284_v22, %v8774_v12  ;;  %v4153_v61 = vrot.slane %v9284_v22, %v8783_v15 }
 0x27b   : > { %5800 = vmatmul.mubr.bf16.gmra.mrb[20].mxu1 %v9227_v5  ;;  %v4377_v20 = vmul.f32 %v4041_v11, %v3181_v3 }
 0x27c   : > { %5897 = vmatmul.mubr.bf16.gmra.mrb[44].mxu0 %v9256_v1  ;;  %v9262_v25 = vsel %vm584_vm1, %v5032_v47, %v5036_v0 }
 0x27d   : > { %9792 = vst [vmem:[#allocation7_spill] sm:$0xff] %v9262_v25  ;;  %5807 = vmatprep.mubr.bf16.mxu1 %v9262_v25 }
 0x27f   : > { %v7156_v50 = vpop.f32.mrb[16].mxu0 }
 0x280   : > { %v2843_v36 = vadd.f32 %v9289_v38, %v7156_v50  ;;  %v2834_v54 = vpop.f32.mrb[17].mxu0 }
 0x281   : > { %v2835_v17 = vadd.f32 %v9289_v38, %v2834_v54  ;;  %v7157_v40 = vpop.f32.mrb[18].mxu0 }
 0x282   : > { %v2882_v7 = vmax.f32 %v2843_v36, 0.0  ;;  %v2846_v62 = vadd.f32 %v9289_v38, %v7157_v40  ;;  %v2837_v14 = vpop.f32.mrb[19].mxu0 }
 0x283   : > { %5808 = vmatmul.mubr.bf16.gmra.mrb[24].mxu1 %v9240_v60  ;;  %v2880_v6 = vmax.f32 %v2835_v17, 0.0  ;;  %v2838_v27 = vadd.f32 %v9289_v38, %v2837_v14 }
 0x284   : > { %v3216_v28 = vcombine.high %v2882_v7, %v2882_v7  ;;  %v3223_v53 = vrot.slane %v2882_v7, %v8743_v24  ;;  %v2883_v63 = vmax.f32 %v2846_v62, 0.0 }
 0x285   : > { %v3182_v21 = vcombine.high %v2880_v6, %v2880_v6  ;;  %v3189_v37 = vrot.slane %v2880_v6, %v8743_v24  ;;  %v2881_v47 = vmax.f32 %v2838_v27, 0.0 }
 0x286   : > { %v3230_v0 = vrot.slane %v3216_v28, %v8743_v24  ;;  %v3231_v9 = vcombine.high %v3223_v53, %v3223_v53  ;;  %v3233_v13 = vcombine.high %v2883_v63, %v2883_v63  ;;  %v3240_v41 = vrot.slane %v2883_v63, %v8743_v24 }
 0x287   : > { %v3196_v50 = vrot.slane %v3182_v21, %v8743_v24  ;;  %v3197_v36 = vcombine.high %v3189_v37, %v3189_v37  ;;  %v4378_v54 = vmul.f32 %v4048_v58, %v3189_v37  ;;  %v3199_v17 = vcombine.high %v2881_v47, %v2881_v47 }
 0x288   : > { %v3232_v40 = vcombine.high %v3230_v0, %v3230_v0  ;;  %v3247_v7 = vrot.slane %v3233_v13, %v8743_v24  ;;  %v3248_v22 = vcombine.high %v3240_v41, %v3240_v41  ;;  %v3206_v11 = vrot.slane %v2881_v47, %v8743_v24 }
 0x289   : > { %v3198_v3 = vcombine.high %v3196_v50, %v3196_v50  ;;  %v4379_v62 = vmul.f32 %v4055_v29, %v3197_v36  ;;  %v4380_v14 = vmul.f32 %v4062_v51, %v3196_v50  ;;  %v4781_v6 = vcombine.low %v4377_v20, %v4378_v54 }
 0x28a   : > { %v3249_v27 = vcombine.high %v3247_v7, %v3247_v7  ;;  %v3213_v28 = vrot.slane %v3199_v17, %v8743_v24  ;;  %v3214_v25 = vcombine.high %v3206_v11, %v3206_v11  ;;  %v4382_v63 = vmul.f32 %v4076_v16, %v3206_v11 }
 0x28b   : > { %v4782_v5 = vcombine.low %v4379_v62, %v4380_v14  ;;  %v4789_v21 = vrot.slane %v4781_v6, %v8743_v24  ;;  %v4381_v58 = vmul.f32 %v4069_v52, %v3198_v3  ;;  %v4386_v37 = vmul.f32 %v4104_v10, %v3223_v53 }
 0x28c   : > { %v3215_v1 = vcombine.high %v3213_v28, %v3213_v28  ;;  %v4383_v32 = vmul.f32 %v4083_v59, %v3214_v25  ;;  %v4384_v13 = vmul.f32 %v4090_v43, %v3213_v28  ;;  %v4387_v26 = vmul.f32 %v4111_v45, %v3231_v9  ;;  %v7346_v28 = vld [vmem:[%s9752_s4 + $0x210] sm:$0xff]  }
 0x28d   : > { %v4796_v47 = vrot.slane %v4782_v5, %v8743_v24  ;;  %v4798_v31 = vcombine.low %v4381_v58, %v4382_v63  ;;  %v4388_v29 = vmul.f32 %v4118_v35, %v3230_v0  ;;  %v4389_v51 = vmul.f32 %v4125_v19, %v3232_v40 }
 0x28e   : > { %v4385_v20 = vmul.f32 %v4097_v44, %v3215_v1  ;;  %v4799_v50 = vcombine.low %v4383_v32, %v4384_v13  ;;  %v4822_v36 = vcombine.low %v4386_v37, %v4387_v26  ;;  %v4390_v54 = vmul.f32 %v4132_v56, %v3240_v41  ;;  %v7348_v13 = vld [vmem:[%s9752_s4 + $0x220] sm:$0xff]  }
 0x28f   : > { %v4797_v17 = vcombine.low %v4789_v21, %v4796_v47  ;;  %v4806_v16 = vrot.slane %v4798_v31, %v8743_v24  ;;  %v4823_v11 = vcombine.low %v4388_v29, %v4389_v51  ;;  %v4391_v62 = vmul.f32 %v4139_v2, %v3248_v22 }
 0x290   : > { %v4813_v52 = vrot.slane %v4799_v50, %v8743_v24  ;;  %v4392_v10 = vmul.f32 %v4146_v46, %v3247_v7  ;;  %v4393_v25 = vmul.f32 %v4153_v61, %v3249_v27  ;;  %v5092_v5 = vrot.slane %v9240_v60, 1  ;;  %v7345_v27 = vld [vmem:[%s9752_s4 + $0x208] sm:$0xff]  }
 0x291   : > { %v4837_v59 = vrot.slane %v4823_v11, %v8743_v24  ;;  %v4839_v43 = vcombine.low %v4390_v54, %v4391_v62  ;;  %v4821_v45 = vrot.slane %v4385_v20, %v8743_v24  ;;  %v4830_v26 = vrot.slane %v4822_v36, %v8743_v24 }
 0x292   : > { %v4814_v1 = vcombine.low %v4806_v16, %v4813_v52  ;;  %v4840_v32 = vcombine.low %v4392_v10, %v4393_v25  ;;  %v5093_v44 = vrot.slane %v9237_v57, 1 }
 0x293   : > { %v4949_v31 = vpack.c.bf16 %v4821_v45, %v4821_v45  ;;  %v4847_v19 = vrot.slane %v4839_v43, %v8743_v24  ;;  %v4838_v2 = vcombine.low %v4830_v26, %v4837_v59 }
 0x294   : > { %v9334_v35 = vpack.c.bf16 %v4814_v1, %v4797_v17  ;;  %v4854_v56 = vrot.slane %v4840_v32, %v8743_v24  ;;  %v9339_v46 = vsel %vm9793_vm10, %v5092_v5, %v5093_v44  ;;  %v7349_v44 = vld [vmem:[%s9752_s4 + $0x228] sm:$0xff]  }
 0x295   : > { %v5046_v53 = vshll.u32 %v4949_v31, 16  ;;  %v5096_v57 = vrot.slane %v4949_v31, 1 }
 0x296   : > { %v4855_v61 = vcombine.low %v4847_v19, %v4854_v56  ;;  %5904 = vmatprep.mubr.bf16.mxu0 %v9334_v35  ;;  %v5041_v0 = vshll.u32 %v9334_v35, 16  ;;  %v5095_v9 = vrot.slane %v9334_v35, 1  ;;  %v5039_v40 = vshrl.u32 %v9334_v35, 16  ;;  %v9795_v19 = vld [vmem:[#allocation4_spill] sm:$0xff] }
 0x297   : > { %5905 = vmatmul.mubr.bf16.gmra.mrb[48].mxu0 %v9339_v46  ;;  %v5048_v14 = vrot.slane %v5046_v53, 1 }
 0x298   : > { %v9345_v41 = vpack.c.bf16 %v4855_v61, %v4838_v2  ;;  %v5043_v7 = vrot.slane %v5041_v0, 1  ;;  %v9349_v22 = vsel %vm9794_vm11, %v5095_v9, %v5096_v57  ;;  %v9796_v61 = vld [vmem:[#allocation2_spill] sm:$0xff]  ;;  %v9797_v57 = vld [vmem:[#allocation5_spill] sm:$0xff] }
 0x29a   : > { %5912 = vmatprep.mubr.bf16.mxu0 %v9345_v41  ;;  %v5044_v3 = vor.u32 %v5043_v7, %v5039_v40  ;;  %v5109_v5 = vshll.u32 %v9345_v41, 16 }
 0x29c   : > { %v9353_v6 = vsel %vm584_vm1, %v5044_v3, %v5048_v14  ;;  %v5111_v40 = vrot.slane %v5109_v5, 1 }
 0x29d   : > { %5815 = vmatprep.mubr.bf16.mxu1 %v9353_v6 }
 0x29e   : > { %5816 = vmatmul.mubr.bf16.gmra.mrb[28].mxu1 %v9334_v35 }
 0x29f   : > { %5913 = vmatmul.mubr.bf16.gmra.mrb[52].mxu0 %v9349_v22  ;;  %5953 = vmatprep.mubr.bf16.mxu1 %v8947_v18  ;;  %v3548_v18 = vpop.permute.xlu0 %3547 }
 0x2a0   : > { %6050 = vmatprep.mubr.bf16.mxu0 %v8969_v55 }
 0x2a3   : > { %v3559_v36 = vpop.permute.xlu0 %3558 }
 0x2a4   : > { %v4195_v10 = vrot.slane %v3559_v36, %v8747_v49  ;;  %v4209_v59 = vrot.slane %v3559_v36, %v8774_v12  ;;  %v4216_v43 = vrot.slane %v3559_v36, %v8783_v15 }
 0x2a6   : > { %5954 = vmatmul.mubr.bf16.vlgmr.msra.gmra.mrb[32].mxu1 %v8957_v42  ;;  %v7347_v42 = vld [vmem:[%s9752_s4 + $0x218] sm:$0xff]  }
 0x2a7   : > { %7163 = vmatpush3.bf16.msra.mxu1 %v9076_v34  ;;  %5961 = vmatprep.mubr.bf16.mxu1 %v9125_v48  ;;  %v3555_v34 = vpop.permute.xlu1 %3554 }
 0x2a8   : > { %6051 = vmatmul.mubr.bf16.vlgmr.msra.gmra.mrb[56].mxu0 %v8931_v33  ;;  %7164 = vmatprep.subr.bf16.mxu1 %v7345_v27  ;;  %v4167_v20 = vrot.slane %v3555_v34, %v8747_v49  ;;  %v4181_v17 = vrot.slane %v3555_v34, %v8774_v12  ;;  %v4188_v16 = vrot.slane %v3555_v34, %v8783_v15 }
 0x2a9   : > { %6058 = vmatprep.mubr.bf16.mxu0 %v9142_v30 }
 0x2ab   : > { %7165 = vmatpush3.bf16.msra.mxu1 %v7345_v27  ;;  %v3563_v25 = vpop.permute.xlu1 %3562 }
 0x2ac   : > { %7166 = vmatprep.subr.bf16.mxu1 %v7346_v28  ;;  %v4223_v12 = vrot.slane %v3563_v25, %v8747_v49 }
 0x2ae   : > { %5962 = vmatmul.mubr.bf16.gmra.mrb[36].mxu1 %v8969_v55  ;;  %v4160_v55 = vrot.slane %v3548_v18, %v8747_v49  ;;  %v5107_v49 = vshrl.u32 %v9345_v41, 16 }
 0x2af   : > { %5969 = vmatprep.mubr.bf16.mxu1 %v9147_v23  ;;  %7167 = vmatpush3.bf16.msra.mxu1 %v7346_v28 }
 0x2b0   : > { %v7160_v63 = vpop.f32.mrb[20].mxu0  ;;  %6059 = vmatmul.mubr.bf16.gmra.mrb[60].mxu0 %v9109_v8  ;;  %7168 = vmatprep.subr.bf16.mxu1 %v7347_v42  ;;  %v4174_v8 = vrot.slane %v3555_v34, %v8770_v39 }
 0x2b1   : > { %v2859_v33 = vadd.f32 %v9289_v38, %v7160_v63  ;;  %v2850_v21 = vpop.f32.mrb[21].mxu0  ;;  %6066 = vmatprep.mubr.bf16.mxu0 %v9152_v4 }
 0x2b2   : > { %v2851_v58 = vadd.f32 %v9289_v38, %v2850_v21  ;;  %v7161_v37 = vpop.f32.mrb[22].mxu0  ;;  %v5121_v21 = vrot.slane %v9345_v41, 1 }
 0x2b3   : > { %v2886_v47 = vmax.f32 %v2859_v33, 0.0  ;;  %v2853_v29 = vpop.f32.mrb[23].mxu0  ;;  %7169 = vmatpush3.bf16.msra.mxu1 %v7347_v42  ;;  %v7351_v37 = vld [vmem:[%s9752_s4 + $0x238] sm:$0xff]  }
 0x2b4   : > { %v2884_v51 = vmax.f32 %v2851_v58, 0.0  ;;  %v2854_v50 = vadd.f32 %v9289_v38, %v2853_v29  ;;  %7170 = vmatprep.subr.bf16.mxu1 %v7348_v13  ;;  %v4202_v38 = vrot.slane %v3559_v36, %v8770_v39 }
 0x2b5   : > { %v3290_v54 = vrot.slane %v2886_v47, %v8743_v24 }
 0x2b6   : > { %v3250_v11 = vcombine.high %v2884_v51, %v2884_v51  ;;  %v3257_v62 = vrot.slane %v2884_v51, %v8743_v24  ;;  %v2885_v52 = vmax.f32 %v2854_v50, 0.0  ;;  %5970 = vmatmul.mubr.bf16.gmra.mrb[40].mxu1 %v9142_v30  ;;  %v7350_v30 = vld [vmem:[%s9752_s4 + $0x230] sm:$0xff]  }
 0x2b7   : > { %v3291_v39 = vcombine.high %v3290_v54, %v3290_v54  ;;  %5977 = vmatprep.mubr.bf16.mxu1 %v9795_v19  ;;  %7171 = vmatpush3.bf16.msra.mxu1 %v7348_v13  ;;  %v4402_v47 = vmul.f32 %v4216_v43, %v3290_v54  ;;  %v9801_v43 = vld [vmem:[#allocation7_spill] sm:$0xff] }
 0x2b8   : > { %v3264_v45 = vrot.slane %v3250_v11, %v8743_v24  ;;  %v3265_v1 = vcombine.high %v3257_v62, %v3257_v62  ;;  %v4394_v32 = vmul.f32 %v4160_v55, %v3257_v62  ;;  %v3267_v26 = vcombine.high %v2885_v52, %v2885_v52  ;;  %6067 = vmatmul.mubr.bf16.gmra.mrb[64].mxu0 %v9796_v61  ;;  %v9799_v11 = vld [vmem:[#allocation6_spill] sm:$0xff] }
 0x2b9   : > { %v3274_v31 = vrot.slane %v2885_v52, %v8743_v24  ;;  %6074 = vmatprep.mubr.bf16.mxu0 %v9797_v57  ;;  %7172 = vmatprep.subr.bf16.mxu1 %v7349_v44  ;;  %v4403_v63 = vmul.f32 %v4223_v12, %v3291_v39  ;;  %v5112_v55 = vor.u32 %v5111_v40, %v5107_v49  ;;  %v9800_v52 = vld [vmem:[#allocation3_spill] sm:$0xff] }
 0x2ba   : > { %v3266_v15 = vcombine.high %v3264_v45, %v3264_v45  ;;  %v4862_v56 = vrot.slane %v4394_v32, %v8743_v24  ;;  %v4395_v2 = vmul.f32 %v4167_v20, %v3265_v1  ;;  %v4396_v53 = vmul.f32 %v4174_v8, %v3264_v45  ;;  %v9434_v32 = vld [vmem:[%s9753_s5] ss:$0 sm:$0xff] }
 0x2bb   : > { %v3281_v0 = vrot.slane %v3267_v26, %v8743_v24  ;;  %v3282_v9 = vcombine.high %v3274_v31, %v3274_v31  ;;  %v4398_v27 = vmul.f32 %v4188_v16, %v3274_v31  ;;  %7173 = vmatpush3.bf16.msra.mxu1 %v7349_v44 }
 0x2bc   : > { %v4951_v7 = vpack.c.bf16 %v4862_v56, %v4862_v56  ;;  %v4397_v3 = vmul.f32 %v4181_v17, %v3266_v15  ;;  %v4863_v14 = vcombine.low %v4395_v2, %v4396_v53  ;;  %7174 = vmatprep.subr.bf16.mxu1 %v7350_v30  ;;  %v4903_v17 = vrot.slane %v4403_v63, %v8743_v24 }
 0x2bd   : > { %v3283_v28 = vcombine.high %v3281_v0, %v3281_v0  ;;  %v4399_v18 = vmul.f32 %v4195_v10, %v3282_v9  ;;  %v4400_v42 = vmul.f32 %v4202_v38, %v3281_v0 }
 0x2be   : > { %v4864_v34 = vcombine.low %v4397_v3, %v4398_v27  ;;  %v5114_v33 = vshll.u32 %v4951_v7, 16  ;;  %v5122_v58 = vrot.slane %v4951_v7, 1  ;;  %v4871_v51 = vrot.slane %v4863_v14, %v8743_v24  ;;  %5978 = vmatmul.mubr.bf16.gmra.mrb[44].mxu1 %v9152_v4 }
 0x2bf   : > { %v4401_v13 = vmul.f32 %v4209_v59, %v3283_v28  ;;  %v4880_v29 = vcombine.low %v4399_v18, %v4400_v42  ;;  %5985 = vmatprep.mubr.bf16.mxu1 %v9799_v11  ;;  %7175 = vmatpush3.bf16.msra.mxu1 %v7350_v30  ;;  %v4953_v1 = vpack.c.bf16 %v4903_v17, %v4903_v17 }
 0x2c0   : > { %v4878_v20 = vrot.slane %v4864_v34, %v8743_v24  ;;  %v5116_v50 = vrot.slane %v5114_v33, 1  ;;  %v9420_v36 = vsel %vm9798_vm12, %v5121_v21, %v5122_v58  ;;  %6075 = vmatmul.mubr.bf16.gmra.mrb[68].mxu0 %v9800_v52  ;;  %7176 = vmatprep.subr.bf16.mxu1 %v7351_v37 }
 0x2c1   : > { %v4881_v8 = vcombine.low %v4401_v13, %v4402_v47  ;;  %v4888_v4 = vrot.slane %v4880_v29, %v8743_v24  ;;  %6082 = vmatprep.mubr.bf16.mxu0 %v9801_v43  ;;  %v5133_v53 = vshll.u32 %v4953_v1, 16  ;;  %v5141_v30 = vrot.slane %v4953_v1, 1 }
 0x2c2   : > { %v6878_v16 = vpop.f32.mrb[0].mxu1  ;;  %v4879_v54 = vcombine.low %v4871_v51, %v4878_v20  ;;  %v9426_v10 = vsel %vm584_vm1, %v5112_v55, %v5116_v50 }
 0x2c3   : > { %v6879_v62 = vpop.f32.mrb[1].mxu1  ;;  %v4895_v25 = vrot.slane %v4881_v8, %v8743_v24  ;;  %7177 = vmatpush3.bf16.msra.mxu1 %v7351_v37  ;;  %v5135_v18 = vrot.slane %v5133_v53, 1 }
 0x2c4   : > { %v6880_v38 = vadd.f32 %v6879_v62, %v6878_v16  ;;  %v6881_v59 = vpop.f32.mrb[2].mxu1 }
 0x2c5   : > { %v6882_v5 = vpop.f32.mrb[3].mxu1  ;;  %v4896_v45 = vcombine.low %v4888_v4, %v4895_v25 }
 0x2c6   : > { %v6883_v26 = vadd.f32 %v6882_v5, %v6881_v59  ;;  %v6942_v44 = vpop.f32.mrb[24].mxu0  ;;  %v5762_v12 = vadd.f32 %v6880_v38, %v9434_v32  ;;  %5986 = vmatmul.mubr.bf16.gmra.mrb[48].mxu1 %v9797_v57 }
 0x2c7   : > { %v4952_v31 = vpack.c.bf16 %v4896_v45, %v4879_v54  ;;  %v6943_v39 = vpop.f32.mrb[25].mxu0  ;;  %5993 = vmatprep.mubr.bf16.mxu1 %v9339_v46 }
 0x2c8   : > { %v6944_v24 = vadd.f32 %v6943_v39, %v6942_v44  ;;  %v6945_v15 = vpop.f32.mrb[26].mxu0  ;;  %v5765_v0 = vadd.f32 %v6883_v26, %v9434_v32  ;;  %6083 = vmatmul.mubr.bf16.gmra.mrb[72].mxu0 %v9240_v60 }
 0x2c9   : > { %v6946_v56 = vpop.f32.mrb[27].mxu0  ;;  %v5128_v2 = vshll.u32 %v4952_v31, 16  ;;  %v5140_v61 = vrot.slane %v4952_v31, 1  ;;  %6090 = vmatprep.mubr.bf16.mxu0 %v9353_v6  ;;  %v5126_v40 = vshrl.u32 %v4952_v31, 16 }
 0x2ca   : > { %v9440_v9 = vadd.f32 %v6944_v24, %v5762_v12  ;;  %v6947_v49 = vadd.f32 %v6946_v56, %v6945_v15 }
 0x2cb   : > { %v5130_v7 = vrot.slane %v5128_v2, 1  ;;  %v5142_v57 = vsel %vm9802_vm3, %v5140_v61, %v5141_v30 }
 0x2cc   : > { %v9445_v3 = vadd.f32 %v6947_v49, %v5765_v0  ;;  %v6884_v14 = vpop.f32.mrb[4].mxu1 }
 0x2cd   : > { %v6885_v27 = vpop.f32.mrb[5].mxu1  ;;  %v5131_v28 = vor.u32 %v5130_v7, %v5126_v40 }
 0x2ce   : > { %v6886_v42 = vadd.f32 %v6885_v27, %v6884_v14  ;;  %v6948_v63 = vpop.f32.mrb[28].mxu0  ;;  %v6887_v34 = vpop.f32.mrb[6].mxu1  ;;  %5994 = vmatmul.mubr.bf16.gmra.mrb[52].mxu1 %v9801_v43 }
 0x2cf   : > { %v6949_v33 = vpop.f32.mrb[29].mxu0  ;;  %v6888_v21 = vpop.f32.mrb[7].mxu1  ;;  %v5136_v60 = vsel %vm584_vm1, %v5131_v28, %v5135_v18  ;;  %6001 = vmatprep.mubr.bf16.mxu1 %v9349_v22  ;;  %vm6462_vm1 = vcmask 27648  }
 0x2d0   : > { %v5770_v58 = vadd.f32 %v6886_v42, %v9434_v32  ;;  %v6950_v37 = vadd.f32 %v6949_v33, %v6948_v63  ;;  %v6889_v13 = vadd.f32 %v6888_v21, %v6887_v34  ;;  %v6951_v47 = vpop.f32.mrb[30].mxu0  ;;  %6091 = vmatmul.mubr.bf16.gmra.mrb[76].mxu0 %v9334_v35 }
 0x2d1   : > { %v6952_v29 = vpop.f32.mrb[31].mxu0  ;;  %6098 = vmatprep.mubr.bf16.mxu0 %v9426_v10 }
 0x2d2   : > { %v9451_v55 = vadd.f32 %v6950_v37, %v5770_v58  ;;  %v5773_v51 = vadd.f32 %v6889_v13, %v9434_v32  ;;  %v6953_v20 = vadd.f32 %v6952_v29, %v6951_v47 }
 0x2d4   : > { %v9456_v50 = vadd.f32 %v6953_v20, %v5773_v51  ;;  %v6890_v8 = vpop.f32.mrb[8].mxu1 }
 0x2d5   : > { %v6891_v17 = vpop.f32.mrb[9].mxu1 }
 0x2d6   : > { %v6892_v16 = vadd.f32 %v6891_v17, %v6890_v8  ;;  %v6893_v54 = vpop.f32.mrb[10].mxu1  ;;  %6002 = vmatmul.mubr.bf16.gmra.mrb[56].mxu1 %v9353_v6 }
 0x2d7   : > { %v6894_v62 = vpop.f32.mrb[11].mxu1  ;;  %6009 = vmatprep.mubr.bf16.mxu1 %v9420_v36 }
 0x2d8   : > { %v6895_v52 = vadd.f32 %v6894_v62, %v6893_v54  ;;  %6099 = vmatmul.mubr.bf16.gmra.mrb[80].mxu0 %v9345_v41  ;;  %v5778_v6 = vadd.f32 %v6892_v16, %v9434_v32 }
 0x2d9   : > { %6106 = vmatprep.mubr.bf16.mxu0 %v5136_v60 }
 0x2de   : > { %6010 = vmatmul.mubr.bf16.gmra.mrb[60].mxu1 %v9426_v10 }
 0x2df   : > { %7178 = vmatprep.mubr.bf16.mxu1 %v9125_v48 }
 0x2e0   : > { %6107 = vmatmul.mubr.bf16.gmra.mrb[84].mxu0 %v4952_v31 }
 0x2e6   : > { %7179 = vmatmul.mubr.bf16.vlgmr.msra.gmra.mrb[64].mxu1 %v9147_v23  ;;  %v5781_v23 = vadd.f32 %v6895_v52, %v9434_v32 }
 0x2e7   : > { %7182 = vmatprep.mubr.bf16.mxu1 %v9795_v19 }
 0x2ee   : > { %7183 = vmatmul.mubr.bf16.gmra.mrb[68].mxu1 %v9799_v11 }
 0x2ef   : > { %7186 = vmatprep.mubr.bf16.mxu1 %v9339_v46 }
 0x2f6   : > { %7187 = vmatmul.mubr.bf16.gmra.mrb[72].mxu1 %v9349_v22 }
 0x2f7   : > { %7190 = vmatprep.mubr.bf16.mxu1 %v9420_v36 }
 0x2fe   : > { %7191 = vmatmul.mubr.bf16.gmra.mrb[76].mxu1 %v5142_v57 }
 0x306   : > { %v6954_v35 = vpop.f32.mrb[32].mxu0 }
 0x307   : > { %v6955_v41 = vpop.f32.mrb[33].mxu0 }
 0x308   : > { %v6956_v10 = vadd.f32 %v6955_v41, %v6954_v35  ;;  %v6957_v48 = vpop.f32.mrb[34].mxu0 }
 0x309   : > { %v6958_v4 = vpop.f32.mrb[35].mxu0 }
 0x30a   : > { %v9471_v25 = vadd.f32 %v6956_v10, %v5778_v6  ;;  %v6959_v19 = vadd.f32 %v6958_v4, %v6957_v48 }
 0x30c   : > { %v9473_v11 = vadd.f32 %v6959_v19, %v5781_v23 }
 0x30d   : > { %v6896_v46 = vpop.f32.mrb[12].mxu1 }
 0x30e   : > { %v6960_v38 = vpop.f32.mrb[36].mxu0  ;;  %v6897_v22 = vpop.f32.mrb[13].mxu1 }
 0x30f   : > { %v6961_v59 = vpop.f32.mrb[37].mxu0  ;;  %v6898_v36 = vadd.f32 %v6897_v22, %v6896_v46  ;;  %v6899_v43 = vpop.f32.mrb[14].mxu1 }
 0x310   : > { %v6962_v5 = vadd.f32 %v6961_v59, %v6960_v38  ;;  %v6963_v45 = vpop.f32.mrb[38].mxu0  ;;  %v6900_v1 = vpop.f32.mrb[15].mxu1 }
 0x311   : > { %v6964_v26 = vpop.f32.mrb[39].mxu0  ;;  %v5786_v44 = vadd.f32 %v6898_v36, %v9434_v32  ;;  %v6901_v31 = vadd.f32 %v6900_v1, %v6899_v43 }
 0x312   : > { %v6965_v39 = vadd.f32 %v6964_v26, %v6963_v45 }
 0x313   : > { %v9476_v12 = vadd.f32 %v6962_v5, %v5786_v44  ;;  %v5789_v24 = vadd.f32 %v6901_v31, %v9434_v32 }
 0x315   : > { %v9479_v15 = vadd.f32 %v6965_v39, %v5789_v24  ;;  %v6902_v56 = vpop.f32.mrb[16].mxu1 }
 0x316   : > { %v6903_v2 = vpop.f32.mrb[17].mxu1 }
 0x317   : > { %v6904_v53 = vadd.f32 %v6903_v2, %v6902_v56  ;;  %v6905_v61 = vpop.f32.mrb[18].mxu1 }
 0x318   : > { %v6906_v30 = vpop.f32.mrb[19].mxu1 }
 0x319   : > { %v6907_v0 = vadd.f32 %v6906_v30, %v6905_v61  ;;  %v5794_v7 = vadd.f32 %v6904_v53, %v9434_v32 }
 0x31b   : > { %v5797_v28 = vadd.f32 %v6907_v0, %v9434_v32 }
 0x347   : > { %v6966_v49 = vpop.f32.mrb[40].mxu0 }
 0x348   : > { %v6967_v40 = vpop.f32.mrb[41].mxu0 }
 0x349   : > { %v6968_v57 = vadd.f32 %v6967_v40, %v6966_v49  ;;  %v6969_v14 = vpop.f32.mrb[42].mxu0 }
 0x34a   : > { %v6970_v27 = vpop.f32.mrb[43].mxu0 }
 0x34b   : > { %v9483_v18 = vadd.f32 %v6968_v57, %v5794_v7  ;;  %v6971_v42 = vadd.f32 %v6970_v27, %v6969_v14 }
 0x34d   : > { %v9485_v63 = vadd.f32 %v6971_v42, %v5797_v28 }
 0x34e   : > { %v6908_v34 = vpop.f32.mrb[20].mxu1 }
 0x34f   : > { %v6909_v33 = vpop.f32.mrb[21].mxu1  ;;  %v6972_v21 = vpop.f32.mrb[44].mxu0 }
 0x350   : > { %v6910_v60 = vadd.f32 %v6909_v33, %v6908_v34  ;;  %v6911_v58 = vpop.f32.mrb[22].mxu1  ;;  %v6973_v37 = vpop.f32.mrb[45].mxu0 }
 0x351   : > { %v6974_v13 = vadd.f32 %v6973_v37, %v6972_v21  ;;  %v6912_v47 = vpop.f32.mrb[23].mxu1  ;;  %v6975_v29 = vpop.f32.mrb[46].mxu0 }
 0x352   : > { %v5802_v51 = vadd.f32 %v6910_v60, %v9434_v32  ;;  %v6913_v20 = vadd.f32 %v6912_v47, %v6911_v58  ;;  %v6976_v8 = vpop.f32.mrb[47].mxu0 }
 0x353   : > { %v6977_v17 = vadd.f32 %v6976_v8, %v6975_v29 }
 0x354   : > { %v9488_v16 = vadd.f32 %v6974_v13, %v5802_v51  ;;  %v5805_v54 = vadd.f32 %v6913_v20, %v9434_v32 }
 0x356   : > { %v9491_v62 = vadd.f32 %v6977_v17, %v5805_v54  ;;  %v6914_v52 = vpop.f32.mrb[24].mxu1 }
 0x357   : > { %v6915_v35 = vpop.f32.mrb[25].mxu1 }
 0x358   : > { %v6916_v41 = vadd.f32 %v6915_v35, %v6914_v52  ;;  %v6917_v6 = vpop.f32.mrb[26].mxu1 }
 0x359   : > { %v6918_v10 = vpop.f32.mrb[27].mxu1 }
 0x35a   : > { %v6919_v48 = vadd.f32 %v6918_v10, %v6917_v6  ;;  %v5810_v19 = vadd.f32 %v6916_v41, %v9434_v32 }
 0x35c   : > { %v5813_v59 = vadd.f32 %v6919_v48, %v9434_v32 }
 0x36a   : > { %v6978_v4 = vpop.f32.mrb[48].mxu0 }
 0x36b   : > { %v6979_v23 = vpop.f32.mrb[49].mxu0 }
 0x36c   : > { %v6980_v46 = vadd.f32 %v6979_v23, %v6978_v4  ;;  %v6981_v38 = vpop.f32.mrb[50].mxu0 }
 0x36d   : > { %v6982_v22 = vpop.f32.mrb[51].mxu0 }
 0x36e   : > { %v9495_v36 = vadd.f32 %v6980_v46, %v5810_v19  ;;  %v6983_v43 = vadd.f32 %v6982_v22, %v6981_v38 }
 0x370   : > { %v9497_v5 = vadd.f32 %v6983_v43, %v5813_v59 }
 0x371   : > { %v6920_v45 = vpop.f32.mrb[28].mxu1 }
 0x372   : > { %v6921_v1 = vpop.f32.mrb[29].mxu1  ;;  %v6984_v26 = vpop.f32.mrb[52].mxu0 }
 0x373   : > { %v6922_v44 = vadd.f32 %v6921_v1, %v6920_v45  ;;  %v6923_v31 = vpop.f32.mrb[30].mxu1  ;;  %v6985_v39 = vpop.f32.mrb[53].mxu0 }
 0x374   : > { %v6986_v24 = vadd.f32 %v6985_v39, %v6984_v26  ;;  %v6924_v56 = vpop.f32.mrb[31].mxu1  ;;  %v6987_v2 = vpop.f32.mrb[54].mxu0 }
 0x375   : > { %v5818_v53 = vadd.f32 %v6922_v44, %v9434_v32  ;;  %v6925_v61 = vadd.f32 %v6924_v56, %v6923_v31  ;;  %v6988_v30 = vpop.f32.mrb[55].mxu0 }
 0x376   : > { %v6989_v0 = vadd.f32 %v6988_v30, %v6987_v2 }
 0x377   : > { %v9500_v49 = vadd.f32 %v6986_v24, %v5818_v53  ;;  %v5821_v40 = vadd.f32 %v6925_v61, %v9434_v32 }
 0x379   : > { %v9503_v7 = vadd.f32 %v6989_v0, %v5821_v40  ;;  %v7006_v57 = vpop.f32.mrb[32].mxu1 }
 0x37a   : > { %v7007_v14 = vpop.f32.mrb[33].mxu1 }
 0x37b   : > { %v7008_v27 = vadd.f32 %v7007_v14, %v7006_v57  ;;  %v7070_v28 = vpop.f32.mrb[56].mxu0  ;;  %v7009_v42 = vpop.f32.mrb[34].mxu1 }
 0x37c   : > { %v7071_v34 = vpop.f32.mrb[57].mxu0  ;;  %v7010_v33 = vpop.f32.mrb[35].mxu1 }
 0x37d   : > { %v5956_v21 = vadd.f32 %v7008_v27, %v9440_v9  ;;  %v7072_v60 = vadd.f32 %v7071_v34, %v7070_v28  ;;  %v7011_v58 = vadd.f32 %v7010_v33, %v7009_v42  ;;  %v7073_v37 = vpop.f32.mrb[58].mxu0 }
 0x37e   : > { %v7074_v13 = vpop.f32.mrb[59].mxu0 }
 0x37f   : > { %v5959_v47 = vadd.f32 %v7011_v58, %v9445_v3  ;;  %v7075_v29 = vadd.f32 %v7074_v13, %v7073_v37  ;;  %v9507_v51 = vadd.f32 %v7072_v60, %v5956_v21 }
 0x381   : > { %v7012_v32 = vpop.f32.mrb[36].mxu1  ;;  %v9509_v20 = vadd.f32 %v7075_v29, %v5959_v47 }
 0x382   : > { %v7013_v8 = vpop.f32.mrb[37].mxu1 }
 0x383   : > { %v7014_v17 = vadd.f32 %v7013_v8, %v7012_v32  ;;  %v7076_v54 = vpop.f32.mrb[60].mxu0  ;;  %v7015_v52 = vpop.f32.mrb[38].mxu1 }
 0x384   : > { %v7077_v35 = vpop.f32.mrb[61].mxu0  ;;  %v7016_v41 = vpop.f32.mrb[39].mxu1 }
 0x385   : > { %v5964_v9 = vadd.f32 %v7014_v17, %v9451_v55  ;;  %v7078_v6 = vadd.f32 %v7077_v35, %v7076_v54  ;;  %v7017_v10 = vadd.f32 %v7016_v41, %v7015_v52  ;;  %v7079_v48 = vpop.f32.mrb[62].mxu0 }
 0x386   : > { %v7080_v4 = vpop.f32.mrb[63].mxu0 }
 0x387   : > { %v5967_v3 = vadd.f32 %v7017_v10, %v9456_v50  ;;  %v7081_v23 = vadd.f32 %v7080_v4, %v7079_v48  ;;  %v9513_v19 = vadd.f32 %v7078_v6, %v5964_v9 }
 0x389   : > { %v7018_v46 = vpop.f32.mrb[40].mxu1  ;;  %v9515_v38 = vadd.f32 %v7081_v23, %v5967_v3 }
 0x38a   : > { %v7019_v22 = vpop.f32.mrb[41].mxu1 }
 0x38b   : > { %v7020_v59 = vadd.f32 %v7019_v22, %v7018_v46  ;;  %v7082_v43 = vpop.f32.mrb[64].mxu0  ;;  %v7021_v45 = vpop.f32.mrb[42].mxu1 }
 0x38c   : > { %v7083_v1 = vpop.f32.mrb[65].mxu0  ;;  %v7022_v26 = vpop.f32.mrb[43].mxu1 }
 0x38d   : > { %v5972_v55 = vadd.f32 %v7020_v59, %v9471_v25  ;;  %v7084_v44 = vadd.f32 %v7083_v1, %v7082_v43  ;;  %v7023_v31 = vadd.f32 %v7022_v26, %v7021_v45  ;;  %v7085_v39 = vpop.f32.mrb[66].mxu0 }
 0x38e   : > { %v7086_v24 = vpop.f32.mrb[67].mxu0 }
 0x38f   : > { %v5975_v50 = vadd.f32 %v7023_v31, %v9473_v11  ;;  %v7087_v56 = vadd.f32 %v7086_v24, %v7085_v39  ;;  %v9519_v2 = vadd.f32 %v7084_v44, %v5972_v55 }
 0x391   : > { %v7024_v53 = vpop.f32.mrb[44].mxu1  ;;  %v9521_v61 = vadd.f32 %v7087_v56, %v5975_v50 }
 0x392   : > { %v7025_v30 = vpop.f32.mrb[45].mxu1 }
 0x393   : > { %v7026_v0 = vadd.f32 %v7025_v30, %v7024_v53  ;;  %v7088_v40 = vpop.f32.mrb[68].mxu0  ;;  %v7027_v57 = vpop.f32.mrb[46].mxu1 }
 0x394   : > { %v7089_v14 = vpop.f32.mrb[69].mxu0  ;;  %v7028_v27 = vpop.f32.mrb[47].mxu1 }
 0x395   : > { %v5980_v25 = vadd.f32 %v7026_v0, %v9476_v12  ;;  %v7090_v28 = vadd.f32 %v7089_v14, %v7088_v40  ;;  %v7029_v42 = vadd.f32 %v7028_v27, %v7027_v57  ;;  %v7091_v34 = vpop.f32.mrb[70].mxu0 }
 0x396   : > { %v7092_v33 = vpop.f32.mrb[71].mxu0 }
 0x397   : > { %v5983_v11 = vadd.f32 %v7029_v42, %v9479_v15  ;;  %v7093_v21 = vadd.f32 %v7092_v33, %v7091_v34  ;;  %v9525_v60 = vadd.f32 %v7090_v28, %v5980_v25 }
 0x399   : > { %v7030_v58 = vpop.f32.mrb[48].mxu1  ;;  %v9527_v37 = vadd.f32 %v7093_v21, %v5983_v11 }
 0x39a   : > { %v7031_v13 = vpop.f32.mrb[49].mxu1 }
 0x39b   : > { %v7032_v47 = vadd.f32 %v7031_v13, %v7030_v58  ;;  %v7094_v29 = vpop.f32.mrb[72].mxu0  ;;  %v7033_v32 = vpop.f32.mrb[50].mxu1 }
 0x39c   : > { %v7095_v8 = vpop.f32.mrb[73].mxu0  ;;  %v7034_v17 = vpop.f32.mrb[51].mxu1 }
 0x39d   : > { %v5988_v12 = vadd.f32 %v7032_v47, %v9483_v18  ;;  %v7096_v54 = vadd.f32 %v7095_v8, %v7094_v29  ;;  %v7035_v52 = vadd.f32 %v7034_v17, %v7033_v32  ;;  %v7097_v35 = vpop.f32.mrb[74].mxu0 }
 0x39e   : > { %v7098_v41 = vpop.f32.mrb[75].mxu0 }
 0x39f   : > { %v5991_v15 = vadd.f32 %v7035_v52, %v9485_v63  ;;  %v7099_v9 = vadd.f32 %v7098_v41, %v7097_v35  ;;  %v9531_v6 = vadd.f32 %v7096_v54, %v5988_v12 }
 0x3a1   : > { %v7036_v10 = vpop.f32.mrb[52].mxu1  ;;  %v9533_v48 = vadd.f32 %v7099_v9, %v5991_v15 }
 0x3a2   : > { %v7037_v4 = vpop.f32.mrb[53].mxu1 }
 0x3a3   : > { %v7038_v3 = vadd.f32 %v7037_v4, %v7036_v10  ;;  %v7100_v23 = vpop.f32.mrb[76].mxu0  ;;  %v7039_v46 = vpop.f32.mrb[54].mxu1 }
 0x3a4   : > { %v7101_v22 = vpop.f32.mrb[77].mxu0  ;;  %v7040_v59 = vpop.f32.mrb[55].mxu1 }
 0x3a5   : > { %v5996_v18 = vadd.f32 %v7038_v3, %v9488_v16  ;;  %v7102_v43 = vadd.f32 %v7101_v22, %v7100_v23  ;;  %v7041_v45 = vadd.f32 %v7040_v59, %v7039_v46  ;;  %v7103_v1 = vpop.f32.mrb[78].mxu0 }
 0x3a6   : > { %v7104_v26 = vpop.f32.mrb[79].mxu0 }
 0x3a7   : > { %v5999_v63 = vadd.f32 %v7041_v45, %v9491_v62  ;;  %v7105_v55 = vadd.f32 %v7104_v26, %v7103_v1  ;;  %v6093_v44 = vadd.f32 %v7102_v43, %v5996_v18 }
 0x3a9   : > { %v7042_v31 = vpop.f32.mrb[56].mxu1  ;;  %v6096_v39 = vadd.f32 %v7105_v55, %v5999_v63 }
 0x3aa   : > { %v7043_v24 = vpop.f32.mrb[57].mxu1 }
 0x3ab   : > { %v7044_v50 = vadd.f32 %v7043_v24, %v7042_v31  ;;  %v7106_v56 = vpop.f32.mrb[80].mxu0  ;;  %v7045_v53 = vpop.f32.mrb[58].mxu1 }
 0x3ac   : > { %v7107_v30 = vpop.f32.mrb[81].mxu0  ;;  %v7046_v0 = vpop.f32.mrb[59].mxu1 }
 0x3ad   : > { %v6004_v40 = vadd.f32 %v7044_v50, %v9495_v36  ;;  %v7108_v57 = vadd.f32 %v7107_v30, %v7106_v56  ;;  %v7047_v16 = vadd.f32 %v7046_v0, %v7045_v53  ;;  %v7109_v14 = vpop.f32.mrb[82].mxu0  ;;  %v9632_v50 = vld [vmem:[%s9755_s7] ss:$0 sm:$0xff] }
 0x3ae   : > { %v7110_v27 = vpop.f32.mrb[83].mxu0  ;;  %v6808_v56 = vld [vmem:[%s9626_s21] sm:$0xff]  }
 0x3af   : > { %v6007_v25 = vadd.f32 %v7047_v16, %v9497_v5  ;;  %v7111_v28 = vadd.f32 %v7110_v27, %v7109_v14  ;;  %v6101_v62 = vadd.f32 %v7108_v57, %v6004_v40  ;;  %v6809_v0 = vunpack.c.l.bf16 %v6808_v56  ;;  %v6843_v40 = vld [vmem:[%s9626_s21 + $0x18] sm:$0xff]   ;;  %v9640_v57 = vld [vmem:[%s9755_s7 + $0x1] ss:$0 sm:$0xff] }
 0x3b0   : > { %v6810_v14 = vunpack.c.h.bf16 %v6808_v56  ;;  %v6821_v27 = vunpack.c.l.bf16 %v6843_v40 }
 0x3b1   : > { %v7048_v42 = vpop.f32.mrb[60].mxu1  ;;  %v6104_v34 = vadd.f32 %v7111_v28, %v6007_v25 }
 0x3b2   : > { %v7049_v33 = vpop.f32.mrb[61].mxu1 }
 0x3b3   : > { %v7050_v11 = vadd.f32 %v7049_v33, %v7048_v42  ;;  %v7112_v21 = vpop.f32.mrb[84].mxu0  ;;  %v7051_v58 = vpop.f32.mrb[62].mxu1  ;;  %v6842_v42 = vld [vmem:[%s9626_s21 + $0x10] sm:$0xff]  }
 0x3b4   : > { %v7113_v13 = vpop.f32.mrb[85].mxu0  ;;  %v7052_v47 = vpop.f32.mrb[63].mxu1 }
 0x3b5   : > { %v6012_v29 = vadd.f32 %v7050_v11, %v9500_v49  ;;  %v7114_v32 = vadd.f32 %v7113_v13, %v7112_v21  ;;  %v7053_v36 = vadd.f32 %v7052_v47, %v7051_v58  ;;  %v7115_v8 = vpop.f32.mrb[86].mxu0  ;;  %v6251_v21 = vsub.f32 %v6810_v14, %v9632_v50 }
 0x3b6   : > { %v7116_v17 = vpop.f32.mrb[87].mxu0  ;;  %v6256_v58 = vsub.f32 %v6821_v27, %v9632_v50  ;;  %v6817_v13 = vunpack.c.l.bf16 %v6842_v42 }
 0x3b7   : > { %v6015_v12 = vadd.f32 %v7053_v36, %v9503_v7  ;;  %v7117_v54 = vadd.f32 %v7116_v17, %v7115_v8  ;;  %v6109_v5 = vadd.f32 %v7114_v32, %v6012_v29  ;;  %v6845_v36 = vld [vmem:[%s9626_s21 + $0x28] sm:$0xff]  }
 0x3b9   : > { %v7180_v52 = vpop.f32.mrb[64].mxu1  ;;  %v6112_v35 = vadd.f32 %v7117_v54, %v6015_v12  ;;  %v6818_v12 = vunpack.c.h.bf16 %v6842_v42 }
 0x3ba   : > { %v9542_v41 = vadd.f32 %v7180_v52, %v9513_v19  ;;  %v6149_v15 = vpop.f32.mrb[65].mxu1 }
 0x3bb   : > { %v9545_v9 = vadd.f32 %v6149_v15, %v9507_v51  ;;  %v7181_v10 = vpop.f32.mrb[66].mxu1  ;;  %v6276_v15 = vmul.f32 %v9640_v57, %v6256_v58 }
 0x3bc   : > { %v9548_v49 = vadd.f32 %v7181_v10, %v9515_v38  ;;  %6338 = vrot.lane.b32.xlu0 %v9542_v41, %s7424_s25  ;;  %v6152_v7 = vpop.f32.mrb[67].mxu1  ;;  %v6288_v25 = vadd.f32 1.0, %v9542_v41  ;;  %v6829_v10 = vunpack.c.l.bf16 %v6845_v36 }
 0x3bd   : > { %v9553_v4 = vadd.f32 %v6152_v7, %v9509_v20  ;;  %v6286_v47 = vadd.f32 1.0, %v9545_v9 }
 0x3be   : > { %6340 = vrot.lane.b32.xlu1 %v9548_v49, %s7424_s25  ;;  %v6289_v33 = vadd.f32 1.0, %v9548_v49 }
 0x3bf   : > { %v6287_v54 = vadd.f32 1.0, %v9553_v4 }
 0x3c0   : > { %6334 = vrot.lane.b32.xlu0 %v9545_v9, %s7424_s25  ;;  %v6254_v9 = vsub.f32 %v6817_v13, %v9632_v50 }
 0x3c1   : > { %v7184_v51 = vpop.f32.mrb[68].mxu1 }
 0x3c2   : > { %v9560_v19 = vadd.f32 %v7184_v51, %v9525_v60  ;;  %v6165_v38 = vpop.f32.mrb[69].mxu1  ;;  %6336 = vrot.lane.b32.xlu1 %v9553_v4, %s7424_s25 }
 0x3c3   : > { %v9565_v3 = vadd.f32 %v6165_v38, %v9519_v2  ;;  %v7185_v23 = vpop.f32.mrb[70].mxu1  ;;  %v6844_v38 = vld [vmem:[%s9626_s21 + $0x20] sm:$0xff]  }
 0x3c4   : > { %v9568_v20 = vadd.f32 %v7185_v23, %v9527_v37  ;;  %v6168_v46 = vpop.f32.mrb[71].mxu1  ;;  %6346 = vrot.lane.b32.xlu0 %v9560_v19, %s7424_s25  ;;  %v6292_v49 = vadd.f32 1.0, %v9560_v19 }
 0x3c5   : > { %v9573_v22 = vadd.f32 %v6168_v46, %v9521_v61 }
 0x3c6   : > { %6348 = vrot.lane.b32.xlu1 %v9568_v20, %s7424_s25 }
 0x3c7   : > { %v6291_v14 = vadd.f32 1.0, %v9573_v22 }
 0x3c8   : > { %6342 = vrot.lane.b32.xlu0 %v9565_v3, %s7424_s25 }
 0x3c9   : > { %v7188_v60 = vpop.f32.mrb[72].mxu1 }
 0x3ca   : > { %v9579_v2 = vadd.f32 %v7188_v60, %v6093_v44  ;;  %v6181_v59 = vpop.f32.mrb[73].mxu1  ;;  %6344 = vrot.lane.b32.xlu1 %v9573_v22, %s7424_s25  ;;  %v6255_v60 = vsub.f32 %v6818_v12, %v9632_v50 }
 0x3cb   : > { %v9584_v37 = vadd.f32 %v6181_v59, %v9531_v6  ;;  %v7189_v18 = vpop.f32.mrb[74].mxu1  ;;  %v6830_v59 = vunpack.c.h.bf16 %v6845_v36 }
 0x3cc   : > { %v9586_v43 = vadd.f32 %v7189_v18, %v6096_v39  ;;  %v6184_v61 = vpop.f32.mrb[75].mxu1  ;;  %6354 = vrot.lane.b32.xlu0 %v9579_v2, %s7424_s25  ;;  %v6841_v39 = vld [vmem:[%s9626_s21 + $0x8] sm:$0xff]   ;;  %v6293_v18 = vadd.f32 1.0, %v9568_v20  ;;  %v6308_v20 = vmul.f32 %v6292_v49, %v6276_v15 }
 0x3cd   : > { %v9591_v45 = vadd.f32 %v6184_v61, %v9533_v48  ;;  %v6813_v24 = vunpack.c.l.bf16 %v6841_v39  ;;  %v6814_v53 = vunpack.c.h.bf16 %v6841_v39  ;;  %v6825_v39 = vunpack.c.l.bf16 %v6844_v38 }
 0x3ce   : > { %6356 = vrot.lane.b32.xlu1 %v9586_v43, %s7424_s25 }
 0x3cf   : > { %v6252_v30 = vsub.f32 %v6813_v24, %v9632_v50  ;;  %v6253_v16 = vsub.f32 %v6814_v53, %v9632_v50  ;;  %v6290_v24 = vadd.f32 1.0, %v9565_v3 }
 0x3d0   : > { %6350 = vrot.lane.b32.xlu0 %v9584_v37, %s7424_s25 }
 0x3d1   : > { %v7192_v6 = vpop.f32.mrb[76].mxu1  ;;  %v6272_v28 = vmul.f32 %v9640_v57, %v6252_v30  ;;  %v6273_v11 = vmul.f32 %v9640_v57, %v6253_v16  ;;  %v6826_v16 = vunpack.c.h.bf16 %v6844_v38 }
 0x3d2   : > { %v9597_v1 = vadd.f32 %v7192_v6, %v6109_v5  ;;  %6352 = vrot.lane.b32.xlu1 %v9591_v45, %s7424_s25  ;;  %v6197_v26 = vpop.f32.mrb[77].mxu1 }
 0x3d3   : > { %v9601_v63 = vadd.f32 %v6197_v26, %v6101_v62  ;;  %v7193_v48 = vpop.f32.mrb[78].mxu1  ;;  %v6250_v62 = vsub.f32 %v6809_v0, %v9632_v50  ;;  %v6304_v29 = vmul.f32 %v6288_v25, %v6272_v28  ;;  %v6305_v52 = vmul.f32 %v6289_v33, %v6273_v11  ;;  %v6846_v28 = vld [vmem:[%s9626_s21 + $0x30] sm:$0xff]  }
 0x3d4   : > { %v9603_v55 = vadd.f32 %v7193_v48, %v6112_v35  ;;  %v6200_v44 = vpop.f32.mrb[79].mxu1  ;;  %v6271_v35 = vmul.f32 %v9640_v57, %v6251_v21  ;;  %v6274_v48 = vmul.f32 %v9640_v57, %v6254_v9  ;;  %v6275_v0 = vmul.f32 %v9640_v57, %v6255_v60 }
 0x3d5   : > { %v9605_v31 = vadd.f32 %v6200_v44, %v6104_v34  ;;  %6358 = vrot.lane.b32.xlu0 %v9601_v63, %s7424_s25  ;;  %v6822_v34 = vunpack.c.h.bf16 %v6843_v40  ;;  %v6270_v32 = vmul.f32 %v9640_v57, %v6250_v62  ;;  %v6260_v44 = vsub.f32 %v6829_v10, %v9632_v50 }
 0x3d6   : > { %v6303_v26 = vmul.f32 %v6287_v54, %v6271_v35  ;;  %v6261_v40 = vsub.f32 %v6830_v59, %v9632_v50  ;;  %v6296_v33 = vadd.f32 1.0, %v9579_v2  ;;  %v6306_v22 = vmul.f32 %v6290_v24, %v6274_v48 }
 0x3d7   : > { %6360 = vrot.lane.b32.xlu1 %v9605_v31, %s7424_s25  ;;  %v6257_v17 = vsub.f32 %v6822_v34, %v9632_v50  ;;  %v6302_v51 = vmul.f32 %v6286_v47, %v6270_v32  ;;  %v6280_v42 = vmul.f32 %v9640_v57, %v6260_v44  ;;  %v6258_v34 = vsub.f32 %v6825_v39, %v9632_v50 }
 0x3d8   : > { %v6281_v13 = vmul.f32 %v9640_v57, %v6261_v40  ;;  %v6259_v47 = vsub.f32 %v6826_v16, %v9632_v50  ;;  %v6297_v32 = vadd.f32 1.0, %v9586_v43  ;;  %v6307_v2 = vmul.f32 %v6291_v14, %v6275_v0 }
 0x3d9   : > { %6362 = vrot.lane.b32.xlu0 %v9597_v1, %s7424_s25  ;;  %v6277_v46 = vmul.f32 %v9640_v57, %v6257_v17  ;;  %v6847_v17 = vld [vmem:[%s9626_s21 + $0x38] sm:$0xff]   ;;  %v6278_v54 = vmul.f32 %v9640_v57, %v6258_v34  ;;  %v6312_v15 = vmul.f32 %v6296_v33, %v6280_v42  ;;  %v6299_v39 = vadd.f32 1.0, %v9605_v31 }
 0x3da   : > { %v6279_v9 = vmul.f32 %v9640_v57, %v6259_v47  ;;  %v6837_v49 = vunpack.c.l.bf16 %v6847_v17  ;;  %v6301_v14 = vadd.f32 1.0, %v9603_v55 }
 0x3db   : > { %6364 = vrot.lane.b32.xlu1 %v9603_v55, %s7424_s25  ;;  %v6309_v3 = vmul.f32 %v6293_v18, %v6277_v46  ;;  %v6838_v46 = vunpack.c.h.bf16 %v6847_v17 }
 0x42e   : > { %v6339_v8 = vpop.permute.xlu0 %6338 }
 0x42f   : > { %v6384_v5 = vadd.f32 %v6339_v8, %v6304_v29  ;;  %v6833_v29 = vunpack.c.l.bf16 %v6846_v28 }
 0x430   : > { %v6341_v41 = vpop.permute.xlu1 %6340 }
 0x431   : > { %v6793_v7 = vpack.c.bf16 %v6384_v5, %v6384_v5  ;;  %v6385_v4 = vadd.f32 %v6341_v41, %v6305_v52  ;;  %v6834_v5 = vunpack.c.h.bf16 %v6846_v28  ;;  %v6294_v52 = vadd.f32 1.0, %v9584_v37 }
 0x432   : > { %v6335_v23 = vpop.permute.xlu0 %6334  ;;  %v6262_v10 = vsub.f32 %v6833_v29, %v9632_v50  ;;  %v6313_v37 = vmul.f32 %v6297_v32, %v6281_v13 }
 0x433   : > { %6465 = vst.msk [vmem:[%s9662_s26 + $0x8] sm:$0xf] %vm6462_vm1, %v6793_v7  ;;  %v6794_v61 = vpack.c.bf16 %v6385_v4, %v6385_v4  ;;  %v6382_v6 = vadd.f32 %v6335_v23, %v6302_v51  ;;  %v6295_v7 = vadd.f32 1.0, %v9591_v45  ;;  %v6263_v23 = vsub.f32 %v6834_v5, %v9632_v50 }
 0x434   : > { %v6337_v19 = vpop.permute.xlu1 %6336  ;;  %v6310_v18 = vmul.f32 %v6294_v52, %v6278_v54  ;;  %v6282_v45 = vmul.f32 %v9640_v57, %v6262_v10 }
 0x435   : > { %6466 = vst.msk [vmem:[%s9662_s26 + $0xc] sm:$0xf] %vm6462_vm1, %v6794_v61  ;;  %v6791_v56 = vpack.c.bf16 %v6382_v6, %v6382_v6  ;;  %v6383_v53 = vadd.f32 %v6337_v19, %v6303_v26  ;;  %v6298_v61 = vadd.f32 1.0, %v9601_v63  ;;  %v6264_v26 = vsub.f32 %v6837_v49, %v9632_v50 }
 0x436   : > { %v6347_v30 = vpop.permute.xlu0 %6346  ;;  %v6311_v44 = vmul.f32 %v6295_v7, %v6279_v9 }
 0x437   : > { %6463 = vst.msk [vmem:[%s9662_s26] sm:$0xf] %vm6462_vm1, %v6791_v56  ;;  %v6792_v27 = vpack.c.bf16 %v6383_v53, %v6383_v53  ;;  %v6388_v25 = vadd.f32 %v6347_v30, %v6308_v20  ;;  %v6283_v56 = vmul.f32 %v9640_v57, %v6263_v23  ;;  %v6265_v53 = vsub.f32 %v6838_v46, %v9632_v50 }
 0x438   : > { %v6349_v62 = vpop.permute.xlu1 %6348  ;;  %v6300_v30 = vadd.f32 1.0, %v9597_v1  ;;  %v6314_v0 = vmul.f32 %v6298_v61, %v6282_v45  ;;  %v6284_v40 = vmul.f32 %v9640_v57, %v6264_v26 }
 0x439   : > { %6464 = vst.msk [vmem:[%s9662_s26 + $0x4] sm:$0xf] %vm6462_vm1, %v6792_v27  ;;  %v6797_v11 = vpack.c.bf16 %v6388_v25, %v6388_v25  ;;  %v6389_v21 = vadd.f32 %v6349_v62, %v6309_v3  ;;  %v6315_v25 = vmul.f32 %v6299_v39, %v6283_v56  ;;  %v6285_v50 = vmul.f32 %v9640_v57, %v6265_v53 }
 0x43a   : > { %v6343_v58 = vpop.permute.xlu0 %6342  ;;  %v6316_v62 = vmul.f32 %v6300_v30, %v6284_v40 }
 0x43b   : > { %6469 = vst.msk [vmem:[%s9662_s26 + $0x18] sm:$0xf] %vm6462_vm1, %v6797_v11  ;;  %v6798_v36 = vpack.c.bf16 %v6389_v21, %v6389_v21  ;;  %v6386_v8 = vadd.f32 %v6343_v58, %v6306_v22  ;;  %v6317_v11 = vmul.f32 %v6301_v14, %v6285_v50 }
 0x43c   : > { %v6345_v12 = vpop.permute.xlu1 %6344 }
 0x43d   : > { %6470 = vst.msk [vmem:[%s9662_s26 + $0x1c] sm:$0xf] %vm6462_vm1, %v6798_v36  ;;  %v6795_v35 = vpack.c.bf16 %v6386_v8, %v6386_v8  ;;  %v6387_v41 = vadd.f32 %v6345_v12, %v6307_v2 }
 0x43e   : > { %v6355_v43 = vpop.permute.xlu0 %6354 }
 0x43f   : > { %6467 = vst.msk [vmem:[%s9662_s26 + $0x10] sm:$0xf] %vm6462_vm1, %v6795_v35  ;;  %v6796_v4 = vpack.c.bf16 %v6387_v41, %v6387_v41  ;;  %v6392_v51 = vadd.f32 %v6355_v43, %v6312_v15 }
 0x440   : > { %v6357_v38 = vpop.permute.xlu1 %6356 }
 0x441   : > { %6468 = vst.msk [vmem:[%s9662_s26 + $0x14] sm:$0xf] %vm6462_vm1, %v6796_v4  ;;  %v6801_v60 = vpack.c.bf16 %v6392_v51, %v6392_v51  ;;  %v6393_v59 = vadd.f32 %v6357_v38, %v6313_v37 }
 0x442   : > { %v6351_v6 = vpop.permute.xlu0 %6350 }
 0x443   : > { %6473 = vst.msk [vmem:[%s9662_s26 + $0x28] sm:$0xf] %vm6462_vm1, %v6801_v60  ;;  %v6802_v19 = vpack.c.bf16 %v6393_v59, %v6393_v59  ;;  %v6390_v48 = vadd.f32 %v6351_v6, %v6310_v18 }
 0x444   : > { %v6353_v24 = vpop.permute.xlu1 %6352 }
 0x445   : > { %6474 = vst.msk [vmem:[%s9662_s26 + $0x2c] sm:$0xf] %vm6462_vm1, %v6802_v19  ;;  %v6799_v63 = vpack.c.bf16 %v6390_v48, %v6390_v48  ;;  %v6391_v20 = vadd.f32 %v6353_v24, %v6311_v44 }
 0x447   : > { %6471 = vst.msk [vmem:[%s9662_s26 + $0x20] sm:$0xf] %vm6462_vm1, %v6799_v63  ;;  %v6800_v16 = vpack.c.bf16 %v6391_v20, %v6391_v20  ;;  %v6359_v31 = vpop.permute.xlu0 %6358 }
 0x448   : > { %v6394_v27 = vadd.f32 %v6359_v31, %v6314_v0 }
 0x449   : > { %6472 = vst.msk [vmem:[%s9662_s26 + $0x24] sm:$0xf] %vm6462_vm1, %v6800_v16  ;;  %v6361_v1 = vpop.permute.xlu1 %6360 }
 0x44a   : > { %v6803_v3 = vpack.c.bf16 %v6394_v27, %v6394_v27  ;;  %v6395_v28 = vadd.f32 %v6361_v1, %v6315_v25 }
 0x44b   : > { %v6363_v42 = vpop.permute.xlu0 %6362 }
 0x44c   : > { %6475 = vst.msk [vmem:[%s9662_s26 + $0x30] sm:$0xf] %vm6462_vm1, %v6803_v3  ;;  %v6804_v34 = vpack.c.bf16 %v6395_v28, %v6395_v28  ;;  %v6396_v33 = vadd.f32 %v6363_v42, %v6316_v62 }
 0x44d   : > { %v6365_v21 = vpop.permute.xlu1 %6364 }
 0x44e   : > { %6476 = vst.msk [vmem:[%s9662_s26 + $0x34] sm:$0xf] %vm6462_vm1, %v6804_v34  ;;  %v6805_v55 = vpack.c.bf16 %v6396_v33, %v6396_v33  ;;  %v6397_v22 = vadd.f32 %v6365_v21, %v6317_v11 }
 0x450   : > { %6477 = vst.msk [vmem:[%s9662_s26 + $0x38] sm:$0xf] %vm6462_vm1, %v6805_v55  ;;  %v6806_v57 = vpack.c.bf16 %v6397_v22, %v6397_v22 }
 0x452   : > { %6478 = vst.msk [vmem:[%s9662_s26 + $0x3c] sm:$0xf] %vm6462_vm1, %v6806_v57 }
 0x453 PF: > { %s18_s9 = sadd.s32 1, %s7406_s9   ;;  %s9803_s27 = smov %s7398_s29 }
 0x454   : > { %p15_p11 = scmp.ge.s32.totalorder %s18_s9, 6   ;;  %s9804_s28 = smov %s7402_s30 }
 0x455   : > { %s9805_s29 = smov %s9808_s10  ;;  %s9806_s30 = smov %s9812_s11 }
 0x456   :  { %17 = sbr.rel (!%p15_p11) target bundleno = 3 (0x3), region = 88 }

</bundles_post_ra>
